<compile_context>
chip_gen: v6e
topology: v6e:2x2x1
jax: 0.10.0
libtpu: 0.0.40
codegen_flags: <defaults>
</compile_context>

<pallas_src>
import functools
import math

import jax
import jax.numpy as jnp
from jax.experimental import pallas as pl
from jax.experimental.pallas import tpu as pltpu


TILE_H = 128                        # hidden tile (=> 4*128 = 512 gate cols/step)
HIDDEN = 512
N_ACT = 4
OC_PAD = 128                        # lane-dense padded conv output channels
CONV_OUT = 7
IN_FEAT = CONV_OUT * CONV_OUT * 64  # 3136


# ---------------------------------------------------------------------------
# Pallas kernels
# ---------------------------------------------------------------------------
def _linear_kernel(x_ref, w_ref, b_ref, o_ref, *, relu):
    # bf16 x bf16 -> f32 accumulate on the MXU; bias+ReLU on the VPU; bf16 store.
    acc = jnp.dot(x_ref[...], w_ref[...], preferred_element_type=jnp.float32)
    acc = acc + b_ref[...]
    if relu:
        acc = jnp.maximum(acc, 0.0)
    o_ref[...] = acc.astype(o_ref.dtype)


def pallas_linear(x, w, b, *, relu=False, tile_m=512, single_block_max_m=2048):
    """out = act(x @ w + b); x:(M,K) bf16, w:(K,N) bf16, b:(N,) f32 -> (M,N) bf16.

    Runs as a single full-M block when M <= single_block_max_m (all conv layers
    at small batch); otherwise tiles M with a "parallel" grid (pads only if
    needed).
    """
    M, K = x.shape
    K2, N = w.shape
    assert K == K2
    b2 = b.reshape(1, N)
    if M <= single_block_max_m:
        tm, Mp, xp = M, M, x
    else:
        tm = tile_m
        Mp = pl.cdiv(M, tm) * tm
        xp = x if Mp == M else jnp.pad(x, ((0, Mp - M), (0, 0)))
    kernel = functools.partial(_linear_kernel, relu=relu)
    out = pl.pallas_call(
        kernel,
        out_shape=jax.ShapeDtypeStruct((Mp, N), x.dtype),
        grid_spec=pltpu.PrefetchScalarGridSpec(
            num_scalar_prefetch=0,
            grid=(Mp // tm,),
            in_specs=[
                pl.BlockSpec((tm, K), lambda i: (i, 0)),
                pl.BlockSpec((K, N), lambda i: (0, 0)),
                pl.BlockSpec((1, N), lambda i: (0, 0)),
            ],
            out_specs=pl.BlockSpec((tm, N), lambda i: (i, 0)),
        ),
        compiler_params=pltpu.CompilerParams(
            dimension_semantics=("parallel",)),
    )(xp, w, b2)
    return out if Mp == M else out[:M]


def _lstm_kernel(feat_ref, h_ref, c_ref, wx_ref, wh_ref, b_ref,
                 h_out_ref, c_out_ref, *, tile_h):
    """One hidden tile per grid step: two MXU dots + gate math (EUP/VPU)."""
    gates = jnp.dot(feat_ref[...], wx_ref[...],
                    preferred_element_type=jnp.float32)
    gates = gates + jnp.dot(h_ref[...], wh_ref[...],
                            preferred_element_type=jnp.float32)
    gates = gates + b_ref[...]
    i_g = jax.nn.sigmoid(gates[:, 0 * tile_h:1 * tile_h])
    f_g = jax.nn.sigmoid(gates[:, 1 * tile_h:2 * tile_h])
    g_g = jnp.tanh(gates[:, 2 * tile_h:3 * tile_h])
    o_g = jax.nn.sigmoid(gates[:, 3 * tile_h:4 * tile_h])
    c_new = f_g * c_ref[...] + i_g * g_g
    h_new = o_g * jnp.tanh(c_new)
    c_out_ref[...] = c_new.astype(c_out_ref.dtype)
    h_out_ref[...] = h_new.astype(h_out_ref.dtype)


def pallas_lstm(feat, h0, c0, wx, wh, b, *, tile_h=TILE_H):
    """Fused LSTMCell.

    feat: (B, IN_FEAT) bf16   conv3 features, NHWC flatten (perm folded in wx)
    h0:   (B, H)       bf16
    c0:   (B, H)       f32
    wx:   (IN_FEAT,4H) bf16   columns regrouped per hidden tile as [i|f|g|o]
    wh:   (H, 4H)      bf16   same column regrouping
    b:    (1, 4H)      f32    same column regrouping (zeros per module init)
    returns h' (B,H) f32, c' (B,H) f32
    """
    B, IN = feat.shape
    H = c0.shape[1]
    T = H // tile_h
    kernel = functools.partial(_lstm_kernel, tile_h=tile_h)
    return pl.pallas_call(
        kernel,
        out_shape=(jax.ShapeDtypeStruct((B, H), jnp.float32),
                   jax.ShapeDtypeStruct((B, H), jnp.float32)),
        grid_spec=pltpu.PrefetchScalarGridSpec(
            num_scalar_prefetch=0,
            grid=(T,),
            in_specs=[
                pl.BlockSpec((B, IN), lambda j: (0, 0)),
                pl.BlockSpec((B, H), lambda j: (0, 0)),
                pl.BlockSpec((B, tile_h), lambda j: (0, j)),
                pl.BlockSpec((IN, 4 * tile_h), lambda j: (0, j)),
                pl.BlockSpec((H, 4 * tile_h), lambda j: (0, j)),
                pl.BlockSpec((1, 4 * tile_h), lambda j: (0, j)),
            ],
            out_specs=(pl.BlockSpec((B, tile_h), lambda j: (0, j)),
                       pl.BlockSpec((B, tile_h), lambda j: (0, j))),
        ),
        compiler_params=pltpu.CompilerParams(
            dimension_semantics=("parallel",)),
    )(feat, h0, c0, wx, wh, b)


# ---------------------------------------------------------------------------
# Plain-JAX glue (patch extraction, layout plumbing)
# ---------------------------------------------------------------------------
def conv2d_relu(x_nhwc, w_mat, b, *, oc, k, stride):
    # Patch extraction stays in XLA as a single conv_general_dilated_patches op
    # (per-window gathers are not expressible via BlockSpec).  Its channel-major
    # (C, KH, KW) patch layout is folded into the conv weight rows at init.
    patches = jax.lax.conv_general_dilated_patches(
        x_nhwc, (k, k), (stride, stride), "VALID",
        dimension_numbers=("NHWC", "HWIO", "NHWC"))
    B, OH, OW, PF = patches.shape
    out = pallas_linear(patches.reshape(B * OH * OW, PF), w_mat, b, relu=True)
    # Output channels are lane-padded to 128; slice back before the next layer.
    return out.reshape(B, OH, OW, -1)[..., :oc]


def qnet_lstm_forward(params, x_nchw, hidden):
    # Input is PyTorch NCHW; converted to NHWC + bf16 once for the whole trunk.
    x = jnp.transpose(x_nchw, (0, 2, 3, 1)).astype(jnp.bfloat16)
    x = conv2d_relu(x, params["conv1_w"], params["conv1_b"], oc=32, k=8, stride=4)  # (B,20,20,32)
    x = conv2d_relu(x, params["conv2_w"], params["conv2_b"], oc=64, k=4, stride=2)  # (B, 9, 9,64)
    x = conv2d_relu(x, params["conv3_w"], params["conv3_b"], oc=64, k=3, stride=1)  # (B, 7, 7,64)
    B = x.shape[0]
    # Natural NHWC flatten (bf16); PyTorch's (C,H,W) flatten permutation was
    # folded into the rows of W_ih at init (no runtime transpose, no concat).
    feat = x.reshape(B, IN_FEAT)
    h0, c0 = hidden
    h, c = pallas_lstm(feat, h0.astype(jnp.bfloat16), c0,
                       params["lstm_wx"], params["lstm_wh"], params["lstm_b"])
    # Q head is a trivial 512x4 matmul; keep it in XLA (f32).
    q = jnp.dot(h, params["q_w"]) + params["q_b"][None, :]
    return q, (h, c)


# ---------------------------------------------------------------------------
# Deterministic parameter initialization (matches module __init__ semantics)
# ---------------------------------------------------------------------------
def xavier_uniform(key, shape, fan_in, fan_out):
    bound = math.sqrt(6.0 / (fan_in + fan_out))
    return jax.random.uniform(key, shape, jnp.float32, -bound, bound)


def _conv_w_matrix(key, oc, ic, k):
    # PyTorch (OC, IC, KH, KW) xavier init.  Rows re-laid out offline to the
    # (IC*KH*KW, OC) order matching conv_general_dilated_patches' channel-major
    # patch layout; columns zero-padded to 128 lanes; stored bf16.
    w = xavier_uniform(key, (oc, ic, k, k), ic * k * k, oc * k * k)
    w_mat = jnp.transpose(w, (1, 2, 3, 0)).reshape(ic * k * k, oc)
    w_pad = jnp.zeros((ic * k * k, OC_PAD), jnp.float32).at[:, :oc].set(w_mat)
    return w_pad.astype(jnp.bfloat16)


def init_params(key):
    ks = jax.random.split(key, 8)
    lstm_bound = 1.0 / math.sqrt(HIDDEN)
    T = HIDDEN // TILE_H

    # LSTMCell weights, PyTorch gate order (i, f, g, o), pre-transposed for
    # matmul: rows = input features, cols = gate outputs.
    w_ih = jax.random.uniform(ks[3], (IN_FEAT, 4 * HIDDEN), jnp.float32,
                              -lstm_bound, lstm_bound)
    w_hh = jax.random.uniform(ks[4], (HIDDEN, 4 * HIDDEN), jnp.float32,
                              -lstm_bound, lstm_bound)
    # Fold PyTorch's NCHW flatten (c,h,w) -> NHWC flatten (h,w,c) into W_ih rows.
    w_ih = (w_ih.reshape(64, CONV_OUT, CONV_OUT, 4 * HIDDEN)
                .transpose(1, 2, 0, 3)
                .reshape(IN_FEAT, 4 * HIDDEN))

    def regroup_cols(w):
        # gate-major columns [i|f|g|o over full H] -> per-hidden-tile [i|f|g|o].
        r = w.shape[0]
        return (w.reshape(r, 4, T, TILE_H)
                 .transpose(0, 2, 1, 3)
                 .reshape(r, 4 * HIDDEN))

    lstm_wx = regroup_cols(w_ih).astype(jnp.bfloat16)   # bf16 weight stream
    lstm_wh = regroup_cols(w_hh).astype(jnp.bfloat16)
    # Module's initialize_weights() zeroes both LSTM biases (b_ih + b_hh = 0).
    lstm_b = jnp.zeros((1, 4 * HIDDEN), jnp.float32)

    # Q head: xavier uniform, bias 0 (computed in XLA, no padding needed).
    q_w = xavier_uniform(ks[5], (HIDDEN, N_ACT), HIDDEN, N_ACT)

    return {
        "conv1_w": _conv_w_matrix(ks[0], 32, 1, 8),
        "conv1_b": jnp.zeros((OC_PAD,), jnp.float32),
        "conv2_w": _conv_w_matrix(ks[1], 64, 32, 4),
        "conv2_b": jnp.zeros((OC_PAD,), jnp.float32),
        "conv3_w": _conv_w_matrix(ks[2], 64, 64, 3),
        "conv3_b": jnp.zeros((OC_PAD,), jnp.float32),
        "lstm_wx": lstm_wx,
        "lstm_wh": lstm_wh,
        "lstm_b": lstm_b,
        "q_w": q_w,
        "q_b": jnp.zeros((N_ACT,), jnp.float32),
    }


# ---------------------------------------------------------------------------
if __name__ == "__main__":
    key = jax.random.PRNGKey(0)
    k_param, k_x, k_h, k_c = jax.random.split(key, 4)

    params = init_params(k_param)

    B = 2
    # 84x84 input is implied by get_conv_out_size() / the LSTM input width.
    x = jax.random.normal(k_x, (B, 1, 84, 84), jnp.float32)
    h0 = jax.random.normal(k_h, (B, HIDDEN), jnp.float32)
    c0 = jax.random.normal(k_c, (B, HIDDEN), jnp.float32)

    fwd = jax.jit(qnet_lstm_forward)
    q, (h, c) = fwd(params, x, (h0, c0))
    jax.block_until_ready((q, h, c))

    assert q.shape == (B, N_ACT) and h.shape == (B, HIDDEN) and c.shape == (B, HIDDEN)
    assert bool(jnp.all(jnp.isfinite(q))) and bool(jnp.all(jnp.isfinite(h)))
    assert bool(jnp.all(jnp.isfinite(c)))
    print("KERNEL_OK")
</pallas_src>

<mosaic_0001>
module attributes {stable_mosaic.version = 11 : i64} {
  func.func @_linear_kernel(%arg0: i32, %arg1: memref<800x64xbf16, #tpu.memory_space<vmem>>, %arg2: memref<64x128xbf16, #tpu.memory_space<vmem>>, %arg3: memref<1x128xf32, #tpu.memory_space<vmem>>, %arg4: memref<800x128xbf16, #tpu.memory_space<vmem>>) attributes {dimension_semantics = [#tpu.dimension_semantics<parallel>], iteration_bounds = array<i64: 1>, scalar_prefetch = 0 : i64, scratch_operands = 0 : i64, tpu.core_type = #tpu.core_type<tc>, window_params = [{transform_indices = @transform_0, window_bounds = array<i64: 800, 64>}, {pipeline_mode = #tpu.pipeline_mode<synchronous>, transform_indices = @transform_1, window_bounds = array<i64: 64, 128>}, {pipeline_mode = #tpu.pipeline_mode<synchronous>, transform_indices = @transform_2, window_bounds = array<i64: 1, 128>}, {transform_indices = @transform_3, window_bounds = array<i64: 800, 128>}]} {
    %c0 = arith.constant 0 : index
    %c0_0 = arith.constant 0 : index
    %0 = vector.load %arg1[%c0, %c0_0] : memref<800x64xbf16, #tpu.memory_space<vmem>>, vector<800x64xbf16>
    %c0_1 = arith.constant 0 : index
    %c0_2 = arith.constant 0 : index
    %1 = vector.load %arg2[%c0_1, %c0_2] : memref<64x128xbf16, #tpu.memory_space<vmem>>, vector<64x128xbf16>
    %cst = arith.constant dense<0.000000e+00> : vector<800x128xf32>
    %2 = tpu.matmul %0, %1, %cst {dimension_numbers = #tpu.dot_dimension_numbers<[1], [0], [0], [1], [0, 0, 1, 1], [], []>} : vector<800x64xbf16>, vector<64x128xbf16>, vector<800x128xf32> -> vector<800x128xf32>
    %c0_3 = arith.constant 0 : index
    %c0_4 = arith.constant 0 : index
    %3 = vector.load %arg3[%c0_3, %c0_4] : memref<1x128xf32, #tpu.memory_space<vmem>>, vector<1x128xf32>
    %4 = vector.broadcast %3 : vector<1x128xf32> to vector<800x128xf32>
    %5 = arith.addf %2, %4 : vector<800x128xf32>
    %cst_5 = arith.constant 0.000000e+00 : f32
    %6 = vector.broadcast %cst_5 : f32 to vector<800x128xf32>
    %7 = arith.maximumf %5, %6 : vector<800x128xf32>
    %8 = arith.truncf %7 : vector<800x128xf32> to vector<800x128xbf16>
    %c0_6 = arith.constant 0 : index
    %c0_7 = arith.constant 0 : index
    %9 = vector.load %arg4[%c0_6, %c0_7] : memref<800x128xbf16, #tpu.memory_space<vmem>>, vector<800x128xbf16>
    tpu.vector_store %arg4[%c0_6, %c0_7], %8 {strides = array<i32>} : memref<800x128xbf16, #tpu.memory_space<vmem>>, vector<800x128xbf16>,
    return
  }
  func.func @transform_0(%arg0: i32) -> (i32, i32) {
    %c0_i32 = arith.constant 0 : i32
    %c0_i32_0 = arith.constant 0 : i32
    return %arg0, %c0_i32 : i32, i32
  }
  func.func @transform_1(%arg0: i32) -> (i32, i32) {
    %c0_i32 = arith.constant 0 : i32
    %c0_i32_0 = arith.constant 0 : i32
    %c0_i32_1 = arith.constant 0 : i32
    return %c0_i32, %c0_i32_0 : i32, i32
  }
  func.func @transform_2(%arg0: i32) -> (i32, i32) {
    %c0_i32 = arith.constant 0 : i32
    %c0_i32_0 = arith.constant 0 : i32
    %c0_i32_1 = arith.constant 0 : i32
    return %c0_i32, %c0_i32_0 : i32, i32
  }
  func.func @transform_3(%arg0: i32) -> (i32, i32) {
    %c0_i32 = arith.constant 0 : i32
    %c0_i32_0 = arith.constant 0 : i32
    return %arg0, %c0_i32 : i32, i32
  }
}

module attributes {stable_mosaic.version = 11 : i64} {
  func.func @_linear_kernel(%arg0: i32, %arg1: memref<162x512xbf16, #tpu.memory_space<vmem>>, %arg2: memref<512x128xbf16, #tpu.memory_space<vmem>>, %arg3: memref<1x128xf32, #tpu.memory_space<vmem>>, %arg4: memref<162x128xbf16, #tpu.memory_space<vmem>>) attributes {dimension_semantics = [#tpu.dimension_semantics<parallel>], iteration_bounds = array<i64: 1>, scalar_prefetch = 0 : i64, scratch_operands = 0 : i64, tpu.core_type = #tpu.core_type<tc>, window_params = [{transform_indices = @transform_0, window_bounds = array<i64: 162, 512>}, {pipeline_mode = #tpu.pipeline_mode<synchronous>, transform_indices = @transform_1, window_bounds = array<i64: 512, 128>}, {pipeline_mode = #tpu.pipeline_mode<synchronous>, transform_indices = @transform_2, window_bounds = array<i64: 1, 128>}, {transform_indices = @transform_3, window_bounds = array<i64: 162, 128>}]} {
    %c0 = arith.constant 0 : index
    %c0_0 = arith.constant 0 : index
    %0 = vector.load %arg1[%c0, %c0_0] : memref<162x512xbf16, #tpu.memory_space<vmem>>, vector<162x512xbf16>
    %c0_1 = arith.constant 0 : index
    %c0_2 = arith.constant 0 : index
    %1 = vector.load %arg2[%c0_1, %c0_2] : memref<512x128xbf16, #tpu.memory_space<vmem>>, vector<512x128xbf16>
    %cst = arith.constant dense<0.000000e+00> : vector<162x128xf32>
    %2 = tpu.matmul %0, %1, %cst {dimension_numbers = #tpu.dot_dimension_numbers<[1], [0], [0], [1], [0, 0, 1, 1], [], []>} : vector<162x512xbf16>, vector<512x128xbf16>, vector<162x128xf32> -> vector<162x128xf32>
    %c0_3 = arith.constant 0 : index
    %c0_4 = arith.constant 0 : index
    %3 = vector.load %arg3[%c0_3, %c0_4] : memref<1x128xf32, #tpu.memory_space<vmem>>, vector<1x128xf32>
    %4 = vector.broadcast %3 : vector<1x128xf32> to vector<162x128xf32>
    %5 = arith.addf %2, %4 : vector<162x128xf32>
    %cst_5 = arith.constant 0.000000e+00 : f32
    %6 = vector.broadcast %cst_5 : f32 to vector<162x128xf32>
    %7 = arith.maximumf %5, %6 : vector<162x128xf32>
    %8 = arith.truncf %7 : vector<162x128xf32> to vector<162x128xbf16>
    %c0_6 = arith.constant 0 : index
    %c0_7 = arith.constant 0 : index
    %9 = vector.load %arg4[%c0_6, %c0_7] : memref<162x128xbf16, #tpu.memory_space<vmem>>, vector<162x128xbf16>
    tpu.vector_store %arg4[%c0_6, %c0_7], %8 {strides = array<i32>} : memref<162x128xbf16, #tpu.memory_space<vmem>>, vector<162x128xbf16>,
    return
  }
  func.func @transform_0(%arg0: i32) -> (i32, i32) {
    %c0_i32 = arith.constant 0 : i32
    %c0_i32_0 = arith.constant 0 : i32
    return %arg0, %c0_i32 : i32, i32
  }
  func.func @transform_1(%arg0: i32) -> (i32, i32) {
    %c0_i32 = arith.constant 0 : i32
    %c0_i32_0 = arith.constant 0 : i32
    %c0_i32_1 = arith.constant 0 : i32
    return %c0_i32, %c0_i32_0 : i32, i32
  }
  func.func @transform_2(%arg0: i32) -> (i32, i32) {
    %c0_i32 = arith.constant 0 : i32
    %c0_i32_0 = arith.constant 0 : i32
    %c0_i32_1 = arith.constant 0 : i32
    return %c0_i32, %c0_i32_0 : i32, i32
  }
  func.func @transform_3(%arg0: i32) -> (i32, i32) {
    %c0_i32 = arith.constant 0 : i32
    %c0_i32_0 = arith.constant 0 : i32
    return %arg0, %c0_i32 : i32, i32
  }
}

module attributes {stable_mosaic.version = 11 : i64} {
  func.func @_linear_kernel(%arg0: i32, %arg1: memref<98x576xbf16, #tpu.memory_space<vmem>>, %arg2: memref<576x128xbf16, #tpu.memory_space<vmem>>, %arg3: memref<1x128xf32, #tpu.memory_space<vmem>>, %arg4: memref<98x128xbf16, #tpu.memory_space<vmem>>) attributes {dimension_semantics = [#tpu.dimension_semantics<parallel>], iteration_bounds = array<i64: 1>, scalar_prefetch = 0 : i64, scratch_operands = 0 : i64, tpu.core_type = #tpu.core_type<tc>, window_params = [{transform_indices = @transform_0, window_bounds = array<i64: 98, 576>}, {pipeline_mode = #tpu.pipeline_mode<synchronous>, transform_indices = @transform_1, window_bounds = array<i64: 576, 128>}, {pipeline_mode = #tpu.pipeline_mode<synchronous>, transform_indices = @transform_2, window_bounds = array<i64: 1, 128>}, {transform_indices = @transform_3, window_bounds = array<i64: 98, 128>}]} {
    %c0 = arith.constant 0 : index
    %c0_0 = arith.constant 0 : index
    %0 = vector.load %arg1[%c0, %c0_0] : memref<98x576xbf16, #tpu.memory_space<vmem>>, vector<98x576xbf16>
    %c0_1 = arith.constant 0 : index
    %c0_2 = arith.constant 0 : index
    %1 = vector.load %arg2[%c0_1, %c0_2] : memref<576x128xbf16, #tpu.memory_space<vmem>>, vector<576x128xbf16>
    %cst = arith.constant dense<0.000000e+00> : vector<98x128xf32>
    %2 = tpu.matmul %0, %1, %cst {dimension_numbers = #tpu.dot_dimension_numbers<[1], [0], [0], [1], [0, 0, 1, 1], [], []>} : vector<98x576xbf16>, vector<576x128xbf16>, vector<98x128xf32> -> vector<98x128xf32>
    %c0_3 = arith.constant 0 : index
    %c0_4 = arith.constant 0 : index
    %3 = vector.load %arg3[%c0_3, %c0_4] : memref<1x128xf32, #tpu.memory_space<vmem>>, vector<1x128xf32>
    %4 = vector.broadcast %3 : vector<1x128xf32> to vector<98x128xf32>
    %5 = arith.addf %2, %4 : vector<98x128xf32>
    %cst_5 = arith.constant 0.000000e+00 : f32
    %6 = vector.broadcast %cst_5 : f32 to vector<98x128xf32>
    %7 = arith.maximumf %5, %6 : vector<98x128xf32>
    %8 = arith.truncf %7 : vector<98x128xf32> to vector<98x128xbf16>
    %c0_6 = arith.constant 0 : index
    %c0_7 = arith.constant 0 : index
    %9 = vector.load %arg4[%c0_6, %c0_7] : memref<98x128xbf16, #tpu.memory_space<vmem>>, vector<98x128xbf16>
    tpu.vector_store %arg4[%c0_6, %c0_7], %8 {strides = array<i32>} : memref<98x128xbf16, #tpu.memory_space<vmem>>, vector<98x128xbf16>,
    return
  }
  func.func @transform_0(%arg0: i32) -> (i32, i32) {
    %c0_i32 = arith.constant 0 : i32
    %c0_i32_0 = arith.constant 0 : i32
    return %arg0, %c0_i32 : i32, i32
  }
  func.func @transform_1(%arg0: i32) -> (i32, i32) {
    %c0_i32 = arith.constant 0 : i32
    %c0_i32_0 = arith.constant 0 : i32
    %c0_i32_1 = arith.constant 0 : i32
    return %c0_i32, %c0_i32_0 : i32, i32
  }
  func.func @transform_2(%arg0: i32) -> (i32, i32) {
    %c0_i32 = arith.constant 0 : i32
    %c0_i32_0 = arith.constant 0 : i32
    %c0_i32_1 = arith.constant 0 : i32
    return %c0_i32, %c0_i32_0 : i32, i32
  }
  func.func @transform_3(%arg0: i32) -> (i32, i32) {
    %c0_i32 = arith.constant 0 : i32
    %c0_i32_0 = arith.constant 0 : i32
    return %arg0, %c0_i32 : i32, i32
  }
}

module attributes {stable_mosaic.version = 11 : i64} {
  func.func @_lstm_kernel(%arg0: i32, %arg1: memref<2x3136xbf16, #tpu.memory_space<vmem>>, %arg2: memref<2x512xbf16, #tpu.memory_space<vmem>>, %arg3: memref<2x128xf32, #tpu.memory_space<vmem>>, %arg4: memref<3136x512xbf16, #tpu.memory_space<vmem>>, %arg5: memref<512x512xbf16, #tpu.memory_space<vmem>>, %arg6: memref<1x512xf32, #tpu.memory_space<vmem>>, %arg7: memref<2x128xf32, #tpu.memory_space<vmem>>, %arg8: memref<2x128xf32, #tpu.memory_space<vmem>>) attributes {dimension_semantics = [#tpu.dimension_semantics<parallel>], iteration_bounds = array<i64: 4>, scalar_prefetch = 0 : i64, scratch_operands = 0 : i64, tpu.core_type = #tpu.core_type<tc>, window_params = [{pipeline_mode = #tpu.pipeline_mode<synchronous>, transform_indices = @transform_0, window_bounds = array<i64: 2, 3136>}, {pipeline_mode = #tpu.pipeline_mode<synchronous>, transform_indices = @transform_1, window_bounds = array<i64: 2, 512>}, {transform_indices = @transform_2, window_bounds = array<i64: 2, 128>}, {transform_indices = @transform_3, window_bounds = array<i64: 3136, 512>}, {transform_indices = @transform_4, window_bounds = array<i64: 512, 512>}, {transform_indices = @transform_5, window_bounds = array<i64: 1, 512>}, {transform_indices = @transform_6, window_bounds = array<i64: 2, 128>}, {transform_indices = @transform_7, window_bounds = array<i64: 2, 128>}]} {
    %c0 = arith.constant 0 : index
    %c0_0 = arith.constant 0 : index
    %0 = vector.load %arg1[%c0, %c0_0] : memref<2x3136xbf16, #tpu.memory_space<vmem>>, vector<2x3136xbf16>
    %c0_1 = arith.constant 0 : index
    %c0_2 = arith.constant 0 : index
    %1 = vector.load %arg4[%c0_1, %c0_2] : memref<3136x512xbf16, #tpu.memory_space<vmem>>, vector<3136x512xbf16>
    %cst = arith.constant dense<0.000000e+00> : vector<2x512xf32>
    %2 = tpu.matmul %0, %1, %cst {dimension_numbers = #tpu.dot_dimension_numbers<[1], [0], [0], [1], [0, 0, 1, 1], [], []>} : vector<2x3136xbf16>, vector<3136x512xbf16>, vector<2x512xf32> -> vector<2x512xf32>
    %c0_3 = arith.constant 0 : index
    %c0_4 = arith.constant 0 : index
    %3 = vector.load %arg2[%c0_3, %c0_4] : memref<2x512xbf16, #tpu.memory_space<vmem>>, vector<2x512xbf16>
    %c0_5 = arith.constant 0 : index
    %c0_6 = arith.constant 0 : index
    %4 = vector.load %arg5[%c0_5, %c0_6] : memref<512x512xbf16, #tpu.memory_space<vmem>>, vector<512x512xbf16>
    %cst_7 = arith.constant dense<0.000000e+00> : vector<2x512xf32>
    %5 = tpu.matmul %3, %4, %cst_7 {dimension_numbers = #tpu.dot_dimension_numbers<[1], [0], [0], [1], [0, 0, 1, 1], [], []>} : vector<2x512xbf16>, vector<512x512xbf16>, vector<2x512xf32> -> vector<2x512xf32>
    %6 = arith.addf %2, %5 : vector<2x512xf32>
    %c0_8 = arith.constant 0 : index
    %c0_9 = arith.constant 0 : index
    %7 = vector.load %arg6[%c0_8, %c0_9] : memref<1x512xf32, #tpu.memory_space<vmem>>, vector<1x512xf32>
    %8 = vector.broadcast %7 : vector<1x512xf32> to vector<2x512xf32>
    %9 = arith.addf %6, %8 : vector<2x512xf32>
    %10 = vector.extract_strided_slice %9 {offsets = [0, 0], sizes = [2, 128], strides = [1, 1]} : vector<2x512xf32> to vector<2x128xf32>
    %11 = arith.negf %10 : vector<2x128xf32>
    %12 = math.exp %11 : vector<2x128xf32>
    %cst_10 = arith.constant 1.000000e+00 : f32
    %13 = vector.broadcast %cst_10 : f32 to vector<2x128xf32>
    %14 = arith.addf %13, %12 : vector<2x128xf32>
    %15 = arith.divf %13, %14 : vector<2x128xf32>
    %16 = vector.extract_strided_slice %9 {offsets = [0, 128], sizes = [2, 128], strides = [1, 1]} : vector<2x512xf32> to vector<2x128xf32>
    %17 = arith.negf %16 : vector<2x128xf32>
    %18 = math.exp %17 : vector<2x128xf32>
    %cst_11 = arith.constant 1.000000e+00 : f32
    %19 = vector.broadcast %cst_11 : f32 to vector<2x128xf32>
    %20 = arith.addf %19, %18 : vector<2x128xf32>
    %21 = arith.divf %19, %20 : vector<2x128xf32>
    %22 = vector.extract_strided_slice %9 {offsets = [0, 256], sizes = [2, 128], strides = [1, 1]} : vector<2x512xf32> to vector<2x128xf32>
    %23 = math.tanh %22 : vector<2x128xf32>
    %24 = vector.extract_strided_slice %9 {offsets = [0, 384], sizes = [2, 128], strides = [1, 1]} : vector<2x512xf32> to vector<2x128xf32>
    %25 = arith.negf %24 : vector<2x128xf32>
    %26 = math.exp %25 : vector<2x128xf32>
    %cst_12 = arith.constant 1.000000e+00 : f32
    %27 = vector.broadcast %cst_12 : f32 to vector<2x128xf32>
    %28 = arith.addf %27, %26 : vector<2x128xf32>
    %29 = arith.divf %27, %28 : vector<2x128xf32>
    %c0_13 = arith.constant 0 : index
    %c0_14 = arith.constant 0 : index
    %30 = vector.load %arg3[%c0_13, %c0_14] : memref<2x128xf32, #tpu.memory_space<vmem>>, vector<2x128xf32>
    %31 = arith.mulf %21, %30 : vector<2x128xf32>
    %32 = arith.mulf %15, %23 : vector<2x128xf32>
    %33 = arith.addf %31, %32 : vector<2x128xf32>
    %34 = math.tanh %33 : vector<2x128xf32>
    %35 = arith.mulf %29, %34 : vector<2x128xf32>
    %c0_15 = arith.constant 0 : index
    %c0_16 = arith.constant 0 : index
    %36 = vector.load %arg8[%c0_15, %c0_16] : memref<2x128xf32, #tpu.memory_space<vmem>>, vector<2x128xf32>
    tpu.vector_store %arg8[%c0_15, %c0_16], %33 {strides = array<i32>} : memref<2x128xf32, #tpu.memory_space<vmem>>, vector<2x128xf32>,
    %c0_17 = arith.constant 0 : index
    %c0_18 = arith.constant 0 : index
    %37 = vector.load %arg7[%c0_17, %c0_18] : memref<2x128xf32, #tpu.memory_space<vmem>>, vector<2x128xf32>
    tpu.vector_store %arg7[%c0_17, %c0_18], %35 {strides = array<i32>} : memref<2x128xf32, #tpu.memory_space<vmem>>, vector<2x128xf32>,
    return
  }
  func.func @transform_0(%arg0: i32) -> (i32, i32) {
    %c0_i32 = arith.constant 0 : i32
    %c0_i32_0 = arith.constant 0 : i32
    %c0_i32_1 = arith.constant 0 : i32
    return %c0_i32, %c0_i32_0 : i32, i32
  }
  func.func @transform_1(%arg0: i32) -> (i32, i32) {
    %c0_i32 = arith.constant 0 : i32
    %c0_i32_0 = arith.constant 0 : i32
    %c0_i32_1 = arith.constant 0 : i32
    return %c0_i32, %c0_i32_0 : i32, i32
  }
  func.func @transform_2(%arg0: i32) -> (i32, i32) {
    %c0_i32 = arith.constant 0 : i32
    %c0_i32_0 = arith.constant 0 : i32
    return %c0_i32, %arg0 : i32, i32
  }
  func.func @transform_3(%arg0: i32) -> (i32, i32) {
    %c0_i32 = arith.constant 0 : i32
    %c0_i32_0 = arith.constant 0 : i32
    return %c0_i32, %arg0 : i32, i32
  }
  func.func @transform_4(%arg0: i32) -> (i32, i32) {
    %c0_i32 = arith.constant 0 : i32
    %c0_i32_0 = arith.constant 0 : i32
    return %c0_i32, %arg0 : i32, i32
  }
  func.func @transform_5(%arg0: i32) -> (i32, i32) {
    %c0_i32 = arith.constant 0 : i32
    %c0_i32_0 = arith.constant 0 : i32
    return %c0_i32, %arg0 : i32, i32
  }
  func.func @transform_6(%arg0: i32) -> (i32, i32) {
    %c0_i32 = arith.constant 0 : i32
    %c0_i32_0 = arith.constant 0 : i32
    return %c0_i32, %arg0 : i32, i32
  }
  func.func @transform_7(%arg0: i32) -> (i32, i32) {
    %c0_i32 = arith.constant 0 : i32
    %c0_i32_0 = arith.constant 0 : i32
    return %c0_i32, %arg0 : i32, i32
  }
}

</mosaic_0001>

<bundles_post_ra>
// kernel: qnet_lstm_forward.4
= control target key start
LH: loop header
LB: loop body
LE: loop exit
PB: predicated region body
PF: predicated region fallthrough
CT: control target
= control target key end

     0   :  { %vm404_vm0 = vcmask 523264   ;;  %s2907_s1 = inlined_call_operand.vmem [shape: bf16[64,128], index: 1, kind: input, shape index: {}]   ;;  %s2908_s0 = inlined_call_operand.vmem [shape: bf16[800,64], index: 0, kind: input, shape index: {}]   ;;  %s2909_s2 = inlined_call_operand.vmem [shape: f32[1,128], index: 2, kind: input, shape index: {}]   ;;  %s2910_s3 = inlined_call_operand.vmem [shape: bf16[800,128], index: 3, kind: output, shape index: {}]  }
   0x1   :  { %v2366_v0 = vld [vmem:[%s2907_s1 + $0x18] sm:$0xff]   ;;  %v2367_v1 = vld [vmem:[%s2907_s1 + $0x10] sm:$0xff]   ;;  %v2368_v2 = vld [vmem:[%s2907_s1 + $0x8] sm:$0xff]  }
   0x2   :  { %2250 = vmatprep.subr.bf16.mxu0 %v2366_v0  ;;  %2358 = vmatprep.subr.bf16.mxu1 %v2366_v0  ;;  %v2370_v3 = vld [vmem:[%s2908_s0] sm:$0xff]   ;;  %v2372_v4 = vld [vmem:[%s2908_s0 + $0xd0] sm:$0xff]   ;;  %v2371_v6 = vld [vmem:[%s2908_s0 + $0x8] sm:$0xff]  }
   0x3   :  { %2251 = vmatpush3.bf16.msra.mxu0 %v2366_v0  ;;  %2362 = vmatpush3.bf16.msra.mxu1 %v2366_v0  ;;  %v2369_v5 = vld [vmem:[%s2907_s1] sm:$0xff]   ;;  %v2373_v7 = vld [vmem:[%s2908_s0 + $0xd8] sm:$0xff]   ;;  %v2374_v8 = vld [vmem:[%s2908_s0 + $0x10] sm:$0xff]  }
   0x4   :  { %2252 = vmatprep.subr.bf16.mxu0 %v2367_v1  ;;  %2359 = vmatprep.subr.bf16.mxu1 %v2367_v1  ;;  %v2376_v9 = vld [vmem:[%s2908_s0 + $0xe0] sm:$0xff]   ;;  %v2375_v10 = vld [vmem:[%s2908_s0 + $0x18] sm:$0xff]   ;;  %v2377_v11 = vld [vmem:[%s2908_s0 + $0xe8] sm:$0xff]  }
   0x5   :  { %2258 = vmatprep.mubr.msk.bf16.mxu0 %vm404_vm0, %v2370_v3  ;;  %2310 = vmatprep.mubr.msk.bf16.mxu1 %vm404_vm0, %v2372_v4  ;;  %v2378_v12 = vld [vmem:[%s2908_s0 + $0x20] sm:$0xff]   ;;  %v2380_v13 = vld [vmem:[%s2908_s0 + $0xf0] sm:$0xff]   ;;  %v2379_v14 = vld [vmem:[%s2908_s0 + $0x28] sm:$0xff]  }
   0x6   :  { %v2381_v15 = vld [vmem:[%s2908_s0 + $0xf8] sm:$0xff]   ;;  %v2382_v16 = vld [vmem:[%s2908_s0 + $0x30] sm:$0xff]   ;;  %v2384_v17 = vld [vmem:[%s2908_s0 + $0x100] sm:$0xff]  }
   0x7   :  { %2253 = vmatpush3.bf16.msra.mxu0 %v2367_v1  ;;  %2363 = vmatpush3.bf16.msra.mxu1 %v2367_v1  ;;  %v2383_v18 = vld [vmem:[%s2908_s0 + $0x38] sm:$0xff]   ;;  %v2385_v19 = vld [vmem:[%s2908_s0 + $0x108] sm:$0xff]   ;;  %v2386_v20 = vld [vmem:[%s2908_s0 + $0x40] sm:$0xff]  }
   0x8   :  { %2254 = vmatprep.subr.bf16.mxu0 %v2368_v2  ;;  %2360 = vmatprep.subr.bf16.mxu1 %v2368_v2  ;;  %v2388_v21 = vld [vmem:[%s2908_s0 + $0x110] sm:$0xff]   ;;  %v2387_v22 = vld [vmem:[%s2908_s0 + $0x48] sm:$0xff]   ;;  %v2389_v23 = vld [vmem:[%s2908_s0 + $0x118] sm:$0xff]  }
   0x9   :  { %v2390_v24 = vld [vmem:[%s2908_s0 + $0x50] sm:$0xff]   ;;  %v2392_v25 = vld [vmem:[%s2908_s0 + $0x120] sm:$0xff]   ;;  %v2391_v26 = vld [vmem:[%s2908_s0 + $0x58] sm:$0xff]  }
   0xa   :  { %v2393_v27 = vld [vmem:[%s2908_s0 + $0x128] sm:$0xff]   ;;  %v2394_v28 = vld [vmem:[%s2908_s0 + $0x60] sm:$0xff]   ;;  %v2396_v29 = vld [vmem:[%s2908_s0 + $0x130] sm:$0xff]  }
   0xb   :  { %2255 = vmatpush3.bf16.msra.mxu0 %v2368_v2  ;;  %2364 = vmatpush3.bf16.msra.mxu1 %v2368_v2  ;;  %v2395_v30 = vld [vmem:[%s2908_s0 + $0x68] sm:$0xff]   ;;  %v2397_v31 = vld [vmem:[%s2908_s0 + $0x138] sm:$0xff]   ;;  %v2398_v32 = vld [vmem:[%s2908_s0 + $0x70] sm:$0xff]  }
   0xc   :  { %2256 = vmatprep.subr.bf16.mxu0 %v2369_v5  ;;  %2361 = vmatprep.subr.bf16.mxu1 %v2369_v5  ;;  %v2400_v33 = vld [vmem:[%s2908_s0 + $0x140] sm:$0xff]   ;;  %v2399_v34 = vld [vmem:[%s2908_s0 + $0x78] sm:$0xff]   ;;  %v2401_v35 = vld [vmem:[%s2908_s0 + $0x148] sm:$0xff]  }
   0xd   :  { %v2402_v36 = vld [vmem:[%s2908_s0 + $0x80] sm:$0xff]   ;;  %v2404_v37 = vld [vmem:[%s2908_s0 + $0x150] sm:$0xff]   ;;  %v2403_v38 = vld [vmem:[%s2908_s0 + $0x88] sm:$0xff]  }
   0xe   :  { %v2405_v39 = vld [vmem:[%s2908_s0 + $0x158] sm:$0xff]   ;;  %v2406_v40 = vld [vmem:[%s2908_s0 + $0x90] sm:$0xff]   ;;  %v2408_v41 = vld [vmem:[%s2908_s0 + $0x160] sm:$0xff]  }
   0xf   :  { %2257 = vmatpush3.bf16.msra.mxu0 %v2369_v5  ;;  %2365 = vmatpush3.bf16.msra.mxu1 %v2369_v5  ;;  %v2407_v42 = vld [vmem:[%s2908_s0 + $0x98] sm:$0xff]   ;;  %v2409_v43 = vld [vmem:[%s2908_s0 + $0x168] sm:$0xff]   ;;  %v2410_v44 = vld [vmem:[%s2908_s0 + $0xa0] sm:$0xff]  }
  0x10   :  { %v2412_v45 = vld [vmem:[%s2908_s0 + $0x170] sm:$0xff]   ;;  %v2411_v46 = vld [vmem:[%s2908_s0 + $0xa8] sm:$0xff]   ;;  %v2413_v47 = vld [vmem:[%s2908_s0 + $0x178] sm:$0xff]  }
  0x11   :  { %v2414_v48 = vld [vmem:[%s2908_s0 + $0xb0] sm:$0xff]   ;;  %v2416_v49 = vld [vmem:[%s2908_s0 + $0x180] sm:$0xff]   ;;  %v2415_v50 = vld [vmem:[%s2908_s0 + $0xb8] sm:$0xff]  }
  0x12   :  { %2259 = vmatmul.mubr.msk.bf16.vlgmr.msra.gmra.mxu0 %vm404_vm0, %v2371_v6  ;;  %2311 = vmatmul.mubr.msk.bf16.vlgmr.msra.gmra.mxu1 %vm404_vm0, %v2373_v7  ;;  %v2417_v51 = vld [vmem:[%s2908_s0 + $0x188] sm:$0xff]   ;;  %v2418_v52 = vld [vmem:[%s2908_s0 + $0xc0] sm:$0xff]  }
  0x13   :  { %2262 = vmatprep.mubr.msk.bf16.mxu0 %vm404_vm0, %v2374_v8  ;;  %2314 = vmatprep.mubr.msk.bf16.mxu1 %vm404_vm0, %v2376_v9  ;;  %v2419_v53 = vld [vmem:[%s2908_s0 + $0xc8] sm:$0xff]   ;;  %v2655_v54 = vld [vmem:[%s2909_s2] ss:$0 sm:$0xff] }
  0x1a   :  { %2263 = vmatmul.mubr.msk.bf16.gmra.mxu0 %vm404_vm0, %v2375_v10  ;;  %2315 = vmatmul.mubr.msk.bf16.gmra.mxu1 %vm404_vm0, %v2377_v11 }
  0x1b   :  { %2266 = vmatprep.mubr.msk.bf16.mxu0 %vm404_vm0, %v2378_v12  ;;  %2318 = vmatprep.mubr.msk.bf16.mxu1 %vm404_vm0, %v2380_v13 }
  0x22   :  { %2267 = vmatmul.mubr.msk.bf16.gmra.mxu0 %vm404_vm0, %v2379_v14  ;;  %2319 = vmatmul.mubr.msk.bf16.gmra.mxu1 %vm404_vm0, %v2381_v15 }
  0x23   :  { %2270 = vmatprep.mubr.msk.bf16.mxu0 %vm404_vm0, %v2382_v16  ;;  %2322 = vmatprep.mubr.msk.bf16.mxu1 %vm404_vm0, %v2384_v17 }
  0x2a   :  { %2271 = vmatmul.mubr.msk.bf16.gmra.mxu0 %vm404_vm0, %v2383_v18  ;;  %2323 = vmatmul.mubr.msk.bf16.gmra.mxu1 %vm404_vm0, %v2385_v19 }
  0x2b   :  { %2274 = vmatprep.mubr.msk.bf16.mxu0 %vm404_vm0, %v2386_v20  ;;  %2326 = vmatprep.mubr.msk.bf16.mxu1 %vm404_vm0, %v2388_v21 }
  0x32   :  { %2275 = vmatmul.mubr.msk.bf16.gmra.mxu0 %vm404_vm0, %v2387_v22  ;;  %2327 = vmatmul.mubr.msk.bf16.gmra.mxu1 %vm404_vm0, %v2389_v23 }
  0x33   :  { %2278 = vmatprep.mubr.msk.bf16.mxu0 %vm404_vm0, %v2390_v24  ;;  %2330 = vmatprep.mubr.msk.bf16.mxu1 %vm404_vm0, %v2392_v25 }
  0x3a   :  { %2279 = vmatmul.mubr.msk.bf16.gmra.mxu0 %vm404_vm0, %v2391_v26  ;;  %2331 = vmatmul.mubr.msk.bf16.gmra.mxu1 %vm404_vm0, %v2393_v27 }
  0x3b   :  { %2282 = vmatprep.mubr.msk.bf16.mxu0 %vm404_vm0, %v2394_v28  ;;  %2334 = vmatprep.mubr.msk.bf16.mxu1 %vm404_vm0, %v2396_v29 }
  0x42   :  { %2283 = vmatmul.mubr.msk.bf16.gmra.mxu0 %vm404_vm0, %v2395_v30  ;;  %2335 = vmatmul.mubr.msk.bf16.gmra.mxu1 %vm404_vm0, %v2397_v31 }
  0x43   :  { %2286 = vmatprep.mubr.msk.bf16.mxu0 %vm404_vm0, %v2398_v32  ;;  %2338 = vmatprep.mubr.msk.bf16.mxu1 %vm404_vm0, %v2400_v33 }
  0x4a   :  { %2287 = vmatmul.mubr.msk.bf16.gmra.mxu0 %vm404_vm0, %v2399_v34  ;;  %2339 = vmatmul.mubr.msk.bf16.gmra.mxu1 %vm404_vm0, %v2401_v35 }
  0x4b   :  { %2290 = vmatprep.mubr.msk.bf16.mxu0 %vm404_vm0, %v2402_v36  ;;  %2342 = vmatprep.mubr.msk.bf16.mxu1 %vm404_vm0, %v2404_v37 }
  0x52   :  { %2291 = vmatmul.mubr.msk.bf16.gmra.mxu0 %vm404_vm0, %v2403_v38  ;;  %2343 = vmatmul.mubr.msk.bf16.gmra.mxu1 %vm404_vm0, %v2405_v39 }
  0x53   :  { %2294 = vmatprep.mubr.msk.bf16.mxu0 %vm404_vm0, %v2406_v40  ;;  %2346 = vmatprep.mubr.msk.bf16.mxu1 %vm404_vm0, %v2408_v41 }
  0x5a   :  { %2295 = vmatmul.mubr.msk.bf16.gmra.mxu0 %vm404_vm0, %v2407_v42  ;;  %2347 = vmatmul.mubr.msk.bf16.gmra.mxu1 %vm404_vm0, %v2409_v43 }
  0x5b   :  { %2298 = vmatprep.mubr.msk.bf16.mxu0 %vm404_vm0, %v2410_v44  ;;  %2350 = vmatprep.mubr.msk.bf16.mxu1 %vm404_vm0, %v2412_v45 }
  0x62   :  { %2299 = vmatmul.mubr.msk.bf16.gmra.mxu0 %vm404_vm0, %v2411_v46  ;;  %2351 = vmatmul.mubr.msk.bf16.gmra.mxu1 %vm404_vm0, %v2413_v47 }
  0x63   :  { %2302 = vmatprep.mubr.msk.bf16.mxu0 %vm404_vm0, %v2414_v48  ;;  %2354 = vmatprep.mubr.msk.bf16.mxu1 %vm404_vm0, %v2416_v49 }
  0x6a   :  { %2303 = vmatmul.mubr.msk.bf16.gmra.mxu0 %vm404_vm0, %v2415_v50  ;;  %2355 = vmatmul.mubr.msk.bf16.gmra.mxu1 %vm404_vm0, %v2417_v51 }
  0x6b   :  { %2306 = vmatprep.mubr.msk.bf16.mxu0 %vm404_vm0, %v2418_v52 }
  0x72   :  { %2307 = vmatmul.mubr.msk.bf16.gmra.mxu0 %vm404_vm0, %v2419_v53 }
  0xd2   :  { %v2260_v55 = vpop.f32.mrf.mxu0  ;;  %v2312_v56 = vpop.f32.mrf.mxu1 }
  0xd3   :  { %v806_v57 = vadd.f32 %v2312_v56, %v2655_v54  ;;  %v598_v58 = vadd.f32 %v2260_v55, %v2655_v54 }
  0xd4   :  { %v589_v59 = vpop.f32.mrf.mxu0  ;;  %v797_v60 = vpop.f32.mrf.mxu1 }
  0xd5   :  { %v798_v62 = vadd.f32 %v2655_v54, %v797_v60  ;;  %v590_v0 = vadd.f32 %v2655_v54, %v589_v59  ;;  %v1042_v1 = vmax.f32 %v806_v57, 0.0  ;;  %v990_v4 = vmax.f32 %v598_v58, 0.0 }
  0xd6   :  { %v2261_v61 = vpop.f32.mrf.mxu0  ;;  %v2313_v63 = vpop.f32.mrf.mxu1 }
  0xd7   :  { %v601_v2 = vadd.f32 %v2261_v61, %v2655_v54  ;;  %v809_v3 = vadd.f32 %v2313_v63, %v2655_v54  ;;  %v1040_v11 = vmax.f32 %v798_v62, 0.0  ;;  %v988_v14 = vmax.f32 %v590_v0, 0.0 }
  0xd8   :  { %v592_v5 = vpop.f32.mrf.mxu0  ;;  %v800_v6 = vpop.f32.mrf.mxu1 }
  0xd9   :  { %v991_v7 = vmax.f32 %v601_v2, 0.0  ;;  %v593_v8 = vadd.f32 %v2655_v54, %v592_v5  ;;  %v1043_v9 = vmax.f32 %v809_v3, 0.0  ;;  %v801_v10 = vadd.f32 %v2655_v54, %v800_v6 }
  0xda   :  { %v2264_v12 = vpop.f32.mrf.mxu0  ;;  %v2316_v13 = vpop.f32.mrf.mxu1 }
  0xdb   :  { %v1905_v15 = vpack.c.bf16 %v991_v7, %v990_v4  ;;  %v989_v16 = vmax.f32 %v593_v8, 0.0  ;;  %v2035_v17 = vpack.c.bf16 %v1043_v9, %v1042_v1  ;;  %v614_v18 = vadd.f32 %v2264_v12, %v2655_v54 }
  0xdc   :  { %v1041_v19 = vmax.f32 %v801_v10, 0.0  ;;  %v605_v20 = vpop.f32.mrf.mxu0  ;;  %v822_v21 = vadd.f32 %v2316_v13, %v2655_v54  ;;  %v813_v22 = vpop.f32.mrf.mxu1 }
  0xdd   :  { %2147 = vst [vmem:[%s2910_s3 + $0x8] sm:$0xff] %v1905_v15   ;;  %v1900_v23 = vpack.c.bf16 %v989_v16, %v988_v14  ;;  %2173 = vst [vmem:[%s2910_s3 + $0xd8] sm:$0xff] %v2035_v17   ;;  %v814_v26 = vadd.f32 %v2655_v54, %v813_v22  ;;  %v606_v28 = vadd.f32 %v2655_v54, %v605_v20  ;;  %v994_v32 = vmax.f32 %v614_v18, 0.0 }
  0xde   :  { %v2030_v24 = vpack.c.bf16 %v1041_v19, %v1040_v11  ;;  %v2265_v25 = vpop.f32.mrf.mxu0  ;;  %v2317_v27 = vpop.f32.mrf.mxu1  ;;  %v1046_v29 = vmax.f32 %v822_v21, 0.0 }
  0xdf   :  { %1901 = vst [vmem:[%s2910_s3] sm:$0xff] %v1900_v23   ;;  %v617_v30 = vadd.f32 %v2265_v25, %v2655_v54  ;;  %v825_v31 = vadd.f32 %v2317_v27, %v2655_v54  ;;  %v1044_v39 = vmax.f32 %v814_v26, 0.0  ;;  %v992_v42 = vmax.f32 %v606_v28, 0.0 }
  0xe0   :  { %2172 = vst [vmem:[%s2910_s3 + $0xd0] sm:$0xff] %v2030_v24   ;;  %v608_v33 = vpop.f32.mrf.mxu0  ;;  %v816_v34 = vpop.f32.mrf.mxu1 }
  0xe1   :  { %v995_v35 = vmax.f32 %v617_v30, 0.0  ;;  %v609_v36 = vadd.f32 %v2655_v54, %v608_v33  ;;  %v1047_v37 = vmax.f32 %v825_v31, 0.0  ;;  %v817_v38 = vadd.f32 %v2655_v54, %v816_v34 }
  0xe2   :  { %v2268_v40 = vpop.f32.mrf.mxu0  ;;  %v2320_v41 = vpop.f32.mrf.mxu1 }
  0xe3   :  { %v1915_v43 = vpack.c.bf16 %v995_v35, %v994_v32  ;;  %v993_v44 = vmax.f32 %v609_v36, 0.0  ;;  %v2045_v45 = vpack.c.bf16 %v1047_v37, %v1046_v29  ;;  %v630_v46 = vadd.f32 %v2268_v40, %v2655_v54 }
  0xe4   :  { %v1045_v47 = vmax.f32 %v817_v38, 0.0  ;;  %v621_v48 = vpop.f32.mrf.mxu0  ;;  %v838_v49 = vadd.f32 %v2320_v41, %v2655_v54  ;;  %v829_v50 = vpop.f32.mrf.mxu1 }
  0xe5   :  { %2149 = vst [vmem:[%s2910_s3 + $0x18] sm:$0xff] %v1915_v43   ;;  %v1910_v51 = vpack.c.bf16 %v993_v44, %v992_v42  ;;  %2175 = vst [vmem:[%s2910_s3 + $0xe8] sm:$0xff] %v2045_v45   ;;  %v830_v55 = vadd.f32 %v2655_v54, %v829_v50  ;;  %v622_v57 = vadd.f32 %v2655_v54, %v621_v48  ;;  %v998_v61 = vmax.f32 %v630_v46, 0.0 }
  0xe6   :  { %v2040_v52 = vpack.c.bf16 %v1045_v47, %v1044_v39  ;;  %v2269_v53 = vpop.f32.mrf.mxu0  ;;  %v2321_v56 = vpop.f32.mrf.mxu1  ;;  %v1050_v58 = vmax.f32 %v838_v49, 0.0 }
  0xe7   :  { %2148 = vst [vmem:[%s2910_s3 + $0x10] sm:$0xff] %v1910_v51   ;;  %v633_v59 = vadd.f32 %v2269_v53, %v2655_v54  ;;  %v841_v60 = vadd.f32 %v2321_v56, %v2655_v54  ;;  %v1048_v4 = vmax.f32 %v830_v55, 0.0  ;;  %v996_v7 = vmax.f32 %v622_v57, 0.0 }
  0xe8   :  { %2174 = vst [vmem:[%s2910_s3 + $0xe0] sm:$0xff] %v2040_v52   ;;  %v624_v62 = vpop.f32.mrf.mxu0  ;;  %v832_v63 = vpop.f32.mrf.mxu1 }
  0xe9   :  { %v999_v0 = vmax.f32 %v633_v59, 0.0  ;;  %v625_v1 = vadd.f32 %v2655_v54, %v624_v62  ;;  %v1051_v2 = vmax.f32 %v841_v60, 0.0  ;;  %v833_v3 = vadd.f32 %v2655_v54, %v832_v63 }
  0xea   :  { %v2272_v5 = vpop.f32.mrf.mxu0  ;;  %v2324_v6 = vpop.f32.mrf.mxu1 }
  0xeb   :  { %v1925_v8 = vpack.c.bf16 %v999_v0, %v998_v61  ;;  %v997_v9 = vmax.f32 %v625_v1, 0.0  ;;  %v2055_v10 = vpack.c.bf16 %v1051_v2, %v1050_v58  ;;  %v646_v11 = vadd.f32 %v2272_v5, %v2655_v54 }
  0xec   :  { %v1049_v12 = vmax.f32 %v833_v3, 0.0  ;;  %v637_v13 = vpop.f32.mrf.mxu0  ;;  %v854_v14 = vadd.f32 %v2324_v6, %v2655_v54  ;;  %v845_v15 = vpop.f32.mrf.mxu1 }
  0xed   :  { %2151 = vst [vmem:[%s2910_s3 + $0x28] sm:$0xff] %v1925_v8   ;;  %v1920_v16 = vpack.c.bf16 %v997_v9, %v996_v7  ;;  %2177 = vst [vmem:[%s2910_s3 + $0xf8] sm:$0xff] %v2055_v10   ;;  %v846_v19 = vadd.f32 %v2655_v54, %v845_v15  ;;  %v638_v21 = vadd.f32 %v2655_v54, %v637_v13  ;;  %v1002_v25 = vmax.f32 %v646_v11, 0.0 }
  0xee   :  { %v2050_v17 = vpack.c.bf16 %v1049_v12, %v1048_v4  ;;  %v2273_v18 = vpop.f32.mrf.mxu0  ;;  %v2325_v20 = vpop.f32.mrf.mxu1  ;;  %v1054_v22 = vmax.f32 %v854_v14, 0.0 }
  0xef   :  { %2150 = vst [vmem:[%s2910_s3 + $0x20] sm:$0xff] %v1920_v16   ;;  %v649_v23 = vadd.f32 %v2273_v18, %v2655_v54  ;;  %v857_v24 = vadd.f32 %v2325_v20, %v2655_v54  ;;  %v1052_v32 = vmax.f32 %v846_v19, 0.0  ;;  %v1000_v35 = vmax.f32 %v638_v21, 0.0 }
  0xf0   :  { %2176 = vst [vmem:[%s2910_s3 + $0xf0] sm:$0xff] %v2050_v17   ;;  %v640_v26 = vpop.f32.mrf.mxu0  ;;  %v848_v27 = vpop.f32.mrf.mxu1 }
  0xf1   :  { %v1003_v28 = vmax.f32 %v649_v23, 0.0  ;;  %v641_v29 = vadd.f32 %v2655_v54, %v640_v26  ;;  %v1055_v30 = vmax.f32 %v857_v24, 0.0  ;;  %v849_v31 = vadd.f32 %v2655_v54, %v848_v27 }
  0xf2   :  { %v2276_v33 = vpop.f32.mrf.mxu0  ;;  %v2328_v34 = vpop.f32.mrf.mxu1 }
  0xf3   :  { %v1935_v36 = vpack.c.bf16 %v1003_v28, %v1002_v25  ;;  %v1001_v37 = vmax.f32 %v641_v29, 0.0  ;;  %v2065_v38 = vpack.c.bf16 %v1055_v30, %v1054_v22  ;;  %v662_v39 = vadd.f32 %v2276_v33, %v2655_v54 }
  0xf4   :  { %v1053_v40 = vmax.f32 %v849_v31, 0.0  ;;  %v653_v41 = vpop.f32.mrf.mxu0  ;;  %v870_v42 = vadd.f32 %v2328_v34, %v2655_v54  ;;  %v861_v43 = vpop.f32.mrf.mxu1 }
  0xf5   :  { %2153 = vst [vmem:[%s2910_s3 + $0x38] sm:$0xff] %v1935_v36   ;;  %v1930_v44 = vpack.c.bf16 %v1001_v37, %v1000_v35  ;;  %2179 = vst [vmem:[%s2910_s3 + $0x108] sm:$0xff] %v2065_v38   ;;  %v862_v47 = vadd.f32 %v2655_v54, %v861_v43  ;;  %v654_v49 = vadd.f32 %v2655_v54, %v653_v41  ;;  %v1006_v53 = vmax.f32 %v662_v39, 0.0 }
  0xf6   :  { %v2060_v45 = vpack.c.bf16 %v1053_v40, %v1052_v32  ;;  %v2277_v46 = vpop.f32.mrf.mxu0  ;;  %v2329_v48 = vpop.f32.mrf.mxu1  ;;  %v1058_v50 = vmax.f32 %v870_v42, 0.0 }
  0xf7   :  { %2152 = vst [vmem:[%s2910_s3 + $0x30] sm:$0xff] %v1930_v44   ;;  %v665_v51 = vadd.f32 %v2277_v46, %v2655_v54  ;;  %v873_v52 = vadd.f32 %v2329_v48, %v2655_v54  ;;  %v1056_v61 = vmax.f32 %v862_v47, 0.0  ;;  %v1004_v0 = vmax.f32 %v654_v49, 0.0 }
  0xf8   :  { %2178 = vst [vmem:[%s2910_s3 + $0x100] sm:$0xff] %v2060_v45   ;;  %v656_v55 = vpop.f32.mrf.mxu0  ;;  %v864_v56 = vpop.f32.mrf.mxu1 }
  0xf9   :  { %v1007_v57 = vmax.f32 %v665_v51, 0.0  ;;  %v657_v58 = vadd.f32 %v2655_v54, %v656_v55  ;;  %v1059_v59 = vmax.f32 %v873_v52, 0.0  ;;  %v865_v60 = vadd.f32 %v2655_v54, %v864_v56 }
  0xfa   :  { %v2280_v62 = vpop.f32.mrf.mxu0  ;;  %v2332_v63 = vpop.f32.mrf.mxu1 }
  0xfb   :  { %v1945_v1 = vpack.c.bf16 %v1007_v57, %v1006_v53  ;;  %v1005_v2 = vmax.f32 %v657_v58, 0.0  ;;  %v2075_v3 = vpack.c.bf16 %v1059_v59, %v1058_v50  ;;  %v678_v4 = vadd.f32 %v2280_v62, %v2655_v54 }
  0xfc   :  { %v1057_v5 = vmax.f32 %v865_v60, 0.0  ;;  %v669_v6 = vpop.f32.mrf.mxu0  ;;  %v886_v7 = vadd.f32 %v2332_v63, %v2655_v54  ;;  %v877_v8 = vpop.f32.mrf.mxu1 }
  0xfd   :  { %2155 = vst [vmem:[%s2910_s3 + $0x48] sm:$0xff] %v1945_v1   ;;  %v1940_v9 = vpack.c.bf16 %v1005_v2, %v1004_v0  ;;  %2181 = vst [vmem:[%s2910_s3 + $0x118] sm:$0xff] %v2075_v3   ;;  %v878_v12 = vadd.f32 %v2655_v54, %v877_v8  ;;  %v670_v14 = vadd.f32 %v2655_v54, %v669_v6  ;;  %v1010_v18 = vmax.f32 %v678_v4, 0.0 }
  0xfe   :  { %v2070_v10 = vpack.c.bf16 %v1057_v5, %v1056_v61  ;;  %v2281_v11 = vpop.f32.mrf.mxu0  ;;  %v2333_v13 = vpop.f32.mrf.mxu1  ;;  %v1062_v15 = vmax.f32 %v886_v7, 0.0 }
  0xff   :  { %2154 = vst [vmem:[%s2910_s3 + $0x40] sm:$0xff] %v1940_v9   ;;  %v681_v16 = vadd.f32 %v2281_v11, %v2655_v54  ;;  %v889_v17 = vadd.f32 %v2333_v13, %v2655_v54  ;;  %v1060_v25 = vmax.f32 %v878_v12, 0.0  ;;  %v1008_v28 = vmax.f32 %v670_v14, 0.0 }
 0x100   :  { %2180 = vst [vmem:[%s2910_s3 + $0x110] sm:$0xff] %v2070_v10   ;;  %v672_v19 = vpop.f32.mrf.mxu0  ;;  %v880_v20 = vpop.f32.mrf.mxu1 }
 0x101   :  { %v1011_v21 = vmax.f32 %v681_v16, 0.0  ;;  %v673_v22 = vadd.f32 %v2655_v54, %v672_v19  ;;  %v1063_v23 = vmax.f32 %v889_v17, 0.0  ;;  %v881_v24 = vadd.f32 %v2655_v54, %v880_v20 }
 0x102   :  { %v2284_v26 = vpop.f32.mrf.mxu0  ;;  %v2336_v27 = vpop.f32.mrf.mxu1 }
 0x103   :  { %v1955_v29 = vpack.c.bf16 %v1011_v21, %v1010_v18  ;;  %v1009_v30 = vmax.f32 %v673_v22, 0.0  ;;  %v2085_v31 = vpack.c.bf16 %v1063_v23, %v1062_v15  ;;  %v694_v32 = vadd.f32 %v2284_v26, %v2655_v54 }
 0x104   :  { %v1061_v33 = vmax.f32 %v881_v24, 0.0  ;;  %v685_v34 = vpop.f32.mrf.mxu0  ;;  %v902_v35 = vadd.f32 %v2336_v27, %v2655_v54  ;;  %v893_v36 = vpop.f32.mrf.mxu1 }
 0x105   :  { %2157 = vst [vmem:[%s2910_s3 + $0x58] sm:$0xff] %v1955_v29   ;;  %v1950_v37 = vpack.c.bf16 %v1009_v30, %v1008_v28  ;;  %2183 = vst [vmem:[%s2910_s3 + $0x128] sm:$0xff] %v2085_v31   ;;  %v894_v40 = vadd.f32 %v2655_v54, %v893_v36  ;;  %v686_v42 = vadd.f32 %v2655_v54, %v685_v34  ;;  %v1014_v46 = vmax.f32 %v694_v32, 0.0 }
 0x106   :  { %v2080_v38 = vpack.c.bf16 %v1061_v33, %v1060_v25  ;;  %v2285_v39 = vpop.f32.mrf.mxu0  ;;  %v2337_v41 = vpop.f32.mrf.mxu1  ;;  %v1066_v43 = vmax.f32 %v902_v35, 0.0 }
 0x107   :  { %2156 = vst [vmem:[%s2910_s3 + $0x50] sm:$0xff] %v1950_v37   ;;  %v697_v44 = vadd.f32 %v2285_v39, %v2655_v54  ;;  %v905_v45 = vadd.f32 %v2337_v41, %v2655_v54  ;;  %v1064_v53 = vmax.f32 %v894_v40, 0.0  ;;  %v1012_v57 = vmax.f32 %v686_v42, 0.0 }
 0x108   :  { %2182 = vst [vmem:[%s2910_s3 + $0x120] sm:$0xff] %v2080_v38   ;;  %v688_v47 = vpop.f32.mrf.mxu0  ;;  %v896_v48 = vpop.f32.mrf.mxu1 }
 0x109   :  { %v1015_v49 = vmax.f32 %v697_v44, 0.0  ;;  %v689_v50 = vadd.f32 %v2655_v54, %v688_v47  ;;  %v1067_v51 = vmax.f32 %v905_v45, 0.0  ;;  %v897_v52 = vadd.f32 %v2655_v54, %v896_v48 }
 0x10a   :  { %v2288_v55 = vpop.f32.mrf.mxu0  ;;  %v2340_v56 = vpop.f32.mrf.mxu1 }
 0x10b   :  { %v1965_v58 = vpack.c.bf16 %v1015_v49, %v1014_v46  ;;  %v1013_v59 = vmax.f32 %v689_v50, 0.0  ;;  %v2095_v60 = vpack.c.bf16 %v1067_v51, %v1066_v43  ;;  %v710_v61 = vadd.f32 %v2288_v55, %v2655_v54 }
 0x10c   :  { %v1065_v62 = vmax.f32 %v897_v52, 0.0  ;;  %v701_v63 = vpop.f32.mrf.mxu0  ;;  %v918_v0 = vadd.f32 %v2340_v56, %v2655_v54  ;;  %v909_v1 = vpop.f32.mrf.mxu1 }
 0x10d   :  { %2159 = vst [vmem:[%s2910_s3 + $0x68] sm:$0xff] %v1965_v58   ;;  %v1960_v2 = vpack.c.bf16 %v1013_v59, %v1012_v57  ;;  %2185 = vst [vmem:[%s2910_s3 + $0x138] sm:$0xff] %v2095_v60   ;;  %v910_v5 = vadd.f32 %v2655_v54, %v909_v1  ;;  %v702_v7 = vadd.f32 %v2655_v54, %v701_v63  ;;  %v1018_v11 = vmax.f32 %v710_v61, 0.0 }
 0x10e   :  { %v2090_v3 = vpack.c.bf16 %v1065_v62, %v1064_v53  ;;  %v2289_v4 = vpop.f32.mrf.mxu0  ;;  %v2341_v6 = vpop.f32.mrf.mxu1  ;;  %v1070_v8 = vmax.f32 %v918_v0, 0.0 }
 0x10f   :  { %2158 = vst [vmem:[%s2910_s3 + $0x60] sm:$0xff] %v1960_v2   ;;  %v713_v9 = vadd.f32 %v2289_v4, %v2655_v54  ;;  %v921_v10 = vadd.f32 %v2341_v6, %v2655_v54  ;;  %v1068_v18 = vmax.f32 %v910_v5, 0.0  ;;  %v1016_v21 = vmax.f32 %v702_v7, 0.0 }
 0x110   :  { %2184 = vst [vmem:[%s2910_s3 + $0x130] sm:$0xff] %v2090_v3   ;;  %v704_v12 = vpop.f32.mrf.mxu0  ;;  %v912_v13 = vpop.f32.mrf.mxu1 }
 0x111   :  { %v1019_v14 = vmax.f32 %v713_v9, 0.0  ;;  %v705_v15 = vadd.f32 %v2655_v54, %v704_v12  ;;  %v1071_v16 = vmax.f32 %v921_v10, 0.0  ;;  %v913_v17 = vadd.f32 %v2655_v54, %v912_v13 }
 0x112   :  { %v2292_v19 = vpop.f32.mrf.mxu0  ;;  %v2344_v20 = vpop.f32.mrf.mxu1 }
 0x113   :  { %v1975_v22 = vpack.c.bf16 %v1019_v14, %v1018_v11  ;;  %v1017_v23 = vmax.f32 %v705_v15, 0.0  ;;  %v2105_v24 = vpack.c.bf16 %v1071_v16, %v1070_v8  ;;  %v726_v25 = vadd.f32 %v2292_v19, %v2655_v54 }
 0x114   :  { %v1069_v26 = vmax.f32 %v913_v17, 0.0  ;;  %v717_v27 = vpop.f32.mrf.mxu0  ;;  %v934_v28 = vadd.f32 %v2344_v20, %v2655_v54  ;;  %v925_v29 = vpop.f32.mrf.mxu1 }
 0x115   :  { %2161 = vst [vmem:[%s2910_s3 + $0x78] sm:$0xff] %v1975_v22   ;;  %v1970_v30 = vpack.c.bf16 %v1017_v23, %v1016_v21  ;;  %2187 = vst [vmem:[%s2910_s3 + $0x148] sm:$0xff] %v2105_v24   ;;  %v926_v33 = vadd.f32 %v2655_v54, %v925_v29  ;;  %v718_v35 = vadd.f32 %v2655_v54, %v717_v27  ;;  %v1022_v39 = vmax.f32 %v726_v25, 0.0 }
 0x116   :  { %v2100_v31 = vpack.c.bf16 %v1069_v26, %v1068_v18  ;;  %v2293_v32 = vpop.f32.mrf.mxu0  ;;  %v2345_v34 = vpop.f32.mrf.mxu1  ;;  %v1074_v36 = vmax.f32 %v934_v28, 0.0 }
 0x117   :  { %2160 = vst [vmem:[%s2910_s3 + $0x70] sm:$0xff] %v1970_v30   ;;  %v729_v37 = vadd.f32 %v2293_v32, %v2655_v54  ;;  %v937_v38 = vadd.f32 %v2345_v34, %v2655_v54  ;;  %v1072_v46 = vmax.f32 %v926_v33, 0.0  ;;  %v1020_v49 = vmax.f32 %v718_v35, 0.0 }
 0x118   :  { %2186 = vst [vmem:[%s2910_s3 + $0x140] sm:$0xff] %v2100_v31   ;;  %v720_v40 = vpop.f32.mrf.mxu0  ;;  %v928_v41 = vpop.f32.mrf.mxu1 }
 0x119   :  { %v1023_v42 = vmax.f32 %v729_v37, 0.0  ;;  %v721_v43 = vadd.f32 %v2655_v54, %v720_v40  ;;  %v1075_v44 = vmax.f32 %v937_v38, 0.0  ;;  %v929_v45 = vadd.f32 %v2655_v54, %v928_v41 }
 0x11a   :  { %v2296_v47 = vpop.f32.mrf.mxu0  ;;  %v2348_v48 = vpop.f32.mrf.mxu1 }
 0x11b   :  { %v1985_v50 = vpack.c.bf16 %v1023_v42, %v1022_v39  ;;  %v1021_v51 = vmax.f32 %v721_v43, 0.0  ;;  %v2115_v52 = vpack.c.bf16 %v1075_v44, %v1074_v36  ;;  %v742_v53 = vadd.f32 %v2296_v47, %v2655_v54 }
 0x11c   :  { %v1073_v55 = vmax.f32 %v929_v45, 0.0  ;;  %v733_v56 = vpop.f32.mrf.mxu0  ;;  %v950_v57 = vadd.f32 %v2348_v48, %v2655_v54  ;;  %v941_v58 = vpop.f32.mrf.mxu1 }
 0x11d   :  { %2163 = vst [vmem:[%s2910_s3 + $0x88] sm:$0xff] %v1985_v50   ;;  %v1980_v59 = vpack.c.bf16 %v1021_v51, %v1020_v49  ;;  %2189 = vst [vmem:[%s2910_s3 + $0x158] sm:$0xff] %v2115_v52   ;;  %v942_v62 = vadd.f32 %v2655_v54, %v941_v58  ;;  %v734_v0 = vadd.f32 %v2655_v54, %v733_v56  ;;  %v1026_v4 = vmax.f32 %v742_v53, 0.0 }
 0x11e   :  { %v2110_v60 = vpack.c.bf16 %v1073_v55, %v1072_v46  ;;  %v2297_v61 = vpop.f32.mrf.mxu0  ;;  %v2349_v63 = vpop.f32.mrf.mxu1  ;;  %v1078_v1 = vmax.f32 %v950_v57, 0.0 }
 0x11f   :  { %2162 = vst [vmem:[%s2910_s3 + $0x80] sm:$0xff] %v1980_v59   ;;  %v745_v2 = vadd.f32 %v2297_v61, %v2655_v54  ;;  %v953_v3 = vadd.f32 %v2349_v63, %v2655_v54  ;;  %v1076_v11 = vmax.f32 %v942_v62, 0.0  ;;  %v1024_v14 = vmax.f32 %v734_v0, 0.0 }
 0x120   :  { %2188 = vst [vmem:[%s2910_s3 + $0x150] sm:$0xff] %v2110_v60   ;;  %v736_v5 = vpop.f32.mrf.mxu0  ;;  %v944_v6 = vpop.f32.mrf.mxu1 }
 0x121   :  { %v1027_v7 = vmax.f32 %v745_v2, 0.0  ;;  %v737_v8 = vadd.f32 %v2655_v54, %v736_v5  ;;  %v1079_v9 = vmax.f32 %v953_v3, 0.0  ;;  %v945_v10 = vadd.f32 %v2655_v54, %v944_v6 }
 0x122   :  { %v2300_v12 = vpop.f32.mrf.mxu0  ;;  %v2352_v13 = vpop.f32.mrf.mxu1 }
 0x123   :  { %v1995_v15 = vpack.c.bf16 %v1027_v7, %v1026_v4  ;;  %v1025_v16 = vmax.f32 %v737_v8, 0.0  ;;  %v2125_v17 = vpack.c.bf16 %v1079_v9, %v1078_v1  ;;  %v758_v18 = vadd.f32 %v2300_v12, %v2655_v54 }
 0x124   :  { %v1077_v19 = vmax.f32 %v945_v10, 0.0  ;;  %v749_v20 = vpop.f32.mrf.mxu0  ;;  %v966_v21 = vadd.f32 %v2352_v13, %v2655_v54  ;;  %v957_v22 = vpop.f32.mrf.mxu1 }
 0x125   :  { %2165 = vst [vmem:[%s2910_s3 + $0x98] sm:$0xff] %v1995_v15   ;;  %v1990_v23 = vpack.c.bf16 %v1025_v16, %v1024_v14  ;;  %2191 = vst [vmem:[%s2910_s3 + $0x168] sm:$0xff] %v2125_v17   ;;  %v958_v26 = vadd.f32 %v2655_v54, %v957_v22  ;;  %v750_v28 = vadd.f32 %v2655_v54, %v749_v20  ;;  %v1030_v32 = vmax.f32 %v758_v18, 0.0 }
 0x126   :  { %v2120_v24 = vpack.c.bf16 %v1077_v19, %v1076_v11  ;;  %v2301_v25 = vpop.f32.mrf.mxu0  ;;  %v2353_v27 = vpop.f32.mrf.mxu1  ;;  %v1082_v29 = vmax.f32 %v966_v21, 0.0 }
 0x127   :  { %2164 = vst [vmem:[%s2910_s3 + $0x90] sm:$0xff] %v1990_v23   ;;  %v761_v30 = vadd.f32 %v2301_v25, %v2655_v54  ;;  %v969_v31 = vadd.f32 %v2353_v27, %v2655_v54  ;;  %v1080_v39 = vmax.f32 %v958_v26, 0.0  ;;  %v1028_v42 = vmax.f32 %v750_v28, 0.0 }
 0x128   :  { %2190 = vst [vmem:[%s2910_s3 + $0x160] sm:$0xff] %v2120_v24   ;;  %v752_v33 = vpop.f32.mrf.mxu0  ;;  %v960_v34 = vpop.f32.mrf.mxu1 }
 0x129   :  { %v1031_v35 = vmax.f32 %v761_v30, 0.0  ;;  %v753_v36 = vadd.f32 %v2655_v54, %v752_v33  ;;  %v1083_v37 = vmax.f32 %v969_v31, 0.0  ;;  %v961_v38 = vadd.f32 %v2655_v54, %v960_v34 }
 0x12a   :  { %v2304_v40 = vpop.f32.mrf.mxu0  ;;  %v2356_v41 = vpop.f32.mrf.mxu1 }
 0x12b   :  { %v2005_v43 = vpack.c.bf16 %v1031_v35, %v1030_v32  ;;  %v1029_v44 = vmax.f32 %v753_v36, 0.0  ;;  %v2135_v45 = vpack.c.bf16 %v1083_v37, %v1082_v29  ;;  %v774_v46 = vadd.f32 %v2304_v40, %v2655_v54 }
 0x12c   :  { %v1081_v47 = vmax.f32 %v961_v38, 0.0  ;;  %v765_v48 = vpop.f32.mrf.mxu0  ;;  %v982_v49 = vadd.f32 %v2356_v41, %v2655_v54  ;;  %v973_v50 = vpop.f32.mrf.mxu1 }
 0x12d   :  { %2167 = vst [vmem:[%s2910_s3 + $0xa8] sm:$0xff] %v2005_v43   ;;  %v2000_v51 = vpack.c.bf16 %v1029_v44, %v1028_v42  ;;  %2193 = vst [vmem:[%s2910_s3 + $0x178] sm:$0xff] %v2135_v45   ;;  %v974_v55 = vadd.f32 %v2655_v54, %v973_v50  ;;  %v766_v57 = vadd.f32 %v2655_v54, %v765_v48  ;;  %v1034_v61 = vmax.f32 %v774_v46, 0.0 }
 0x12e   :  { %v2130_v52 = vpack.c.bf16 %v1081_v47, %v1080_v39  ;;  %v2305_v53 = vpop.f32.mrf.mxu0  ;;  %v2357_v56 = vpop.f32.mrf.mxu1  ;;  %v1086_v58 = vmax.f32 %v982_v49, 0.0 }
 0x12f   :  { %2166 = vst [vmem:[%s2910_s3 + $0xa0] sm:$0xff] %v2000_v51   ;;  %v777_v59 = vadd.f32 %v2305_v53, %v2655_v54  ;;  %v985_v60 = vadd.f32 %v2357_v56, %v2655_v54  ;;  %v1084_v4 = vmax.f32 %v974_v55, 0.0  ;;  %v1032_v6 = vmax.f32 %v766_v57, 0.0 }
 0x130   :  { %2192 = vst [vmem:[%s2910_s3 + $0x170] sm:$0xff] %v2130_v52   ;;  %v768_v62 = vpop.f32.mrf.mxu0  ;;  %v976_v63 = vpop.f32.mrf.mxu1 }
 0x131   :  { %v1035_v0 = vmax.f32 %v777_v59, 0.0  ;;  %v769_v1 = vadd.f32 %v2655_v54, %v768_v62  ;;  %v1087_v2 = vmax.f32 %v985_v60, 0.0  ;;  %v977_v3 = vadd.f32 %v2655_v54, %v976_v63 }
 0x132   :  { %v2308_v5 = vpop.f32.mrf.mxu0 }
 0x133   :  { %v2015_v7 = vpack.c.bf16 %v1035_v0, %v1034_v61  ;;  %v1033_v8 = vmax.f32 %v769_v1, 0.0  ;;  %v2145_v9 = vpack.c.bf16 %v1087_v2, %v1086_v58  ;;  %v1085_v10 = vmax.f32 %v977_v3, 0.0 }
 0x134   :  { %v781_v11 = vpop.f32.mrf.mxu0  ;;  %v790_v13 = vadd.f32 %v2308_v5, %v2655_v54 }
 0x135   :  { %2169 = vst [vmem:[%s2910_s3 + $0xb8] sm:$0xff] %v2015_v7   ;;  %v2010_v12 = vpack.c.bf16 %v1033_v8, %v1032_v6  ;;  %2195 = vst [vmem:[%s2910_s3 + $0x188] sm:$0xff] %v2145_v9   ;;  %v2140_v14 = vpack.c.bf16 %v1085_v10, %v1084_v4  ;;  %v782_v16 = vadd.f32 %v2655_v54, %v781_v11 }
 0x136   :  { %v2309_v15 = vpop.f32.mrf.mxu0  ;;  %v1038_v19 = vmax.f32 %v790_v13, 0.0 }
 0x137   :  { %2168 = vst [vmem:[%s2910_s3 + $0xb0] sm:$0xff] %v2010_v12   ;;  %v793_v17 = vadd.f32 %v2309_v15, %v2655_v54  ;;  %2194 = vst [vmem:[%s2910_s3 + $0x180] sm:$0xff] %v2140_v14   ;;  %v1036_v22 = vmax.f32 %v782_v16, 0.0 }
 0x138   :  { %v784_v18 = vpop.f32.mrf.mxu0 }
 0x139   :  { %v1039_v20 = vmax.f32 %v793_v17, 0.0  ;;  %v785_v21 = vadd.f32 %v2655_v54, %v784_v18 }
 0x13b   :  { %v2025_v23 = vpack.c.bf16 %v1039_v20, %v1038_v19  ;;  %v1037_v24 = vmax.f32 %v785_v21, 0.0 }
 0x13d   :  { %2171 = vst [vmem:[%s2910_s3 + $0xc8] sm:$0xff] %v2025_v23   ;;  %v2020_v25 = vpack.c.bf16 %v1037_v24, %v1036_v22 }
 0x13f   :  { %2170 = vst [vmem:[%s2910_s3 + $0xc0] sm:$0xff] %v2020_v25  }

// kernel: qnet_lstm_forward.5
= control target key start
LH: loop header
LB: loop body
LE: loop exit
PB: predicated region body
PF: predicated region fallthrough
CT: control target
= control target key end

     0   :  { %s1644_s1 = inlined_call_operand.vmem [shape: bf16[512,128], index: 1, kind: input, shape index: {}]   ;;  %s1645_s0 = inlined_call_operand.vmem [shape: bf16[162,512], index: 0, kind: input, shape index: {}]   ;;  %s1646_s2 = inlined_call_operand.vmem [shape: f32[1,128], index: 2, kind: input, shape index: {}]   ;;  %s1647_s3 = inlined_call_operand.vmem [shape: bf16[162,128], index: 3, kind: output, shape index: {}]  }
   0x1   :  { %v1247_v0 = vld [vmem:[%s1644_s1 + $0x78] sm:$0xff]   ;;  %v1251_v4 = vld [vmem:[%s1644_s1 + $0x70] sm:$0xff]   ;;  %v1255_v8 = vld [vmem:[%s1644_s1 + $0x68] sm:$0xff]  }
   0x2   :  { %v1248_v1 = vld [vmem:[%s1644_s1 + $0xf8] sm:$0xff]   ;;  %1083 = vmatprep.subr.bf16.mxu0 %v1247_v0  ;;  %v1252_v5 = vld [vmem:[%s1644_s1 + $0xf0] sm:$0xff]   ;;  %v1256_v9 = vld [vmem:[%s1644_s1 + $0xe8] sm:$0xff]  }
   0x3   :  { %v1249_v2 = vld [vmem:[%s1644_s1 + $0x38] sm:$0xff]   ;;  %1165 = vmatprep.subr.bf16.mxu1 %v1248_v1  ;;  %v1253_v6 = vld [vmem:[%s1644_s1 + $0x30] sm:$0xff]   ;;  %v1257_v10 = vld [vmem:[%s1644_s1 + $0x28] sm:$0xff]  }
   0x4   :  { %v1250_v3 = vld [vmem:[%s1644_s1 + $0xb8] sm:$0xff]   ;;  %1084 = vmatpush3.bf16.msra.mxu0 %v1249_v2  ;;  %v1254_v7 = vld [vmem:[%s1644_s1 + $0xb0] sm:$0xff]   ;;  %v1258_v11 = vld [vmem:[%s1644_s1 + $0xa8] sm:$0xff]  }
   0x5   :  { %1166 = vmatpush3.bf16.msra.mxu1 %v1250_v3  ;;  %1085 = vmatprep.subr.bf16.mxu0 %v1251_v4  ;;  %v1259_v12 = vld [vmem:[%s1644_s1 + $0x60] sm:$0xff]   ;;  %v1263_v16 = vld [vmem:[%s1644_s1 + $0x58] sm:$0xff]   ;;  %v1267_v20 = vld [vmem:[%s1644_s1 + $0x50] sm:$0xff]  }
   0x6   :  { %1167 = vmatprep.subr.bf16.mxu1 %v1252_v5  ;;  %v1260_v13 = vld [vmem:[%s1644_s1 + $0xe0] sm:$0xff]   ;;  %v1264_v17 = vld [vmem:[%s1644_s1 + $0xd8] sm:$0xff]   ;;  %v1268_v21 = vld [vmem:[%s1644_s1 + $0xd0] sm:$0xff]  }
   0x7   :  { %v1261_v14 = vld [vmem:[%s1644_s1 + $0x20] sm:$0xff]   ;;  %v1265_v18 = vld [vmem:[%s1644_s1 + $0x18] sm:$0xff]   ;;  %v1269_v22 = vld [vmem:[%s1644_s1 + $0x10] sm:$0xff]  }
   0x8   :  { %1086 = vmatpush3.bf16.msra.mxu0 %v1253_v6  ;;  %v1262_v15 = vld [vmem:[%s1644_s1 + $0xa0] sm:$0xff]   ;;  %v1266_v19 = vld [vmem:[%s1644_s1 + $0x98] sm:$0xff]   ;;  %v1270_v23 = vld [vmem:[%s1644_s1 + $0x90] sm:$0xff]  }
   0x9   :  { %1168 = vmatpush3.bf16.msra.mxu1 %v1254_v7  ;;  %1087 = vmatprep.subr.bf16.mxu0 %v1255_v8  ;;  %v1271_v24 = vld [vmem:[%s1644_s1 + $0x48] sm:$0xff]   ;;  %v1275_v28 = vld [vmem:[%s1644_s1 + $0x40] sm:$0xff]  }
   0xa   :  { %1169 = vmatprep.subr.bf16.mxu1 %v1256_v9  ;;  %v1272_v25 = vld [vmem:[%s1644_s1 + $0xc8] sm:$0xff]   ;;  %v1276_v29 = vld [vmem:[%s1644_s1 + $0xc0] sm:$0xff]  }
   0xb   :  { %v1273_v26 = vld [vmem:[%s1644_s1 + $0x8] sm:$0xff]   ;;  %v1277_v30 = vld [vmem:[%s1644_s1] sm:$0xff]  }
   0xc   :  { %1088 = vmatpush3.bf16.msra.mxu0 %v1257_v10  ;;  %v1274_v27 = vld [vmem:[%s1644_s1 + $0x88] sm:$0xff]   ;;  %v1278_v31 = vld [vmem:[%s1644_s1 + $0x80] sm:$0xff]  }
   0xd   :  { %1170 = vmatpush3.bf16.msra.mxu1 %v1258_v11  ;;  %1089 = vmatprep.subr.bf16.mxu0 %v1259_v12  ;;  %v1279_v32 = vld [vmem:[%s1645_s0] ss:$16 sps:$4 sm:$0xff]   ;;  %v1281_v33 = vld [vmem:[%s1645_s0 + $0x4] ss:$16 sps:$4 sm:$0xff]   ;;  %v1282_v34 = vld [vmem:[%s1645_s0 + $0x8] ss:$16 sps:$4 sm:$0xff]  }
   0xe   :  { %1171 = vmatprep.subr.bf16.mxu1 %v1260_v13  ;;  %v1284_v35 = vld [vmem:[%s1645_s0 + $0xc] ss:$16 sps:$4 sm:$0xff]   ;;  %566 = vmatprep.mubr.bf16.mxu0 %v1281_v33  ;;  %v1285_v36 = vld [vmem:[%s1645_s0 + $0x24] ss:$16 sps:$4 sm:$0xff]   ;;  %v1289_v38 = vld [vmem:[%s1645_s0 + $0x20] ss:$16 sps:$4 sm:$0xff]  }
   0xf   :  { %686 = vmatprep.mubr.bf16.mxu1 %v1284_v35  ;;  %v1287_v37 = vld [vmem:[%s1645_s0 + $0x2c] ss:$16 sps:$4 sm:$0xff]   ;;  %v1290_v39 = vld [vmem:[%s1645_s0 + $0x28] ss:$16 sps:$4 sm:$0xff]   ;;  %v1291_v40 = vld [vmem:[%s1645_s0 + $0x44] ss:$16 sps:$4 sm:$0xff]  }
  0x10   :  { %1090 = vmatpush3.bf16.msra.mxu0 %v1261_v14  ;;  %v1293_v41 = vld [vmem:[%s1645_s0 + $0x4c] ss:$16 sps:$4 sm:$0xff]   ;;  %v1295_v42 = vld [vmem:[%s1645_s0 + $0x40] ss:$16 sps:$4 sm:$0xff]   ;;  %v1296_v43 = vld [vmem:[%s1645_s0 + $0x48] ss:$16 sps:$4 sm:$0xff]  }
  0x11   :  { %1172 = vmatpush3.bf16.msra.mxu1 %v1262_v15  ;;  %1091 = vmatprep.subr.bf16.mxu0 %v1263_v16  ;;  %v1297_v44 = vld [vmem:[%s1645_s0 + $0x64] ss:$16 sps:$4 sm:$0xff]   ;;  %v1299_v45 = vld [vmem:[%s1645_s0 + $0x6c] ss:$16 sps:$4 sm:$0xff]   ;;  %v1301_v46 = vld [vmem:[%s1645_s0 + $0x60] ss:$16 sps:$4 sm:$0xff]  }
  0x12   :  { %1173 = vmatprep.subr.bf16.mxu1 %v1264_v17  ;;  %v1302_v47 = vld [vmem:[%s1645_s0 + $0x68] ss:$16 sps:$4 sm:$0xff]   ;;  %v1303_v48 = vld [vmem:[%s1645_s0 + $0x84] ss:$16 sps:$4 sm:$0xff]   ;;  %v1305_v49 = vld [vmem:[%s1645_s0 + $0x8c] ss:$16 sps:$4 sm:$0xff]  }
  0x13   :  { %v1307_v50 = vld [vmem:[%s1645_s0 + $0x80] ss:$16 sps:$4 sm:$0xff]   ;;  %v1308_v51 = vld [vmem:[%s1645_s0 + $0x88] ss:$16 sps:$4 sm:$0xff]   ;;  %v1309_v52 = vld [vmem:[%s1645_s0 + $0xa4] ss:$16 sps:$4 sm:$0xff]  }
  0x14   :  { %1092 = vmatpush3.bf16.msra.mxu0 %v1265_v18  ;;  %v1311_v53 = vld [vmem:[%s1645_s0 + $0xac] ss:$16 sps:$4 sm:$0xff]   ;;  %v1313_v54 = vld [vmem:[%s1645_s0 + $0xa0] ss:$16 sps:$4 sm:$0xff]   ;;  %v1314_v55 = vld [vmem:[%s1645_s0 + $0xa8] ss:$16 sps:$4 sm:$0xff]  }
  0x15   :  { %1174 = vmatpush3.bf16.msra.mxu1 %v1266_v19  ;;  %1093 = vmatprep.subr.bf16.mxu0 %v1267_v20  ;;  %v1315_v56 = vld [vmem:[%s1645_s0 + $0xc4] ss:$16 sps:$4 sm:$0xff]   ;;  %v1317_v57 = vld [vmem:[%s1645_s0 + $0xcc] ss:$16 sps:$4 sm:$0xff]   ;;  %v1319_v58 = vld [vmem:[%s1645_s0 + $0xc0] ss:$16 sps:$4 sm:$0xff]  }
  0x16   :  { %1175 = vmatprep.subr.bf16.mxu1 %v1268_v21  ;;  %v1320_v59 = vld [vmem:[%s1645_s0 + $0xc8] ss:$16 sps:$4 sm:$0xff]   ;;  %v1321_v60 = vld [vmem:[%s1645_s0 + $0xe4] ss:$16 sps:$4 sm:$0xff]   ;;  %v1323_v61 = vld [vmem:[%s1645_s0 + $0xec] ss:$16 sps:$4 sm:$0xff]  }
  0x17   :  { %v1325_v62 = vld [vmem:[%s1645_s0 + $0xe0] ss:$16 sps:$4 sm:$0xff]   ;;  %v1326_v63 = vld [vmem:[%s1645_s0 + $0xe8] ss:$16 sps:$4 sm:$0xff]   ;;  %v1327_v0 = vld [vmem:[%s1645_s0 + $0x104] ss:$16 sps:$4 sm:$0xff]  }
  0x18   :  { %1094 = vmatpush3.bf16.msra.mxu0 %v1269_v22  ;;  %v1329_v1 = vld [vmem:[%s1645_s0 + $0x10c] ss:$16 sps:$4 sm:$0xff]   ;;  %v1331_v2 = vld [vmem:[%s1645_s0 + $0x100] ss:$16 sps:$4 sm:$0xff]   ;;  %v1332_v3 = vld [vmem:[%s1645_s0 + $0x108] ss:$16 sps:$4 sm:$0xff]  }
  0x19   :  { %1176 = vmatpush3.bf16.msra.mxu1 %v1270_v23  ;;  %1095 = vmatprep.subr.bf16.mxu0 %v1271_v24  ;;  %v1333_v4 = vld [vmem:[%s1645_s0 + $0x124] ss:$16 sps:$4 sm:$0xff]   ;;  %v1335_v5 = vld [vmem:[%s1645_s0 + $0x12c] ss:$16 sps:$4 sm:$0xff]   ;;  %v1337_v8 = vld [vmem:[%s1645_s0 + $0x120] ss:$16 sps:$4 sm:$0xff]  }
  0x1a   :  { %1177 = vmatprep.subr.bf16.mxu1 %v1272_v25  ;;  %v55_v6 = vld [vmem:[%s1645_s0 + $0x140] sm:$0x11]  ;;  %v56_v7 = vld [vmem:[%s1645_s0 + $0x148] sm:$0x11] }
  0x1b   :  { %v1338_v9 = vld [vmem:[%s1645_s0 + $0x128] ss:$16 sps:$4 sm:$0xff]   ;;  %v947_v10 = vcombine.high %v55_v6, %v55_v6  ;;  %v949_v11 = vcombine.high %v56_v7, %v56_v7  ;;  %v946_v12 = vcombine.low %v55_v6, %v55_v6  ;;  %v948_v13 = vcombine.low %v56_v7, %v56_v7  ;;  %v1588_v16 = vld [vmem:[%s1646_s2] ss:$0 sm:$0xff] }
  0x1c   :  { %1096 = vmatpush3.bf16.msra.mxu0 %v1273_v26 }
  0x1d   :  { %1178 = vmatpush3.bf16.msra.mxu1 %v1274_v27  ;;  %1097 = vmatprep.subr.bf16.mxu0 %v1275_v28 }
  0x1e   :  { %1179 = vmatprep.subr.bf16.mxu1 %v1276_v29 }
  0x20   :  { %1098 = vmatpush3.bf16.msra.mxu0 %v1277_v30 }
  0x21   :  { %1180 = vmatpush3.bf16.msra.mxu1 %v1278_v31 }
  0x23   :  { %567 = vmatmul.mubr.bf16.vlgmr.msra.gmra.mxu0 %v1279_v32 }
  0x24   :  { %687 = vmatmul.mubr.bf16.vlgmr.msra.gmra.mxu1 %v1282_v34  ;;  %574 = vmatprep.mubr.bf16.mxu0 %v1285_v36 }
  0x25   :  { %694 = vmatprep.mubr.bf16.mxu1 %v1287_v37 }
  0x2b   :  { %575 = vmatmul.mubr.bf16.gmra.mxu0 %v1289_v38 }
  0x2c   :  { %695 = vmatmul.mubr.bf16.gmra.mxu1 %v1290_v39  ;;  %582 = vmatprep.mubr.bf16.mxu0 %v1291_v40 }
  0x2d   :  { %702 = vmatprep.mubr.bf16.mxu1 %v1293_v41 }
  0x33   :  { %583 = vmatmul.mubr.bf16.gmra.mxu0 %v1295_v42 }
  0x34   :  { %703 = vmatmul.mubr.bf16.gmra.mxu1 %v1296_v43  ;;  %590 = vmatprep.mubr.bf16.mxu0 %v1297_v44 }
  0x35   :  { %710 = vmatprep.mubr.bf16.mxu1 %v1299_v45 }
  0x3b   :  { %591 = vmatmul.mubr.bf16.gmra.mxu0 %v1301_v46 }
  0x3c   :  { %711 = vmatmul.mubr.bf16.gmra.mxu1 %v1302_v47  ;;  %598 = vmatprep.mubr.bf16.mxu0 %v1303_v48 }
  0x3d   :  { %718 = vmatprep.mubr.bf16.mxu1 %v1305_v49 }
  0x43   :  { %599 = vmatmul.mubr.bf16.gmra.mxu0 %v1307_v50 }
  0x44   :  { %719 = vmatmul.mubr.bf16.gmra.mxu1 %v1308_v51  ;;  %606 = vmatprep.mubr.bf16.mxu0 %v1309_v52 }
  0x45   :  { %726 = vmatprep.mubr.bf16.mxu1 %v1311_v53 }
  0x4b   :  { %607 = vmatmul.mubr.bf16.gmra.mxu0 %v1313_v54 }
  0x4c   :  { %727 = vmatmul.mubr.bf16.gmra.mxu1 %v1314_v55  ;;  %614 = vmatprep.mubr.bf16.mxu0 %v1315_v56 }
  0x4d   :  { %734 = vmatprep.mubr.bf16.mxu1 %v1317_v57 }
  0x53   :  { %615 = vmatmul.mubr.bf16.gmra.mxu0 %v1319_v58 }
  0x54   :  { %735 = vmatmul.mubr.bf16.gmra.mxu1 %v1320_v59  ;;  %622 = vmatprep.mubr.bf16.mxu0 %v1321_v60 }
  0x55   :  { %742 = vmatprep.mubr.bf16.mxu1 %v1323_v61 }
  0x5b   :  { %623 = vmatmul.mubr.bf16.gmra.mxu0 %v1325_v62 }
  0x5c   :  { %743 = vmatmul.mubr.bf16.gmra.mxu1 %v1326_v63  ;;  %630 = vmatprep.mubr.bf16.mxu0 %v1327_v0 }
  0x5d   :  { %750 = vmatprep.mubr.bf16.mxu1 %v1329_v1 }
  0x63   :  { %631 = vmatmul.mubr.bf16.gmra.mxu0 %v1331_v2 }
  0x64   :  { %751 = vmatmul.mubr.bf16.gmra.mxu1 %v1332_v3  ;;  %638 = vmatprep.mubr.bf16.mxu0 %v1333_v4 }
  0x65   :  { %758 = vmatprep.mubr.bf16.mxu1 %v1335_v5 }
  0x6b   :  { %639 = vmatmul.mubr.bf16.gmra.mxu0 %v1337_v8 }
  0x6c   :  { %759 = vmatmul.mubr.bf16.gmra.mxu1 %v1338_v9  ;;  %646 = vmatprep.mubr.bf16.mxu0 %v947_v10 }
  0x6d   :  { %766 = vmatprep.mubr.bf16.mxu1 %v949_v11 }
  0x73   :  { %647 = vmatmul.mubr.bf16.gmra.mxu0 %v946_v12 }
  0x74   :  { %767 = vmatmul.mubr.bf16.gmra.mxu1 %v948_v13 }
  0xe3   :  { %v1099_v14 = vpop.f32.mrf.mxu0 }
  0xe4   :  { %v1181_v15 = vpop.f32.mrf.mxu1 }
  0xe5   :  { %v1100_v17 = vpop.f32.mrf.mxu0 }
  0xe6   :  { %v1101_v18 = vadd.f32 %v1100_v17, %v1099_v14  ;;  %v1182_v19 = vpop.f32.mrf.mxu1 }
  0xe7   :  { %v1102_v20 = vpop.f32.mrf.mxu0  ;;  %v1183_v24 = vadd.f32 %v1182_v19, %v1181_v15 }
  0xe8   :  { %v569_v21 = vadd.f32 %v1101_v18, %v1588_v16  ;;  %v1184_v22 = vpop.f32.mrf.mxu1 }
  0xe9   :  { %v1103_v23 = vpop.f32.mrf.mxu0 }
  0xea   :  { %v1104_v25 = vadd.f32 %v1103_v23, %v1102_v20  ;;  %v1185_v26 = vpop.f32.mrf.mxu1  ;;  %v689_v28 = vadd.f32 %v1183_v24, %v569_v21 }
  0xeb   :  { %v1105_v27 = vpop.f32.mrf.mxu0  ;;  %v1186_v30 = vadd.f32 %v1185_v26, %v1184_v22 }
  0xec   :  { %v572_v29 = vadd.f32 %v1104_v25, %v1588_v16  ;;  %v1187_v31 = vpop.f32.mrf.mxu1  ;;  %v774_v37 = vmax.f32 %v689_v28, 0.0 }
  0xed   :  { %v1106_v32 = vpop.f32.mrf.mxu0 }
  0xee   :  { %v692_v33 = vadd.f32 %v1186_v30, %v572_v29  ;;  %v1107_v34 = vadd.f32 %v1106_v32, %v1105_v27  ;;  %v1188_v35 = vpop.f32.mrf.mxu1 }
  0xef   :  { %v1108_v36 = vpop.f32.mrf.mxu0  ;;  %v1189_v43 = vadd.f32 %v1188_v35, %v1187_v31 }
  0xf0   :  { %v775_v38 = vmax.f32 %v692_v33, 0.0  ;;  %v577_v39 = vadd.f32 %v1107_v34, %v1588_v16  ;;  %v1190_v40 = vpop.f32.mrf.mxu1 }
  0xf1   :  { %v1109_v41 = vpop.f32.mrf.mxu0 }
  0xf2   :  { %v1027_v42 = vpack.c.bf16 %v775_v38, %v774_v37  ;;  %v1110_v44 = vadd.f32 %v1109_v41, %v1108_v36  ;;  %v1191_v45 = vpop.f32.mrf.mxu1  ;;  %v697_v47 = vadd.f32 %v1189_v43, %v577_v39 }
  0xf3   :  { %v1111_v46 = vpop.f32.mrf.mxu0  ;;  %v1192_v49 = vadd.f32 %v1191_v45, %v1190_v40 }
  0xf4   :  { %1028 = vst [vmem:[%s1647_s3] sm:$0xff] %v1027_v42   ;;  %v580_v48 = vadd.f32 %v1110_v44, %v1588_v16  ;;  %v1193_v50 = vpop.f32.mrf.mxu1  ;;  %v776_v56 = vmax.f32 %v697_v47, 0.0 }
  0xf5   :  { %v1112_v51 = vpop.f32.mrf.mxu0 }
  0xf6   :  { %v700_v52 = vadd.f32 %v1192_v49, %v580_v48  ;;  %v1113_v53 = vadd.f32 %v1112_v51, %v1111_v46  ;;  %v1194_v54 = vpop.f32.mrf.mxu1 }
  0xf7   :  { %v1114_v55 = vpop.f32.mrf.mxu0  ;;  %v1195_v62 = vadd.f32 %v1194_v54, %v1193_v50 }
  0xf8   :  { %v777_v57 = vmax.f32 %v700_v52, 0.0  ;;  %v585_v58 = vadd.f32 %v1113_v53, %v1588_v16  ;;  %v1196_v59 = vpop.f32.mrf.mxu1 }
  0xf9   :  { %v1115_v60 = vpop.f32.mrf.mxu0 }
  0xfa   :  { %v1032_v61 = vpack.c.bf16 %v777_v57, %v776_v56  ;;  %v1116_v63 = vadd.f32 %v1115_v60, %v1114_v55  ;;  %v1197_v0 = vpop.f32.mrf.mxu1  ;;  %v705_v2 = vadd.f32 %v1195_v62, %v585_v58 }
  0xfb   :  { %v1117_v1 = vpop.f32.mrf.mxu0  ;;  %v1198_v4 = vadd.f32 %v1197_v0, %v1196_v59 }
  0xfc   :  { %1074 = vst [vmem:[%s1647_s3 + $0x8] sm:$0xff] %v1032_v61   ;;  %v588_v3 = vadd.f32 %v1116_v63, %v1588_v16  ;;  %v1199_v5 = vpop.f32.mrf.mxu1  ;;  %v778_v11 = vmax.f32 %v705_v2, 0.0 }
  0xfd   :  { %v1118_v6 = vpop.f32.mrf.mxu0 }
  0xfe   :  { %v708_v7 = vadd.f32 %v1198_v4, %v588_v3  ;;  %v1119_v8 = vadd.f32 %v1118_v6, %v1117_v1  ;;  %v1200_v9 = vpop.f32.mrf.mxu1 }
  0xff   :  { %v1120_v10 = vpop.f32.mrf.mxu0  ;;  %v1201_v18 = vadd.f32 %v1200_v9, %v1199_v5 }
 0x100   :  { %v779_v12 = vmax.f32 %v708_v7, 0.0  ;;  %v593_v13 = vadd.f32 %v1119_v8, %v1588_v16  ;;  %v1202_v14 = vpop.f32.mrf.mxu1 }
 0x101   :  { %v1121_v15 = vpop.f32.mrf.mxu0 }
 0x102   :  { %v1037_v17 = vpack.c.bf16 %v779_v12, %v778_v11  ;;  %v1122_v19 = vadd.f32 %v1121_v15, %v1120_v10  ;;  %v1203_v20 = vpop.f32.mrf.mxu1  ;;  %v713_v22 = vadd.f32 %v1201_v18, %v593_v13 }
 0x103   :  { %v1123_v21 = vpop.f32.mrf.mxu0  ;;  %v1204_v24 = vadd.f32 %v1203_v20, %v1202_v14 }
 0x104   :  { %1075 = vst [vmem:[%s1647_s3 + $0x10] sm:$0xff] %v1037_v17   ;;  %v596_v23 = vadd.f32 %v1122_v19, %v1588_v16  ;;  %v1205_v25 = vpop.f32.mrf.mxu1  ;;  %v780_v31 = vmax.f32 %v713_v22, 0.0 }
 0x105   :  { %v1124_v26 = vpop.f32.mrf.mxu0 }
 0x106   :  { %v716_v27 = vadd.f32 %v1204_v24, %v596_v23  ;;  %v1125_v28 = vadd.f32 %v1124_v26, %v1123_v21  ;;  %v1206_v29 = vpop.f32.mrf.mxu1 }
 0x107   :  { %v1126_v30 = vpop.f32.mrf.mxu0  ;;  %v1207_v37 = vadd.f32 %v1206_v29, %v1205_v25 }
 0x108   :  { %v781_v32 = vmax.f32 %v716_v27, 0.0  ;;  %v601_v33 = vadd.f32 %v1125_v28, %v1588_v16  ;;  %v1208_v34 = vpop.f32.mrf.mxu1 }
 0x109   :  { %v1127_v35 = vpop.f32.mrf.mxu0 }
 0x10a   :  { %v1042_v36 = vpack.c.bf16 %v781_v32, %v780_v31  ;;  %v1128_v38 = vadd.f32 %v1127_v35, %v1126_v30  ;;  %v1209_v39 = vpop.f32.mrf.mxu1  ;;  %v721_v41 = vadd.f32 %v1207_v37, %v601_v33 }
 0x10b   :  { %v1129_v40 = vpop.f32.mrf.mxu0  ;;  %v1210_v43 = vadd.f32 %v1209_v39, %v1208_v34 }
 0x10c   :  { %1076 = vst [vmem:[%s1647_s3 + $0x18] sm:$0xff] %v1042_v36   ;;  %v604_v42 = vadd.f32 %v1128_v38, %v1588_v16  ;;  %v1211_v44 = vpop.f32.mrf.mxu1  ;;  %v782_v50 = vmax.f32 %v721_v41, 0.0 }
 0x10d   :  { %v1130_v45 = vpop.f32.mrf.mxu0 }
 0x10e   :  { %v724_v46 = vadd.f32 %v1210_v43, %v604_v42  ;;  %v1131_v47 = vadd.f32 %v1130_v45, %v1129_v40  ;;  %v1212_v48 = vpop.f32.mrf.mxu1 }
 0x10f   :  { %v1132_v49 = vpop.f32.mrf.mxu0  ;;  %v1213_v56 = vadd.f32 %v1212_v48, %v1211_v44 }
 0x110   :  { %v783_v51 = vmax.f32 %v724_v46, 0.0  ;;  %v609_v52 = vadd.f32 %v1131_v47, %v1588_v16  ;;  %v1214_v53 = vpop.f32.mrf.mxu1 }
 0x111   :  { %v1133_v54 = vpop.f32.mrf.mxu0 }
 0x112   :  { %v1047_v55 = vpack.c.bf16 %v783_v51, %v782_v50  ;;  %v1134_v57 = vadd.f32 %v1133_v54, %v1132_v49  ;;  %v1215_v58 = vpop.f32.mrf.mxu1  ;;  %v729_v60 = vadd.f32 %v1213_v56, %v609_v52 }
 0x113   :  { %v1135_v59 = vpop.f32.mrf.mxu0  ;;  %v1216_v62 = vadd.f32 %v1215_v58, %v1214_v53 }
 0x114   :  { %1077 = vst [vmem:[%s1647_s3 + $0x20] sm:$0xff] %v1047_v55   ;;  %v612_v61 = vadd.f32 %v1134_v57, %v1588_v16  ;;  %v1217_v63 = vpop.f32.mrf.mxu1  ;;  %v784_v5 = vmax.f32 %v729_v60, 0.0 }
 0x115   :  { %v1136_v0 = vpop.f32.mrf.mxu0 }
 0x116   :  { %v732_v1 = vadd.f32 %v1216_v62, %v612_v61  ;;  %v1137_v2 = vadd.f32 %v1136_v0, %v1135_v59  ;;  %v1218_v3 = vpop.f32.mrf.mxu1 }
 0x117   :  { %v1138_v4 = vpop.f32.mrf.mxu0  ;;  %v1219_v11 = vadd.f32 %v1218_v3, %v1217_v63 }
 0x118   :  { %v785_v6 = vmax.f32 %v732_v1, 0.0  ;;  %v617_v7 = vadd.f32 %v1137_v2, %v1588_v16  ;;  %v1220_v8 = vpop.f32.mrf.mxu1 }
 0x119   :  { %v1139_v9 = vpop.f32.mrf.mxu0 }
 0x11a   :  { %v1052_v10 = vpack.c.bf16 %v785_v6, %v784_v5  ;;  %v1140_v12 = vadd.f32 %v1139_v9, %v1138_v4  ;;  %v1221_v13 = vpop.f32.mrf.mxu1  ;;  %v737_v15 = vadd.f32 %v1219_v11, %v617_v7 }
 0x11b   :  { %v1141_v14 = vpop.f32.mrf.mxu0  ;;  %v1222_v18 = vadd.f32 %v1221_v13, %v1220_v8 }
 0x11c   :  { %1078 = vst [vmem:[%s1647_s3 + $0x28] sm:$0xff] %v1052_v10   ;;  %v620_v17 = vadd.f32 %v1140_v12, %v1588_v16  ;;  %v1223_v19 = vpop.f32.mrf.mxu1  ;;  %v786_v25 = vmax.f32 %v737_v15, 0.0 }
 0x11d   :  { %v1142_v20 = vpop.f32.mrf.mxu0 }
 0x11e   :  { %v740_v21 = vadd.f32 %v1222_v18, %v620_v17  ;;  %v1143_v22 = vadd.f32 %v1142_v20, %v1141_v14  ;;  %v1224_v23 = vpop.f32.mrf.mxu1 }
 0x11f   :  { %v1144_v24 = vpop.f32.mrf.mxu0  ;;  %v1225_v31 = vadd.f32 %v1224_v23, %v1223_v19 }
 0x120   :  { %v787_v26 = vmax.f32 %v740_v21, 0.0  ;;  %v625_v27 = vadd.f32 %v1143_v22, %v1588_v16  ;;  %v1226_v28 = vpop.f32.mrf.mxu1 }
 0x121   :  { %v1145_v29 = vpop.f32.mrf.mxu0 }
 0x122   :  { %v1057_v30 = vpack.c.bf16 %v787_v26, %v786_v25  ;;  %v1146_v32 = vadd.f32 %v1145_v29, %v1144_v24  ;;  %v1227_v33 = vpop.f32.mrf.mxu1  ;;  %v745_v35 = vadd.f32 %v1225_v31, %v625_v27 }
 0x123   :  { %v1147_v34 = vpop.f32.mrf.mxu0  ;;  %v1228_v37 = vadd.f32 %v1227_v33, %v1226_v28 }
 0x124   :  { %1079 = vst [vmem:[%s1647_s3 + $0x30] sm:$0xff] %v1057_v30   ;;  %v628_v36 = vadd.f32 %v1146_v32, %v1588_v16  ;;  %v1229_v38 = vpop.f32.mrf.mxu1  ;;  %v788_v44 = vmax.f32 %v745_v35, 0.0 }
 0x125   :  { %v1148_v39 = vpop.f32.mrf.mxu0 }
 0x126   :  { %v748_v40 = vadd.f32 %v1228_v37, %v628_v36  ;;  %v1149_v41 = vadd.f32 %v1148_v39, %v1147_v34  ;;  %v1230_v42 = vpop.f32.mrf.mxu1 }
 0x127   :  { %v1150_v43 = vpop.f32.mrf.mxu0  ;;  %v1231_v50 = vadd.f32 %v1230_v42, %v1229_v38 }
 0x128   :  { %v789_v45 = vmax.f32 %v748_v40, 0.0  ;;  %v633_v46 = vadd.f32 %v1149_v41, %v1588_v16  ;;  %v1232_v47 = vpop.f32.mrf.mxu1 }
 0x129   :  { %v1151_v48 = vpop.f32.mrf.mxu0 }
 0x12a   :  { %v1062_v49 = vpack.c.bf16 %v789_v45, %v788_v44  ;;  %v1152_v51 = vadd.f32 %v1151_v48, %v1150_v43  ;;  %v1233_v52 = vpop.f32.mrf.mxu1  ;;  %v753_v54 = vadd.f32 %v1231_v50, %v633_v46 }
 0x12b   :  { %v1153_v53 = vpop.f32.mrf.mxu0  ;;  %v1234_v56 = vadd.f32 %v1233_v52, %v1232_v47 }
 0x12c   :  { %1080 = vst [vmem:[%s1647_s3 + $0x38] sm:$0xff] %v1062_v49   ;;  %v636_v55 = vadd.f32 %v1152_v51, %v1588_v16  ;;  %v1235_v57 = vpop.f32.mrf.mxu1  ;;  %v790_v63 = vmax.f32 %v753_v54, 0.0 }
 0x12d   :  { %v1154_v58 = vpop.f32.mrf.mxu0 }
 0x12e   :  { %v756_v59 = vadd.f32 %v1234_v56, %v636_v55  ;;  %v1155_v60 = vadd.f32 %v1154_v58, %v1153_v53  ;;  %v1236_v61 = vpop.f32.mrf.mxu1 }
 0x12f   :  { %v1156_v62 = vpop.f32.mrf.mxu0  ;;  %v1237_v5 = vadd.f32 %v1236_v61, %v1235_v57 }
 0x130   :  { %v791_v0 = vmax.f32 %v756_v59, 0.0  ;;  %v641_v1 = vadd.f32 %v1155_v60, %v1588_v16  ;;  %v1238_v2 = vpop.f32.mrf.mxu1 }
 0x131   :  { %v1157_v3 = vpop.f32.mrf.mxu0 }
 0x132   :  { %v1067_v4 = vpack.c.bf16 %v791_v0, %v790_v63  ;;  %v1158_v6 = vadd.f32 %v1157_v3, %v1156_v62  ;;  %v1239_v7 = vpop.f32.mrf.mxu1  ;;  %v761_v9 = vadd.f32 %v1237_v5, %v641_v1 }
 0x133   :  { %v1159_v8 = vpop.f32.mrf.mxu0  ;;  %v1240_v11 = vadd.f32 %v1239_v7, %v1238_v2 }
 0x134   :  { %1081 = vst [vmem:[%s1647_s3 + $0x40] sm:$0xff] %v1067_v4   ;;  %v644_v10 = vadd.f32 %v1158_v6, %v1588_v16  ;;  %v1241_v12 = vpop.f32.mrf.mxu1  ;;  %v792_v19 = vmax.f32 %v761_v9, 0.0 }
 0x135   :  { %v1160_v13 = vpop.f32.mrf.mxu0 }
 0x136   :  { %v764_v14 = vadd.f32 %v1240_v11, %v644_v10  ;;  %v1161_v15 = vadd.f32 %v1160_v13, %v1159_v8  ;;  %v1242_v17 = vpop.f32.mrf.mxu1 }
 0x137   :  { %v1162_v18 = vpop.f32.mrf.mxu0  ;;  %v1243_v22 = vadd.f32 %v1242_v17, %v1241_v12 }
 0x138   :  { %v793_v20 = vmax.f32 %v764_v14, 0.0  ;;  %v649_v21 = vadd.f32 %v1161_v15, %v1588_v16  ;;  %v1244_v23 = vpop.f32.mrf.mxu1 }
 0x139   :  { %v1163_v24 = vpop.f32.mrf.mxu0 }
 0x13a   :  { %v1072_v25 = vpack.c.bf16 %v793_v20, %v792_v19  ;;  %v769_v26 = vadd.f32 %v1243_v22, %v649_v21  ;;  %v1245_v27 = vpop.f32.mrf.mxu1 }
 0x13c   :  { %1082 = vst [vmem:[%s1647_s3 + $0x48] sm:$0xff] %v1072_v25   ;;  %v794_v28 = vmax.f32 %v769_v26, 0.0 }
 0x13e   :  { %v1023_v29 = vpack.c.bf16 %v794_v28, %v794_v28 }
 0x140   :  { %900 = vst [vmem:[%s1647_s3 + $0x50] sm:$0x1] %v1023_v29 }

// kernel: qnet_lstm_forward.6
= control target key start
LH: loop header
LB: loop body
LE: loop exit
PB: predicated region body
PF: predicated region fallthrough
CT: control target
= control target key end

     0   :  { %v1281_v34 = vmov 0.0   ;;  %vm1282_vm0 = vmmov 0   ;;  %vm516_vm1 = vcmask 523264   ;;  %s1650_s1 = inlined_call_operand.vmem [shape: bf16[576,128], index: 1, kind: input, shape index: {}]   ;;  %s1651_s0 = inlined_call_operand.vmem [shape: bf16[98,576], index: 0, kind: input, shape index: {}]   ;;  %s1652_s2 = inlined_call_operand.vmem [shape: f32[1,128], index: 2, kind: input, shape index: {}]   ;;  %s1653_s3 = inlined_call_operand.vmem [shape: bf16[98,128], index: 3, kind: output, shape index: {}]  }
   0x1   :  { %v1198_v0 = vld [vmem:[%s1650_s1 + $0x78] sm:$0xff]   ;;  %v1202_v4 = vld [vmem:[%s1650_s1 + $0x70] sm:$0xff]   ;;  %v1206_v8 = vld [vmem:[%s1650_s1 + $0x68] sm:$0xff]  }
   0x2   :  { %v1199_v1 = vld [vmem:[%s1650_s1 + $0xf8] sm:$0xff]   ;;  %1025 = vmatprep.subr.bf16.mxu0 %v1198_v0  ;;  %v1203_v5 = vld [vmem:[%s1650_s1 + $0xf0] sm:$0xff]   ;;  %v1207_v9 = vld [vmem:[%s1650_s1 + $0xe8] sm:$0xff]  }
   0x3   :  { %v1200_v2 = vld [vmem:[%s1650_s1 + $0x38] sm:$0xff]   ;;  %1083 = vmatprep.subr.bf16.mxu1 %v1199_v1  ;;  %v1204_v6 = vld [vmem:[%s1650_s1 + $0x30] sm:$0xff]   ;;  %v1208_v10 = vld [vmem:[%s1650_s1 + $0x28] sm:$0xff]  }
   0x4   :  { %v1201_v3 = vld [vmem:[%s1650_s1 + $0xb8] sm:$0xff]   ;;  %1026 = vmatpush3.bf16.msra.mxu0 %v1200_v2  ;;  %v1205_v7 = vld [vmem:[%s1650_s1 + $0xb0] sm:$0xff]   ;;  %v1209_v11 = vld [vmem:[%s1650_s1 + $0xa8] sm:$0xff]  }
   0x5   :  { %1084 = vmatpush3.bf16.msra.mxu1 %v1201_v3  ;;  %1027 = vmatprep.subr.bf16.mxu0 %v1202_v4  ;;  %v1210_v12 = vld [vmem:[%s1650_s1 + $0x60] sm:$0xff]   ;;  %v1214_v16 = vld [vmem:[%s1650_s1 + $0x58] sm:$0xff]   ;;  %v1218_v20 = vld [vmem:[%s1650_s1 + $0x50] sm:$0xff]  }
   0x6   :  { %1085 = vmatprep.subr.bf16.mxu1 %v1203_v5  ;;  %v1211_v13 = vld [vmem:[%s1650_s1 + $0xe0] sm:$0xff]   ;;  %v1215_v17 = vld [vmem:[%s1650_s1 + $0xd8] sm:$0xff]   ;;  %v1219_v21 = vld [vmem:[%s1650_s1 + $0xd0] sm:$0xff]  }
   0x7   :  { %v1212_v14 = vld [vmem:[%s1650_s1 + $0x20] sm:$0xff]   ;;  %v1216_v18 = vld [vmem:[%s1650_s1 + $0x18] sm:$0xff]   ;;  %v1220_v22 = vld [vmem:[%s1650_s1 + $0x10] sm:$0xff]  }
   0x8   :  { %1028 = vmatpush3.bf16.msra.mxu0 %v1204_v6  ;;  %v1213_v15 = vld [vmem:[%s1650_s1 + $0xa0] sm:$0xff]   ;;  %v1217_v19 = vld [vmem:[%s1650_s1 + $0x98] sm:$0xff]   ;;  %v1221_v23 = vld [vmem:[%s1650_s1 + $0x90] sm:$0xff]  }
   0x9   :  { %1086 = vmatpush3.bf16.msra.mxu1 %v1205_v7  ;;  %1029 = vmatprep.subr.bf16.mxu0 %v1206_v8  ;;  %v1222_v24 = vld [vmem:[%s1650_s1 + $0x48] sm:$0xff]   ;;  %v1226_v28 = vld [vmem:[%s1650_s1 + $0x40] sm:$0xff]   ;;  %v1236_v37 = vld [vmem:[%s1650_s1 + $0x118] sm:$0xff]  }
   0xa   :  { %1087 = vmatprep.subr.bf16.mxu1 %v1207_v9  ;;  %v1223_v25 = vld [vmem:[%s1650_s1 + $0xc8] sm:$0xff]   ;;  %v1227_v29 = vld [vmem:[%s1650_s1 + $0xc0] sm:$0xff]   ;;  %v1247_v43 = vld [vmem:[%s1650_s1 + $0x110] sm:$0xff]  }
   0xb   :  { %v1224_v26 = vld [vmem:[%s1650_s1 + $0x8] sm:$0xff]   ;;  %v1228_v30 = vld [vmem:[%s1650_s1] sm:$0xff]   ;;  %v1245_v44 = vld [vmem:[%s1651_s0 + $0x5c] ss:$20 sps:$4 sm:$0xff]  }
   0xc   :  { %1030 = vmatpush3.bf16.msra.mxu0 %v1208_v10  ;;  %v1225_v27 = vld [vmem:[%s1650_s1 + $0x88] sm:$0xff]   ;;  %v1229_v31 = vld [vmem:[%s1650_s1 + $0x80] sm:$0xff]   ;;  %v1250_v48 = vld [vmem:[%s1651_s0 + $0x7c] ss:$20 sps:$4 sm:$0xff]  }
   0xd   :  { %1088 = vmatpush3.bf16.msra.mxu1 %v1209_v11  ;;  %1031 = vmatprep.subr.bf16.mxu0 %v1210_v12  ;;  %v1230_v32 = vld [vmem:[%s1651_s0] ss:$20 sps:$4 sm:$0xff]   ;;  %v1232_v33 = vld [vmem:[%s1651_s0 + $0x4] ss:$20 sps:$4 sm:$0xff]   ;;  %v1233_v35 = vld [vmem:[%s1651_s0 + $0x8] ss:$20 sps:$4 sm:$0xff]  }
   0xe   :  { %1089 = vmatprep.subr.bf16.mxu1 %v1211_v13  ;;  %v1235_v36 = vld [vmem:[%s1651_s0 + $0xc] ss:$20 sps:$4 sm:$0xff]   ;;  %570 = vmatprep.mubr.bf16.mxu0 %v1232_v33  ;;  %v1239_v39 = vld [vmem:[%s1651_s0 + $0x34] ss:$20 sps:$4 sm:$0xff]   ;;  %v1242_v41 = vld [vmem:[%s1651_s0 + $0x30] ss:$20 sps:$4 sm:$0xff]  }
   0xf   :  { %658 = vmatprep.mubr.bf16.mxu1 %v1235_v36  ;;  %v1237_v38 = vld [vmem:[%s1651_s0 + $0x2c] ss:$20 sps:$4 sm:$0xff]   ;;  %v1241_v40 = vld [vmem:[%s1651_s0 + $0x28] ss:$20 sps:$4 sm:$0xff]   ;;  %v1248_v46 = vld [vmem:[%s1651_s0 + $0x50] ss:$20 sps:$4 sm:$0xff]  }
  0x10   :  { %1032 = vmatpush3.bf16.msra.mxu0 %v1212_v14  ;;  %v1243_v42 = vld [vmem:[%s1651_s0 + $0x54] ss:$20 sps:$4 sm:$0xff]   ;;  %v1249_v47 = vld [vmem:[%s1651_s0 + $0x58] ss:$20 sps:$4 sm:$0xff]   ;;  %v1269_v50 = vld [vmem:[%s1650_s1 + $0x100] sm:$0xff]  }
  0x11   :  { %1090 = vmatpush3.bf16.msra.mxu1 %v1213_v15  ;;  %1033 = vmatprep.subr.bf16.mxu0 %v1214_v16  ;;  %v1256_v45 = vld [vmem:[%s1650_s1 + $0x108] sm:$0xff]   ;;  %v1252_v49 = vld [vmem:[%s1651_s0 + $0x84] ss:$20 sps:$4 sm:$0xff]   ;;  %v1255_v52 = vld [vmem:[%s1651_s0 + $0x80] ss:$20 sps:$4 sm:$0xff]  }
  0x12   :  { %1091 = vmatprep.subr.bf16.mxu1 %v1215_v17  ;;  %v1254_v51 = vld [vmem:[%s1651_s0 + $0x78] ss:$20 sps:$4 sm:$0xff]   ;;  %v1261_v55 = vld [vmem:[%s1651_s0 + $0xa0] ss:$20 sps:$4 sm:$0xff]   ;;  %v1262_v56 = vld [vmem:[%s1651_s0 + $0xa8] ss:$20 sps:$4 sm:$0xff]  }
  0x13   :  { %v1257_v53 = vld [vmem:[%s1651_s0 + $0xa4] ss:$20 sps:$4 sm:$0xff]   ;;  %v1259_v54 = vld [vmem:[%s1651_s0 + $0xac] ss:$20 sps:$4 sm:$0xff]   ;;  %v1265_v58 = vld [vmem:[%s1651_s0 + $0xd4] ss:$20 sps:$4 sm:$0xff]  }
  0x14   :  { %1034 = vmatpush3.bf16.msra.mxu0 %v1216_v18  ;;  %v1263_v57 = vld [vmem:[%s1651_s0 + $0xcc] ss:$20 sps:$4 sm:$0xff]   ;;  %v51_v59 = vld [vmem:[%s1651_s0 + $0xf0] sm:$0x11]  ;;  %v52_v60 = vld [vmem:[%s1651_s0 + $0xf8] sm:$0x11] }
  0x15   :  { %1092 = vmatpush3.bf16.msra.mxu1 %v1217_v19  ;;  %1035 = vmatprep.subr.bf16.mxu0 %v1218_v20  ;;  %v1267_v61 = vld [vmem:[%s1651_s0 + $0xc8] ss:$20 sps:$4 sm:$0xff]   ;;  %v1268_v62 = vld [vmem:[%s1651_s0 + $0xd0] ss:$20 sps:$4 sm:$0xff]   ;;  %v917_v63 = vcombine.high %v51_v59, %v51_v59  ;;  %v919_v0 = vcombine.high %v52_v60, %v52_v60  ;;  %v916_v1 = vcombine.low %v51_v59, %v51_v59  ;;  %v1276_v5 = vld [vmem:[%s1651_s0 + $0x38] ss:$20 sps:$4 sm:$0xff]  }
  0x16   :  { %1093 = vmatprep.subr.bf16.mxu1 %v1219_v21  ;;  %v918_v2 = vcombine.low %v52_v60, %v52_v60  ;;  %v1274_v3 = vld [vmem:[%s1651_s0 + $0x10] ss:$20 sps:$4 sm:$0xff]   ;;  %v1277_v6 = vld [vmem:[%s1651_s0 + $0xd8] ss:$20 sps:$4 sm:$0xff]   ;;  %v1278_v7 = vld [vmem:[%s1651_s0 + $0x60] ss:$20 sps:$4 sm:$0xff]  }
  0x17   :  { %v1275_v4 = vld [vmem:[%s1651_s0 + $0xb0] ss:$20 sps:$4 sm:$0xff]   ;;  %v1279_v8 = vld [vmem:[%s1651_s0 + $0x100] ss:$0 sps:$4 sm:$0x11]  }
  0x18   :  { %1036 = vmatpush3.bf16.msra.mxu0 %v1220_v22  ;;  %v1280_v9 = vld [vmem:[%s1651_s0 + $0x88] ss:$20 sps:$4 sm:$0xff]  }
  0x19   :  { %1094 = vmatpush3.bf16.msra.mxu1 %v1221_v23  ;;  %1037 = vmatprep.subr.bf16.mxu0 %v1222_v24 }
  0x1a   :  { %1095 = vmatprep.subr.bf16.mxu1 %v1223_v25 }
  0x1c   :  { %1038 = vmatpush3.bf16.msra.mxu0 %v1224_v26 }
  0x1d   :  { %1096 = vmatpush3.bf16.msra.mxu1 %v1225_v27  ;;  %1039 = vmatprep.subr.bf16.mxu0 %v1226_v28 }
  0x1e   :  { %1097 = vmatprep.subr.bf16.mxu1 %v1227_v29 }
  0x20   :  { %1040 = vmatpush3.bf16.msra.mxu0 %v1228_v30 }
  0x21   :  { %1098 = vmatpush3.bf16.msra.mxu1 %v1229_v31  ;;  %1152 = vmatprep.subr.bf16.mxu0 %v1281_v34 }
  0x22   :  { %1188 = vmatprep.subr.bf16.mxu1 %v1281_v34 }
  0x23   :  { %571 = vmatmul.mubr.bf16.vlgmr.msra.gmra.mxu0 %v1230_v32 }
  0x24   :  { %659 = vmatmul.mubr.bf16.vlgmr.msra.gmra.mxu1 %v1233_v35  ;;  %1153 = vmatpush3.bf16.msra.mxu0 %v1236_v37 }
  0x25   :  { %578 = vmatprep.mubr.bf16.mxu0 %v1237_v38  ;;  %1192 = vmatpush3.bf16.msra.mxu1 %v1236_v37 }
  0x26   :  { %666 = vmatprep.mubr.bf16.mxu1 %v1239_v39  ;;  %1154 = vmatprep.subr.bf16.mxu0 %v1281_v34 }
  0x27   :  { %1189 = vmatprep.subr.bf16.mxu1 %v1281_v34 }
  0x28   :  { %1155 = vmatpush3.bf16.msra.mxu0 %v1247_v43 }
  0x29   :  { %1193 = vmatpush3.bf16.msra.mxu1 %v1247_v43  ;;  %1156 = vmatprep.subr.bf16.mxu0 %v1281_v34 }
  0x2a   :  { %1190 = vmatprep.subr.bf16.mxu1 %v1281_v34 }
  0x2b   :  { %579 = vmatmul.mubr.bf16.gmra.mxu0 %v1241_v40 }
  0x2c   :  { %667 = vmatmul.mubr.bf16.gmra.mxu1 %v1242_v41  ;;  %586 = vmatprep.mubr.bf16.mxu0 %v1243_v42 }
  0x2d   :  { %674 = vmatprep.mubr.bf16.mxu1 %v1245_v44  ;;  %1157 = vmatpush3.bf16.msra.mxu0 %v1256_v45 }
  0x2e   :  { %1194 = vmatpush3.bf16.msra.mxu1 %v1256_v45  ;;  %1158 = vmatprep.subr.bf16.mxu0 %v1281_v34 }
  0x2f   :  { %1191 = vmatprep.subr.bf16.mxu1 %v1281_v34 }
  0x31   :  { %1159 = vmatpush3.bf16.msra.mxu0 %v1269_v50 }
  0x32   :  { %1195 = vmatpush3.bf16.msra.mxu1 %v1269_v50 }
  0x33   :  { %587 = vmatmul.mubr.bf16.gmra.mxu0 %v1248_v46 }
  0x34   :  { %675 = vmatmul.mubr.bf16.gmra.mxu1 %v1249_v47  ;;  %594 = vmatprep.mubr.bf16.mxu0 %v1250_v48 }
  0x35   :  { %682 = vmatprep.mubr.bf16.mxu1 %v1252_v49 }
  0x3b   :  { %595 = vmatmul.mubr.bf16.gmra.mxu0 %v1254_v51 }
  0x3c   :  { %683 = vmatmul.mubr.bf16.gmra.mxu1 %v1255_v52  ;;  %602 = vmatprep.mubr.bf16.mxu0 %v1257_v53 }
  0x3d   :  { %690 = vmatprep.mubr.bf16.mxu1 %v1259_v54 }
  0x43   :  { %603 = vmatmul.mubr.bf16.gmra.mxu0 %v1261_v55 }
  0x44   :  { %691 = vmatmul.mubr.bf16.gmra.mxu1 %v1262_v56  ;;  %610 = vmatprep.mubr.bf16.mxu0 %v1263_v57 }
  0x45   :  { %698 = vmatprep.mubr.bf16.mxu1 %v1265_v58 }
  0x4b   :  { %611 = vmatmul.mubr.bf16.gmra.mxu0 %v1267_v61  ;;  %v1590_v61 = vld [vmem:[%s1652_s2] ss:$0 sm:$0xff] }
  0x4c   :  { %699 = vmatmul.mubr.bf16.gmra.mxu1 %v1268_v62  ;;  %618 = vmatprep.mubr.bf16.mxu0 %v917_v63 }
  0x4d   :  { %706 = vmatprep.mubr.bf16.mxu1 %v919_v0 }
  0x53   :  { %619 = vmatmul.mubr.bf16.gmra.mxu0 %v916_v1 }
  0x54   :  { %707 = vmatmul.mubr.bf16.gmra.mxu1 %v918_v2  ;;  %1160 = vmatprep.mubr.msk.bf16.mxu0 %vm1282_vm0, %v1281_v34 }
  0x55   :  { %1176 = vmatprep.mubr.msk.bf16.mxu1 %vm1282_vm0, %v1281_v34 }
  0x5b   :  { %1161 = vmatmul.mubr.msk.bf16.vlgmr.msra.gmra.mxu0 %vm516_vm1, %v1274_v3 }
  0x5c   :  { %1177 = vmatmul.mubr.msk.bf16.vlgmr.msra.gmra.mxu1 %vm516_vm1, %v1275_v4  ;;  %1164 = vmatprep.mubr.msk.bf16.mxu0 %vm1282_vm0, %v1281_v34 }
  0x5d   :  { %1180 = vmatprep.mubr.msk.bf16.mxu1 %vm1282_vm0, %v1281_v34 }
  0x63   :  { %1165 = vmatmul.mubr.msk.bf16.gmra.mxu0 %vm516_vm1, %v1276_v5 }
  0x64   :  { %1181 = vmatmul.mubr.msk.bf16.gmra.mxu1 %vm516_vm1, %v1277_v6  ;;  %1168 = vmatprep.mubr.msk.bf16.mxu0 %vm1282_vm0, %v1281_v34 }
  0x65   :  { %1184 = vmatprep.mubr.msk.bf16.mxu1 %vm1282_vm0, %v1281_v34 }
  0x6b   :  { %1169 = vmatmul.mubr.msk.bf16.gmra.mxu0 %vm516_vm1, %v1278_v7 }
  0x6c   :  { %1185 = vmatmul.mubr.msk.bf16.gmra.mxu1 %vm516_vm1, %v1279_v8  ;;  %1172 = vmatprep.mubr.msk.bf16.mxu0 %vm1282_vm0, %v1281_v34 }
  0x73   :  { %1173 = vmatmul.mubr.msk.bf16.gmra.mxu0 %vm516_vm1, %v1280_v9 }
  0xe3   :  { %v1041_v10 = vpop.f32.mrf.mxu0 }
  0xe4   :  { %v1099_v11 = vpop.f32.mrf.mxu1 }
  0xe5   :  { %v1042_v12 = vpop.f32.mrf.mxu0 }
  0xe6   :  { %v1100_v13 = vpop.f32.mrf.mxu1  ;;  %v1043_v59 = vadd.f32 %v1042_v12, %v1041_v10 }
  0xe7   :  { %v1044_v14 = vpop.f32.mrf.mxu0  ;;  %v1101_v5 = vadd.f32 %v1100_v13, %v1099_v11 }
  0xe8   :  { %v1102_v15 = vpop.f32.mrf.mxu1  ;;  %v573_v4 = vadd.f32 %v1043_v59, %v1590_v61 }
  0xe9   :  { %v1045_v16 = vpop.f32.mrf.mxu0 }
  0xea   :  { %v1103_v17 = vpop.f32.mrf.mxu1  ;;  %v1046_v0 = vadd.f32 %v1045_v16, %v1044_v14  ;;  %v661_v16 = vadd.f32 %v1101_v5, %v573_v4 }
  0xeb   :  { %v1539_v18 = vpop.f32.mrf.mxu0  ;;  %v1104_v12 = vadd.f32 %v1103_v17, %v1102_v15 }
  0xec   :  { %v1541_v19 = vpop.f32.mrf.mxu1  ;;  %v576_v10 = vadd.f32 %v1046_v0, %v1590_v61 }
  0xed   :  { %v1048_v20 = vpop.f32.mrf.mxu0 }
  0xee   :  { %v1543_v21 = vpop.f32.mrf.mxu1  ;;  %v1049_v14 = vadd.f32 %v1048_v20, %v1539_v18 }
  0xef   :  { %v1545_v22 = vpop.f32.mrf.mxu0  ;;  %v1107_v18 = vadd.f32 %v1543_v21, %v1541_v19 }
  0xf0   :  { %v1547_v23 = vpop.f32.mrf.mxu1 }
  0xf1   :  { %v1549_v24 = vpop.f32.mrf.mxu0 }
  0xf2   :  { %v1551_v25 = vpop.f32.mrf.mxu1  ;;  %v1052_v13 = vadd.f32 %v1549_v24, %v1545_v22 }
  0xf3   :  { %v1553_v26 = vpop.f32.mrf.mxu0 }
  0xf4   :  { %v1555_v27 = vpop.f32.mrf.mxu1 }
  0xf5   :  { %v1557_v28 = vpop.f32.mrf.mxu0 }
  0xf6   :  { %v1559_v29 = vpop.f32.mrf.mxu1 }
  0xf7   :  { %v1561_v30 = vpop.f32.mrf.mxu0 }
  0xf8   :  { %v1563_v31 = vpop.f32.mrf.mxu1 }
  0xf9   :  { %v1565_v32 = vpop.f32.mrf.mxu0 }
  0xfa   :  { %v1567_v33 = vpop.f32.mrf.mxu1 }
  0xfb   :  { %v1569_v34 = vpop.f32.mrf.mxu0 }
  0xfc   :  { %v1571_v35 = vpop.f32.mrf.mxu1 }
  0xfd   :  { %v1573_v36 = vpop.f32.mrf.mxu0 }
  0xfe   :  { %v1575_v37 = vpop.f32.mrf.mxu1 }
  0xff   :  { %v1577_v38 = vpop.f32.mrf.mxu0 }
 0x100   :  { %v1579_v39 = vpop.f32.mrf.mxu1 }
 0x101   :  { %1654 = vst [vmem:[#allocation2_spill] sm:$0xff] %v1579_v39  ;;  %v1581_v40 = vpop.f32.mrf.mxu0 }
 0x102   :  { %v1583_v41 = vpop.f32.mrf.mxu1 }
 0x103   :  { %1655 = vst [vmem:[#allocation3_spill] sm:$0xff] %v1583_v41  ;;  %v1065_v42 = vpop.f32.mrf.mxu0 }
 0x104   :  { %v1123_v43 = vpop.f32.mrf.mxu1 }
 0x105   :  { %v1066_v44 = vpop.f32.mrf.mxu0 }
 0x106   :  { %v1124_v45 = vpop.f32.mrf.mxu1  ;;  %v1067_v62 = vadd.f32 %v1066_v44, %v1065_v42 }
 0x107   :  { %v1068_v46 = vpop.f32.mrf.mxu0  ;;  %v1125_v8 = vadd.f32 %v1124_v45, %v1123_v43 }
 0x108   :  { %v1126_v47 = vpop.f32.mrf.mxu1  ;;  %v605_v7 = vadd.f32 %v1067_v62, %v1590_v61  ;;  %v664_v62 = vadd.f32 %v1104_v12, %v576_v10 }
 0x109   :  { %v1069_v48 = vpop.f32.mrf.mxu0 }
 0x10a   :  { %v1127_v49 = vpop.f32.mrf.mxu1  ;;  %v1070_v2 = vadd.f32 %v1069_v48, %v1068_v46  ;;  %v693_v59 = vadd.f32 %v1125_v8, %v605_v7 }
 0x10b   :  { %v1071_v50 = vpop.f32.mrf.mxu0  ;;  %v1128_v42 = vadd.f32 %v1127_v49, %v1126_v47  ;;  %v581_v47 = vadd.f32 %v1049_v14, %v1590_v61 }
 0x10c   :  { %v1129_v51 = vpop.f32.mrf.mxu1  ;;  %v608_v39 = vadd.f32 %v1070_v2, %v1590_v61 }
 0x10d   :  { %v1072_v52 = vpop.f32.mrf.mxu0  ;;  %v669_v8 = vadd.f32 %v1107_v18, %v581_v47 }
 0x10e   :  { %v1130_v53 = vpop.f32.mrf.mxu1  ;;  %v1073_v48 = vadd.f32 %v1072_v52, %v1071_v50  ;;  %v1110_v50 = vadd.f32 %v1551_v25, %v1547_v23  ;;  %v1055_v23 = vadd.f32 %v1557_v28, %v1553_v26 }
 0x10f   :  { %v1074_v54 = vpop.f32.mrf.mxu0  ;;  %v1131_v22 = vadd.f32 %v1130_v53, %v1129_v51 }
 0x110   :  { %v1132_v55 = vpop.f32.mrf.mxu1  ;;  %v613_v52 = vadd.f32 %v1073_v48, %v1590_v61 }
 0x111   :  { %v1075_v56 = vpop.f32.mrf.mxu0 }
 0x112   :  { %v1133_v57 = vpop.f32.mrf.mxu1  ;;  %v1076_v0 = vadd.f32 %v1075_v56, %v1074_v54  ;;  %v584_v54 = vadd.f32 %v1052_v13, %v1590_v61 }
 0x113   :  { %v1077_v58 = vpop.f32.mrf.mxu0  ;;  %v1134_v56 = vadd.f32 %v1133_v57, %v1132_v55  ;;  %v1058_v55 = vadd.f32 %v1565_v32, %v1561_v30  ;;  %v589_v30 = vadd.f32 %v1055_v23, %v1590_v61  ;;  %v1113_v32 = vadd.f32 %v1559_v29, %v1555_v27 }
 0x114   :  { %v1585_v60 = vpop.f32.mrf.mxu1  ;;  %v616_v5 = vadd.f32 %v1076_v0, %v1590_v61 }
 0x115   :  { %v1078_v63 = vpop.f32.mrf.mxu0  ;;  %v677_v29 = vadd.f32 %v1113_v32, %v589_v30 }
 0x116   :  { %v1136_v1 = vpop.f32.mrf.mxu1 }
 0x117   :  { %v1080_v3 = vpop.f32.mrf.mxu0  ;;  %v1137_v26 = vadd.f32 %v1136_v1, %v1585_v60  ;;  %v1116_v60 = vadd.f32 %v1567_v33, %v1563_v31 }
 0x118   :  { %v1138_v6 = vpop.f32.mrf.mxu1 }
 0x119   :  { %v1081_v9 = vpop.f32.mrf.mxu0  ;;  %v1079_v6 = vadd.f32 %v1078_v63, %v1077_v58  ;;  %v672_v63 = vadd.f32 %v1110_v50, %v584_v54  ;;  %v1656_v54 = vld [vmem:[#allocation2_spill] sm:$0xff] }
 0x11a   :  { %v1139_v41 = vpop.f32.mrf.mxu1  ;;  %v701_v9 = vadd.f32 %v1131_v22, %v613_v52  ;;  %v1119_v52 = vadd.f32 %v1575_v37, %v1571_v35 }
 0x11b   :  { %v748_v44 = vpop.f32.mrf.mxu0  ;;  %v696_v41 = vadd.f32 %v1128_v42, %v608_v39  ;;  %v621_v12 = vadd.f32 %v1079_v6, %v1590_v61 }
 0x11c   :  { %v780_v46 = vpop.f32.mrf.mxu1  ;;  %v749_v43 = vadd.f32 %v748_v44, %v661_v16  ;;  %v704_v44 = vadd.f32 %v1134_v56, %v616_v5  ;;  %v1657_v56 = vld [vmem:[#allocation3_spill] sm:$0xff] }
 0x11d   :  { %v1162_v11 = vpop.f32.mrf.mxu0  ;;  %v781_v15 = vadd.f32 %v780_v46, %v693_v59  ;;  %v592_v59 = vadd.f32 %v1058_v55, %v1590_v61  ;;  %v709_v0 = vadd.f32 %v1137_v26, %v621_v12 }
 0x11e   :  { %v1178_v45 = vpop.f32.mrf.mxu1  ;;  %v802_v3 = vmax.f32 %v749_v43, 0.0 }
 0x11f   :  { %v751_v17 = vpop.f32.mrf.mxu0  ;;  %v810_v19 = vmax.f32 %v781_v15, 0.0  ;;  %v1061_v15 = vadd.f32 %v1573_v36, %v1569_v34  ;;  %v680_v33 = vadd.f32 %v1116_v60, %v592_v59 }
 0x120   :  { %v752_v20 = vadd.f32 %v751_v17, %v664_v62  ;;  %v783_v49 = vpop.f32.mrf.mxu1 }
 0x121   :  { %v784_v24 = vadd.f32 %v783_v49, %v696_v41  ;;  %v1163_v2 = vpop.f32.mrf.mxu0  ;;  %v597_v50 = vadd.f32 %v1061_v15, %v1590_v61 }
 0x122   :  { %v803_v39 = vmax.f32 %v752_v20, 0.0  ;;  %v1179_v4 = vpop.f32.mrf.mxu1  ;;  %v1064_v20 = vadd.f32 %v1581_v40, %v1577_v38 }
 0x123   :  { %v811_v21 = vmax.f32 %v784_v24, 0.0  ;;  %v756_v7 = vpop.f32.mrf.mxu0 }
 0x124   :  { %v993_v25 = vpack.c.bf16 %v803_v39, %v802_v3  ;;  %v788_v51 = vpop.f32.mrf.mxu1  ;;  %v757_v57 = vadd.f32 %v756_v7, %v669_v8  ;;  %v600_v2 = vadd.f32 %v1064_v20, %v1590_v61  ;;  %v1122_v3 = vadd.f32 %v1657_v56, %v1656_v54 }
 0x125   :  { %v1013_v53 = vpack.c.bf16 %v811_v21, %v810_v19  ;;  %v1166_v10 = vpop.f32.mrf.mxu0  ;;  %v789_v28 = vadd.f32 %v788_v51, %v701_v9  ;;  %v685_v21 = vadd.f32 %v1119_v52, %v597_v50 }
 0x126   :  { %994 = vst [vmem:[%s1653_s3] sm:$0xff] %v993_v25   ;;  %v1182_v58 = vpop.f32.mrf.mxu1  ;;  %v804_v1 = vmax.f32 %v757_v57, 0.0  ;;  %v688_v61 = vadd.f32 %v1122_v3, %v600_v2 }
 0x127   :  { %1023 = vst [vmem:[%s1653_s3 + $0x20] sm:$0xff] %v1013_v53   ;;  %v759_v42 = vpop.f32.mrf.mxu0  ;;  %v812_v43 = vmax.f32 %v789_v28, 0.0 }
 0x128   :  { %v760_v14 = vadd.f32 %v759_v42, %v672_v63  ;;  %v791_v16 = vpop.f32.mrf.mxu1 }
 0x129   :  { %v792_v46 = vadd.f32 %v791_v16, %v704_v44  ;;  %v1167_v48 = vpop.f32.mrf.mxu0 }
 0x12a   :  { %v805_v11 = vmax.f32 %v760_v14, 0.0  ;;  %v1183_v13 = vpop.f32.mrf.mxu1 }
 0x12b   :  { %v813_v45 = vmax.f32 %v792_v46, 0.0  ;;  %v764_v62 = vpop.f32.mrf.mxu0 }
 0x12c   :  { %v998_v27 = vpack.c.bf16 %v805_v11, %v804_v1  ;;  %v796_v17 = vpop.f32.mrf.mxu1  ;;  %v765_v31 = vadd.f32 %v764_v62, %v677_v29 }
 0x12d   :  { %v1018_v41 = vpack.c.bf16 %v813_v45, %v812_v43  ;;  %v797_v47 = vadd.f32 %v796_v17, %v709_v0  ;;  %v1170_v18 = vpop.f32.mrf.mxu0 }
 0x12e   :  { %1020 = vst [vmem:[%s1653_s3 + $0x8] sm:$0xff] %v998_v27   ;;  %v1186_v49 = vpop.f32.mrf.mxu1  ;;  %v806_v39 = vmax.f32 %v765_v31, 0.0 }
 0x12f   :  { %1024 = vst [vmem:[%s1653_s3 + $0x28] sm:$0xff] %v1018_v41   ;;  %v814_v34 = vmax.f32 %v797_v47, 0.0  ;;  %v767_v36 = vpop.f32.mrf.mxu0 }
 0x130   :  { %v768_v22 = vadd.f32 %v767_v36, %v680_v33  ;;  %v799_v38 = vpop.f32.mrf.mxu1 }
 0x131   :  { %v989_v40 = vpack.c.bf16 %v814_v34, %v814_v34  ;;  %v1171_v24 = vpop.f32.mrf.mxu0 }
 0x132   :  { %v807_v4 = vmax.f32 %v768_v22, 0.0  ;;  %v1187_v5 = vpop.f32.mrf.mxu1 }
 0x133   :  { %880 = vst [vmem:[%s1653_s3 + $0x30] sm:$0x1] %v989_v40  ;;  %v772_v6 = vpop.f32.mrf.mxu0 }
 0x134   :  { %v1003_v19 = vpack.c.bf16 %v807_v4, %v806_v39  ;;  %v773_v37 = vadd.f32 %v772_v6, %v685_v21 }
 0x135   :  { %v1174_v35 = vpop.f32.mrf.mxu0 }
 0x136   :  { %1021 = vst [vmem:[%s1653_s3 + $0x10] sm:$0xff] %v1003_v19   ;;  %v808_v8 = vmax.f32 %v773_v37, 0.0 }
 0x137   :  { %v775_v7 = vpop.f32.mrf.mxu0 }
 0x138   :  { %v776_v23 = vadd.f32 %v775_v7, %v688_v61 }
 0x139   :  { %v1175_v25 = vpop.f32.mrf.mxu0 }
 0x13a   :  { %v809_v51 = vmax.f32 %v776_v23, 0.0 }
 0x13c   :  { %v1008_v53 = vpack.c.bf16 %v809_v51, %v808_v8 }
 0x13e   :  { %1022 = vst [vmem:[%s1653_s3 + $0x18] sm:$0xff] %v1008_v53  }

// kernel: qnet_lstm_forward.7
= control target key start
LH: loop header
LB: loop body
LE: loop exit
PB: predicated region body
PF: predicated region fallthrough
CT: control target
= control target key end

     0   :  { %13 = vsyncpa [#allocation5], 0  ;;  %s15002_s0 = inlined_call_operand.vmem [shape: bf16[2,3136], index: 0, kind: input, shape index: {}]   ;;  %s15003_s1 = inlined_call_operand.vmem [shape: bf16[2,512], index: 1, kind: input, shape index: {}]   ;;  %s15004_s2 = inlined_call_operand.vmem [shape: f32[2,512], index: 2, kind: input, shape index: {}]   ;;  %s15005_s3 = inlined_call_operand.vmem [shape: bf16[3136,2048], index: 3, kind: input, shape index: {}]   ;;  %s15006_s4 = inlined_call_operand.vmem [shape: bf16[512,2048], index: 4, kind: input, shape index: {}]   ;;  %s15007_s5 = inlined_call_operand.vmem [shape: f32[1,2048], index: 5, kind: input, shape index: {}]   ;;  %s15008_s6 = inlined_call_operand.vmem [shape: f32[2,512], index: 6, kind: output, shape index: {0}]   ;;  %s15009_s7 = inlined_call_operand.hbm [shape: f32[2,512], index: 7, kind: output, shape index: {1}]  }
   0x1   :  { %15 = vsyncpa [#allocation5 + $0x1], 0  ;;  %s11812_s24 = smov 0   ;;  %s11814_s25 = smov 0  }
   0x2   :  { %s11816_s26 = smov 0   ;;  %s11818_s27 = smov 0  }
   0x3 LB: > { %s11833_s28 = sadd.s32 4294967295, %s11767_s27   ;;  %s9338_s29 = sadd.s32 4294967294, %s11767_s27   ;;  %s11767_s27 = sphi %s11818_s27, %s15016_s27   ;;  %s11763_s26 = sphi %s11816_s26, %s15015_s26   ;;  %s11759_s25 = sphi %s11814_s25, %s15014_s25   ;;  %s11755_s24 = sphi %s11812_s24, %s15013_s24  }
   0x4   : > { %s11837_s30 = sadd.s32 1, %s11767_s27   ;;  %s96_s8 = sadd.s32 1, %s11763_s26 }
   0x5   : > { %s93_s9 = ssub.s32 %s11767_s27, %s11837_s30  ;;  %p103_p0 = scmp.ne.s32.totalorder %s11763_s26, %s11759_s25 }
   0x6   : > { %p94_p1 = scmp.eq.s32.totalorder %s93_s9, 0  ;;  %p104_p2 = scmp.eq.s32.totalorder %s11767_s27, 0 }
   0x7   : > { %p211_p3 = scmp.eq.s32.totalorder %s11833_s28, 3  ;;  %p216_p4 = scmp.ne.s32.totalorder %s11759_s25, %s11755_s24 }
   0x8   : > { %s11849_s10 = scalar_select %p94_p1, %s11763_s26, %s96_s8  }
   0x9   : > { %p11851_p5 = por %p104_p2, %p103_p0  ;;  %p11855_p6 = por %p211_p3, %p103_p0 }
   0xa   : > { %p217_p7 = scmp.eq.s32.totalorder %s9338_s29, 3  ;;  %p9340_p9 = scmp.ge.s32.totalorder %s11767_s27, 4 }
   0xc   : > { %p11859_p8 = por %p217_p7, %p216_p4  ;;  %239 = sbr.rel (%p9340_p9) target bundleno = 481 (0x1e1), region = 24 }
  0x11   : > { %249 = sbr.rel (!%p11851_p5) target bundleno = 413 (0x19d), region = 32  ;;  %s251_s14 = sand.u32 (%p11851_p5), 1, %s11763_s26  }
  0x12   : > { %s10275_s15 = sshll.u32 (%p11851_p5), %s11767_s27, 4  ;;  %s10277_s16 = smul.u32 (%p11851_p5), 6272, %s251_s14 }
  0x13   : > { %s11871_s19 = scalar_lea.vmem (%p11851_p5), %s15005_s3, %s10275_s15 }
  0x14   : > { %v269_v0 = vld [vmem:[%s11871_s19] sm:$0xff] (%p11851_p5)  ;;  %v271_v1 = vld [vmem:[%s11871_s19 + $0x8] sm:$0xff] (%p11851_p5)  ;;  %s11879_s20 = scalar_lea.vmem (%p11851_p5), [#allocation2], %s10277_s16 }
  0x15   : > { %v273_v2 = vld [vmem:[%s11871_s19 + $0x40] sm:$0xff] (%p11851_p5)  ;;  %v275_v3 = vld [vmem:[%s11871_s19 + $0x48] sm:$0xff] (%p11851_p5)  ;;  %270 = vst [vmem:[%s11879_s20] sm:$0xff] (%p11851_p5), %v269_v0  ;;  %272 = vst [vmem:[%s11879_s20 + $0x8] sm:$0xff] (%p11851_p5), %v271_v1 }
  0x16   : > { %v277_v4 = vld [vmem:[%s11871_s19 + $0x80] sm:$0xff]  ;;  %v279_v5 = vld [vmem:[%s11871_s19 + $0x88] sm:$0xff]  ;;  %274 = vst [vmem:[%s11879_s20 + $0x10] sm:$0xff] %v273_v2  ;;  %276 = vst [vmem:[%s11879_s20 + $0x18] sm:$0xff] %v275_v3 }
  0x17   : > { %278 = vst [vmem:[%s11879_s20 + $0x20] sm:$0xff] %v277_v4  ;;  %280 = vst [vmem:[%s11879_s20 + $0x28] sm:$0xff] %v279_v5  ;;  %v281_v6 = vld [vmem:[%s11871_s19 + $0xc0] sm:$0xff]  ;;  %v283_v7 = vld [vmem:[%s11871_s19 + $0xc8] sm:$0xff] }
  0x18   : > { %v285_v8 = vld [vmem:[%s11871_s19 + $0x100] sm:$0xff]  ;;  %282 = vst [vmem:[%s11879_s20 + $0x30] sm:$0xff] %v281_v6  ;;  %284 = vst [vmem:[%s11879_s20 + $0x38] sm:$0xff] %v283_v7  ;;  %v287_v9 = vld [vmem:[%s11871_s19 + $0x108] sm:$0xff] }
  0x19   : > { %286 = vst [vmem:[%s11879_s20 + $0x40] sm:$0xff] %v285_v8  ;;  %v289_v10 = vld [vmem:[%s11871_s19 + $0x140] sm:$0xff]  ;;  %v291_v11 = vld [vmem:[%s11871_s19 + $0x148] sm:$0xff]  ;;  %288 = vst [vmem:[%s11879_s20 + $0x48] sm:$0xff] %v287_v9 }
  0x1a   : > { %290 = vst [vmem:[%s11879_s20 + $0x50] sm:$0xff] %v289_v10  ;;  %292 = vst [vmem:[%s11879_s20 + $0x58] sm:$0xff] %v291_v11  ;;  %v293_v12 = vld [vmem:[%s11871_s19 + $0x180] sm:$0xff]  ;;  %v295_v13 = vld [vmem:[%s11871_s19 + $0x188] sm:$0xff] }
  0x1b   : > { %v297_v14 = vld [vmem:[%s11871_s19 + $0x1c0] sm:$0xff]  ;;  %294 = vst [vmem:[%s11879_s20 + $0x60] sm:$0xff] %v293_v12  ;;  %296 = vst [vmem:[%s11879_s20 + $0x68] sm:$0xff] %v295_v13  ;;  %v299_v15 = vld [vmem:[%s11871_s19 + $0x1c8] sm:$0xff] }
  0x1c   : > { %298 = vst [vmem:[%s11879_s20 + $0x70] sm:$0xff] %v297_v14  ;;  %v301_v16 = vld [vmem:[%s11871_s19 + $0x200] sm:$0xff]  ;;  %v303_v17 = vld [vmem:[%s11871_s19 + $0x208] sm:$0xff]  ;;  %300 = vst [vmem:[%s11879_s20 + $0x78] sm:$0xff] %v299_v15 }
  0x1d   : > { %302 = vst [vmem:[%s11879_s20 + $0x80] sm:$0xff] %v301_v16  ;;  %304 = vst [vmem:[%s11879_s20 + $0x88] sm:$0xff] %v303_v17  ;;  %v305_v18 = vld [vmem:[%s11871_s19 + $0x240] sm:$0xff]  ;;  %v307_v19 = vld [vmem:[%s11871_s19 + $0x248] sm:$0xff] }
  0x1e   : > { %v309_v20 = vld [vmem:[%s11871_s19 + $0x280] sm:$0xff]  ;;  %306 = vst [vmem:[%s11879_s20 + $0x90] sm:$0xff] %v305_v18  ;;  %308 = vst [vmem:[%s11879_s20 + $0x98] sm:$0xff] %v307_v19  ;;  %v311_v21 = vld [vmem:[%s11871_s19 + $0x288] sm:$0xff] }
  0x1f   : > { %310 = vst [vmem:[%s11879_s20 + $0xa0] sm:$0xff] %v309_v20  ;;  %v313_v22 = vld [vmem:[%s11871_s19 + $0x2c0] sm:$0xff]  ;;  %v315_v23 = vld [vmem:[%s11871_s19 + $0x2c8] sm:$0xff]  ;;  %312 = vst [vmem:[%s11879_s20 + $0xa8] sm:$0xff] %v311_v21 }
  0x20   : > { %314 = vst [vmem:[%s11879_s20 + $0xb0] sm:$0xff] %v313_v22  ;;  %316 = vst [vmem:[%s11879_s20 + $0xb8] sm:$0xff] %v315_v23  ;;  %v317_v24 = vld [vmem:[%s11871_s19 + $0x300] sm:$0xff]  ;;  %v319_v25 = vld [vmem:[%s11871_s19 + $0x308] sm:$0xff] }
  0x21   : > { %v321_v26 = vld [vmem:[%s11871_s19 + $0x340] sm:$0xff]  ;;  %318 = vst [vmem:[%s11879_s20 + $0xc0] sm:$0xff] %v317_v24  ;;  %320 = vst [vmem:[%s11879_s20 + $0xc8] sm:$0xff] %v319_v25  ;;  %v323_v27 = vld [vmem:[%s11871_s19 + $0x348] sm:$0xff] }
  0x22   : > { %322 = vst [vmem:[%s11879_s20 + $0xd0] sm:$0xff] %v321_v26  ;;  %v325_v28 = vld [vmem:[%s11871_s19 + $0x380] sm:$0xff]  ;;  %v327_v29 = vld [vmem:[%s11871_s19 + $0x388] sm:$0xff]  ;;  %324 = vst [vmem:[%s11879_s20 + $0xd8] sm:$0xff] %v323_v27 }
  0x23   : > { %326 = vst [vmem:[%s11879_s20 + $0xe0] sm:$0xff] %v325_v28  ;;  %328 = vst [vmem:[%s11879_s20 + $0xe8] sm:$0xff] %v327_v29  ;;  %v329_v30 = vld [vmem:[%s11871_s19 + $0x3c0] sm:$0xff]  ;;  %v331_v31 = vld [vmem:[%s11871_s19 + $0x3c8] sm:$0xff] }
  0x24   : > { %v333_v32 = vld [vmem:[%s11871_s19 + $0x400] sm:$0xff]  ;;  %330 = vst [vmem:[%s11879_s20 + $0xf0] sm:$0xff] %v329_v30  ;;  %332 = vst [vmem:[%s11879_s20 + $0xf8] sm:$0xff] %v331_v31  ;;  %v335_v33 = vld [vmem:[%s11871_s19 + $0x408] sm:$0xff] }
  0x25   : > { %334 = vst [vmem:[%s11879_s20 + $0x100] sm:$0xff] %v333_v32  ;;  %v337_v34 = vld [vmem:[%s11871_s19 + $0x440] sm:$0xff]  ;;  %v339_v35 = vld [vmem:[%s11871_s19 + $0x448] sm:$0xff]  ;;  %336 = vst [vmem:[%s11879_s20 + $0x108] sm:$0xff] %v335_v33 }
  0x26   : > { %338 = vst [vmem:[%s11879_s20 + $0x110] sm:$0xff] %v337_v34  ;;  %340 = vst [vmem:[%s11879_s20 + $0x118] sm:$0xff] %v339_v35  ;;  %v341_v36 = vld [vmem:[%s11871_s19 + $0x480] sm:$0xff]  ;;  %v343_v37 = vld [vmem:[%s11871_s19 + $0x488] sm:$0xff] }
  0x27   : > { %v345_v38 = vld [vmem:[%s11871_s19 + $0x4c0] sm:$0xff]  ;;  %342 = vst [vmem:[%s11879_s20 + $0x120] sm:$0xff] %v341_v36  ;;  %344 = vst [vmem:[%s11879_s20 + $0x128] sm:$0xff] %v343_v37  ;;  %v347_v39 = vld [vmem:[%s11871_s19 + $0x4c8] sm:$0xff] }
  0x28   : > { %346 = vst [vmem:[%s11879_s20 + $0x130] sm:$0xff] %v345_v38  ;;  %v349_v40 = vld [vmem:[%s11871_s19 + $0x500] sm:$0xff]  ;;  %v351_v41 = vld [vmem:[%s11871_s19 + $0x508] sm:$0xff]  ;;  %348 = vst [vmem:[%s11879_s20 + $0x138] sm:$0xff] %v347_v39 }
  0x29   : > { %350 = vst [vmem:[%s11879_s20 + $0x140] sm:$0xff] %v349_v40  ;;  %352 = vst [vmem:[%s11879_s20 + $0x148] sm:$0xff] %v351_v41  ;;  %v353_v42 = vld [vmem:[%s11871_s19 + $0x540] sm:$0xff]  ;;  %v355_v43 = vld [vmem:[%s11871_s19 + $0x548] sm:$0xff] }
  0x2a   : > { %v357_v44 = vld [vmem:[%s11871_s19 + $0x580] sm:$0xff]  ;;  %354 = vst [vmem:[%s11879_s20 + $0x150] sm:$0xff] %v353_v42  ;;  %356 = vst [vmem:[%s11879_s20 + $0x158] sm:$0xff] %v355_v43  ;;  %v359_v45 = vld [vmem:[%s11871_s19 + $0x588] sm:$0xff] }
  0x2b   : > { %358 = vst [vmem:[%s11879_s20 + $0x160] sm:$0xff] %v357_v44  ;;  %v361_v46 = vld [vmem:[%s11871_s19 + $0x5c0] sm:$0xff]  ;;  %v363_v47 = vld [vmem:[%s11871_s19 + $0x5c8] sm:$0xff]  ;;  %360 = vst [vmem:[%s11879_s20 + $0x168] sm:$0xff] %v359_v45 }
  0x2c   : > { %362 = vst [vmem:[%s11879_s20 + $0x170] sm:$0xff] %v361_v46  ;;  %364 = vst [vmem:[%s11879_s20 + $0x178] sm:$0xff] %v363_v47  ;;  %v365_v48 = vld [vmem:[%s11871_s19 + $0x600] sm:$0xff]  ;;  %v367_v49 = vld [vmem:[%s11871_s19 + $0x608] sm:$0xff] }
  0x2d   : > { %v369_v50 = vld [vmem:[%s11871_s19 + $0x640] sm:$0xff]  ;;  %366 = vst [vmem:[%s11879_s20 + $0x180] sm:$0xff] %v365_v48  ;;  %368 = vst [vmem:[%s11879_s20 + $0x188] sm:$0xff] %v367_v49  ;;  %v371_v51 = vld [vmem:[%s11871_s19 + $0x648] sm:$0xff] }
  0x2e   : > { %370 = vst [vmem:[%s11879_s20 + $0x190] sm:$0xff] %v369_v50  ;;  %v373_v52 = vld [vmem:[%s11871_s19 + $0x680] sm:$0xff]  ;;  %v375_v53 = vld [vmem:[%s11871_s19 + $0x688] sm:$0xff]  ;;  %372 = vst [vmem:[%s11879_s20 + $0x198] sm:$0xff] %v371_v51 }
  0x2f   : > { %374 = vst [vmem:[%s11879_s20 + $0x1a0] sm:$0xff] %v373_v52  ;;  %376 = vst [vmem:[%s11879_s20 + $0x1a8] sm:$0xff] %v375_v53  ;;  %v377_v54 = vld [vmem:[%s11871_s19 + $0x6c0] sm:$0xff]  ;;  %v379_v55 = vld [vmem:[%s11871_s19 + $0x6c8] sm:$0xff] }
  0x30   : > { %v381_v56 = vld [vmem:[%s11871_s19 + $0x700] sm:$0xff]  ;;  %378 = vst [vmem:[%s11879_s20 + $0x1b0] sm:$0xff] %v377_v54  ;;  %380 = vst [vmem:[%s11879_s20 + $0x1b8] sm:$0xff] %v379_v55  ;;  %v383_v57 = vld [vmem:[%s11871_s19 + $0x708] sm:$0xff] }
  0x31   : > { %382 = vst [vmem:[%s11879_s20 + $0x1c0] sm:$0xff] %v381_v56  ;;  %v385_v58 = vld [vmem:[%s11871_s19 + $0x740] sm:$0xff]  ;;  %v387_v59 = vld [vmem:[%s11871_s19 + $0x748] sm:$0xff]  ;;  %384 = vst [vmem:[%s11879_s20 + $0x1c8] sm:$0xff] %v383_v57 }
  0x32   : > { %386 = vst [vmem:[%s11879_s20 + $0x1d0] sm:$0xff] %v385_v58  ;;  %388 = vst [vmem:[%s11879_s20 + $0x1d8] sm:$0xff] %v387_v59  ;;  %v389_v60 = vld [vmem:[%s11871_s19 + $0x780] sm:$0xff]  ;;  %v391_v61 = vld [vmem:[%s11871_s19 + $0x788] sm:$0xff] }
  0x33   : > { %v393_v62 = vld [vmem:[%s11871_s19 + $0x7c0] sm:$0xff]  ;;  %390 = vst [vmem:[%s11879_s20 + $0x1e0] sm:$0xff] %v389_v60  ;;  %392 = vst [vmem:[%s11879_s20 + $0x1e8] sm:$0xff] %v391_v61  ;;  %v395_v63 = vld [vmem:[%s11871_s19 + $0x7c8] sm:$0xff] }
  0x34   : > { %394 = vst [vmem:[%s11879_s20 + $0x1f0] sm:$0xff] %v393_v62  ;;  %v397_v0 = vld [vmem:[%s11871_s19 + $0x800] sm:$0xff]  ;;  %v399_v1 = vld [vmem:[%s11871_s19 + $0x808] sm:$0xff]  ;;  %396 = vst [vmem:[%s11879_s20 + $0x1f8] sm:$0xff] %v395_v63 }
  0x35   : > { %398 = vst [vmem:[%s11879_s20 + $0x200] sm:$0xff] %v397_v0  ;;  %400 = vst [vmem:[%s11879_s20 + $0x208] sm:$0xff] %v399_v1  ;;  %v401_v2 = vld [vmem:[%s11871_s19 + $0x840] sm:$0xff]  ;;  %v403_v3 = vld [vmem:[%s11871_s19 + $0x848] sm:$0xff] }
  0x36   : > { %v405_v4 = vld [vmem:[%s11871_s19 + $0x880] sm:$0xff]  ;;  %402 = vst [vmem:[%s11879_s20 + $0x210] sm:$0xff] %v401_v2  ;;  %404 = vst [vmem:[%s11879_s20 + $0x218] sm:$0xff] %v403_v3  ;;  %v407_v5 = vld [vmem:[%s11871_s19 + $0x888] sm:$0xff] }
  0x37   : > { %406 = vst [vmem:[%s11879_s20 + $0x220] sm:$0xff] %v405_v4  ;;  %v409_v6 = vld [vmem:[%s11871_s19 + $0x8c0] sm:$0xff]  ;;  %v411_v7 = vld [vmem:[%s11871_s19 + $0x8c8] sm:$0xff]  ;;  %408 = vst [vmem:[%s11879_s20 + $0x228] sm:$0xff] %v407_v5 }
  0x38   : > { %410 = vst [vmem:[%s11879_s20 + $0x230] sm:$0xff] %v409_v6  ;;  %412 = vst [vmem:[%s11879_s20 + $0x238] sm:$0xff] %v411_v7  ;;  %v413_v8 = vld [vmem:[%s11871_s19 + $0x900] sm:$0xff]  ;;  %v415_v9 = vld [vmem:[%s11871_s19 + $0x908] sm:$0xff] }
  0x39   : > { %v417_v10 = vld [vmem:[%s11871_s19 + $0x940] sm:$0xff]  ;;  %414 = vst [vmem:[%s11879_s20 + $0x240] sm:$0xff] %v413_v8  ;;  %416 = vst [vmem:[%s11879_s20 + $0x248] sm:$0xff] %v415_v9  ;;  %v419_v11 = vld [vmem:[%s11871_s19 + $0x948] sm:$0xff] }
  0x3a   : > { %418 = vst [vmem:[%s11879_s20 + $0x250] sm:$0xff] %v417_v10  ;;  %v421_v12 = vld [vmem:[%s11871_s19 + $0x980] sm:$0xff]  ;;  %v423_v13 = vld [vmem:[%s11871_s19 + $0x988] sm:$0xff]  ;;  %420 = vst [vmem:[%s11879_s20 + $0x258] sm:$0xff] %v419_v11 }
  0x3b   : > { %422 = vst [vmem:[%s11879_s20 + $0x260] sm:$0xff] %v421_v12  ;;  %424 = vst [vmem:[%s11879_s20 + $0x268] sm:$0xff] %v423_v13  ;;  %v425_v14 = vld [vmem:[%s11871_s19 + $0x9c0] sm:$0xff]  ;;  %v427_v15 = vld [vmem:[%s11871_s19 + $0x9c8] sm:$0xff] }
  0x3c   : > { %v429_v16 = vld [vmem:[%s11871_s19 + $0xa00] sm:$0xff]  ;;  %426 = vst [vmem:[%s11879_s20 + $0x270] sm:$0xff] %v425_v14  ;;  %428 = vst [vmem:[%s11879_s20 + $0x278] sm:$0xff] %v427_v15  ;;  %v431_v17 = vld [vmem:[%s11871_s19 + $0xa08] sm:$0xff] }
  0x3d   : > { %430 = vst [vmem:[%s11879_s20 + $0x280] sm:$0xff] %v429_v16  ;;  %v433_v18 = vld [vmem:[%s11871_s19 + $0xa40] sm:$0xff]  ;;  %v435_v19 = vld [vmem:[%s11871_s19 + $0xa48] sm:$0xff]  ;;  %432 = vst [vmem:[%s11879_s20 + $0x288] sm:$0xff] %v431_v17 }
  0x3e   : > { %434 = vst [vmem:[%s11879_s20 + $0x290] sm:$0xff] %v433_v18  ;;  %436 = vst [vmem:[%s11879_s20 + $0x298] sm:$0xff] %v435_v19  ;;  %v437_v20 = vld [vmem:[%s11871_s19 + $0xa80] sm:$0xff]  ;;  %v439_v21 = vld [vmem:[%s11871_s19 + $0xa88] sm:$0xff] }
  0x3f   : > { %v441_v22 = vld [vmem:[%s11871_s19 + $0xac0] sm:$0xff]  ;;  %438 = vst [vmem:[%s11879_s20 + $0x2a0] sm:$0xff] %v437_v20  ;;  %440 = vst [vmem:[%s11879_s20 + $0x2a8] sm:$0xff] %v439_v21  ;;  %v443_v23 = vld [vmem:[%s11871_s19 + $0xac8] sm:$0xff] }
  0x40   : > { %442 = vst [vmem:[%s11879_s20 + $0x2b0] sm:$0xff] %v441_v22  ;;  %v445_v24 = vld [vmem:[%s11871_s19 + $0xb00] sm:$0xff]  ;;  %v447_v25 = vld [vmem:[%s11871_s19 + $0xb08] sm:$0xff]  ;;  %444 = vst [vmem:[%s11879_s20 + $0x2b8] sm:$0xff] %v443_v23 }
  0x41   : > { %446 = vst [vmem:[%s11879_s20 + $0x2c0] sm:$0xff] %v445_v24  ;;  %448 = vst [vmem:[%s11879_s20 + $0x2c8] sm:$0xff] %v447_v25  ;;  %v449_v26 = vld [vmem:[%s11871_s19 + $0xb40] sm:$0xff]  ;;  %v451_v27 = vld [vmem:[%s11871_s19 + $0xb48] sm:$0xff] }
  0x42   : > { %v453_v28 = vld [vmem:[%s11871_s19 + $0xb80] sm:$0xff]  ;;  %450 = vst [vmem:[%s11879_s20 + $0x2d0] sm:$0xff] %v449_v26  ;;  %452 = vst [vmem:[%s11879_s20 + $0x2d8] sm:$0xff] %v451_v27  ;;  %v455_v29 = vld [vmem:[%s11871_s19 + $0xb88] sm:$0xff] }
  0x43   : > { %454 = vst [vmem:[%s11879_s20 + $0x2e0] sm:$0xff] %v453_v28  ;;  %v457_v30 = vld [vmem:[%s11871_s19 + $0xbc0] sm:$0xff]  ;;  %v459_v31 = vld [vmem:[%s11871_s19 + $0xbc8] sm:$0xff]  ;;  %456 = vst [vmem:[%s11879_s20 + $0x2e8] sm:$0xff] %v455_v29 }
  0x44   : > { %458 = vst [vmem:[%s11879_s20 + $0x2f0] sm:$0xff] %v457_v30  ;;  %460 = vst [vmem:[%s11879_s20 + $0x2f8] sm:$0xff] %v459_v31  ;;  %v461_v32 = vld [vmem:[%s11871_s19 + $0xc00] sm:$0xff]  ;;  %v463_v33 = vld [vmem:[%s11871_s19 + $0xc08] sm:$0xff] }
  0x45   : > { %v465_v34 = vld [vmem:[%s11871_s19 + $0xc40] sm:$0xff]  ;;  %462 = vst [vmem:[%s11879_s20 + $0x300] sm:$0xff] %v461_v32  ;;  %464 = vst [vmem:[%s11879_s20 + $0x308] sm:$0xff] %v463_v33  ;;  %v467_v35 = vld [vmem:[%s11871_s19 + $0xc48] sm:$0xff] }
  0x46   : > { %466 = vst [vmem:[%s11879_s20 + $0x310] sm:$0xff] %v465_v34  ;;  %v469_v36 = vld [vmem:[%s11871_s19 + $0xc80] sm:$0xff]  ;;  %v471_v37 = vld [vmem:[%s11871_s19 + $0xc88] sm:$0xff]  ;;  %468 = vst [vmem:[%s11879_s20 + $0x318] sm:$0xff] %v467_v35 }
  0x47   : > { %470 = vst [vmem:[%s11879_s20 + $0x320] sm:$0xff] %v469_v36  ;;  %472 = vst [vmem:[%s11879_s20 + $0x328] sm:$0xff] %v471_v37  ;;  %v473_v38 = vld [vmem:[%s11871_s19 + $0xcc0] sm:$0xff]  ;;  %v475_v39 = vld [vmem:[%s11871_s19 + $0xcc8] sm:$0xff] }
  0x48   : > { %v477_v40 = vld [vmem:[%s11871_s19 + $0xd00] sm:$0xff]  ;;  %474 = vst [vmem:[%s11879_s20 + $0x330] sm:$0xff] %v473_v38  ;;  %476 = vst [vmem:[%s11879_s20 + $0x338] sm:$0xff] %v475_v39  ;;  %v479_v41 = vld [vmem:[%s11871_s19 + $0xd08] sm:$0xff] }
  0x49   : > { %478 = vst [vmem:[%s11879_s20 + $0x340] sm:$0xff] %v477_v40  ;;  %v481_v42 = vld [vmem:[%s11871_s19 + $0xd40] sm:$0xff]  ;;  %v483_v43 = vld [vmem:[%s11871_s19 + $0xd48] sm:$0xff]  ;;  %480 = vst [vmem:[%s11879_s20 + $0x348] sm:$0xff] %v479_v41 }
  0x4a   : > { %482 = vst [vmem:[%s11879_s20 + $0x350] sm:$0xff] %v481_v42  ;;  %484 = vst [vmem:[%s11879_s20 + $0x358] sm:$0xff] %v483_v43  ;;  %v485_v44 = vld [vmem:[%s11871_s19 + $0xd80] sm:$0xff]  ;;  %v487_v45 = vld [vmem:[%s11871_s19 + $0xd88] sm:$0xff] }
  0x4b   : > { %v489_v46 = vld [vmem:[%s11871_s19 + $0xdc0] sm:$0xff]  ;;  %486 = vst [vmem:[%s11879_s20 + $0x360] sm:$0xff] %v485_v44  ;;  %488 = vst [vmem:[%s11879_s20 + $0x368] sm:$0xff] %v487_v45  ;;  %v491_v47 = vld [vmem:[%s11871_s19 + $0xdc8] sm:$0xff] }
  0x4c   : > { %490 = vst [vmem:[%s11879_s20 + $0x370] sm:$0xff] %v489_v46  ;;  %v493_v48 = vld [vmem:[%s11871_s19 + $0xe00] sm:$0xff]  ;;  %v495_v49 = vld [vmem:[%s11871_s19 + $0xe08] sm:$0xff]  ;;  %492 = vst [vmem:[%s11879_s20 + $0x378] sm:$0xff] %v491_v47 }
  0x4d   : > { %494 = vst [vmem:[%s11879_s20 + $0x380] sm:$0xff] %v493_v48  ;;  %496 = vst [vmem:[%s11879_s20 + $0x388] sm:$0xff] %v495_v49  ;;  %v497_v50 = vld [vmem:[%s11871_s19 + $0xe40] sm:$0xff]  ;;  %v499_v51 = vld [vmem:[%s11871_s19 + $0xe48] sm:$0xff] }
  0x4e   : > { %v501_v52 = vld [vmem:[%s11871_s19 + $0xe80] sm:$0xff]  ;;  %498 = vst [vmem:[%s11879_s20 + $0x390] sm:$0xff] %v497_v50  ;;  %500 = vst [vmem:[%s11879_s20 + $0x398] sm:$0xff] %v499_v51  ;;  %v503_v53 = vld [vmem:[%s11871_s19 + $0xe88] sm:$0xff] }
  0x4f   : > { %502 = vst [vmem:[%s11879_s20 + $0x3a0] sm:$0xff] %v501_v52  ;;  %v505_v54 = vld [vmem:[%s11871_s19 + $0xec0] sm:$0xff]  ;;  %v507_v55 = vld [vmem:[%s11871_s19 + $0xec8] sm:$0xff]  ;;  %504 = vst [vmem:[%s11879_s20 + $0x3a8] sm:$0xff] %v503_v53 }
  0x50   : > { %506 = vst [vmem:[%s11879_s20 + $0x3b0] sm:$0xff] %v505_v54  ;;  %508 = vst [vmem:[%s11879_s20 + $0x3b8] sm:$0xff] %v507_v55  ;;  %v509_v56 = vld [vmem:[%s11871_s19 + $0xf00] sm:$0xff]  ;;  %v511_v57 = vld [vmem:[%s11871_s19 + $0xf08] sm:$0xff] }
  0x51   : > { %v513_v58 = vld [vmem:[%s11871_s19 + $0xf40] sm:$0xff]  ;;  %510 = vst [vmem:[%s11879_s20 + $0x3c0] sm:$0xff] %v509_v56  ;;  %512 = vst [vmem:[%s11879_s20 + $0x3c8] sm:$0xff] %v511_v57  ;;  %v515_v59 = vld [vmem:[%s11871_s19 + $0xf48] sm:$0xff] }
  0x52   : > { %514 = vst [vmem:[%s11879_s20 + $0x3d0] sm:$0xff] %v513_v58  ;;  %v517_v60 = vld [vmem:[%s11871_s19 + $0xf80] sm:$0xff]  ;;  %v519_v61 = vld [vmem:[%s11871_s19 + $0xf88] sm:$0xff]  ;;  %516 = vst [vmem:[%s11879_s20 + $0x3d8] sm:$0xff] %v515_v59 }
  0x53   : > { %518 = vst [vmem:[%s11879_s20 + $0x3e0] sm:$0xff] %v517_v60  ;;  %520 = vst [vmem:[%s11879_s20 + $0x3e8] sm:$0xff] %v519_v61  ;;  %v521_v62 = vld [vmem:[%s11871_s19 + $0xfc0] sm:$0xff]  ;;  %v523_v63 = vld [vmem:[%s11871_s19 + $0xfc8] sm:$0xff] }
  0x54   : > { %v525_v0 = vld [vmem:[%s11871_s19 + $0x1000] sm:$0xff]  ;;  %522 = vst [vmem:[%s11879_s20 + $0x3f0] sm:$0xff] %v521_v62  ;;  %524 = vst [vmem:[%s11879_s20 + $0x3f8] sm:$0xff] %v523_v63  ;;  %v527_v1 = vld [vmem:[%s11871_s19 + $0x1008] sm:$0xff] }
  0x55   : > { %526 = vst [vmem:[%s11879_s20 + $0x400] sm:$0xff] %v525_v0  ;;  %v529_v2 = vld [vmem:[%s11871_s19 + $0x1040] sm:$0xff]  ;;  %v531_v3 = vld [vmem:[%s11871_s19 + $0x1048] sm:$0xff]  ;;  %528 = vst [vmem:[%s11879_s20 + $0x408] sm:$0xff] %v527_v1 }
  0x56   : > { %530 = vst [vmem:[%s11879_s20 + $0x410] sm:$0xff] %v529_v2  ;;  %532 = vst [vmem:[%s11879_s20 + $0x418] sm:$0xff] %v531_v3  ;;  %v533_v4 = vld [vmem:[%s11871_s19 + $0x1080] sm:$0xff]  ;;  %v535_v5 = vld [vmem:[%s11871_s19 + $0x1088] sm:$0xff] }
  0x57   : > { %v537_v6 = vld [vmem:[%s11871_s19 + $0x10c0] sm:$0xff]  ;;  %534 = vst [vmem:[%s11879_s20 + $0x420] sm:$0xff] %v533_v4  ;;  %536 = vst [vmem:[%s11879_s20 + $0x428] sm:$0xff] %v535_v5  ;;  %v539_v7 = vld [vmem:[%s11871_s19 + $0x10c8] sm:$0xff] }
  0x58   : > { %538 = vst [vmem:[%s11879_s20 + $0x430] sm:$0xff] %v537_v6  ;;  %v541_v8 = vld [vmem:[%s11871_s19 + $0x1100] sm:$0xff]  ;;  %v543_v9 = vld [vmem:[%s11871_s19 + $0x1108] sm:$0xff]  ;;  %540 = vst [vmem:[%s11879_s20 + $0x438] sm:$0xff] %v539_v7 }
  0x59   : > { %542 = vst [vmem:[%s11879_s20 + $0x440] sm:$0xff] %v541_v8  ;;  %544 = vst [vmem:[%s11879_s20 + $0x448] sm:$0xff] %v543_v9  ;;  %v545_v10 = vld [vmem:[%s11871_s19 + $0x1140] sm:$0xff]  ;;  %v547_v11 = vld [vmem:[%s11871_s19 + $0x1148] sm:$0xff] }
  0x5a   : > { %v549_v12 = vld [vmem:[%s11871_s19 + $0x1180] sm:$0xff]  ;;  %546 = vst [vmem:[%s11879_s20 + $0x450] sm:$0xff] %v545_v10  ;;  %548 = vst [vmem:[%s11879_s20 + $0x458] sm:$0xff] %v547_v11  ;;  %v551_v13 = vld [vmem:[%s11871_s19 + $0x1188] sm:$0xff] }
  0x5b   : > { %550 = vst [vmem:[%s11879_s20 + $0x460] sm:$0xff] %v549_v12  ;;  %v553_v14 = vld [vmem:[%s11871_s19 + $0x11c0] sm:$0xff]  ;;  %v555_v15 = vld [vmem:[%s11871_s19 + $0x11c8] sm:$0xff]  ;;  %552 = vst [vmem:[%s11879_s20 + $0x468] sm:$0xff] %v551_v13 }
  0x5c   : > { %554 = vst [vmem:[%s11879_s20 + $0x470] sm:$0xff] %v553_v14  ;;  %556 = vst [vmem:[%s11879_s20 + $0x478] sm:$0xff] %v555_v15  ;;  %v557_v16 = vld [vmem:[%s11871_s19 + $0x1200] sm:$0xff]  ;;  %v559_v17 = vld [vmem:[%s11871_s19 + $0x1208] sm:$0xff] }
  0x5d   : > { %v561_v18 = vld [vmem:[%s11871_s19 + $0x1240] sm:$0xff]  ;;  %558 = vst [vmem:[%s11879_s20 + $0x480] sm:$0xff] %v557_v16  ;;  %560 = vst [vmem:[%s11879_s20 + $0x488] sm:$0xff] %v559_v17  ;;  %v563_v19 = vld [vmem:[%s11871_s19 + $0x1248] sm:$0xff] }
  0x5e   : > { %562 = vst [vmem:[%s11879_s20 + $0x490] sm:$0xff] %v561_v18  ;;  %v565_v20 = vld [vmem:[%s11871_s19 + $0x1280] sm:$0xff]  ;;  %v567_v21 = vld [vmem:[%s11871_s19 + $0x1288] sm:$0xff]  ;;  %564 = vst [vmem:[%s11879_s20 + $0x498] sm:$0xff] %v563_v19 }
  0x5f   : > { %566 = vst [vmem:[%s11879_s20 + $0x4a0] sm:$0xff] %v565_v20  ;;  %568 = vst [vmem:[%s11879_s20 + $0x4a8] sm:$0xff] %v567_v21  ;;  %v569_v22 = vld [vmem:[%s11871_s19 + $0x12c0] sm:$0xff]  ;;  %v571_v23 = vld [vmem:[%s11871_s19 + $0x12c8] sm:$0xff] }
  0x60   : > { %v573_v24 = vld [vmem:[%s11871_s19 + $0x1300] sm:$0xff]  ;;  %570 = vst [vmem:[%s11879_s20 + $0x4b0] sm:$0xff] %v569_v22  ;;  %572 = vst [vmem:[%s11879_s20 + $0x4b8] sm:$0xff] %v571_v23  ;;  %v575_v25 = vld [vmem:[%s11871_s19 + $0x1308] sm:$0xff] }
  0x61   : > { %574 = vst [vmem:[%s11879_s20 + $0x4c0] sm:$0xff] %v573_v24  ;;  %v577_v26 = vld [vmem:[%s11871_s19 + $0x1340] sm:$0xff]  ;;  %v579_v27 = vld [vmem:[%s11871_s19 + $0x1348] sm:$0xff]  ;;  %576 = vst [vmem:[%s11879_s20 + $0x4c8] sm:$0xff] %v575_v25 }
  0x62   : > { %578 = vst [vmem:[%s11879_s20 + $0x4d0] sm:$0xff] %v577_v26  ;;  %580 = vst [vmem:[%s11879_s20 + $0x4d8] sm:$0xff] %v579_v27  ;;  %v581_v28 = vld [vmem:[%s11871_s19 + $0x1380] sm:$0xff]  ;;  %v583_v29 = vld [vmem:[%s11871_s19 + $0x1388] sm:$0xff] }
  0x63   : > { %v585_v30 = vld [vmem:[%s11871_s19 + $0x13c0] sm:$0xff]  ;;  %582 = vst [vmem:[%s11879_s20 + $0x4e0] sm:$0xff] %v581_v28  ;;  %584 = vst [vmem:[%s11879_s20 + $0x4e8] sm:$0xff] %v583_v29  ;;  %v587_v31 = vld [vmem:[%s11871_s19 + $0x13c8] sm:$0xff] }
  0x64   : > { %586 = vst [vmem:[%s11879_s20 + $0x4f0] sm:$0xff] %v585_v30  ;;  %v589_v32 = vld [vmem:[%s11871_s19 + $0x1400] sm:$0xff]  ;;  %v591_v33 = vld [vmem:[%s11871_s19 + $0x1408] sm:$0xff]  ;;  %588 = vst [vmem:[%s11879_s20 + $0x4f8] sm:$0xff] %v587_v31 }
  0x65   : > { %590 = vst [vmem:[%s11879_s20 + $0x500] sm:$0xff] %v589_v32  ;;  %592 = vst [vmem:[%s11879_s20 + $0x508] sm:$0xff] %v591_v33  ;;  %v593_v34 = vld [vmem:[%s11871_s19 + $0x1440] sm:$0xff]  ;;  %v595_v35 = vld [vmem:[%s11871_s19 + $0x1448] sm:$0xff] }
  0x66   : > { %v597_v36 = vld [vmem:[%s11871_s19 + $0x1480] sm:$0xff]  ;;  %594 = vst [vmem:[%s11879_s20 + $0x510] sm:$0xff] %v593_v34  ;;  %596 = vst [vmem:[%s11879_s20 + $0x518] sm:$0xff] %v595_v35  ;;  %v599_v37 = vld [vmem:[%s11871_s19 + $0x1488] sm:$0xff] }
  0x67   : > { %598 = vst [vmem:[%s11879_s20 + $0x520] sm:$0xff] %v597_v36  ;;  %v601_v38 = vld [vmem:[%s11871_s19 + $0x14c0] sm:$0xff]  ;;  %v603_v39 = vld [vmem:[%s11871_s19 + $0x14c8] sm:$0xff]  ;;  %600 = vst [vmem:[%s11879_s20 + $0x528] sm:$0xff] %v599_v37 }
  0x68   : > { %602 = vst [vmem:[%s11879_s20 + $0x530] sm:$0xff] %v601_v38  ;;  %604 = vst [vmem:[%s11879_s20 + $0x538] sm:$0xff] %v603_v39  ;;  %v605_v40 = vld [vmem:[%s11871_s19 + $0x1500] sm:$0xff]  ;;  %v607_v41 = vld [vmem:[%s11871_s19 + $0x1508] sm:$0xff] }
  0x69   : > { %v609_v42 = vld [vmem:[%s11871_s19 + $0x1540] sm:$0xff]  ;;  %606 = vst [vmem:[%s11879_s20 + $0x540] sm:$0xff] %v605_v40  ;;  %608 = vst [vmem:[%s11879_s20 + $0x548] sm:$0xff] %v607_v41  ;;  %v611_v43 = vld [vmem:[%s11871_s19 + $0x1548] sm:$0xff] }
  0x6a   : > { %610 = vst [vmem:[%s11879_s20 + $0x550] sm:$0xff] %v609_v42  ;;  %v613_v44 = vld [vmem:[%s11871_s19 + $0x1580] sm:$0xff]  ;;  %v615_v45 = vld [vmem:[%s11871_s19 + $0x1588] sm:$0xff]  ;;  %612 = vst [vmem:[%s11879_s20 + $0x558] sm:$0xff] %v611_v43 }
  0x6b   : > { %614 = vst [vmem:[%s11879_s20 + $0x560] sm:$0xff] %v613_v44  ;;  %616 = vst [vmem:[%s11879_s20 + $0x568] sm:$0xff] %v615_v45  ;;  %v617_v46 = vld [vmem:[%s11871_s19 + $0x15c0] sm:$0xff]  ;;  %v619_v47 = vld [vmem:[%s11871_s19 + $0x15c8] sm:$0xff] }
  0x6c   : > { %v621_v48 = vld [vmem:[%s11871_s19 + $0x1600] sm:$0xff]  ;;  %618 = vst [vmem:[%s11879_s20 + $0x570] sm:$0xff] %v617_v46  ;;  %620 = vst [vmem:[%s11879_s20 + $0x578] sm:$0xff] %v619_v47  ;;  %v623_v49 = vld [vmem:[%s11871_s19 + $0x1608] sm:$0xff] }
  0x6d   : > { %622 = vst [vmem:[%s11879_s20 + $0x580] sm:$0xff] %v621_v48  ;;  %v625_v50 = vld [vmem:[%s11871_s19 + $0x1640] sm:$0xff]  ;;  %v627_v51 = vld [vmem:[%s11871_s19 + $0x1648] sm:$0xff]  ;;  %624 = vst [vmem:[%s11879_s20 + $0x588] sm:$0xff] %v623_v49 }
  0x6e   : > { %626 = vst [vmem:[%s11879_s20 + $0x590] sm:$0xff] %v625_v50  ;;  %628 = vst [vmem:[%s11879_s20 + $0x598] sm:$0xff] %v627_v51  ;;  %v629_v52 = vld [vmem:[%s11871_s19 + $0x1680] sm:$0xff]  ;;  %v631_v53 = vld [vmem:[%s11871_s19 + $0x1688] sm:$0xff] }
  0x6f   : > { %v633_v54 = vld [vmem:[%s11871_s19 + $0x16c0] sm:$0xff]  ;;  %630 = vst [vmem:[%s11879_s20 + $0x5a0] sm:$0xff] %v629_v52  ;;  %632 = vst [vmem:[%s11879_s20 + $0x5a8] sm:$0xff] %v631_v53  ;;  %v635_v55 = vld [vmem:[%s11871_s19 + $0x16c8] sm:$0xff] }
  0x70   : > { %634 = vst [vmem:[%s11879_s20 + $0x5b0] sm:$0xff] %v633_v54  ;;  %v637_v56 = vld [vmem:[%s11871_s19 + $0x1700] sm:$0xff]  ;;  %v639_v57 = vld [vmem:[%s11871_s19 + $0x1708] sm:$0xff]  ;;  %636 = vst [vmem:[%s11879_s20 + $0x5b8] sm:$0xff] %v635_v55 }
  0x71   : > { %638 = vst [vmem:[%s11879_s20 + $0x5c0] sm:$0xff] %v637_v56  ;;  %640 = vst [vmem:[%s11879_s20 + $0x5c8] sm:$0xff] %v639_v57  ;;  %v641_v58 = vld [vmem:[%s11871_s19 + $0x1740] sm:$0xff]  ;;  %v643_v59 = vld [vmem:[%s11871_s19 + $0x1748] sm:$0xff] }
  0x72   : > { %v645_v60 = vld [vmem:[%s11871_s19 + $0x1780] sm:$0xff]  ;;  %642 = vst [vmem:[%s11879_s20 + $0x5d0] sm:$0xff] %v641_v58  ;;  %644 = vst [vmem:[%s11879_s20 + $0x5d8] sm:$0xff] %v643_v59  ;;  %v647_v61 = vld [vmem:[%s11871_s19 + $0x1788] sm:$0xff] }
  0x73   : > { %646 = vst [vmem:[%s11879_s20 + $0x5e0] sm:$0xff] %v645_v60  ;;  %v649_v62 = vld [vmem:[%s11871_s19 + $0x17c0] sm:$0xff]  ;;  %v651_v63 = vld [vmem:[%s11871_s19 + $0x17c8] sm:$0xff]  ;;  %648 = vst [vmem:[%s11879_s20 + $0x5e8] sm:$0xff] %v647_v61 }
  0x74   : > { %650 = vst [vmem:[%s11879_s20 + $0x5f0] sm:$0xff] %v649_v62  ;;  %652 = vst [vmem:[%s11879_s20 + $0x5f8] sm:$0xff] %v651_v63  ;;  %v653_v0 = vld [vmem:[%s11871_s19 + $0x1800] sm:$0xff]  ;;  %v655_v1 = vld [vmem:[%s11871_s19 + $0x1808] sm:$0xff] }
  0x75   : > { %v657_v2 = vld [vmem:[%s11871_s19 + $0x1840] sm:$0xff]  ;;  %654 = vst [vmem:[%s11879_s20 + $0x600] sm:$0xff] %v653_v0  ;;  %656 = vst [vmem:[%s11879_s20 + $0x608] sm:$0xff] %v655_v1  ;;  %v659_v3 = vld [vmem:[%s11871_s19 + $0x1848] sm:$0xff] }
  0x76   : > { %658 = vst [vmem:[%s11879_s20 + $0x610] sm:$0xff] %v657_v2  ;;  %v661_v4 = vld [vmem:[%s11871_s19 + $0x1880] sm:$0xff]  ;;  %v663_v5 = vld [vmem:[%s11871_s19 + $0x1888] sm:$0xff]  ;;  %660 = vst [vmem:[%s11879_s20 + $0x618] sm:$0xff] %v659_v3 }
  0x77   : > { %662 = vst [vmem:[%s11879_s20 + $0x620] sm:$0xff] %v661_v4  ;;  %664 = vst [vmem:[%s11879_s20 + $0x628] sm:$0xff] %v663_v5  ;;  %v665_v6 = vld [vmem:[%s11871_s19 + $0x18c0] sm:$0xff]  ;;  %v667_v7 = vld [vmem:[%s11871_s19 + $0x18c8] sm:$0xff] }
  0x78   : > { %v669_v8 = vld [vmem:[%s11871_s19 + $0x1900] sm:$0xff]  ;;  %666 = vst [vmem:[%s11879_s20 + $0x630] sm:$0xff] %v665_v6  ;;  %668 = vst [vmem:[%s11879_s20 + $0x638] sm:$0xff] %v667_v7  ;;  %v671_v9 = vld [vmem:[%s11871_s19 + $0x1908] sm:$0xff] }
  0x79   : > { %670 = vst [vmem:[%s11879_s20 + $0x640] sm:$0xff] %v669_v8  ;;  %v673_v10 = vld [vmem:[%s11871_s19 + $0x1940] sm:$0xff]  ;;  %v675_v11 = vld [vmem:[%s11871_s19 + $0x1948] sm:$0xff]  ;;  %672 = vst [vmem:[%s11879_s20 + $0x648] sm:$0xff] %v671_v9 }
  0x7a   : > { %674 = vst [vmem:[%s11879_s20 + $0x650] sm:$0xff] %v673_v10  ;;  %676 = vst [vmem:[%s11879_s20 + $0x658] sm:$0xff] %v675_v11  ;;  %v677_v12 = vld [vmem:[%s11871_s19 + $0x1980] sm:$0xff]  ;;  %v679_v13 = vld [vmem:[%s11871_s19 + $0x1988] sm:$0xff] }
  0x7b   : > { %v681_v14 = vld [vmem:[%s11871_s19 + $0x19c0] sm:$0xff]  ;;  %678 = vst [vmem:[%s11879_s20 + $0x660] sm:$0xff] %v677_v12  ;;  %680 = vst [vmem:[%s11879_s20 + $0x668] sm:$0xff] %v679_v13  ;;  %v683_v15 = vld [vmem:[%s11871_s19 + $0x19c8] sm:$0xff] }
  0x7c   : > { %682 = vst [vmem:[%s11879_s20 + $0x670] sm:$0xff] %v681_v14  ;;  %v685_v16 = vld [vmem:[%s11871_s19 + $0x1a00] sm:$0xff]  ;;  %v687_v17 = vld [vmem:[%s11871_s19 + $0x1a08] sm:$0xff]  ;;  %684 = vst [vmem:[%s11879_s20 + $0x678] sm:$0xff] %v683_v15 }
  0x7d   : > { %686 = vst [vmem:[%s11879_s20 + $0x680] sm:$0xff] %v685_v16  ;;  %688 = vst [vmem:[%s11879_s20 + $0x688] sm:$0xff] %v687_v17  ;;  %v689_v18 = vld [vmem:[%s11871_s19 + $0x1a40] sm:$0xff]  ;;  %v691_v19 = vld [vmem:[%s11871_s19 + $0x1a48] sm:$0xff] }
  0x7e   : > { %v693_v20 = vld [vmem:[%s11871_s19 + $0x1a80] sm:$0xff]  ;;  %690 = vst [vmem:[%s11879_s20 + $0x690] sm:$0xff] %v689_v18  ;;  %692 = vst [vmem:[%s11879_s20 + $0x698] sm:$0xff] %v691_v19  ;;  %v695_v21 = vld [vmem:[%s11871_s19 + $0x1a88] sm:$0xff] }
  0x7f   : > { %694 = vst [vmem:[%s11879_s20 + $0x6a0] sm:$0xff] %v693_v20  ;;  %v697_v22 = vld [vmem:[%s11871_s19 + $0x1ac0] sm:$0xff]  ;;  %v699_v23 = vld [vmem:[%s11871_s19 + $0x1ac8] sm:$0xff]  ;;  %696 = vst [vmem:[%s11879_s20 + $0x6a8] sm:$0xff] %v695_v21 }
  0x80   : > { %698 = vst [vmem:[%s11879_s20 + $0x6b0] sm:$0xff] %v697_v22  ;;  %700 = vst [vmem:[%s11879_s20 + $0x6b8] sm:$0xff] %v699_v23  ;;  %v701_v24 = vld [vmem:[%s11871_s19 + $0x1b00] sm:$0xff]  ;;  %v703_v25 = vld [vmem:[%s11871_s19 + $0x1b08] sm:$0xff] }
  0x81   : > { %v705_v26 = vld [vmem:[%s11871_s19 + $0x1b40] sm:$0xff]  ;;  %702 = vst [vmem:[%s11879_s20 + $0x6c0] sm:$0xff] %v701_v24  ;;  %704 = vst [vmem:[%s11879_s20 + $0x6c8] sm:$0xff] %v703_v25  ;;  %v707_v27 = vld [vmem:[%s11871_s19 + $0x1b48] sm:$0xff] }
  0x82   : > { %706 = vst [vmem:[%s11879_s20 + $0x6d0] sm:$0xff] %v705_v26  ;;  %v709_v28 = vld [vmem:[%s11871_s19 + $0x1b80] sm:$0xff]  ;;  %v711_v29 = vld [vmem:[%s11871_s19 + $0x1b88] sm:$0xff]  ;;  %708 = vst [vmem:[%s11879_s20 + $0x6d8] sm:$0xff] %v707_v27 }
  0x83   : > { %710 = vst [vmem:[%s11879_s20 + $0x6e0] sm:$0xff] %v709_v28  ;;  %712 = vst [vmem:[%s11879_s20 + $0x6e8] sm:$0xff] %v711_v29  ;;  %v713_v30 = vld [vmem:[%s11871_s19 + $0x1bc0] sm:$0xff]  ;;  %v715_v31 = vld [vmem:[%s11871_s19 + $0x1bc8] sm:$0xff] }
  0x84   : > { %v717_v32 = vld [vmem:[%s11871_s19 + $0x1c00] sm:$0xff]  ;;  %714 = vst [vmem:[%s11879_s20 + $0x6f0] sm:$0xff] %v713_v30  ;;  %716 = vst [vmem:[%s11879_s20 + $0x6f8] sm:$0xff] %v715_v31  ;;  %v719_v33 = vld [vmem:[%s11871_s19 + $0x1c08] sm:$0xff] }
  0x85   : > { %718 = vst [vmem:[%s11879_s20 + $0x700] sm:$0xff] %v717_v32  ;;  %v721_v34 = vld [vmem:[%s11871_s19 + $0x1c40] sm:$0xff]  ;;  %v723_v35 = vld [vmem:[%s11871_s19 + $0x1c48] sm:$0xff]  ;;  %720 = vst [vmem:[%s11879_s20 + $0x708] sm:$0xff] %v719_v33 }
  0x86   : > { %722 = vst [vmem:[%s11879_s20 + $0x710] sm:$0xff] %v721_v34  ;;  %724 = vst [vmem:[%s11879_s20 + $0x718] sm:$0xff] %v723_v35  ;;  %v725_v36 = vld [vmem:[%s11871_s19 + $0x1c80] sm:$0xff]  ;;  %v727_v37 = vld [vmem:[%s11871_s19 + $0x1c88] sm:$0xff] }
  0x87   : > { %v729_v38 = vld [vmem:[%s11871_s19 + $0x1cc0] sm:$0xff]  ;;  %726 = vst [vmem:[%s11879_s20 + $0x720] sm:$0xff] %v725_v36  ;;  %728 = vst [vmem:[%s11879_s20 + $0x728] sm:$0xff] %v727_v37  ;;  %v731_v39 = vld [vmem:[%s11871_s19 + $0x1cc8] sm:$0xff] }
  0x88   : > { %730 = vst [vmem:[%s11879_s20 + $0x730] sm:$0xff] %v729_v38  ;;  %v733_v40 = vld [vmem:[%s11871_s19 + $0x1d00] sm:$0xff]  ;;  %v735_v41 = vld [vmem:[%s11871_s19 + $0x1d08] sm:$0xff]  ;;  %732 = vst [vmem:[%s11879_s20 + $0x738] sm:$0xff] %v731_v39 }
  0x89   : > { %734 = vst [vmem:[%s11879_s20 + $0x740] sm:$0xff] %v733_v40  ;;  %736 = vst [vmem:[%s11879_s20 + $0x748] sm:$0xff] %v735_v41  ;;  %v737_v42 = vld [vmem:[%s11871_s19 + $0x1d40] sm:$0xff]  ;;  %v739_v43 = vld [vmem:[%s11871_s19 + $0x1d48] sm:$0xff] }
  0x8a   : > { %v741_v44 = vld [vmem:[%s11871_s19 + $0x1d80] sm:$0xff]  ;;  %738 = vst [vmem:[%s11879_s20 + $0x750] sm:$0xff] %v737_v42  ;;  %740 = vst [vmem:[%s11879_s20 + $0x758] sm:$0xff] %v739_v43  ;;  %v743_v45 = vld [vmem:[%s11871_s19 + $0x1d88] sm:$0xff] }
  0x8b   : > { %742 = vst [vmem:[%s11879_s20 + $0x760] sm:$0xff] %v741_v44  ;;  %v745_v46 = vld [vmem:[%s11871_s19 + $0x1dc0] sm:$0xff]  ;;  %v747_v47 = vld [vmem:[%s11871_s19 + $0x1dc8] sm:$0xff]  ;;  %744 = vst [vmem:[%s11879_s20 + $0x768] sm:$0xff] %v743_v45 }
  0x8c   : > { %746 = vst [vmem:[%s11879_s20 + $0x770] sm:$0xff] %v745_v46  ;;  %748 = vst [vmem:[%s11879_s20 + $0x778] sm:$0xff] %v747_v47  ;;  %v749_v48 = vld [vmem:[%s11871_s19 + $0x1e00] sm:$0xff]  ;;  %v751_v49 = vld [vmem:[%s11871_s19 + $0x1e08] sm:$0xff] }
  0x8d   : > { %v753_v50 = vld [vmem:[%s11871_s19 + $0x1e40] sm:$0xff]  ;;  %750 = vst [vmem:[%s11879_s20 + $0x780] sm:$0xff] %v749_v48  ;;  %752 = vst [vmem:[%s11879_s20 + $0x788] sm:$0xff] %v751_v49  ;;  %v755_v51 = vld [vmem:[%s11871_s19 + $0x1e48] sm:$0xff] }
  0x8e   : > { %754 = vst [vmem:[%s11879_s20 + $0x790] sm:$0xff] %v753_v50  ;;  %v757_v52 = vld [vmem:[%s11871_s19 + $0x1e80] sm:$0xff]  ;;  %v759_v53 = vld [vmem:[%s11871_s19 + $0x1e88] sm:$0xff]  ;;  %756 = vst [vmem:[%s11879_s20 + $0x798] sm:$0xff] %v755_v51 }
  0x8f   : > { %758 = vst [vmem:[%s11879_s20 + $0x7a0] sm:$0xff] %v757_v52  ;;  %760 = vst [vmem:[%s11879_s20 + $0x7a8] sm:$0xff] %v759_v53  ;;  %v761_v54 = vld [vmem:[%s11871_s19 + $0x1ec0] sm:$0xff]  ;;  %v763_v55 = vld [vmem:[%s11871_s19 + $0x1ec8] sm:$0xff] }
  0x90   : > { %v765_v56 = vld [vmem:[%s11871_s19 + $0x1f00] sm:$0xff]  ;;  %762 = vst [vmem:[%s11879_s20 + $0x7b0] sm:$0xff] %v761_v54  ;;  %764 = vst [vmem:[%s11879_s20 + $0x7b8] sm:$0xff] %v763_v55  ;;  %v767_v57 = vld [vmem:[%s11871_s19 + $0x1f08] sm:$0xff] }
  0x91   : > { %766 = vst [vmem:[%s11879_s20 + $0x7c0] sm:$0xff] %v765_v56  ;;  %v769_v58 = vld [vmem:[%s11871_s19 + $0x1f40] sm:$0xff]  ;;  %v771_v59 = vld [vmem:[%s11871_s19 + $0x1f48] sm:$0xff]  ;;  %768 = vst [vmem:[%s11879_s20 + $0x7c8] sm:$0xff] %v767_v57 }
  0x92   : > { %770 = vst [vmem:[%s11879_s20 + $0x7d0] sm:$0xff] %v769_v58  ;;  %772 = vst [vmem:[%s11879_s20 + $0x7d8] sm:$0xff] %v771_v59  ;;  %v773_v60 = vld [vmem:[%s11871_s19 + $0x1f80] sm:$0xff]  ;;  %v775_v61 = vld [vmem:[%s11871_s19 + $0x1f88] sm:$0xff] }
  0x93   : > { %v777_v62 = vld [vmem:[%s11871_s19 + $0x1fc0] sm:$0xff]  ;;  %774 = vst [vmem:[%s11879_s20 + $0x7e0] sm:$0xff] %v773_v60  ;;  %776 = vst [vmem:[%s11879_s20 + $0x7e8] sm:$0xff] %v775_v61  ;;  %v779_v63 = vld [vmem:[%s11871_s19 + $0x1fc8] sm:$0xff] }
  0x94   : > { %778 = vst [vmem:[%s11879_s20 + $0x7f0] sm:$0xff] %v777_v62  ;;  %v781_v0 = vld [vmem:[%s11871_s19 + $0x2000] sm:$0xff]  ;;  %v783_v1 = vld [vmem:[%s11871_s19 + $0x2008] sm:$0xff]  ;;  %780 = vst [vmem:[%s11879_s20 + $0x7f8] sm:$0xff] %v779_v63 }
  0x95   : > { %782 = vst [vmem:[%s11879_s20 + $0x800] sm:$0xff] %v781_v0  ;;  %784 = vst [vmem:[%s11879_s20 + $0x808] sm:$0xff] %v783_v1  ;;  %v785_v2 = vld [vmem:[%s11871_s19 + $0x2040] sm:$0xff]  ;;  %v787_v3 = vld [vmem:[%s11871_s19 + $0x2048] sm:$0xff] }
  0x96   : > { %v789_v4 = vld [vmem:[%s11871_s19 + $0x2080] sm:$0xff]  ;;  %786 = vst [vmem:[%s11879_s20 + $0x810] sm:$0xff] %v785_v2  ;;  %788 = vst [vmem:[%s11879_s20 + $0x818] sm:$0xff] %v787_v3  ;;  %v791_v5 = vld [vmem:[%s11871_s19 + $0x2088] sm:$0xff] }
  0x97   : > { %790 = vst [vmem:[%s11879_s20 + $0x820] sm:$0xff] %v789_v4  ;;  %v793_v6 = vld [vmem:[%s11871_s19 + $0x20c0] sm:$0xff]  ;;  %v795_v7 = vld [vmem:[%s11871_s19 + $0x20c8] sm:$0xff]  ;;  %792 = vst [vmem:[%s11879_s20 + $0x828] sm:$0xff] %v791_v5 }
  0x98   : > { %794 = vst [vmem:[%s11879_s20 + $0x830] sm:$0xff] %v793_v6  ;;  %796 = vst [vmem:[%s11879_s20 + $0x838] sm:$0xff] %v795_v7  ;;  %v797_v8 = vld [vmem:[%s11871_s19 + $0x2100] sm:$0xff]  ;;  %v799_v9 = vld [vmem:[%s11871_s19 + $0x2108] sm:$0xff] }
  0x99   : > { %v801_v10 = vld [vmem:[%s11871_s19 + $0x2140] sm:$0xff]  ;;  %798 = vst [vmem:[%s11879_s20 + $0x840] sm:$0xff] %v797_v8  ;;  %800 = vst [vmem:[%s11879_s20 + $0x848] sm:$0xff] %v799_v9  ;;  %v803_v11 = vld [vmem:[%s11871_s19 + $0x2148] sm:$0xff] }
  0x9a   : > { %802 = vst [vmem:[%s11879_s20 + $0x850] sm:$0xff] %v801_v10  ;;  %v805_v12 = vld [vmem:[%s11871_s19 + $0x2180] sm:$0xff]  ;;  %v807_v13 = vld [vmem:[%s11871_s19 + $0x2188] sm:$0xff]  ;;  %804 = vst [vmem:[%s11879_s20 + $0x858] sm:$0xff] %v803_v11 }
  0x9b   : > { %806 = vst [vmem:[%s11879_s20 + $0x860] sm:$0xff] %v805_v12  ;;  %808 = vst [vmem:[%s11879_s20 + $0x868] sm:$0xff] %v807_v13  ;;  %v809_v14 = vld [vmem:[%s11871_s19 + $0x21c0] sm:$0xff]  ;;  %v811_v15 = vld [vmem:[%s11871_s19 + $0x21c8] sm:$0xff] }
  0x9c   : > { %v813_v16 = vld [vmem:[%s11871_s19 + $0x2200] sm:$0xff]  ;;  %810 = vst [vmem:[%s11879_s20 + $0x870] sm:$0xff] %v809_v14  ;;  %812 = vst [vmem:[%s11879_s20 + $0x878] sm:$0xff] %v811_v15  ;;  %v815_v17 = vld [vmem:[%s11871_s19 + $0x2208] sm:$0xff] }
  0x9d   : > { %814 = vst [vmem:[%s11879_s20 + $0x880] sm:$0xff] %v813_v16  ;;  %v817_v18 = vld [vmem:[%s11871_s19 + $0x2240] sm:$0xff]  ;;  %v819_v19 = vld [vmem:[%s11871_s19 + $0x2248] sm:$0xff]  ;;  %816 = vst [vmem:[%s11879_s20 + $0x888] sm:$0xff] %v815_v17 }
  0x9e   : > { %818 = vst [vmem:[%s11879_s20 + $0x890] sm:$0xff] %v817_v18  ;;  %820 = vst [vmem:[%s11879_s20 + $0x898] sm:$0xff] %v819_v19  ;;  %v821_v20 = vld [vmem:[%s11871_s19 + $0x2280] sm:$0xff]  ;;  %v823_v21 = vld [vmem:[%s11871_s19 + $0x2288] sm:$0xff] }
  0x9f   : > { %v825_v22 = vld [vmem:[%s11871_s19 + $0x22c0] sm:$0xff]  ;;  %822 = vst [vmem:[%s11879_s20 + $0x8a0] sm:$0xff] %v821_v20  ;;  %824 = vst [vmem:[%s11879_s20 + $0x8a8] sm:$0xff] %v823_v21  ;;  %v827_v23 = vld [vmem:[%s11871_s19 + $0x22c8] sm:$0xff] }
  0xa0   : > { %826 = vst [vmem:[%s11879_s20 + $0x8b0] sm:$0xff] %v825_v22  ;;  %v829_v24 = vld [vmem:[%s11871_s19 + $0x2300] sm:$0xff]  ;;  %v831_v25 = vld [vmem:[%s11871_s19 + $0x2308] sm:$0xff]  ;;  %828 = vst [vmem:[%s11879_s20 + $0x8b8] sm:$0xff] %v827_v23 }
  0xa1   : > { %830 = vst [vmem:[%s11879_s20 + $0x8c0] sm:$0xff] %v829_v24  ;;  %832 = vst [vmem:[%s11879_s20 + $0x8c8] sm:$0xff] %v831_v25  ;;  %v833_v26 = vld [vmem:[%s11871_s19 + $0x2340] sm:$0xff]  ;;  %v835_v27 = vld [vmem:[%s11871_s19 + $0x2348] sm:$0xff] }
  0xa2   : > { %v837_v28 = vld [vmem:[%s11871_s19 + $0x2380] sm:$0xff]  ;;  %834 = vst [vmem:[%s11879_s20 + $0x8d0] sm:$0xff] %v833_v26  ;;  %836 = vst [vmem:[%s11879_s20 + $0x8d8] sm:$0xff] %v835_v27  ;;  %v839_v29 = vld [vmem:[%s11871_s19 + $0x2388] sm:$0xff] }
  0xa3   : > { %838 = vst [vmem:[%s11879_s20 + $0x8e0] sm:$0xff] %v837_v28  ;;  %v841_v30 = vld [vmem:[%s11871_s19 + $0x23c0] sm:$0xff]  ;;  %v843_v31 = vld [vmem:[%s11871_s19 + $0x23c8] sm:$0xff]  ;;  %840 = vst [vmem:[%s11879_s20 + $0x8e8] sm:$0xff] %v839_v29 }
  0xa4   : > { %842 = vst [vmem:[%s11879_s20 + $0x8f0] sm:$0xff] %v841_v30  ;;  %844 = vst [vmem:[%s11879_s20 + $0x8f8] sm:$0xff] %v843_v31  ;;  %v845_v32 = vld [vmem:[%s11871_s19 + $0x2400] sm:$0xff]  ;;  %v847_v33 = vld [vmem:[%s11871_s19 + $0x2408] sm:$0xff] }
  0xa5   : > { %v849_v34 = vld [vmem:[%s11871_s19 + $0x2440] sm:$0xff]  ;;  %846 = vst [vmem:[%s11879_s20 + $0x900] sm:$0xff] %v845_v32  ;;  %848 = vst [vmem:[%s11879_s20 + $0x908] sm:$0xff] %v847_v33  ;;  %v851_v35 = vld [vmem:[%s11871_s19 + $0x2448] sm:$0xff] }
  0xa6   : > { %850 = vst [vmem:[%s11879_s20 + $0x910] sm:$0xff] %v849_v34  ;;  %v853_v36 = vld [vmem:[%s11871_s19 + $0x2480] sm:$0xff]  ;;  %v855_v37 = vld [vmem:[%s11871_s19 + $0x2488] sm:$0xff]  ;;  %852 = vst [vmem:[%s11879_s20 + $0x918] sm:$0xff] %v851_v35 }
  0xa7   : > { %854 = vst [vmem:[%s11879_s20 + $0x920] sm:$0xff] %v853_v36  ;;  %856 = vst [vmem:[%s11879_s20 + $0x928] sm:$0xff] %v855_v37  ;;  %v857_v38 = vld [vmem:[%s11871_s19 + $0x24c0] sm:$0xff]  ;;  %v859_v39 = vld [vmem:[%s11871_s19 + $0x24c8] sm:$0xff] }
  0xa8   : > { %v861_v40 = vld [vmem:[%s11871_s19 + $0x2500] sm:$0xff]  ;;  %858 = vst [vmem:[%s11879_s20 + $0x930] sm:$0xff] %v857_v38  ;;  %860 = vst [vmem:[%s11879_s20 + $0x938] sm:$0xff] %v859_v39  ;;  %v863_v41 = vld [vmem:[%s11871_s19 + $0x2508] sm:$0xff] }
  0xa9   : > { %862 = vst [vmem:[%s11879_s20 + $0x940] sm:$0xff] %v861_v40  ;;  %v865_v42 = vld [vmem:[%s11871_s19 + $0x2540] sm:$0xff]  ;;  %v867_v43 = vld [vmem:[%s11871_s19 + $0x2548] sm:$0xff]  ;;  %864 = vst [vmem:[%s11879_s20 + $0x948] sm:$0xff] %v863_v41 }
  0xaa   : > { %866 = vst [vmem:[%s11879_s20 + $0x950] sm:$0xff] %v865_v42  ;;  %868 = vst [vmem:[%s11879_s20 + $0x958] sm:$0xff] %v867_v43  ;;  %v869_v44 = vld [vmem:[%s11871_s19 + $0x2580] sm:$0xff]  ;;  %v871_v45 = vld [vmem:[%s11871_s19 + $0x2588] sm:$0xff] }
  0xab   : > { %v873_v46 = vld [vmem:[%s11871_s19 + $0x25c0] sm:$0xff]  ;;  %870 = vst [vmem:[%s11879_s20 + $0x960] sm:$0xff] %v869_v44  ;;  %872 = vst [vmem:[%s11879_s20 + $0x968] sm:$0xff] %v871_v45  ;;  %v875_v47 = vld [vmem:[%s11871_s19 + $0x25c8] sm:$0xff] }
  0xac   : > { %874 = vst [vmem:[%s11879_s20 + $0x970] sm:$0xff] %v873_v46  ;;  %v877_v48 = vld [vmem:[%s11871_s19 + $0x2600] sm:$0xff]  ;;  %v879_v49 = vld [vmem:[%s11871_s19 + $0x2608] sm:$0xff]  ;;  %876 = vst [vmem:[%s11879_s20 + $0x978] sm:$0xff] %v875_v47 }
  0xad   : > { %878 = vst [vmem:[%s11879_s20 + $0x980] sm:$0xff] %v877_v48  ;;  %880 = vst [vmem:[%s11879_s20 + $0x988] sm:$0xff] %v879_v49  ;;  %v881_v50 = vld [vmem:[%s11871_s19 + $0x2640] sm:$0xff]  ;;  %v883_v51 = vld [vmem:[%s11871_s19 + $0x2648] sm:$0xff] }
  0xae   : > { %v885_v52 = vld [vmem:[%s11871_s19 + $0x2680] sm:$0xff]  ;;  %882 = vst [vmem:[%s11879_s20 + $0x990] sm:$0xff] %v881_v50  ;;  %884 = vst [vmem:[%s11879_s20 + $0x998] sm:$0xff] %v883_v51  ;;  %v887_v53 = vld [vmem:[%s11871_s19 + $0x2688] sm:$0xff] }
  0xaf   : > { %886 = vst [vmem:[%s11879_s20 + $0x9a0] sm:$0xff] %v885_v52  ;;  %v889_v54 = vld [vmem:[%s11871_s19 + $0x26c0] sm:$0xff]  ;;  %v891_v55 = vld [vmem:[%s11871_s19 + $0x26c8] sm:$0xff]  ;;  %888 = vst [vmem:[%s11879_s20 + $0x9a8] sm:$0xff] %v887_v53 }
  0xb0   : > { %890 = vst [vmem:[%s11879_s20 + $0x9b0] sm:$0xff] %v889_v54  ;;  %892 = vst [vmem:[%s11879_s20 + $0x9b8] sm:$0xff] %v891_v55  ;;  %v893_v56 = vld [vmem:[%s11871_s19 + $0x2700] sm:$0xff]  ;;  %v895_v57 = vld [vmem:[%s11871_s19 + $0x2708] sm:$0xff] }
  0xb1   : > { %v897_v58 = vld [vmem:[%s11871_s19 + $0x2740] sm:$0xff]  ;;  %894 = vst [vmem:[%s11879_s20 + $0x9c0] sm:$0xff] %v893_v56  ;;  %896 = vst [vmem:[%s11879_s20 + $0x9c8] sm:$0xff] %v895_v57  ;;  %v899_v59 = vld [vmem:[%s11871_s19 + $0x2748] sm:$0xff] }
  0xb2   : > { %898 = vst [vmem:[%s11879_s20 + $0x9d0] sm:$0xff] %v897_v58  ;;  %v901_v60 = vld [vmem:[%s11871_s19 + $0x2780] sm:$0xff]  ;;  %v903_v61 = vld [vmem:[%s11871_s19 + $0x2788] sm:$0xff]  ;;  %900 = vst [vmem:[%s11879_s20 + $0x9d8] sm:$0xff] %v899_v59 }
  0xb3   : > { %902 = vst [vmem:[%s11879_s20 + $0x9e0] sm:$0xff] %v901_v60  ;;  %904 = vst [vmem:[%s11879_s20 + $0x9e8] sm:$0xff] %v903_v61  ;;  %v905_v62 = vld [vmem:[%s11871_s19 + $0x27c0] sm:$0xff]  ;;  %v907_v63 = vld [vmem:[%s11871_s19 + $0x27c8] sm:$0xff] }
  0xb4   : > { %v909_v0 = vld [vmem:[%s11871_s19 + $0x2800] sm:$0xff]  ;;  %906 = vst [vmem:[%s11879_s20 + $0x9f0] sm:$0xff] %v905_v62  ;;  %908 = vst [vmem:[%s11879_s20 + $0x9f8] sm:$0xff] %v907_v63  ;;  %v911_v1 = vld [vmem:[%s11871_s19 + $0x2808] sm:$0xff] }
  0xb5   : > { %910 = vst [vmem:[%s11879_s20 + $0xa00] sm:$0xff] %v909_v0  ;;  %v913_v2 = vld [vmem:[%s11871_s19 + $0x2840] sm:$0xff]  ;;  %v915_v3 = vld [vmem:[%s11871_s19 + $0x2848] sm:$0xff]  ;;  %912 = vst [vmem:[%s11879_s20 + $0xa08] sm:$0xff] %v911_v1 }
  0xb6   : > { %914 = vst [vmem:[%s11879_s20 + $0xa10] sm:$0xff] %v913_v2  ;;  %916 = vst [vmem:[%s11879_s20 + $0xa18] sm:$0xff] %v915_v3  ;;  %v917_v4 = vld [vmem:[%s11871_s19 + $0x2880] sm:$0xff]  ;;  %v919_v5 = vld [vmem:[%s11871_s19 + $0x2888] sm:$0xff] }
  0xb7   : > { %v921_v6 = vld [vmem:[%s11871_s19 + $0x28c0] sm:$0xff]  ;;  %918 = vst [vmem:[%s11879_s20 + $0xa20] sm:$0xff] %v917_v4  ;;  %920 = vst [vmem:[%s11879_s20 + $0xa28] sm:$0xff] %v919_v5  ;;  %v923_v7 = vld [vmem:[%s11871_s19 + $0x28c8] sm:$0xff] }
  0xb8   : > { %922 = vst [vmem:[%s11879_s20 + $0xa30] sm:$0xff] %v921_v6  ;;  %v925_v8 = vld [vmem:[%s11871_s19 + $0x2900] sm:$0xff]  ;;  %v927_v9 = vld [vmem:[%s11871_s19 + $0x2908] sm:$0xff]  ;;  %924 = vst [vmem:[%s11879_s20 + $0xa38] sm:$0xff] %v923_v7 }
  0xb9   : > { %926 = vst [vmem:[%s11879_s20 + $0xa40] sm:$0xff] %v925_v8  ;;  %928 = vst [vmem:[%s11879_s20 + $0xa48] sm:$0xff] %v927_v9  ;;  %v929_v10 = vld [vmem:[%s11871_s19 + $0x2940] sm:$0xff]  ;;  %v931_v11 = vld [vmem:[%s11871_s19 + $0x2948] sm:$0xff] }
  0xba   : > { %v933_v12 = vld [vmem:[%s11871_s19 + $0x2980] sm:$0xff]  ;;  %930 = vst [vmem:[%s11879_s20 + $0xa50] sm:$0xff] %v929_v10  ;;  %932 = vst [vmem:[%s11879_s20 + $0xa58] sm:$0xff] %v931_v11  ;;  %v935_v13 = vld [vmem:[%s11871_s19 + $0x2988] sm:$0xff] }
  0xbb   : > { %934 = vst [vmem:[%s11879_s20 + $0xa60] sm:$0xff] %v933_v12  ;;  %v937_v14 = vld [vmem:[%s11871_s19 + $0x29c0] sm:$0xff]  ;;  %v939_v15 = vld [vmem:[%s11871_s19 + $0x29c8] sm:$0xff]  ;;  %936 = vst [vmem:[%s11879_s20 + $0xa68] sm:$0xff] %v935_v13 }
  0xbc   : > { %938 = vst [vmem:[%s11879_s20 + $0xa70] sm:$0xff] %v937_v14  ;;  %940 = vst [vmem:[%s11879_s20 + $0xa78] sm:$0xff] %v939_v15  ;;  %v941_v16 = vld [vmem:[%s11871_s19 + $0x2a00] sm:$0xff]  ;;  %v943_v17 = vld [vmem:[%s11871_s19 + $0x2a08] sm:$0xff] }
  0xbd   : > { %v945_v18 = vld [vmem:[%s11871_s19 + $0x2a40] sm:$0xff]  ;;  %942 = vst [vmem:[%s11879_s20 + $0xa80] sm:$0xff] %v941_v16  ;;  %944 = vst [vmem:[%s11879_s20 + $0xa88] sm:$0xff] %v943_v17  ;;  %v947_v19 = vld [vmem:[%s11871_s19 + $0x2a48] sm:$0xff] }
  0xbe   : > { %946 = vst [vmem:[%s11879_s20 + $0xa90] sm:$0xff] %v945_v18  ;;  %v949_v20 = vld [vmem:[%s11871_s19 + $0x2a80] sm:$0xff]  ;;  %v951_v21 = vld [vmem:[%s11871_s19 + $0x2a88] sm:$0xff]  ;;  %948 = vst [vmem:[%s11879_s20 + $0xa98] sm:$0xff] %v947_v19 }
  0xbf   : > { %950 = vst [vmem:[%s11879_s20 + $0xaa0] sm:$0xff] %v949_v20  ;;  %952 = vst [vmem:[%s11879_s20 + $0xaa8] sm:$0xff] %v951_v21  ;;  %v953_v22 = vld [vmem:[%s11871_s19 + $0x2ac0] sm:$0xff]  ;;  %v955_v23 = vld [vmem:[%s11871_s19 + $0x2ac8] sm:$0xff] }
  0xc0   : > { %v957_v24 = vld [vmem:[%s11871_s19 + $0x2b00] sm:$0xff]  ;;  %954 = vst [vmem:[%s11879_s20 + $0xab0] sm:$0xff] %v953_v22  ;;  %956 = vst [vmem:[%s11879_s20 + $0xab8] sm:$0xff] %v955_v23  ;;  %v959_v25 = vld [vmem:[%s11871_s19 + $0x2b08] sm:$0xff] }
  0xc1   : > { %958 = vst [vmem:[%s11879_s20 + $0xac0] sm:$0xff] %v957_v24  ;;  %v961_v26 = vld [vmem:[%s11871_s19 + $0x2b40] sm:$0xff]  ;;  %v963_v27 = vld [vmem:[%s11871_s19 + $0x2b48] sm:$0xff]  ;;  %960 = vst [vmem:[%s11879_s20 + $0xac8] sm:$0xff] %v959_v25 }
  0xc2   : > { %962 = vst [vmem:[%s11879_s20 + $0xad0] sm:$0xff] %v961_v26  ;;  %964 = vst [vmem:[%s11879_s20 + $0xad8] sm:$0xff] %v963_v27  ;;  %v965_v28 = vld [vmem:[%s11871_s19 + $0x2b80] sm:$0xff]  ;;  %v967_v29 = vld [vmem:[%s11871_s19 + $0x2b88] sm:$0xff] }
  0xc3   : > { %v969_v30 = vld [vmem:[%s11871_s19 + $0x2bc0] sm:$0xff]  ;;  %966 = vst [vmem:[%s11879_s20 + $0xae0] sm:$0xff] %v965_v28  ;;  %968 = vst [vmem:[%s11879_s20 + $0xae8] sm:$0xff] %v967_v29  ;;  %v971_v31 = vld [vmem:[%s11871_s19 + $0x2bc8] sm:$0xff] }
  0xc4   : > { %970 = vst [vmem:[%s11879_s20 + $0xaf0] sm:$0xff] %v969_v30  ;;  %v973_v32 = vld [vmem:[%s11871_s19 + $0x2c00] sm:$0xff]  ;;  %v975_v33 = vld [vmem:[%s11871_s19 + $0x2c08] sm:$0xff]  ;;  %972 = vst [vmem:[%s11879_s20 + $0xaf8] sm:$0xff] %v971_v31 }
  0xc5   : > { %974 = vst [vmem:[%s11879_s20 + $0xb00] sm:$0xff] %v973_v32  ;;  %976 = vst [vmem:[%s11879_s20 + $0xb08] sm:$0xff] %v975_v33  ;;  %v977_v34 = vld [vmem:[%s11871_s19 + $0x2c40] sm:$0xff]  ;;  %v979_v35 = vld [vmem:[%s11871_s19 + $0x2c48] sm:$0xff] }
  0xc6   : > { %v981_v36 = vld [vmem:[%s11871_s19 + $0x2c80] sm:$0xff]  ;;  %978 = vst [vmem:[%s11879_s20 + $0xb10] sm:$0xff] %v977_v34  ;;  %980 = vst [vmem:[%s11879_s20 + $0xb18] sm:$0xff] %v979_v35  ;;  %v983_v37 = vld [vmem:[%s11871_s19 + $0x2c88] sm:$0xff] }
  0xc7   : > { %982 = vst [vmem:[%s11879_s20 + $0xb20] sm:$0xff] %v981_v36  ;;  %v985_v38 = vld [vmem:[%s11871_s19 + $0x2cc0] sm:$0xff]  ;;  %v987_v39 = vld [vmem:[%s11871_s19 + $0x2cc8] sm:$0xff]  ;;  %984 = vst [vmem:[%s11879_s20 + $0xb28] sm:$0xff] %v983_v37 }
  0xc8   : > { %986 = vst [vmem:[%s11879_s20 + $0xb30] sm:$0xff] %v985_v38  ;;  %988 = vst [vmem:[%s11879_s20 + $0xb38] sm:$0xff] %v987_v39  ;;  %v989_v40 = vld [vmem:[%s11871_s19 + $0x2d00] sm:$0xff]  ;;  %v991_v41 = vld [vmem:[%s11871_s19 + $0x2d08] sm:$0xff] }
  0xc9   : > { %v993_v42 = vld [vmem:[%s11871_s19 + $0x2d40] sm:$0xff]  ;;  %990 = vst [vmem:[%s11879_s20 + $0xb40] sm:$0xff] %v989_v40  ;;  %992 = vst [vmem:[%s11879_s20 + $0xb48] sm:$0xff] %v991_v41  ;;  %v995_v43 = vld [vmem:[%s11871_s19 + $0x2d48] sm:$0xff] }
  0xca   : > { %994 = vst [vmem:[%s11879_s20 + $0xb50] sm:$0xff] %v993_v42  ;;  %v997_v44 = vld [vmem:[%s11871_s19 + $0x2d80] sm:$0xff]  ;;  %v999_v45 = vld [vmem:[%s11871_s19 + $0x2d88] sm:$0xff]  ;;  %996 = vst [vmem:[%s11879_s20 + $0xb58] sm:$0xff] %v995_v43 }
  0xcb   : > { %998 = vst [vmem:[%s11879_s20 + $0xb60] sm:$0xff] %v997_v44  ;;  %1000 = vst [vmem:[%s11879_s20 + $0xb68] sm:$0xff] %v999_v45  ;;  %v1001_v46 = vld [vmem:[%s11871_s19 + $0x2dc0] sm:$0xff]  ;;  %v1003_v47 = vld [vmem:[%s11871_s19 + $0x2dc8] sm:$0xff] }
  0xcc   : > { %v1005_v48 = vld [vmem:[%s11871_s19 + $0x2e00] sm:$0xff]  ;;  %1002 = vst [vmem:[%s11879_s20 + $0xb70] sm:$0xff] %v1001_v46  ;;  %1004 = vst [vmem:[%s11879_s20 + $0xb78] sm:$0xff] %v1003_v47  ;;  %v1007_v49 = vld [vmem:[%s11871_s19 + $0x2e08] sm:$0xff] }
  0xcd   : > { %1006 = vst [vmem:[%s11879_s20 + $0xb80] sm:$0xff] %v1005_v48  ;;  %v1009_v50 = vld [vmem:[%s11871_s19 + $0x2e40] sm:$0xff]  ;;  %v1011_v51 = vld [vmem:[%s11871_s19 + $0x2e48] sm:$0xff]  ;;  %1008 = vst [vmem:[%s11879_s20 + $0xb88] sm:$0xff] %v1007_v49 }
  0xce   : > { %1010 = vst [vmem:[%s11879_s20 + $0xb90] sm:$0xff] %v1009_v50  ;;  %1012 = vst [vmem:[%s11879_s20 + $0xb98] sm:$0xff] %v1011_v51  ;;  %v1013_v52 = vld [vmem:[%s11871_s19 + $0x2e80] sm:$0xff]  ;;  %v1015_v53 = vld [vmem:[%s11871_s19 + $0x2e88] sm:$0xff] }
  0xcf   : > { %v1017_v54 = vld [vmem:[%s11871_s19 + $0x2ec0] sm:$0xff]  ;;  %1014 = vst [vmem:[%s11879_s20 + $0xba0] sm:$0xff] %v1013_v52  ;;  %1016 = vst [vmem:[%s11879_s20 + $0xba8] sm:$0xff] %v1015_v53  ;;  %v1019_v55 = vld [vmem:[%s11871_s19 + $0x2ec8] sm:$0xff] }
  0xd0   : > { %1018 = vst [vmem:[%s11879_s20 + $0xbb0] sm:$0xff] %v1017_v54  ;;  %v1021_v56 = vld [vmem:[%s11871_s19 + $0x2f00] sm:$0xff]  ;;  %v1023_v57 = vld [vmem:[%s11871_s19 + $0x2f08] sm:$0xff]  ;;  %1020 = vst [vmem:[%s11879_s20 + $0xbb8] sm:$0xff] %v1019_v55 }
  0xd1   : > { %1022 = vst [vmem:[%s11879_s20 + $0xbc0] sm:$0xff] %v1021_v56  ;;  %1024 = vst [vmem:[%s11879_s20 + $0xbc8] sm:$0xff] %v1023_v57  ;;  %v1025_v58 = vld [vmem:[%s11871_s19 + $0x2f40] sm:$0xff]  ;;  %v1027_v59 = vld [vmem:[%s11871_s19 + $0x2f48] sm:$0xff] }
  0xd2   : > { %v1029_v60 = vld [vmem:[%s11871_s19 + $0x2f80] sm:$0xff]  ;;  %1026 = vst [vmem:[%s11879_s20 + $0xbd0] sm:$0xff] %v1025_v58  ;;  %1028 = vst [vmem:[%s11879_s20 + $0xbd8] sm:$0xff] %v1027_v59  ;;  %v1031_v61 = vld [vmem:[%s11871_s19 + $0x2f88] sm:$0xff] }
  0xd3   : > { %1030 = vst [vmem:[%s11879_s20 + $0xbe0] sm:$0xff] %v1029_v60  ;;  %v1033_v62 = vld [vmem:[%s11871_s19 + $0x2fc0] sm:$0xff]  ;;  %v1035_v63 = vld [vmem:[%s11871_s19 + $0x2fc8] sm:$0xff]  ;;  %1032 = vst [vmem:[%s11879_s20 + $0xbe8] sm:$0xff] %v1031_v61 }
  0xd4   : > { %1034 = vst [vmem:[%s11879_s20 + $0xbf0] sm:$0xff] %v1033_v62  ;;  %1036 = vst [vmem:[%s11879_s20 + $0xbf8] sm:$0xff] %v1035_v63  ;;  %v1037_v0 = vld [vmem:[%s11871_s19 + $0x3000] sm:$0xff]  ;;  %v1039_v1 = vld [vmem:[%s11871_s19 + $0x3008] sm:$0xff] }
  0xd5   : > { %v1041_v2 = vld [vmem:[%s11871_s19 + $0x3040] sm:$0xff]  ;;  %1038 = vst [vmem:[%s11879_s20 + $0xc00] sm:$0xff] %v1037_v0  ;;  %1040 = vst [vmem:[%s11879_s20 + $0xc08] sm:$0xff] %v1039_v1  ;;  %v1043_v3 = vld [vmem:[%s11871_s19 + $0x3048] sm:$0xff] }
  0xd6   : > { %1042 = vst [vmem:[%s11879_s20 + $0xc10] sm:$0xff] %v1041_v2  ;;  %v1045_v4 = vld [vmem:[%s11871_s19 + $0x3080] sm:$0xff]  ;;  %v1047_v5 = vld [vmem:[%s11871_s19 + $0x3088] sm:$0xff]  ;;  %1044 = vst [vmem:[%s11879_s20 + $0xc18] sm:$0xff] %v1043_v3 }
  0xd7   : > { %1046 = vst [vmem:[%s11879_s20 + $0xc20] sm:$0xff] %v1045_v4  ;;  %1048 = vst [vmem:[%s11879_s20 + $0xc28] sm:$0xff] %v1047_v5  ;;  %v1049_v6 = vld [vmem:[%s11871_s19 + $0x30c0] sm:$0xff]  ;;  %v1051_v7 = vld [vmem:[%s11871_s19 + $0x30c8] sm:$0xff] }
  0xd8   : > { %v1053_v8 = vld [vmem:[%s11871_s19 + $0x3100] sm:$0xff]  ;;  %1050 = vst [vmem:[%s11879_s20 + $0xc30] sm:$0xff] %v1049_v6  ;;  %1052 = vst [vmem:[%s11879_s20 + $0xc38] sm:$0xff] %v1051_v7  ;;  %v1055_v9 = vld [vmem:[%s11871_s19 + $0x3108] sm:$0xff] }
  0xd9   : > { %1054 = vst [vmem:[%s11879_s20 + $0xc40] sm:$0xff] %v1053_v8  ;;  %v1057_v10 = vld [vmem:[%s11871_s19 + $0x3140] sm:$0xff]  ;;  %v1059_v11 = vld [vmem:[%s11871_s19 + $0x3148] sm:$0xff]  ;;  %1056 = vst [vmem:[%s11879_s20 + $0xc48] sm:$0xff] %v1055_v9 }
  0xda   : > { %1058 = vst [vmem:[%s11879_s20 + $0xc50] sm:$0xff] %v1057_v10  ;;  %1060 = vst [vmem:[%s11879_s20 + $0xc58] sm:$0xff] %v1059_v11  ;;  %v1061_v12 = vld [vmem:[%s11871_s19 + $0x3180] sm:$0xff]  ;;  %v1063_v13 = vld [vmem:[%s11871_s19 + $0x3188] sm:$0xff] }
  0xdb   : > { %v1065_v14 = vld [vmem:[%s11871_s19 + $0x31c0] sm:$0xff]  ;;  %1062 = vst [vmem:[%s11879_s20 + $0xc60] sm:$0xff] %v1061_v12  ;;  %1064 = vst [vmem:[%s11879_s20 + $0xc68] sm:$0xff] %v1063_v13  ;;  %v1067_v15 = vld [vmem:[%s11871_s19 + $0x31c8] sm:$0xff] }
  0xdc   : > { %1066 = vst [vmem:[%s11879_s20 + $0xc70] sm:$0xff] %v1065_v14  ;;  %v1069_v16 = vld [vmem:[%s11871_s19 + $0x3200] sm:$0xff]  ;;  %v1071_v17 = vld [vmem:[%s11871_s19 + $0x3208] sm:$0xff]  ;;  %1068 = vst [vmem:[%s11879_s20 + $0xc78] sm:$0xff] %v1067_v15 }
  0xdd   : > { %1070 = vst [vmem:[%s11879_s20 + $0xc80] sm:$0xff] %v1069_v16  ;;  %1072 = vst [vmem:[%s11879_s20 + $0xc88] sm:$0xff] %v1071_v17  ;;  %v1073_v18 = vld [vmem:[%s11871_s19 + $0x3240] sm:$0xff]  ;;  %v1075_v19 = vld [vmem:[%s11871_s19 + $0x3248] sm:$0xff] }
  0xde   : > { %v1077_v20 = vld [vmem:[%s11871_s19 + $0x3280] sm:$0xff]  ;;  %1074 = vst [vmem:[%s11879_s20 + $0xc90] sm:$0xff] %v1073_v18  ;;  %1076 = vst [vmem:[%s11879_s20 + $0xc98] sm:$0xff] %v1075_v19  ;;  %v1079_v21 = vld [vmem:[%s11871_s19 + $0x3288] sm:$0xff] }
  0xdf   : > { %1078 = vst [vmem:[%s11879_s20 + $0xca0] sm:$0xff] %v1077_v20  ;;  %v1081_v22 = vld [vmem:[%s11871_s19 + $0x32c0] sm:$0xff]  ;;  %v1083_v23 = vld [vmem:[%s11871_s19 + $0x32c8] sm:$0xff]  ;;  %1080 = vst [vmem:[%s11879_s20 + $0xca8] sm:$0xff] %v1079_v21 }
  0xe0   : > { %1082 = vst [vmem:[%s11879_s20 + $0xcb0] sm:$0xff] %v1081_v22  ;;  %1084 = vst [vmem:[%s11879_s20 + $0xcb8] sm:$0xff] %v1083_v23  ;;  %v1085_v24 = vld [vmem:[%s11871_s19 + $0x3300] sm:$0xff]  ;;  %v1087_v25 = vld [vmem:[%s11871_s19 + $0x3308] sm:$0xff] }
  0xe1   : > { %v1089_v26 = vld [vmem:[%s11871_s19 + $0x3340] sm:$0xff]  ;;  %1086 = vst [vmem:[%s11879_s20 + $0xcc0] sm:$0xff] %v1085_v24  ;;  %1088 = vst [vmem:[%s11879_s20 + $0xcc8] sm:$0xff] %v1087_v25  ;;  %v1091_v27 = vld [vmem:[%s11871_s19 + $0x3348] sm:$0xff] }
  0xe2   : > { %1090 = vst [vmem:[%s11879_s20 + $0xcd0] sm:$0xff] %v1089_v26  ;;  %v1093_v28 = vld [vmem:[%s11871_s19 + $0x3380] sm:$0xff]  ;;  %v1095_v29 = vld [vmem:[%s11871_s19 + $0x3388] sm:$0xff]  ;;  %1092 = vst [vmem:[%s11879_s20 + $0xcd8] sm:$0xff] %v1091_v27 }
  0xe3   : > { %1094 = vst [vmem:[%s11879_s20 + $0xce0] sm:$0xff] %v1093_v28  ;;  %1096 = vst [vmem:[%s11879_s20 + $0xce8] sm:$0xff] %v1095_v29  ;;  %v1097_v30 = vld [vmem:[%s11871_s19 + $0x33c0] sm:$0xff]  ;;  %v1099_v31 = vld [vmem:[%s11871_s19 + $0x33c8] sm:$0xff] }
  0xe4   : > { %v1101_v32 = vld [vmem:[%s11871_s19 + $0x3400] sm:$0xff]  ;;  %1098 = vst [vmem:[%s11879_s20 + $0xcf0] sm:$0xff] %v1097_v30  ;;  %1100 = vst [vmem:[%s11879_s20 + $0xcf8] sm:$0xff] %v1099_v31  ;;  %v1103_v33 = vld [vmem:[%s11871_s19 + $0x3408] sm:$0xff] }
  0xe5   : > { %1102 = vst [vmem:[%s11879_s20 + $0xd00] sm:$0xff] %v1101_v32  ;;  %v1105_v34 = vld [vmem:[%s11871_s19 + $0x3440] sm:$0xff]  ;;  %v1107_v35 = vld [vmem:[%s11871_s19 + $0x3448] sm:$0xff]  ;;  %1104 = vst [vmem:[%s11879_s20 + $0xd08] sm:$0xff] %v1103_v33 }
  0xe6   : > { %1106 = vst [vmem:[%s11879_s20 + $0xd10] sm:$0xff] %v1105_v34  ;;  %1108 = vst [vmem:[%s11879_s20 + $0xd18] sm:$0xff] %v1107_v35  ;;  %v1109_v36 = vld [vmem:[%s11871_s19 + $0x3480] sm:$0xff]  ;;  %v1111_v37 = vld [vmem:[%s11871_s19 + $0x3488] sm:$0xff] }
  0xe7   : > { %v1113_v38 = vld [vmem:[%s11871_s19 + $0x34c0] sm:$0xff]  ;;  %1110 = vst [vmem:[%s11879_s20 + $0xd20] sm:$0xff] %v1109_v36  ;;  %1112 = vst [vmem:[%s11879_s20 + $0xd28] sm:$0xff] %v1111_v37  ;;  %v1115_v39 = vld [vmem:[%s11871_s19 + $0x34c8] sm:$0xff] }
  0xe8   : > { %1114 = vst [vmem:[%s11879_s20 + $0xd30] sm:$0xff] %v1113_v38  ;;  %v1117_v40 = vld [vmem:[%s11871_s19 + $0x3500] sm:$0xff]  ;;  %v1119_v41 = vld [vmem:[%s11871_s19 + $0x3508] sm:$0xff]  ;;  %1116 = vst [vmem:[%s11879_s20 + $0xd38] sm:$0xff] %v1115_v39 }
  0xe9   : > { %1118 = vst [vmem:[%s11879_s20 + $0xd40] sm:$0xff] %v1117_v40  ;;  %1120 = vst [vmem:[%s11879_s20 + $0xd48] sm:$0xff] %v1119_v41  ;;  %v1121_v42 = vld [vmem:[%s11871_s19 + $0x3540] sm:$0xff]  ;;  %v1123_v43 = vld [vmem:[%s11871_s19 + $0x3548] sm:$0xff] }
  0xea   : > { %v1125_v44 = vld [vmem:[%s11871_s19 + $0x3580] sm:$0xff]  ;;  %1122 = vst [vmem:[%s11879_s20 + $0xd50] sm:$0xff] %v1121_v42  ;;  %1124 = vst [vmem:[%s11879_s20 + $0xd58] sm:$0xff] %v1123_v43  ;;  %v1127_v45 = vld [vmem:[%s11871_s19 + $0x3588] sm:$0xff] }
  0xeb   : > { %1126 = vst [vmem:[%s11879_s20 + $0xd60] sm:$0xff] %v1125_v44  ;;  %v1129_v46 = vld [vmem:[%s11871_s19 + $0x35c0] sm:$0xff]  ;;  %v1131_v47 = vld [vmem:[%s11871_s19 + $0x35c8] sm:$0xff]  ;;  %1128 = vst [vmem:[%s11879_s20 + $0xd68] sm:$0xff] %v1127_v45 }
  0xec   : > { %1130 = vst [vmem:[%s11879_s20 + $0xd70] sm:$0xff] %v1129_v46  ;;  %1132 = vst [vmem:[%s11879_s20 + $0xd78] sm:$0xff] %v1131_v47  ;;  %v1133_v48 = vld [vmem:[%s11871_s19 + $0x3600] sm:$0xff]  ;;  %v1135_v49 = vld [vmem:[%s11871_s19 + $0x3608] sm:$0xff] }
  0xed   : > { %v1137_v50 = vld [vmem:[%s11871_s19 + $0x3640] sm:$0xff]  ;;  %1134 = vst [vmem:[%s11879_s20 + $0xd80] sm:$0xff] %v1133_v48  ;;  %1136 = vst [vmem:[%s11879_s20 + $0xd88] sm:$0xff] %v1135_v49  ;;  %v1139_v51 = vld [vmem:[%s11871_s19 + $0x3648] sm:$0xff] }
  0xee   : > { %1138 = vst [vmem:[%s11879_s20 + $0xd90] sm:$0xff] %v1137_v50  ;;  %v1141_v52 = vld [vmem:[%s11871_s19 + $0x3680] sm:$0xff]  ;;  %v1143_v53 = vld [vmem:[%s11871_s19 + $0x3688] sm:$0xff]  ;;  %1140 = vst [vmem:[%s11879_s20 + $0xd98] sm:$0xff] %v1139_v51 }
  0xef   : > { %1142 = vst [vmem:[%s11879_s20 + $0xda0] sm:$0xff] %v1141_v52  ;;  %1144 = vst [vmem:[%s11879_s20 + $0xda8] sm:$0xff] %v1143_v53  ;;  %v1145_v54 = vld [vmem:[%s11871_s19 + $0x36c0] sm:$0xff]  ;;  %v1147_v55 = vld [vmem:[%s11871_s19 + $0x36c8] sm:$0xff] }
  0xf0   : > { %v1149_v56 = vld [vmem:[%s11871_s19 + $0x3700] sm:$0xff]  ;;  %1146 = vst [vmem:[%s11879_s20 + $0xdb0] sm:$0xff] %v1145_v54  ;;  %1148 = vst [vmem:[%s11879_s20 + $0xdb8] sm:$0xff] %v1147_v55  ;;  %v1151_v57 = vld [vmem:[%s11871_s19 + $0x3708] sm:$0xff] }
  0xf1   : > { %1150 = vst [vmem:[%s11879_s20 + $0xdc0] sm:$0xff] %v1149_v56  ;;  %v1153_v58 = vld [vmem:[%s11871_s19 + $0x3740] sm:$0xff]  ;;  %v1155_v59 = vld [vmem:[%s11871_s19 + $0x3748] sm:$0xff]  ;;  %1152 = vst [vmem:[%s11879_s20 + $0xdc8] sm:$0xff] %v1151_v57 }
  0xf2   : > { %1154 = vst [vmem:[%s11879_s20 + $0xdd0] sm:$0xff] %v1153_v58  ;;  %1156 = vst [vmem:[%s11879_s20 + $0xdd8] sm:$0xff] %v1155_v59  ;;  %v1157_v60 = vld [vmem:[%s11871_s19 + $0x3780] sm:$0xff]  ;;  %v1159_v61 = vld [vmem:[%s11871_s19 + $0x3788] sm:$0xff] }
  0xf3   : > { %v1161_v62 = vld [vmem:[%s11871_s19 + $0x37c0] sm:$0xff]  ;;  %1158 = vst [vmem:[%s11879_s20 + $0xde0] sm:$0xff] %v1157_v60  ;;  %1160 = vst [vmem:[%s11879_s20 + $0xde8] sm:$0xff] %v1159_v61  ;;  %v1163_v63 = vld [vmem:[%s11871_s19 + $0x37c8] sm:$0xff] }
  0xf4   : > { %1162 = vst [vmem:[%s11879_s20 + $0xdf0] sm:$0xff] %v1161_v62  ;;  %v1165_v0 = vld [vmem:[%s11871_s19 + $0x3800] sm:$0xff]  ;;  %v1167_v1 = vld [vmem:[%s11871_s19 + $0x3808] sm:$0xff]  ;;  %1164 = vst [vmem:[%s11879_s20 + $0xdf8] sm:$0xff] %v1163_v63 }
  0xf5   : > { %1166 = vst [vmem:[%s11879_s20 + $0xe00] sm:$0xff] %v1165_v0  ;;  %1168 = vst [vmem:[%s11879_s20 + $0xe08] sm:$0xff] %v1167_v1  ;;  %v1169_v2 = vld [vmem:[%s11871_s19 + $0x3840] sm:$0xff]  ;;  %v1171_v3 = vld [vmem:[%s11871_s19 + $0x3848] sm:$0xff] }
  0xf6   : > { %v1173_v4 = vld [vmem:[%s11871_s19 + $0x3880] sm:$0xff]  ;;  %1170 = vst [vmem:[%s11879_s20 + $0xe10] sm:$0xff] %v1169_v2  ;;  %1172 = vst [vmem:[%s11879_s20 + $0xe18] sm:$0xff] %v1171_v3  ;;  %v1175_v5 = vld [vmem:[%s11871_s19 + $0x3888] sm:$0xff] }
  0xf7   : > { %1174 = vst [vmem:[%s11879_s20 + $0xe20] sm:$0xff] %v1173_v4  ;;  %v1177_v6 = vld [vmem:[%s11871_s19 + $0x38c0] sm:$0xff]  ;;  %v1179_v7 = vld [vmem:[%s11871_s19 + $0x38c8] sm:$0xff]  ;;  %1176 = vst [vmem:[%s11879_s20 + $0xe28] sm:$0xff] %v1175_v5 }
  0xf8   : > { %1178 = vst [vmem:[%s11879_s20 + $0xe30] sm:$0xff] %v1177_v6  ;;  %1180 = vst [vmem:[%s11879_s20 + $0xe38] sm:$0xff] %v1179_v7  ;;  %v1181_v8 = vld [vmem:[%s11871_s19 + $0x3900] sm:$0xff]  ;;  %v1183_v9 = vld [vmem:[%s11871_s19 + $0x3908] sm:$0xff] }
  0xf9   : > { %v1185_v10 = vld [vmem:[%s11871_s19 + $0x3940] sm:$0xff]  ;;  %1182 = vst [vmem:[%s11879_s20 + $0xe40] sm:$0xff] %v1181_v8  ;;  %1184 = vst [vmem:[%s11879_s20 + $0xe48] sm:$0xff] %v1183_v9  ;;  %v1187_v11 = vld [vmem:[%s11871_s19 + $0x3948] sm:$0xff] }
  0xfa   : > { %1186 = vst [vmem:[%s11879_s20 + $0xe50] sm:$0xff] %v1185_v10  ;;  %v1189_v12 = vld [vmem:[%s11871_s19 + $0x3980] sm:$0xff]  ;;  %v1191_v13 = vld [vmem:[%s11871_s19 + $0x3988] sm:$0xff]  ;;  %1188 = vst [vmem:[%s11879_s20 + $0xe58] sm:$0xff] %v1187_v11 }
  0xfb   : > { %1190 = vst [vmem:[%s11879_s20 + $0xe60] sm:$0xff] %v1189_v12  ;;  %1192 = vst [vmem:[%s11879_s20 + $0xe68] sm:$0xff] %v1191_v13  ;;  %v1193_v14 = vld [vmem:[%s11871_s19 + $0x39c0] sm:$0xff]  ;;  %v1195_v15 = vld [vmem:[%s11871_s19 + $0x39c8] sm:$0xff] }
  0xfc   : > { %v1197_v16 = vld [vmem:[%s11871_s19 + $0x3a00] sm:$0xff]  ;;  %1194 = vst [vmem:[%s11879_s20 + $0xe70] sm:$0xff] %v1193_v14  ;;  %1196 = vst [vmem:[%s11879_s20 + $0xe78] sm:$0xff] %v1195_v15  ;;  %v1199_v17 = vld [vmem:[%s11871_s19 + $0x3a08] sm:$0xff] }
  0xfd   : > { %1198 = vst [vmem:[%s11879_s20 + $0xe80] sm:$0xff] %v1197_v16  ;;  %v1201_v18 = vld [vmem:[%s11871_s19 + $0x3a40] sm:$0xff]  ;;  %v1203_v19 = vld [vmem:[%s11871_s19 + $0x3a48] sm:$0xff]  ;;  %1200 = vst [vmem:[%s11879_s20 + $0xe88] sm:$0xff] %v1199_v17 }
  0xfe   : > { %1202 = vst [vmem:[%s11879_s20 + $0xe90] sm:$0xff] %v1201_v18  ;;  %1204 = vst [vmem:[%s11879_s20 + $0xe98] sm:$0xff] %v1203_v19  ;;  %v1205_v20 = vld [vmem:[%s11871_s19 + $0x3a80] sm:$0xff]  ;;  %v1207_v21 = vld [vmem:[%s11871_s19 + $0x3a88] sm:$0xff] }
  0xff   : > { %v1209_v22 = vld [vmem:[%s11871_s19 + $0x3ac0] sm:$0xff]  ;;  %1206 = vst [vmem:[%s11879_s20 + $0xea0] sm:$0xff] %v1205_v20  ;;  %1208 = vst [vmem:[%s11879_s20 + $0xea8] sm:$0xff] %v1207_v21  ;;  %v1211_v23 = vld [vmem:[%s11871_s19 + $0x3ac8] sm:$0xff] }
 0x100   : > { %1210 = vst [vmem:[%s11879_s20 + $0xeb0] sm:$0xff] %v1209_v22  ;;  %v1213_v24 = vld [vmem:[%s11871_s19 + $0x3b00] sm:$0xff]  ;;  %v1215_v25 = vld [vmem:[%s11871_s19 + $0x3b08] sm:$0xff]  ;;  %1212 = vst [vmem:[%s11879_s20 + $0xeb8] sm:$0xff] %v1211_v23 }
 0x101   : > { %1214 = vst [vmem:[%s11879_s20 + $0xec0] sm:$0xff] %v1213_v24  ;;  %1216 = vst [vmem:[%s11879_s20 + $0xec8] sm:$0xff] %v1215_v25  ;;  %v1217_v26 = vld [vmem:[%s11871_s19 + $0x3b40] sm:$0xff]  ;;  %v1219_v27 = vld [vmem:[%s11871_s19 + $0x3b48] sm:$0xff] }
 0x102   : > { %v1221_v28 = vld [vmem:[%s11871_s19 + $0x3b80] sm:$0xff]  ;;  %1218 = vst [vmem:[%s11879_s20 + $0xed0] sm:$0xff] %v1217_v26  ;;  %1220 = vst [vmem:[%s11879_s20 + $0xed8] sm:$0xff] %v1219_v27  ;;  %v1223_v29 = vld [vmem:[%s11871_s19 + $0x3b88] sm:$0xff] }
 0x103   : > { %1222 = vst [vmem:[%s11879_s20 + $0xee0] sm:$0xff] %v1221_v28  ;;  %v1225_v30 = vld [vmem:[%s11871_s19 + $0x3bc0] sm:$0xff]  ;;  %v1227_v31 = vld [vmem:[%s11871_s19 + $0x3bc8] sm:$0xff]  ;;  %1224 = vst [vmem:[%s11879_s20 + $0xee8] sm:$0xff] %v1223_v29 }
 0x104   : > { %1226 = vst [vmem:[%s11879_s20 + $0xef0] sm:$0xff] %v1225_v30  ;;  %1228 = vst [vmem:[%s11879_s20 + $0xef8] sm:$0xff] %v1227_v31  ;;  %v1229_v32 = vld [vmem:[%s11871_s19 + $0x3c00] sm:$0xff]  ;;  %v1231_v33 = vld [vmem:[%s11871_s19 + $0x3c08] sm:$0xff] }
 0x105   : > { %v1233_v34 = vld [vmem:[%s11871_s19 + $0x3c40] sm:$0xff]  ;;  %1230 = vst [vmem:[%s11879_s20 + $0xf00] sm:$0xff] %v1229_v32  ;;  %1232 = vst [vmem:[%s11879_s20 + $0xf08] sm:$0xff] %v1231_v33  ;;  %v1235_v35 = vld [vmem:[%s11871_s19 + $0x3c48] sm:$0xff] }
 0x106   : > { %1234 = vst [vmem:[%s11879_s20 + $0xf10] sm:$0xff] %v1233_v34  ;;  %v1237_v36 = vld [vmem:[%s11871_s19 + $0x3c80] sm:$0xff]  ;;  %v1239_v37 = vld [vmem:[%s11871_s19 + $0x3c88] sm:$0xff]  ;;  %1236 = vst [vmem:[%s11879_s20 + $0xf18] sm:$0xff] %v1235_v35 }
 0x107   : > { %1238 = vst [vmem:[%s11879_s20 + $0xf20] sm:$0xff] %v1237_v36  ;;  %1240 = vst [vmem:[%s11879_s20 + $0xf28] sm:$0xff] %v1239_v37  ;;  %v1241_v38 = vld [vmem:[%s11871_s19 + $0x3cc0] sm:$0xff]  ;;  %v1243_v39 = vld [vmem:[%s11871_s19 + $0x3cc8] sm:$0xff] }
 0x108   : > { %v1245_v40 = vld [vmem:[%s11871_s19 + $0x3d00] sm:$0xff]  ;;  %1242 = vst [vmem:[%s11879_s20 + $0xf30] sm:$0xff] %v1241_v38  ;;  %1244 = vst [vmem:[%s11879_s20 + $0xf38] sm:$0xff] %v1243_v39  ;;  %v1247_v41 = vld [vmem:[%s11871_s19 + $0x3d08] sm:$0xff] }
 0x109   : > { %1246 = vst [vmem:[%s11879_s20 + $0xf40] sm:$0xff] %v1245_v40  ;;  %v1249_v42 = vld [vmem:[%s11871_s19 + $0x3d40] sm:$0xff]  ;;  %v1251_v43 = vld [vmem:[%s11871_s19 + $0x3d48] sm:$0xff]  ;;  %1248 = vst [vmem:[%s11879_s20 + $0xf48] sm:$0xff] %v1247_v41 }
 0x10a   : > { %1250 = vst [vmem:[%s11879_s20 + $0xf50] sm:$0xff] %v1249_v42  ;;  %1252 = vst [vmem:[%s11879_s20 + $0xf58] sm:$0xff] %v1251_v43  ;;  %v1253_v44 = vld [vmem:[%s11871_s19 + $0x3d80] sm:$0xff]  ;;  %v1255_v45 = vld [vmem:[%s11871_s19 + $0x3d88] sm:$0xff] }
 0x10b   : > { %v1257_v46 = vld [vmem:[%s11871_s19 + $0x3dc0] sm:$0xff]  ;;  %1254 = vst [vmem:[%s11879_s20 + $0xf60] sm:$0xff] %v1253_v44  ;;  %1256 = vst [vmem:[%s11879_s20 + $0xf68] sm:$0xff] %v1255_v45  ;;  %v1259_v47 = vld [vmem:[%s11871_s19 + $0x3dc8] sm:$0xff] }
 0x10c   : > { %1258 = vst [vmem:[%s11879_s20 + $0xf70] sm:$0xff] %v1257_v46  ;;  %v1261_v48 = vld [vmem:[%s11871_s19 + $0x3e00] sm:$0xff]  ;;  %v1263_v49 = vld [vmem:[%s11871_s19 + $0x3e08] sm:$0xff]  ;;  %1260 = vst [vmem:[%s11879_s20 + $0xf78] sm:$0xff] %v1259_v47 }
 0x10d   : > { %1262 = vst [vmem:[%s11879_s20 + $0xf80] sm:$0xff] %v1261_v48  ;;  %1264 = vst [vmem:[%s11879_s20 + $0xf88] sm:$0xff] %v1263_v49  ;;  %v1265_v50 = vld [vmem:[%s11871_s19 + $0x3e40] sm:$0xff]  ;;  %v1267_v51 = vld [vmem:[%s11871_s19 + $0x3e48] sm:$0xff] }
 0x10e   : > { %v1269_v52 = vld [vmem:[%s11871_s19 + $0x3e80] sm:$0xff]  ;;  %1266 = vst [vmem:[%s11879_s20 + $0xf90] sm:$0xff] %v1265_v50  ;;  %1268 = vst [vmem:[%s11879_s20 + $0xf98] sm:$0xff] %v1267_v51  ;;  %v1271_v53 = vld [vmem:[%s11871_s19 + $0x3e88] sm:$0xff] }
 0x10f   : > { %1270 = vst [vmem:[%s11879_s20 + $0xfa0] sm:$0xff] %v1269_v52  ;;  %v1273_v54 = vld [vmem:[%s11871_s19 + $0x3ec0] sm:$0xff]  ;;  %v1275_v55 = vld [vmem:[%s11871_s19 + $0x3ec8] sm:$0xff]  ;;  %1272 = vst [vmem:[%s11879_s20 + $0xfa8] sm:$0xff] %v1271_v53 }
 0x110   : > { %1274 = vst [vmem:[%s11879_s20 + $0xfb0] sm:$0xff] %v1273_v54  ;;  %1276 = vst [vmem:[%s11879_s20 + $0xfb8] sm:$0xff] %v1275_v55  ;;  %v1277_v56 = vld [vmem:[%s11871_s19 + $0x3f00] sm:$0xff]  ;;  %v1279_v57 = vld [vmem:[%s11871_s19 + $0x3f08] sm:$0xff] }
 0x111   : > { %v1281_v58 = vld [vmem:[%s11871_s19 + $0x3f40] sm:$0xff]  ;;  %1278 = vst [vmem:[%s11879_s20 + $0xfc0] sm:$0xff] %v1277_v56  ;;  %1280 = vst [vmem:[%s11879_s20 + $0xfc8] sm:$0xff] %v1279_v57  ;;  %v1283_v59 = vld [vmem:[%s11871_s19 + $0x3f48] sm:$0xff] }
 0x112   : > { %1282 = vst [vmem:[%s11879_s20 + $0xfd0] sm:$0xff] %v1281_v58  ;;  %v1285_v60 = vld [vmem:[%s11871_s19 + $0x3f80] sm:$0xff]  ;;  %v1287_v61 = vld [vmem:[%s11871_s19 + $0x3f88] sm:$0xff]  ;;  %1284 = vst [vmem:[%s11879_s20 + $0xfd8] sm:$0xff] %v1283_v59 }
 0x113   : > { %1286 = vst [vmem:[%s11879_s20 + $0xfe0] sm:$0xff] %v1285_v60  ;;  %1288 = vst [vmem:[%s11879_s20 + $0xfe8] sm:$0xff] %v1287_v61  ;;  %v1289_v62 = vld [vmem:[%s11871_s19 + $0x3fc0] sm:$0xff]  ;;  %v1291_v63 = vld [vmem:[%s11871_s19 + $0x3fc8] sm:$0xff] }
 0x114   : > { %v1293_v0 = vld [vmem:[%s11871_s19 + $0x4000] sm:$0xff]  ;;  %1290 = vst [vmem:[%s11879_s20 + $0xff0] sm:$0xff] %v1289_v62  ;;  %1292 = vst [vmem:[%s11879_s20 + $0xff8] sm:$0xff] %v1291_v63  ;;  %v1295_v1 = vld [vmem:[%s11871_s19 + $0x4008] sm:$0xff] }
 0x115   : > { %1294 = vst [vmem:[%s11879_s20 + $0x1000] sm:$0xff] %v1293_v0  ;;  %v1297_v2 = vld [vmem:[%s11871_s19 + $0x4040] sm:$0xff]  ;;  %v1299_v3 = vld [vmem:[%s11871_s19 + $0x4048] sm:$0xff]  ;;  %1296 = vst [vmem:[%s11879_s20 + $0x1008] sm:$0xff] %v1295_v1 }
 0x116   : > { %1298 = vst [vmem:[%s11879_s20 + $0x1010] sm:$0xff] %v1297_v2  ;;  %1300 = vst [vmem:[%s11879_s20 + $0x1018] sm:$0xff] %v1299_v3  ;;  %v1301_v4 = vld [vmem:[%s11871_s19 + $0x4080] sm:$0xff]  ;;  %v1303_v5 = vld [vmem:[%s11871_s19 + $0x4088] sm:$0xff] }
 0x117   : > { %v1305_v6 = vld [vmem:[%s11871_s19 + $0x40c0] sm:$0xff]  ;;  %1302 = vst [vmem:[%s11879_s20 + $0x1020] sm:$0xff] %v1301_v4  ;;  %1304 = vst [vmem:[%s11879_s20 + $0x1028] sm:$0xff] %v1303_v5  ;;  %v1307_v7 = vld [vmem:[%s11871_s19 + $0x40c8] sm:$0xff] }
 0x118   : > { %1306 = vst [vmem:[%s11879_s20 + $0x1030] sm:$0xff] %v1305_v6  ;;  %v1309_v8 = vld [vmem:[%s11871_s19 + $0x4100] sm:$0xff]  ;;  %v1311_v9 = vld [vmem:[%s11871_s19 + $0x4108] sm:$0xff]  ;;  %1308 = vst [vmem:[%s11879_s20 + $0x1038] sm:$0xff] %v1307_v7 }
 0x119   : > { %1310 = vst [vmem:[%s11879_s20 + $0x1040] sm:$0xff] %v1309_v8  ;;  %1312 = vst [vmem:[%s11879_s20 + $0x1048] sm:$0xff] %v1311_v9  ;;  %v1313_v10 = vld [vmem:[%s11871_s19 + $0x4140] sm:$0xff]  ;;  %v1315_v11 = vld [vmem:[%s11871_s19 + $0x4148] sm:$0xff] }
 0x11a   : > { %v1317_v12 = vld [vmem:[%s11871_s19 + $0x4180] sm:$0xff]  ;;  %1314 = vst [vmem:[%s11879_s20 + $0x1050] sm:$0xff] %v1313_v10  ;;  %1316 = vst [vmem:[%s11879_s20 + $0x1058] sm:$0xff] %v1315_v11  ;;  %v1319_v13 = vld [vmem:[%s11871_s19 + $0x4188] sm:$0xff] }
 0x11b   : > { %1318 = vst [vmem:[%s11879_s20 + $0x1060] sm:$0xff] %v1317_v12  ;;  %v1321_v14 = vld [vmem:[%s11871_s19 + $0x41c0] sm:$0xff]  ;;  %v1323_v15 = vld [vmem:[%s11871_s19 + $0x41c8] sm:$0xff]  ;;  %1320 = vst [vmem:[%s11879_s20 + $0x1068] sm:$0xff] %v1319_v13 }
 0x11c   : > { %1322 = vst [vmem:[%s11879_s20 + $0x1070] sm:$0xff] %v1321_v14  ;;  %1324 = vst [vmem:[%s11879_s20 + $0x1078] sm:$0xff] %v1323_v15  ;;  %v1325_v16 = vld [vmem:[%s11871_s19 + $0x4200] sm:$0xff]  ;;  %v1327_v17 = vld [vmem:[%s11871_s19 + $0x4208] sm:$0xff] }
 0x11d   : > { %v1329_v18 = vld [vmem:[%s11871_s19 + $0x4240] sm:$0xff]  ;;  %1326 = vst [vmem:[%s11879_s20 + $0x1080] sm:$0xff] %v1325_v16  ;;  %1328 = vst [vmem:[%s11879_s20 + $0x1088] sm:$0xff] %v1327_v17  ;;  %v1331_v19 = vld [vmem:[%s11871_s19 + $0x4248] sm:$0xff] }
 0x11e   : > { %1330 = vst [vmem:[%s11879_s20 + $0x1090] sm:$0xff] %v1329_v18  ;;  %v1333_v20 = vld [vmem:[%s11871_s19 + $0x4280] sm:$0xff]  ;;  %v1335_v21 = vld [vmem:[%s11871_s19 + $0x4288] sm:$0xff]  ;;  %1332 = vst [vmem:[%s11879_s20 + $0x1098] sm:$0xff] %v1331_v19 }
 0x11f   : > { %1334 = vst [vmem:[%s11879_s20 + $0x10a0] sm:$0xff] %v1333_v20  ;;  %1336 = vst [vmem:[%s11879_s20 + $0x10a8] sm:$0xff] %v1335_v21  ;;  %v1337_v22 = vld [vmem:[%s11871_s19 + $0x42c0] sm:$0xff]  ;;  %v1339_v23 = vld [vmem:[%s11871_s19 + $0x42c8] sm:$0xff] }
 0x120   : > { %v1341_v24 = vld [vmem:[%s11871_s19 + $0x4300] sm:$0xff]  ;;  %1338 = vst [vmem:[%s11879_s20 + $0x10b0] sm:$0xff] %v1337_v22  ;;  %1340 = vst [vmem:[%s11879_s20 + $0x10b8] sm:$0xff] %v1339_v23  ;;  %v1343_v25 = vld [vmem:[%s11871_s19 + $0x4308] sm:$0xff] }
 0x121   : > { %1342 = vst [vmem:[%s11879_s20 + $0x10c0] sm:$0xff] %v1341_v24  ;;  %v1345_v26 = vld [vmem:[%s11871_s19 + $0x4340] sm:$0xff]  ;;  %v1347_v27 = vld [vmem:[%s11871_s19 + $0x4348] sm:$0xff]  ;;  %1344 = vst [vmem:[%s11879_s20 + $0x10c8] sm:$0xff] %v1343_v25 }
 0x122   : > { %1346 = vst [vmem:[%s11879_s20 + $0x10d0] sm:$0xff] %v1345_v26  ;;  %1348 = vst [vmem:[%s11879_s20 + $0x10d8] sm:$0xff] %v1347_v27  ;;  %v1349_v28 = vld [vmem:[%s11871_s19 + $0x4380] sm:$0xff]  ;;  %v1351_v29 = vld [vmem:[%s11871_s19 + $0x4388] sm:$0xff] }
 0x123   : > { %v1353_v30 = vld [vmem:[%s11871_s19 + $0x43c0] sm:$0xff]  ;;  %1350 = vst [vmem:[%s11879_s20 + $0x10e0] sm:$0xff] %v1349_v28  ;;  %1352 = vst [vmem:[%s11879_s20 + $0x10e8] sm:$0xff] %v1351_v29  ;;  %v1355_v31 = vld [vmem:[%s11871_s19 + $0x43c8] sm:$0xff] }
 0x124   : > { %1354 = vst [vmem:[%s11879_s20 + $0x10f0] sm:$0xff] %v1353_v30  ;;  %v1357_v32 = vld [vmem:[%s11871_s19 + $0x4400] sm:$0xff]  ;;  %v1359_v33 = vld [vmem:[%s11871_s19 + $0x4408] sm:$0xff]  ;;  %1356 = vst [vmem:[%s11879_s20 + $0x10f8] sm:$0xff] %v1355_v31 }
 0x125   : > { %1358 = vst [vmem:[%s11879_s20 + $0x1100] sm:$0xff] %v1357_v32  ;;  %1360 = vst [vmem:[%s11879_s20 + $0x1108] sm:$0xff] %v1359_v33  ;;  %v1361_v34 = vld [vmem:[%s11871_s19 + $0x4440] sm:$0xff]  ;;  %v1363_v35 = vld [vmem:[%s11871_s19 + $0x4448] sm:$0xff] }
 0x126   : > { %v1365_v36 = vld [vmem:[%s11871_s19 + $0x4480] sm:$0xff]  ;;  %1362 = vst [vmem:[%s11879_s20 + $0x1110] sm:$0xff] %v1361_v34  ;;  %1364 = vst [vmem:[%s11879_s20 + $0x1118] sm:$0xff] %v1363_v35  ;;  %v1367_v37 = vld [vmem:[%s11871_s19 + $0x4488] sm:$0xff] }
 0x127   : > { %1366 = vst [vmem:[%s11879_s20 + $0x1120] sm:$0xff] %v1365_v36  ;;  %v1369_v38 = vld [vmem:[%s11871_s19 + $0x44c0] sm:$0xff]  ;;  %v1371_v39 = vld [vmem:[%s11871_s19 + $0x44c8] sm:$0xff]  ;;  %1368 = vst [vmem:[%s11879_s20 + $0x1128] sm:$0xff] %v1367_v37 }
 0x128   : > { %1370 = vst [vmem:[%s11879_s20 + $0x1130] sm:$0xff] %v1369_v38  ;;  %1372 = vst [vmem:[%s11879_s20 + $0x1138] sm:$0xff] %v1371_v39  ;;  %v1373_v40 = vld [vmem:[%s11871_s19 + $0x4500] sm:$0xff]  ;;  %v1375_v41 = vld [vmem:[%s11871_s19 + $0x4508] sm:$0xff] }
 0x129   : > { %v1377_v42 = vld [vmem:[%s11871_s19 + $0x4540] sm:$0xff]  ;;  %1374 = vst [vmem:[%s11879_s20 + $0x1140] sm:$0xff] %v1373_v40  ;;  %1376 = vst [vmem:[%s11879_s20 + $0x1148] sm:$0xff] %v1375_v41  ;;  %v1379_v43 = vld [vmem:[%s11871_s19 + $0x4548] sm:$0xff] }
 0x12a   : > { %1378 = vst [vmem:[%s11879_s20 + $0x1150] sm:$0xff] %v1377_v42  ;;  %v1381_v44 = vld [vmem:[%s11871_s19 + $0x4580] sm:$0xff]  ;;  %v1383_v45 = vld [vmem:[%s11871_s19 + $0x4588] sm:$0xff]  ;;  %1380 = vst [vmem:[%s11879_s20 + $0x1158] sm:$0xff] %v1379_v43 }
 0x12b   : > { %1382 = vst [vmem:[%s11879_s20 + $0x1160] sm:$0xff] %v1381_v44  ;;  %1384 = vst [vmem:[%s11879_s20 + $0x1168] sm:$0xff] %v1383_v45  ;;  %v1385_v46 = vld [vmem:[%s11871_s19 + $0x45c0] sm:$0xff]  ;;  %v1387_v47 = vld [vmem:[%s11871_s19 + $0x45c8] sm:$0xff] }
 0x12c   : > { %v1389_v48 = vld [vmem:[%s11871_s19 + $0x4600] sm:$0xff]  ;;  %1386 = vst [vmem:[%s11879_s20 + $0x1170] sm:$0xff] %v1385_v46  ;;  %1388 = vst [vmem:[%s11879_s20 + $0x1178] sm:$0xff] %v1387_v47  ;;  %v1391_v49 = vld [vmem:[%s11871_s19 + $0x4608] sm:$0xff] }
 0x12d   : > { %1390 = vst [vmem:[%s11879_s20 + $0x1180] sm:$0xff] %v1389_v48  ;;  %v1393_v50 = vld [vmem:[%s11871_s19 + $0x4640] sm:$0xff]  ;;  %v1395_v51 = vld [vmem:[%s11871_s19 + $0x4648] sm:$0xff]  ;;  %1392 = vst [vmem:[%s11879_s20 + $0x1188] sm:$0xff] %v1391_v49 }
 0x12e   : > { %1394 = vst [vmem:[%s11879_s20 + $0x1190] sm:$0xff] %v1393_v50  ;;  %1396 = vst [vmem:[%s11879_s20 + $0x1198] sm:$0xff] %v1395_v51  ;;  %v1397_v52 = vld [vmem:[%s11871_s19 + $0x4680] sm:$0xff]  ;;  %v1399_v53 = vld [vmem:[%s11871_s19 + $0x4688] sm:$0xff] }
 0x12f   : > { %v1401_v54 = vld [vmem:[%s11871_s19 + $0x46c0] sm:$0xff]  ;;  %1398 = vst [vmem:[%s11879_s20 + $0x11a0] sm:$0xff] %v1397_v52  ;;  %1400 = vst [vmem:[%s11879_s20 + $0x11a8] sm:$0xff] %v1399_v53  ;;  %v1403_v55 = vld [vmem:[%s11871_s19 + $0x46c8] sm:$0xff] }
 0x130   : > { %1402 = vst [vmem:[%s11879_s20 + $0x11b0] sm:$0xff] %v1401_v54  ;;  %v1405_v56 = vld [vmem:[%s11871_s19 + $0x4700] sm:$0xff]  ;;  %v1407_v57 = vld [vmem:[%s11871_s19 + $0x4708] sm:$0xff]  ;;  %1404 = vst [vmem:[%s11879_s20 + $0x11b8] sm:$0xff] %v1403_v55 }
 0x131   : > { %1406 = vst [vmem:[%s11879_s20 + $0x11c0] sm:$0xff] %v1405_v56  ;;  %1408 = vst [vmem:[%s11879_s20 + $0x11c8] sm:$0xff] %v1407_v57  ;;  %v1409_v58 = vld [vmem:[%s11871_s19 + $0x4740] sm:$0xff]  ;;  %v1411_v59 = vld [vmem:[%s11871_s19 + $0x4748] sm:$0xff] }
 0x132   : > { %v1413_v60 = vld [vmem:[%s11871_s19 + $0x4780] sm:$0xff]  ;;  %1410 = vst [vmem:[%s11879_s20 + $0x11d0] sm:$0xff] %v1409_v58  ;;  %1412 = vst [vmem:[%s11879_s20 + $0x11d8] sm:$0xff] %v1411_v59  ;;  %v1415_v61 = vld [vmem:[%s11871_s19 + $0x4788] sm:$0xff] }
 0x133   : > { %1414 = vst [vmem:[%s11879_s20 + $0x11e0] sm:$0xff] %v1413_v60  ;;  %v1417_v62 = vld [vmem:[%s11871_s19 + $0x47c0] sm:$0xff]  ;;  %v1419_v63 = vld [vmem:[%s11871_s19 + $0x47c8] sm:$0xff]  ;;  %1416 = vst [vmem:[%s11879_s20 + $0x11e8] sm:$0xff] %v1415_v61 }
 0x134   : > { %1418 = vst [vmem:[%s11879_s20 + $0x11f0] sm:$0xff] %v1417_v62  ;;  %1420 = vst [vmem:[%s11879_s20 + $0x11f8] sm:$0xff] %v1419_v63  ;;  %v1421_v0 = vld [vmem:[%s11871_s19 + $0x4800] sm:$0xff]  ;;  %v1423_v1 = vld [vmem:[%s11871_s19 + $0x4808] sm:$0xff] }
 0x135   : > { %v1425_v2 = vld [vmem:[%s11871_s19 + $0x4840] sm:$0xff]  ;;  %1422 = vst [vmem:[%s11879_s20 + $0x1200] sm:$0xff] %v1421_v0  ;;  %1424 = vst [vmem:[%s11879_s20 + $0x1208] sm:$0xff] %v1423_v1  ;;  %v1427_v3 = vld [vmem:[%s11871_s19 + $0x4848] sm:$0xff] }
 0x136   : > { %1426 = vst [vmem:[%s11879_s20 + $0x1210] sm:$0xff] %v1425_v2  ;;  %v1429_v4 = vld [vmem:[%s11871_s19 + $0x4880] sm:$0xff]  ;;  %v1431_v5 = vld [vmem:[%s11871_s19 + $0x4888] sm:$0xff]  ;;  %1428 = vst [vmem:[%s11879_s20 + $0x1218] sm:$0xff] %v1427_v3 }
 0x137   : > { %1430 = vst [vmem:[%s11879_s20 + $0x1220] sm:$0xff] %v1429_v4  ;;  %1432 = vst [vmem:[%s11879_s20 + $0x1228] sm:$0xff] %v1431_v5  ;;  %v1433_v6 = vld [vmem:[%s11871_s19 + $0x48c0] sm:$0xff]  ;;  %v1435_v7 = vld [vmem:[%s11871_s19 + $0x48c8] sm:$0xff] }
 0x138   : > { %v1437_v8 = vld [vmem:[%s11871_s19 + $0x4900] sm:$0xff]  ;;  %1434 = vst [vmem:[%s11879_s20 + $0x1230] sm:$0xff] %v1433_v6  ;;  %1436 = vst [vmem:[%s11879_s20 + $0x1238] sm:$0xff] %v1435_v7  ;;  %v1439_v9 = vld [vmem:[%s11871_s19 + $0x4908] sm:$0xff] }
 0x139   : > { %1438 = vst [vmem:[%s11879_s20 + $0x1240] sm:$0xff] %v1437_v8  ;;  %v1441_v10 = vld [vmem:[%s11871_s19 + $0x4940] sm:$0xff]  ;;  %v1443_v11 = vld [vmem:[%s11871_s19 + $0x4948] sm:$0xff]  ;;  %1440 = vst [vmem:[%s11879_s20 + $0x1248] sm:$0xff] %v1439_v9 }
 0x13a   : > { %1442 = vst [vmem:[%s11879_s20 + $0x1250] sm:$0xff] %v1441_v10  ;;  %1444 = vst [vmem:[%s11879_s20 + $0x1258] sm:$0xff] %v1443_v11  ;;  %v1445_v12 = vld [vmem:[%s11871_s19 + $0x4980] sm:$0xff]  ;;  %v1447_v13 = vld [vmem:[%s11871_s19 + $0x4988] sm:$0xff] }
 0x13b   : > { %v1449_v14 = vld [vmem:[%s11871_s19 + $0x49c0] sm:$0xff]  ;;  %1446 = vst [vmem:[%s11879_s20 + $0x1260] sm:$0xff] %v1445_v12  ;;  %1448 = vst [vmem:[%s11879_s20 + $0x1268] sm:$0xff] %v1447_v13  ;;  %v1451_v15 = vld [vmem:[%s11871_s19 + $0x49c8] sm:$0xff] }
 0x13c   : > { %1450 = vst [vmem:[%s11879_s20 + $0x1270] sm:$0xff] %v1449_v14  ;;  %v1453_v16 = vld [vmem:[%s11871_s19 + $0x4a00] sm:$0xff]  ;;  %v1455_v17 = vld [vmem:[%s11871_s19 + $0x4a08] sm:$0xff]  ;;  %1452 = vst [vmem:[%s11879_s20 + $0x1278] sm:$0xff] %v1451_v15 }
 0x13d   : > { %1454 = vst [vmem:[%s11879_s20 + $0x1280] sm:$0xff] %v1453_v16  ;;  %1456 = vst [vmem:[%s11879_s20 + $0x1288] sm:$0xff] %v1455_v17  ;;  %v1457_v18 = vld [vmem:[%s11871_s19 + $0x4a40] sm:$0xff]  ;;  %v1459_v19 = vld [vmem:[%s11871_s19 + $0x4a48] sm:$0xff] }
 0x13e   : > { %v1461_v20 = vld [vmem:[%s11871_s19 + $0x4a80] sm:$0xff]  ;;  %1458 = vst [vmem:[%s11879_s20 + $0x1290] sm:$0xff] %v1457_v18  ;;  %1460 = vst [vmem:[%s11879_s20 + $0x1298] sm:$0xff] %v1459_v19  ;;  %v1463_v21 = vld [vmem:[%s11871_s19 + $0x4a88] sm:$0xff] }
 0x13f   : > { %1462 = vst [vmem:[%s11879_s20 + $0x12a0] sm:$0xff] %v1461_v20  ;;  %v1465_v22 = vld [vmem:[%s11871_s19 + $0x4ac0] sm:$0xff]  ;;  %v1467_v23 = vld [vmem:[%s11871_s19 + $0x4ac8] sm:$0xff]  ;;  %1464 = vst [vmem:[%s11879_s20 + $0x12a8] sm:$0xff] %v1463_v21 }
 0x140   : > { %1466 = vst [vmem:[%s11879_s20 + $0x12b0] sm:$0xff] %v1465_v22  ;;  %1468 = vst [vmem:[%s11879_s20 + $0x12b8] sm:$0xff] %v1467_v23  ;;  %v1469_v24 = vld [vmem:[%s11871_s19 + $0x4b00] sm:$0xff]  ;;  %v1471_v25 = vld [vmem:[%s11871_s19 + $0x4b08] sm:$0xff] }
 0x141   : > { %v1473_v26 = vld [vmem:[%s11871_s19 + $0x4b40] sm:$0xff]  ;;  %1470 = vst [vmem:[%s11879_s20 + $0x12c0] sm:$0xff] %v1469_v24  ;;  %1472 = vst [vmem:[%s11879_s20 + $0x12c8] sm:$0xff] %v1471_v25  ;;  %v1475_v27 = vld [vmem:[%s11871_s19 + $0x4b48] sm:$0xff] }
 0x142   : > { %1474 = vst [vmem:[%s11879_s20 + $0x12d0] sm:$0xff] %v1473_v26  ;;  %v1477_v28 = vld [vmem:[%s11871_s19 + $0x4b80] sm:$0xff]  ;;  %v1479_v29 = vld [vmem:[%s11871_s19 + $0x4b88] sm:$0xff]  ;;  %1476 = vst [vmem:[%s11879_s20 + $0x12d8] sm:$0xff] %v1475_v27 }
 0x143   : > { %1478 = vst [vmem:[%s11879_s20 + $0x12e0] sm:$0xff] %v1477_v28  ;;  %1480 = vst [vmem:[%s11879_s20 + $0x12e8] sm:$0xff] %v1479_v29  ;;  %v1481_v30 = vld [vmem:[%s11871_s19 + $0x4bc0] sm:$0xff]  ;;  %v1483_v31 = vld [vmem:[%s11871_s19 + $0x4bc8] sm:$0xff] }
 0x144   : > { %v1485_v32 = vld [vmem:[%s11871_s19 + $0x4c00] sm:$0xff]  ;;  %1482 = vst [vmem:[%s11879_s20 + $0x12f0] sm:$0xff] %v1481_v30  ;;  %1484 = vst [vmem:[%s11879_s20 + $0x12f8] sm:$0xff] %v1483_v31  ;;  %v1487_v33 = vld [vmem:[%s11871_s19 + $0x4c08] sm:$0xff] }
 0x145   : > { %1486 = vst [vmem:[%s11879_s20 + $0x1300] sm:$0xff] %v1485_v32  ;;  %v1489_v34 = vld [vmem:[%s11871_s19 + $0x4c40] sm:$0xff]  ;;  %v1491_v35 = vld [vmem:[%s11871_s19 + $0x4c48] sm:$0xff]  ;;  %1488 = vst [vmem:[%s11879_s20 + $0x1308] sm:$0xff] %v1487_v33 }
 0x146   : > { %1490 = vst [vmem:[%s11879_s20 + $0x1310] sm:$0xff] %v1489_v34  ;;  %1492 = vst [vmem:[%s11879_s20 + $0x1318] sm:$0xff] %v1491_v35  ;;  %v1493_v36 = vld [vmem:[%s11871_s19 + $0x4c80] sm:$0xff]  ;;  %v1495_v37 = vld [vmem:[%s11871_s19 + $0x4c88] sm:$0xff] }
 0x147   : > { %v1497_v38 = vld [vmem:[%s11871_s19 + $0x4cc0] sm:$0xff]  ;;  %1494 = vst [vmem:[%s11879_s20 + $0x1320] sm:$0xff] %v1493_v36  ;;  %1496 = vst [vmem:[%s11879_s20 + $0x1328] sm:$0xff] %v1495_v37  ;;  %v1499_v39 = vld [vmem:[%s11871_s19 + $0x4cc8] sm:$0xff] }
 0x148   : > { %1498 = vst [vmem:[%s11879_s20 + $0x1330] sm:$0xff] %v1497_v38  ;;  %v1501_v40 = vld [vmem:[%s11871_s19 + $0x4d00] sm:$0xff]  ;;  %v1503_v41 = vld [vmem:[%s11871_s19 + $0x4d08] sm:$0xff]  ;;  %1500 = vst [vmem:[%s11879_s20 + $0x1338] sm:$0xff] %v1499_v39 }
 0x149   : > { %1502 = vst [vmem:[%s11879_s20 + $0x1340] sm:$0xff] %v1501_v40  ;;  %1504 = vst [vmem:[%s11879_s20 + $0x1348] sm:$0xff] %v1503_v41  ;;  %v1505_v42 = vld [vmem:[%s11871_s19 + $0x4d40] sm:$0xff]  ;;  %v1507_v43 = vld [vmem:[%s11871_s19 + $0x4d48] sm:$0xff] }
 0x14a   : > { %v1509_v44 = vld [vmem:[%s11871_s19 + $0x4d80] sm:$0xff]  ;;  %1506 = vst [vmem:[%s11879_s20 + $0x1350] sm:$0xff] %v1505_v42  ;;  %1508 = vst [vmem:[%s11879_s20 + $0x1358] sm:$0xff] %v1507_v43  ;;  %v1511_v45 = vld [vmem:[%s11871_s19 + $0x4d88] sm:$0xff] }
 0x14b   : > { %1510 = vst [vmem:[%s11879_s20 + $0x1360] sm:$0xff] %v1509_v44  ;;  %v1513_v46 = vld [vmem:[%s11871_s19 + $0x4dc0] sm:$0xff]  ;;  %v1515_v47 = vld [vmem:[%s11871_s19 + $0x4dc8] sm:$0xff]  ;;  %1512 = vst [vmem:[%s11879_s20 + $0x1368] sm:$0xff] %v1511_v45 }
 0x14c   : > { %1514 = vst [vmem:[%s11879_s20 + $0x1370] sm:$0xff] %v1513_v46  ;;  %1516 = vst [vmem:[%s11879_s20 + $0x1378] sm:$0xff] %v1515_v47  ;;  %v1517_v48 = vld [vmem:[%s11871_s19 + $0x4e00] sm:$0xff]  ;;  %v1519_v49 = vld [vmem:[%s11871_s19 + $0x4e08] sm:$0xff] }
 0x14d   : > { %v1521_v50 = vld [vmem:[%s11871_s19 + $0x4e40] sm:$0xff]  ;;  %1518 = vst [vmem:[%s11879_s20 + $0x1380] sm:$0xff] %v1517_v48  ;;  %1520 = vst [vmem:[%s11879_s20 + $0x1388] sm:$0xff] %v1519_v49  ;;  %v1523_v51 = vld [vmem:[%s11871_s19 + $0x4e48] sm:$0xff] }
 0x14e   : > { %1522 = vst [vmem:[%s11879_s20 + $0x1390] sm:$0xff] %v1521_v50  ;;  %v1525_v52 = vld [vmem:[%s11871_s19 + $0x4e80] sm:$0xff]  ;;  %v1527_v53 = vld [vmem:[%s11871_s19 + $0x4e88] sm:$0xff]  ;;  %1524 = vst [vmem:[%s11879_s20 + $0x1398] sm:$0xff] %v1523_v51 }
 0x14f   : > { %1526 = vst [vmem:[%s11879_s20 + $0x13a0] sm:$0xff] %v1525_v52  ;;  %1528 = vst [vmem:[%s11879_s20 + $0x13a8] sm:$0xff] %v1527_v53  ;;  %v1529_v54 = vld [vmem:[%s11871_s19 + $0x4ec0] sm:$0xff]  ;;  %v1531_v55 = vld [vmem:[%s11871_s19 + $0x4ec8] sm:$0xff] }
 0x150   : > { %v1533_v56 = vld [vmem:[%s11871_s19 + $0x4f00] sm:$0xff]  ;;  %1530 = vst [vmem:[%s11879_s20 + $0x13b0] sm:$0xff] %v1529_v54  ;;  %1532 = vst [vmem:[%s11879_s20 + $0x13b8] sm:$0xff] %v1531_v55  ;;  %v1535_v57 = vld [vmem:[%s11871_s19 + $0x4f08] sm:$0xff] }
 0x151   : > { %1534 = vst [vmem:[%s11879_s20 + $0x13c0] sm:$0xff] %v1533_v56  ;;  %v1537_v58 = vld [vmem:[%s11871_s19 + $0x4f40] sm:$0xff]  ;;  %v1539_v59 = vld [vmem:[%s11871_s19 + $0x4f48] sm:$0xff]  ;;  %1536 = vst [vmem:[%s11879_s20 + $0x13c8] sm:$0xff] %v1535_v57 }
 0x152   : > { %1538 = vst [vmem:[%s11879_s20 + $0x13d0] sm:$0xff] %v1537_v58  ;;  %1540 = vst [vmem:[%s11879_s20 + $0x13d8] sm:$0xff] %v1539_v59  ;;  %v1541_v60 = vld [vmem:[%s11871_s19 + $0x4f80] sm:$0xff]  ;;  %v1543_v61 = vld [vmem:[%s11871_s19 + $0x4f88] sm:$0xff] }
 0x153   : > { %v1545_v62 = vld [vmem:[%s11871_s19 + $0x4fc0] sm:$0xff]  ;;  %1542 = vst [vmem:[%s11879_s20 + $0x13e0] sm:$0xff] %v1541_v60  ;;  %1544 = vst [vmem:[%s11879_s20 + $0x13e8] sm:$0xff] %v1543_v61  ;;  %v1547_v63 = vld [vmem:[%s11871_s19 + $0x4fc8] sm:$0xff] }
 0x154   : > { %1546 = vst [vmem:[%s11879_s20 + $0x13f0] sm:$0xff] %v1545_v62  ;;  %v1549_v0 = vld [vmem:[%s11871_s19 + $0x5000] sm:$0xff]  ;;  %v1551_v1 = vld [vmem:[%s11871_s19 + $0x5008] sm:$0xff]  ;;  %1548 = vst [vmem:[%s11879_s20 + $0x13f8] sm:$0xff] %v1547_v63 }
 0x155   : > { %1550 = vst [vmem:[%s11879_s20 + $0x1400] sm:$0xff] %v1549_v0  ;;  %1552 = vst [vmem:[%s11879_s20 + $0x1408] sm:$0xff] %v1551_v1  ;;  %v1553_v2 = vld [vmem:[%s11871_s19 + $0x5040] sm:$0xff]  ;;  %v1555_v3 = vld [vmem:[%s11871_s19 + $0x5048] sm:$0xff] }
 0x156   : > { %v1557_v4 = vld [vmem:[%s11871_s19 + $0x5080] sm:$0xff]  ;;  %1554 = vst [vmem:[%s11879_s20 + $0x1410] sm:$0xff] %v1553_v2  ;;  %1556 = vst [vmem:[%s11879_s20 + $0x1418] sm:$0xff] %v1555_v3  ;;  %v1559_v5 = vld [vmem:[%s11871_s19 + $0x5088] sm:$0xff] }
 0x157   : > { %1558 = vst [vmem:[%s11879_s20 + $0x1420] sm:$0xff] %v1557_v4  ;;  %v1561_v6 = vld [vmem:[%s11871_s19 + $0x50c0] sm:$0xff]  ;;  %v1563_v7 = vld [vmem:[%s11871_s19 + $0x50c8] sm:$0xff]  ;;  %1560 = vst [vmem:[%s11879_s20 + $0x1428] sm:$0xff] %v1559_v5 }
 0x158   : > { %1562 = vst [vmem:[%s11879_s20 + $0x1430] sm:$0xff] %v1561_v6  ;;  %1564 = vst [vmem:[%s11879_s20 + $0x1438] sm:$0xff] %v1563_v7  ;;  %v1565_v8 = vld [vmem:[%s11871_s19 + $0x5100] sm:$0xff]  ;;  %v1567_v9 = vld [vmem:[%s11871_s19 + $0x5108] sm:$0xff] }
 0x159   : > { %v1569_v10 = vld [vmem:[%s11871_s19 + $0x5140] sm:$0xff]  ;;  %1566 = vst [vmem:[%s11879_s20 + $0x1440] sm:$0xff] %v1565_v8  ;;  %1568 = vst [vmem:[%s11879_s20 + $0x1448] sm:$0xff] %v1567_v9  ;;  %v1571_v11 = vld [vmem:[%s11871_s19 + $0x5148] sm:$0xff] }
 0x15a   : > { %1570 = vst [vmem:[%s11879_s20 + $0x1450] sm:$0xff] %v1569_v10  ;;  %v1573_v12 = vld [vmem:[%s11871_s19 + $0x5180] sm:$0xff]  ;;  %v1575_v13 = vld [vmem:[%s11871_s19 + $0x5188] sm:$0xff]  ;;  %1572 = vst [vmem:[%s11879_s20 + $0x1458] sm:$0xff] %v1571_v11 }
 0x15b   : > { %1574 = vst [vmem:[%s11879_s20 + $0x1460] sm:$0xff] %v1573_v12  ;;  %1576 = vst [vmem:[%s11879_s20 + $0x1468] sm:$0xff] %v1575_v13  ;;  %v1577_v14 = vld [vmem:[%s11871_s19 + $0x51c0] sm:$0xff]  ;;  %v1579_v15 = vld [vmem:[%s11871_s19 + $0x51c8] sm:$0xff] }
 0x15c   : > { %v1581_v16 = vld [vmem:[%s11871_s19 + $0x5200] sm:$0xff]  ;;  %1578 = vst [vmem:[%s11879_s20 + $0x1470] sm:$0xff] %v1577_v14  ;;  %1580 = vst [vmem:[%s11879_s20 + $0x1478] sm:$0xff] %v1579_v15  ;;  %v1583_v17 = vld [vmem:[%s11871_s19 + $0x5208] sm:$0xff] }
 0x15d   : > { %1582 = vst [vmem:[%s11879_s20 + $0x1480] sm:$0xff] %v1581_v16  ;;  %v1585_v18 = vld [vmem:[%s11871_s19 + $0x5240] sm:$0xff]  ;;  %v1587_v19 = vld [vmem:[%s11871_s19 + $0x5248] sm:$0xff]  ;;  %1584 = vst [vmem:[%s11879_s20 + $0x1488] sm:$0xff] %v1583_v17 }
 0x15e   : > { %1586 = vst [vmem:[%s11879_s20 + $0x1490] sm:$0xff] %v1585_v18  ;;  %1588 = vst [vmem:[%s11879_s20 + $0x1498] sm:$0xff] %v1587_v19  ;;  %v1589_v20 = vld [vmem:[%s11871_s19 + $0x5280] sm:$0xff]  ;;  %v1591_v21 = vld [vmem:[%s11871_s19 + $0x5288] sm:$0xff] }
 0x15f   : > { %v1593_v22 = vld [vmem:[%s11871_s19 + $0x52c0] sm:$0xff]  ;;  %1590 = vst [vmem:[%s11879_s20 + $0x14a0] sm:$0xff] %v1589_v20  ;;  %1592 = vst [vmem:[%s11879_s20 + $0x14a8] sm:$0xff] %v1591_v21  ;;  %v1595_v23 = vld [vmem:[%s11871_s19 + $0x52c8] sm:$0xff] }
 0x160   : > { %1594 = vst [vmem:[%s11879_s20 + $0x14b0] sm:$0xff] %v1593_v22  ;;  %v1597_v24 = vld [vmem:[%s11871_s19 + $0x5300] sm:$0xff]  ;;  %v1599_v25 = vld [vmem:[%s11871_s19 + $0x5308] sm:$0xff]  ;;  %1596 = vst [vmem:[%s11879_s20 + $0x14b8] sm:$0xff] %v1595_v23 }
 0x161   : > { %1598 = vst [vmem:[%s11879_s20 + $0x14c0] sm:$0xff] %v1597_v24  ;;  %1600 = vst [vmem:[%s11879_s20 + $0x14c8] sm:$0xff] %v1599_v25  ;;  %v1601_v26 = vld [vmem:[%s11871_s19 + $0x5340] sm:$0xff]  ;;  %v1603_v27 = vld [vmem:[%s11871_s19 + $0x5348] sm:$0xff] }
 0x162   : > { %v1605_v28 = vld [vmem:[%s11871_s19 + $0x5380] sm:$0xff]  ;;  %1602 = vst [vmem:[%s11879_s20 + $0x14d0] sm:$0xff] %v1601_v26  ;;  %1604 = vst [vmem:[%s11879_s20 + $0x14d8] sm:$0xff] %v1603_v27  ;;  %v1607_v29 = vld [vmem:[%s11871_s19 + $0x5388] sm:$0xff] }
 0x163   : > { %1606 = vst [vmem:[%s11879_s20 + $0x14e0] sm:$0xff] %v1605_v28  ;;  %v1609_v30 = vld [vmem:[%s11871_s19 + $0x53c0] sm:$0xff]  ;;  %v1611_v31 = vld [vmem:[%s11871_s19 + $0x53c8] sm:$0xff]  ;;  %1608 = vst [vmem:[%s11879_s20 + $0x14e8] sm:$0xff] %v1607_v29 }
 0x164   : > { %1610 = vst [vmem:[%s11879_s20 + $0x14f0] sm:$0xff] %v1609_v30  ;;  %1612 = vst [vmem:[%s11879_s20 + $0x14f8] sm:$0xff] %v1611_v31  ;;  %v1613_v32 = vld [vmem:[%s11871_s19 + $0x5400] sm:$0xff]  ;;  %v1615_v33 = vld [vmem:[%s11871_s19 + $0x5408] sm:$0xff] }
 0x165   : > { %v1617_v34 = vld [vmem:[%s11871_s19 + $0x5440] sm:$0xff]  ;;  %1614 = vst [vmem:[%s11879_s20 + $0x1500] sm:$0xff] %v1613_v32  ;;  %1616 = vst [vmem:[%s11879_s20 + $0x1508] sm:$0xff] %v1615_v33  ;;  %v1619_v35 = vld [vmem:[%s11871_s19 + $0x5448] sm:$0xff] }
 0x166   : > { %1618 = vst [vmem:[%s11879_s20 + $0x1510] sm:$0xff] %v1617_v34  ;;  %v1621_v36 = vld [vmem:[%s11871_s19 + $0x5480] sm:$0xff]  ;;  %v1623_v37 = vld [vmem:[%s11871_s19 + $0x5488] sm:$0xff]  ;;  %1620 = vst [vmem:[%s11879_s20 + $0x1518] sm:$0xff] %v1619_v35 }
 0x167   : > { %1622 = vst [vmem:[%s11879_s20 + $0x1520] sm:$0xff] %v1621_v36  ;;  %1624 = vst [vmem:[%s11879_s20 + $0x1528] sm:$0xff] %v1623_v37  ;;  %v1625_v38 = vld [vmem:[%s11871_s19 + $0x54c0] sm:$0xff]  ;;  %v1627_v39 = vld [vmem:[%s11871_s19 + $0x54c8] sm:$0xff] }
 0x168   : > { %v1629_v40 = vld [vmem:[%s11871_s19 + $0x5500] sm:$0xff]  ;;  %1626 = vst [vmem:[%s11879_s20 + $0x1530] sm:$0xff] %v1625_v38  ;;  %1628 = vst [vmem:[%s11879_s20 + $0x1538] sm:$0xff] %v1627_v39  ;;  %v1631_v41 = vld [vmem:[%s11871_s19 + $0x5508] sm:$0xff] }
 0x169   : > { %1630 = vst [vmem:[%s11879_s20 + $0x1540] sm:$0xff] %v1629_v40  ;;  %v1633_v42 = vld [vmem:[%s11871_s19 + $0x5540] sm:$0xff]  ;;  %v1635_v43 = vld [vmem:[%s11871_s19 + $0x5548] sm:$0xff]  ;;  %1632 = vst [vmem:[%s11879_s20 + $0x1548] sm:$0xff] %v1631_v41 }
 0x16a   : > { %1634 = vst [vmem:[%s11879_s20 + $0x1550] sm:$0xff] %v1633_v42  ;;  %1636 = vst [vmem:[%s11879_s20 + $0x1558] sm:$0xff] %v1635_v43  ;;  %v1637_v44 = vld [vmem:[%s11871_s19 + $0x5580] sm:$0xff]  ;;  %v1639_v45 = vld [vmem:[%s11871_s19 + $0x5588] sm:$0xff] }
 0x16b   : > { %v1641_v46 = vld [vmem:[%s11871_s19 + $0x55c0] sm:$0xff]  ;;  %1638 = vst [vmem:[%s11879_s20 + $0x1560] sm:$0xff] %v1637_v44  ;;  %1640 = vst [vmem:[%s11879_s20 + $0x1568] sm:$0xff] %v1639_v45  ;;  %v1643_v47 = vld [vmem:[%s11871_s19 + $0x55c8] sm:$0xff] }
 0x16c   : > { %1642 = vst [vmem:[%s11879_s20 + $0x1570] sm:$0xff] %v1641_v46  ;;  %v1645_v48 = vld [vmem:[%s11871_s19 + $0x5600] sm:$0xff]  ;;  %v1647_v49 = vld [vmem:[%s11871_s19 + $0x5608] sm:$0xff]  ;;  %1644 = vst [vmem:[%s11879_s20 + $0x1578] sm:$0xff] %v1643_v47 }
 0x16d   : > { %1646 = vst [vmem:[%s11879_s20 + $0x1580] sm:$0xff] %v1645_v48  ;;  %1648 = vst [vmem:[%s11879_s20 + $0x1588] sm:$0xff] %v1647_v49  ;;  %v1649_v50 = vld [vmem:[%s11871_s19 + $0x5640] sm:$0xff]  ;;  %v1651_v51 = vld [vmem:[%s11871_s19 + $0x5648] sm:$0xff] }
 0x16e   : > { %v1653_v52 = vld [vmem:[%s11871_s19 + $0x5680] sm:$0xff]  ;;  %1650 = vst [vmem:[%s11879_s20 + $0x1590] sm:$0xff] %v1649_v50  ;;  %1652 = vst [vmem:[%s11879_s20 + $0x1598] sm:$0xff] %v1651_v51  ;;  %v1655_v53 = vld [vmem:[%s11871_s19 + $0x5688] sm:$0xff] }
 0x16f   : > { %1654 = vst [vmem:[%s11879_s20 + $0x15a0] sm:$0xff] %v1653_v52  ;;  %v1657_v54 = vld [vmem:[%s11871_s19 + $0x56c0] sm:$0xff]  ;;  %v1659_v55 = vld [vmem:[%s11871_s19 + $0x56c8] sm:$0xff]  ;;  %1656 = vst [vmem:[%s11879_s20 + $0x15a8] sm:$0xff] %v1655_v53 }
 0x170   : > { %1658 = vst [vmem:[%s11879_s20 + $0x15b0] sm:$0xff] %v1657_v54  ;;  %1660 = vst [vmem:[%s11879_s20 + $0x15b8] sm:$0xff] %v1659_v55  ;;  %v1661_v56 = vld [vmem:[%s11871_s19 + $0x5700] sm:$0xff]  ;;  %v1663_v57 = vld [vmem:[%s11871_s19 + $0x5708] sm:$0xff] }
 0x171   : > { %v1665_v58 = vld [vmem:[%s11871_s19 + $0x5740] sm:$0xff]  ;;  %1662 = vst [vmem:[%s11879_s20 + $0x15c0] sm:$0xff] %v1661_v56  ;;  %1664 = vst [vmem:[%s11879_s20 + $0x15c8] sm:$0xff] %v1663_v57  ;;  %v1667_v59 = vld [vmem:[%s11871_s19 + $0x5748] sm:$0xff] }
 0x172   : > { %1666 = vst [vmem:[%s11879_s20 + $0x15d0] sm:$0xff] %v1665_v58  ;;  %v1669_v60 = vld [vmem:[%s11871_s19 + $0x5780] sm:$0xff]  ;;  %v1671_v61 = vld [vmem:[%s11871_s19 + $0x5788] sm:$0xff]  ;;  %1668 = vst [vmem:[%s11879_s20 + $0x15d8] sm:$0xff] %v1667_v59 }
 0x173   : > { %1670 = vst [vmem:[%s11879_s20 + $0x15e0] sm:$0xff] %v1669_v60  ;;  %1672 = vst [vmem:[%s11879_s20 + $0x15e8] sm:$0xff] %v1671_v61  ;;  %v1673_v62 = vld [vmem:[%s11871_s19 + $0x57c0] sm:$0xff]  ;;  %v1675_v63 = vld [vmem:[%s11871_s19 + $0x57c8] sm:$0xff] }
 0x174   : > { %v1677_v0 = vld [vmem:[%s11871_s19 + $0x5800] sm:$0xff]  ;;  %1674 = vst [vmem:[%s11879_s20 + $0x15f0] sm:$0xff] %v1673_v62  ;;  %1676 = vst [vmem:[%s11879_s20 + $0x15f8] sm:$0xff] %v1675_v63  ;;  %v1679_v1 = vld [vmem:[%s11871_s19 + $0x5808] sm:$0xff] }
 0x175   : > { %1678 = vst [vmem:[%s11879_s20 + $0x1600] sm:$0xff] %v1677_v0  ;;  %v1681_v2 = vld [vmem:[%s11871_s19 + $0x5840] sm:$0xff]  ;;  %v1683_v3 = vld [vmem:[%s11871_s19 + $0x5848] sm:$0xff]  ;;  %1680 = vst [vmem:[%s11879_s20 + $0x1608] sm:$0xff] %v1679_v1 }
 0x176   : > { %1682 = vst [vmem:[%s11879_s20 + $0x1610] sm:$0xff] %v1681_v2  ;;  %1684 = vst [vmem:[%s11879_s20 + $0x1618] sm:$0xff] %v1683_v3  ;;  %v1685_v4 = vld [vmem:[%s11871_s19 + $0x5880] sm:$0xff]  ;;  %v1687_v5 = vld [vmem:[%s11871_s19 + $0x5888] sm:$0xff] }
 0x177   : > { %v1689_v6 = vld [vmem:[%s11871_s19 + $0x58c0] sm:$0xff]  ;;  %1686 = vst [vmem:[%s11879_s20 + $0x1620] sm:$0xff] %v1685_v4  ;;  %1688 = vst [vmem:[%s11879_s20 + $0x1628] sm:$0xff] %v1687_v5  ;;  %v1691_v7 = vld [vmem:[%s11871_s19 + $0x58c8] sm:$0xff] }
 0x178   : > { %1690 = vst [vmem:[%s11879_s20 + $0x1630] sm:$0xff] %v1689_v6  ;;  %v1693_v8 = vld [vmem:[%s11871_s19 + $0x5900] sm:$0xff]  ;;  %v1695_v9 = vld [vmem:[%s11871_s19 + $0x5908] sm:$0xff]  ;;  %1692 = vst [vmem:[%s11879_s20 + $0x1638] sm:$0xff] %v1691_v7 }
 0x179   : > { %1694 = vst [vmem:[%s11879_s20 + $0x1640] sm:$0xff] %v1693_v8  ;;  %1696 = vst [vmem:[%s11879_s20 + $0x1648] sm:$0xff] %v1695_v9  ;;  %v1697_v10 = vld [vmem:[%s11871_s19 + $0x5940] sm:$0xff]  ;;  %v1699_v11 = vld [vmem:[%s11871_s19 + $0x5948] sm:$0xff] }
 0x17a   : > { %v1701_v12 = vld [vmem:[%s11871_s19 + $0x5980] sm:$0xff]  ;;  %1698 = vst [vmem:[%s11879_s20 + $0x1650] sm:$0xff] %v1697_v10  ;;  %1700 = vst [vmem:[%s11879_s20 + $0x1658] sm:$0xff] %v1699_v11  ;;  %v1703_v13 = vld [vmem:[%s11871_s19 + $0x5988] sm:$0xff] }
 0x17b   : > { %1702 = vst [vmem:[%s11879_s20 + $0x1660] sm:$0xff] %v1701_v12  ;;  %v1705_v14 = vld [vmem:[%s11871_s19 + $0x59c0] sm:$0xff]  ;;  %v1707_v15 = vld [vmem:[%s11871_s19 + $0x59c8] sm:$0xff]  ;;  %1704 = vst [vmem:[%s11879_s20 + $0x1668] sm:$0xff] %v1703_v13 }
 0x17c   : > { %1706 = vst [vmem:[%s11879_s20 + $0x1670] sm:$0xff] %v1705_v14  ;;  %1708 = vst [vmem:[%s11879_s20 + $0x1678] sm:$0xff] %v1707_v15  ;;  %v1709_v16 = vld [vmem:[%s11871_s19 + $0x5a00] sm:$0xff]  ;;  %v1711_v17 = vld [vmem:[%s11871_s19 + $0x5a08] sm:$0xff] }
 0x17d   : > { %v1713_v18 = vld [vmem:[%s11871_s19 + $0x5a40] sm:$0xff]  ;;  %1710 = vst [vmem:[%s11879_s20 + $0x1680] sm:$0xff] %v1709_v16  ;;  %1712 = vst [vmem:[%s11879_s20 + $0x1688] sm:$0xff] %v1711_v17  ;;  %v1715_v19 = vld [vmem:[%s11871_s19 + $0x5a48] sm:$0xff] }
 0x17e   : > { %1714 = vst [vmem:[%s11879_s20 + $0x1690] sm:$0xff] %v1713_v18  ;;  %v1717_v20 = vld [vmem:[%s11871_s19 + $0x5a80] sm:$0xff]  ;;  %v1719_v21 = vld [vmem:[%s11871_s19 + $0x5a88] sm:$0xff]  ;;  %1716 = vst [vmem:[%s11879_s20 + $0x1698] sm:$0xff] %v1715_v19 }
 0x17f   : > { %1718 = vst [vmem:[%s11879_s20 + $0x16a0] sm:$0xff] %v1717_v20  ;;  %1720 = vst [vmem:[%s11879_s20 + $0x16a8] sm:$0xff] %v1719_v21  ;;  %v1721_v22 = vld [vmem:[%s11871_s19 + $0x5ac0] sm:$0xff]  ;;  %v1723_v23 = vld [vmem:[%s11871_s19 + $0x5ac8] sm:$0xff] }
 0x180   : > { %v1725_v24 = vld [vmem:[%s11871_s19 + $0x5b00] sm:$0xff]  ;;  %1722 = vst [vmem:[%s11879_s20 + $0x16b0] sm:$0xff] %v1721_v22  ;;  %1724 = vst [vmem:[%s11879_s20 + $0x16b8] sm:$0xff] %v1723_v23  ;;  %v1727_v25 = vld [vmem:[%s11871_s19 + $0x5b08] sm:$0xff] }
 0x181   : > { %1726 = vst [vmem:[%s11879_s20 + $0x16c0] sm:$0xff] %v1725_v24  ;;  %v1729_v26 = vld [vmem:[%s11871_s19 + $0x5b40] sm:$0xff]  ;;  %v1731_v27 = vld [vmem:[%s11871_s19 + $0x5b48] sm:$0xff]  ;;  %1728 = vst [vmem:[%s11879_s20 + $0x16c8] sm:$0xff] %v1727_v25 }
 0x182   : > { %1730 = vst [vmem:[%s11879_s20 + $0x16d0] sm:$0xff] %v1729_v26  ;;  %1732 = vst [vmem:[%s11879_s20 + $0x16d8] sm:$0xff] %v1731_v27  ;;  %v1733_v28 = vld [vmem:[%s11871_s19 + $0x5b80] sm:$0xff]  ;;  %v1735_v29 = vld [vmem:[%s11871_s19 + $0x5b88] sm:$0xff] }
 0x183   : > { %v1737_v30 = vld [vmem:[%s11871_s19 + $0x5bc0] sm:$0xff]  ;;  %1734 = vst [vmem:[%s11879_s20 + $0x16e0] sm:$0xff] %v1733_v28  ;;  %1736 = vst [vmem:[%s11879_s20 + $0x16e8] sm:$0xff] %v1735_v29  ;;  %v1739_v31 = vld [vmem:[%s11871_s19 + $0x5bc8] sm:$0xff] }
 0x184   : > { %1738 = vst [vmem:[%s11879_s20 + $0x16f0] sm:$0xff] %v1737_v30  ;;  %v1741_v32 = vld [vmem:[%s11871_s19 + $0x5c00] sm:$0xff]  ;;  %v1743_v33 = vld [vmem:[%s11871_s19 + $0x5c08] sm:$0xff]  ;;  %1740 = vst [vmem:[%s11879_s20 + $0x16f8] sm:$0xff] %v1739_v31 }
 0x185   : > { %1742 = vst [vmem:[%s11879_s20 + $0x1700] sm:$0xff] %v1741_v32  ;;  %1744 = vst [vmem:[%s11879_s20 + $0x1708] sm:$0xff] %v1743_v33  ;;  %v1745_v34 = vld [vmem:[%s11871_s19 + $0x5c40] sm:$0xff]  ;;  %v1747_v35 = vld [vmem:[%s11871_s19 + $0x5c48] sm:$0xff] }
 0x186   : > { %v1749_v36 = vld [vmem:[%s11871_s19 + $0x5c80] sm:$0xff]  ;;  %1746 = vst [vmem:[%s11879_s20 + $0x1710] sm:$0xff] %v1745_v34  ;;  %1748 = vst [vmem:[%s11879_s20 + $0x1718] sm:$0xff] %v1747_v35  ;;  %v1751_v37 = vld [vmem:[%s11871_s19 + $0x5c88] sm:$0xff] }
 0x187   : > { %1750 = vst [vmem:[%s11879_s20 + $0x1720] sm:$0xff] %v1749_v36  ;;  %v1753_v38 = vld [vmem:[%s11871_s19 + $0x5cc0] sm:$0xff]  ;;  %v1755_v39 = vld [vmem:[%s11871_s19 + $0x5cc8] sm:$0xff]  ;;  %1752 = vst [vmem:[%s11879_s20 + $0x1728] sm:$0xff] %v1751_v37 }
 0x188   : > { %1754 = vst [vmem:[%s11879_s20 + $0x1730] sm:$0xff] %v1753_v38  ;;  %1756 = vst [vmem:[%s11879_s20 + $0x1738] sm:$0xff] %v1755_v39  ;;  %v1757_v40 = vld [vmem:[%s11871_s19 + $0x5d00] sm:$0xff]  ;;  %v1759_v41 = vld [vmem:[%s11871_s19 + $0x5d08] sm:$0xff] }
 0x189   : > { %v1761_v42 = vld [vmem:[%s11871_s19 + $0x5d40] sm:$0xff]  ;;  %1758 = vst [vmem:[%s11879_s20 + $0x1740] sm:$0xff] %v1757_v40  ;;  %1760 = vst [vmem:[%s11879_s20 + $0x1748] sm:$0xff] %v1759_v41  ;;  %v1763_v43 = vld [vmem:[%s11871_s19 + $0x5d48] sm:$0xff] }
 0x18a   : > { %1762 = vst [vmem:[%s11879_s20 + $0x1750] sm:$0xff] %v1761_v42  ;;  %v1765_v44 = vld [vmem:[%s11871_s19 + $0x5d80] sm:$0xff]  ;;  %v1767_v45 = vld [vmem:[%s11871_s19 + $0x5d88] sm:$0xff]  ;;  %1764 = vst [vmem:[%s11879_s20 + $0x1758] sm:$0xff] %v1763_v43 }
 0x18b   : > { %1766 = vst [vmem:[%s11879_s20 + $0x1760] sm:$0xff] %v1765_v44  ;;  %1768 = vst [vmem:[%s11879_s20 + $0x1768] sm:$0xff] %v1767_v45  ;;  %v1769_v46 = vld [vmem:[%s11871_s19 + $0x5dc0] sm:$0xff]  ;;  %v1771_v47 = vld [vmem:[%s11871_s19 + $0x5dc8] sm:$0xff] }
 0x18c   : > { %v1773_v48 = vld [vmem:[%s11871_s19 + $0x5e00] sm:$0xff]  ;;  %1770 = vst [vmem:[%s11879_s20 + $0x1770] sm:$0xff] %v1769_v46  ;;  %1772 = vst [vmem:[%s11879_s20 + $0x1778] sm:$0xff] %v1771_v47  ;;  %v1775_v49 = vld [vmem:[%s11871_s19 + $0x5e08] sm:$0xff] }
 0x18d   : > { %1774 = vst [vmem:[%s11879_s20 + $0x1780] sm:$0xff] %v1773_v48  ;;  %v1777_v50 = vld [vmem:[%s11871_s19 + $0x5e40] sm:$0xff]  ;;  %v1779_v51 = vld [vmem:[%s11871_s19 + $0x5e48] sm:$0xff]  ;;  %1776 = vst [vmem:[%s11879_s20 + $0x1788] sm:$0xff] %v1775_v49 }
 0x18e   : > { %1778 = vst [vmem:[%s11879_s20 + $0x1790] sm:$0xff] %v1777_v50  ;;  %1780 = vst [vmem:[%s11879_s20 + $0x1798] sm:$0xff] %v1779_v51  ;;  %v1781_v52 = vld [vmem:[%s11871_s19 + $0x5e80] sm:$0xff]  ;;  %v1783_v53 = vld [vmem:[%s11871_s19 + $0x5e88] sm:$0xff] }
 0x18f   : > { %v1785_v54 = vld [vmem:[%s11871_s19 + $0x5ec0] sm:$0xff]  ;;  %1782 = vst [vmem:[%s11879_s20 + $0x17a0] sm:$0xff] %v1781_v52  ;;  %1784 = vst [vmem:[%s11879_s20 + $0x17a8] sm:$0xff] %v1783_v53  ;;  %v1787_v55 = vld [vmem:[%s11871_s19 + $0x5ec8] sm:$0xff] }
 0x190   : > { %1786 = vst [vmem:[%s11879_s20 + $0x17b0] sm:$0xff] %v1785_v54  ;;  %v1789_v56 = vld [vmem:[%s11871_s19 + $0x5f00] sm:$0xff]  ;;  %v1791_v57 = vld [vmem:[%s11871_s19 + $0x5f08] sm:$0xff]  ;;  %1788 = vst [vmem:[%s11879_s20 + $0x17b8] sm:$0xff] %v1787_v55 }
 0x191   : > { %1790 = vst [vmem:[%s11879_s20 + $0x17c0] sm:$0xff] %v1789_v56  ;;  %1792 = vst [vmem:[%s11879_s20 + $0x17c8] sm:$0xff] %v1791_v57  ;;  %v1793_v58 = vld [vmem:[%s11871_s19 + $0x5f40] sm:$0xff]  ;;  %v1795_v59 = vld [vmem:[%s11871_s19 + $0x5f48] sm:$0xff] }
 0x192   : > { %v1797_v60 = vld [vmem:[%s11871_s19 + $0x5f80] sm:$0xff]  ;;  %1794 = vst [vmem:[%s11879_s20 + $0x17d0] sm:$0xff] %v1793_v58  ;;  %1796 = vst [vmem:[%s11879_s20 + $0x17d8] sm:$0xff] %v1795_v59  ;;  %v1799_v61 = vld [vmem:[%s11871_s19 + $0x5f88] sm:$0xff] }
 0x193   : > { %1798 = vst [vmem:[%s11879_s20 + $0x17e0] sm:$0xff] %v1797_v60  ;;  %v1801_v62 = vld [vmem:[%s11871_s19 + $0x5fc0] sm:$0xff]  ;;  %v1803_v63 = vld [vmem:[%s11871_s19 + $0x5fc8] sm:$0xff]  ;;  %1800 = vst [vmem:[%s11879_s20 + $0x17e8] sm:$0xff] %v1799_v61 }
 0x194   : > { %1802 = vst [vmem:[%s11879_s20 + $0x17f0] sm:$0xff] %v1801_v62  ;;  %1804 = vst [vmem:[%s11879_s20 + $0x17f8] sm:$0xff] %v1803_v63  ;;  %v1805_v0 = vld [vmem:[%s11871_s19 + $0x6000] sm:$0xff]  ;;  %v1807_v1 = vld [vmem:[%s11871_s19 + $0x6008] sm:$0xff] }
 0x195   : > { %v1809_v2 = vld [vmem:[%s11871_s19 + $0x6040] sm:$0xff]  ;;  %1806 = vst [vmem:[%s11879_s20 + $0x1800] sm:$0xff] %v1805_v0  ;;  %1808 = vst [vmem:[%s11879_s20 + $0x1808] sm:$0xff] %v1807_v1  ;;  %v1811_v3 = vld [vmem:[%s11871_s19 + $0x6048] sm:$0xff] }
 0x196   : > { %1810 = vst [vmem:[%s11879_s20 + $0x1810] sm:$0xff] %v1809_v2  ;;  %v1813_v4 = vld [vmem:[%s11871_s19 + $0x6080] sm:$0xff]  ;;  %v1815_v5 = vld [vmem:[%s11871_s19 + $0x6088] sm:$0xff]  ;;  %1812 = vst [vmem:[%s11879_s20 + $0x1818] sm:$0xff] %v1811_v3 }
 0x197   : > { %1814 = vst [vmem:[%s11879_s20 + $0x1820] sm:$0xff] %v1813_v4  ;;  %1816 = vst [vmem:[%s11879_s20 + $0x1828] sm:$0xff] %v1815_v5  ;;  %v1817_v6 = vld [vmem:[%s11871_s19 + $0x60c0] sm:$0xff]  ;;  %v1819_v7 = vld [vmem:[%s11871_s19 + $0x60c8] sm:$0xff] }
 0x198   : > { %v1821_v8 = vld [vmem:[%s11871_s19 + $0x6100] sm:$0xff]  ;;  %1818 = vst [vmem:[%s11879_s20 + $0x1830] sm:$0xff] %v1817_v6  ;;  %1820 = vst [vmem:[%s11879_s20 + $0x1838] sm:$0xff] %v1819_v7  ;;  %v1823_v9 = vld [vmem:[%s11871_s19 + $0x6108] sm:$0xff] }
 0x199   : > { %1822 = vst [vmem:[%s11879_s20 + $0x1840] sm:$0xff] %v1821_v8  ;;  %v1825_v10 = vld [vmem:[%s11871_s19 + $0x6140] sm:$0xff]  ;;  %v1827_v11 = vld [vmem:[%s11871_s19 + $0x6148] sm:$0xff]  ;;  %1824 = vst [vmem:[%s11879_s20 + $0x1848] sm:$0xff] %v1823_v9 }
 0x19a   : > { %1826 = vst [vmem:[%s11879_s20 + $0x1850] sm:$0xff] %v1825_v10  ;;  %1828 = vst [vmem:[%s11879_s20 + $0x1858] sm:$0xff] %v1827_v11  ;;  %v1829_v12 = vld [vmem:[%s11871_s19 + $0x6180] sm:$0xff]  ;;  %v1831_v13 = vld [vmem:[%s11871_s19 + $0x6188] sm:$0xff] }
 0x19b   : > { %v1833_v14 = vld [vmem:[%s11871_s19 + $0x61c0] sm:$0xff]  ;;  %1830 = vst [vmem:[%s11879_s20 + $0x1860] sm:$0xff] %v1829_v12  ;;  %1832 = vst [vmem:[%s11879_s20 + $0x1868] sm:$0xff] %v1831_v13  ;;  %v1835_v15 = vld [vmem:[%s11871_s19 + $0x61c8] sm:$0xff] }
 0x19c   : > { %1834 = vst [vmem:[%s11879_s20 + $0x1870] sm:$0xff] %v1833_v14  ;;  %1836 = vst [vmem:[%s11879_s20 + $0x1878] sm:$0xff] %v1835_v15 }
 0x19d PF: > { %1842 = sbr.rel (!%p11851_p5) target bundleno = 481 (0x1e1), region = 55  ;;  %s1844_s21 = sand.u32 (%p11851_p5), 1, %s11763_s26  }
 0x19e   : > { %s10276_s22 = sshll.u32 (%p11851_p5), %s11767_s27, 4  ;;  %s9343_s23 = sshll.u32 (%p11851_p5), %s1844_s21, 10 }
 0x19f   : > { %s13450_s9 = scalar_lea.vmem (%p11851_p5), %s15006_s4, %s10276_s22  ;;  %s13455_s11 = scalar_lea.vmem (%p11851_p5), [#allocation3], %s9343_s23 }
 0x1a0   : > { %v1862_v16 = vld [vmem:[%s13450_s9] sm:$0xff] (%p11851_p5)  ;;  %v1864_v17 = vld [vmem:[%s13450_s9 + $0x8] sm:$0xff] (%p11851_p5) }
 0x1a1   : > { %v1866_v18 = vld [vmem:[%s13450_s9 + $0x40] sm:$0xff] (%p11851_p5)  ;;  %1863 = vst [vmem:[%s13455_s11] sm:$0xff] (%p11851_p5), %v1862_v16  ;;  %1865 = vst [vmem:[%s13455_s11 + $0x8] sm:$0xff] (%p11851_p5), %v1864_v17  ;;  %v1868_v19 = vld [vmem:[%s13450_s9 + $0x48] sm:$0xff] (%p11851_p5) }
 0x1a2   : > { %1867 = vst [vmem:[%s13455_s11 + $0x10] sm:$0xff] %v1866_v18  ;;  %v1870_v20 = vld [vmem:[%s13450_s9 + $0x80] sm:$0xff]  ;;  %v1872_v21 = vld [vmem:[%s13450_s9 + $0x88] sm:$0xff]  ;;  %1869 = vst [vmem:[%s13455_s11 + $0x18] sm:$0xff] %v1868_v19 }
 0x1a3   : > { %1871 = vst [vmem:[%s13455_s11 + $0x20] sm:$0xff] %v1870_v20  ;;  %1873 = vst [vmem:[%s13455_s11 + $0x28] sm:$0xff] %v1872_v21  ;;  %v1874_v22 = vld [vmem:[%s13450_s9 + $0xc0] sm:$0xff]  ;;  %v1876_v23 = vld [vmem:[%s13450_s9 + $0xc8] sm:$0xff] }
 0x1a4   : > { %v1878_v24 = vld [vmem:[%s13450_s9 + $0x100] sm:$0xff]  ;;  %1875 = vst [vmem:[%s13455_s11 + $0x30] sm:$0xff] %v1874_v22  ;;  %1877 = vst [vmem:[%s13455_s11 + $0x38] sm:$0xff] %v1876_v23  ;;  %v1880_v25 = vld [vmem:[%s13450_s9 + $0x108] sm:$0xff] }
 0x1a5   : > { %1879 = vst [vmem:[%s13455_s11 + $0x40] sm:$0xff] %v1878_v24  ;;  %v1882_v26 = vld [vmem:[%s13450_s9 + $0x140] sm:$0xff]  ;;  %v1884_v27 = vld [vmem:[%s13450_s9 + $0x148] sm:$0xff]  ;;  %1881 = vst [vmem:[%s13455_s11 + $0x48] sm:$0xff] %v1880_v25 }
 0x1a6   : > { %1883 = vst [vmem:[%s13455_s11 + $0x50] sm:$0xff] %v1882_v26  ;;  %1885 = vst [vmem:[%s13455_s11 + $0x58] sm:$0xff] %v1884_v27  ;;  %v1886_v28 = vld [vmem:[%s13450_s9 + $0x180] sm:$0xff]  ;;  %v1888_v29 = vld [vmem:[%s13450_s9 + $0x188] sm:$0xff] }
 0x1a7   : > { %v1890_v30 = vld [vmem:[%s13450_s9 + $0x1c0] sm:$0xff]  ;;  %1887 = vst [vmem:[%s13455_s11 + $0x60] sm:$0xff] %v1886_v28  ;;  %1889 = vst [vmem:[%s13455_s11 + $0x68] sm:$0xff] %v1888_v29  ;;  %v1892_v31 = vld [vmem:[%s13450_s9 + $0x1c8] sm:$0xff] }
 0x1a8   : > { %1891 = vst [vmem:[%s13455_s11 + $0x70] sm:$0xff] %v1890_v30  ;;  %v1894_v32 = vld [vmem:[%s13450_s9 + $0x200] sm:$0xff]  ;;  %v1896_v33 = vld [vmem:[%s13450_s9 + $0x208] sm:$0xff]  ;;  %1893 = vst [vmem:[%s13455_s11 + $0x78] sm:$0xff] %v1892_v31 }
 0x1a9   : > { %1895 = vst [vmem:[%s13455_s11 + $0x80] sm:$0xff] %v1894_v32  ;;  %1897 = vst [vmem:[%s13455_s11 + $0x88] sm:$0xff] %v1896_v33  ;;  %v1898_v34 = vld [vmem:[%s13450_s9 + $0x240] sm:$0xff]  ;;  %v1900_v35 = vld [vmem:[%s13450_s9 + $0x248] sm:$0xff] }
 0x1aa   : > { %v1902_v36 = vld [vmem:[%s13450_s9 + $0x280] sm:$0xff]  ;;  %1899 = vst [vmem:[%s13455_s11 + $0x90] sm:$0xff] %v1898_v34  ;;  %1901 = vst [vmem:[%s13455_s11 + $0x98] sm:$0xff] %v1900_v35  ;;  %v1904_v37 = vld [vmem:[%s13450_s9 + $0x288] sm:$0xff] }
 0x1ab   : > { %1903 = vst [vmem:[%s13455_s11 + $0xa0] sm:$0xff] %v1902_v36  ;;  %v1906_v38 = vld [vmem:[%s13450_s9 + $0x2c0] sm:$0xff]  ;;  %v1908_v39 = vld [vmem:[%s13450_s9 + $0x2c8] sm:$0xff]  ;;  %1905 = vst [vmem:[%s13455_s11 + $0xa8] sm:$0xff] %v1904_v37 }
 0x1ac   : > { %1907 = vst [vmem:[%s13455_s11 + $0xb0] sm:$0xff] %v1906_v38  ;;  %1909 = vst [vmem:[%s13455_s11 + $0xb8] sm:$0xff] %v1908_v39  ;;  %v1910_v40 = vld [vmem:[%s13450_s9 + $0x300] sm:$0xff]  ;;  %v1912_v41 = vld [vmem:[%s13450_s9 + $0x308] sm:$0xff] }
 0x1ad   : > { %v1914_v42 = vld [vmem:[%s13450_s9 + $0x340] sm:$0xff]  ;;  %1911 = vst [vmem:[%s13455_s11 + $0xc0] sm:$0xff] %v1910_v40  ;;  %1913 = vst [vmem:[%s13455_s11 + $0xc8] sm:$0xff] %v1912_v41  ;;  %v1916_v43 = vld [vmem:[%s13450_s9 + $0x348] sm:$0xff] }
 0x1ae   : > { %1915 = vst [vmem:[%s13455_s11 + $0xd0] sm:$0xff] %v1914_v42  ;;  %v1918_v44 = vld [vmem:[%s13450_s9 + $0x380] sm:$0xff]  ;;  %v1920_v45 = vld [vmem:[%s13450_s9 + $0x388] sm:$0xff]  ;;  %1917 = vst [vmem:[%s13455_s11 + $0xd8] sm:$0xff] %v1916_v43 }
 0x1af   : > { %1919 = vst [vmem:[%s13455_s11 + $0xe0] sm:$0xff] %v1918_v44  ;;  %1921 = vst [vmem:[%s13455_s11 + $0xe8] sm:$0xff] %v1920_v45  ;;  %v1922_v46 = vld [vmem:[%s13450_s9 + $0x3c0] sm:$0xff]  ;;  %v1924_v47 = vld [vmem:[%s13450_s9 + $0x3c8] sm:$0xff] }
 0x1b0   : > { %v1926_v48 = vld [vmem:[%s13450_s9 + $0x400] sm:$0xff]  ;;  %1923 = vst [vmem:[%s13455_s11 + $0xf0] sm:$0xff] %v1922_v46  ;;  %1925 = vst [vmem:[%s13455_s11 + $0xf8] sm:$0xff] %v1924_v47  ;;  %v1928_v49 = vld [vmem:[%s13450_s9 + $0x408] sm:$0xff] }
 0x1b1   : > { %1927 = vst [vmem:[%s13455_s11 + $0x100] sm:$0xff] %v1926_v48  ;;  %v1930_v50 = vld [vmem:[%s13450_s9 + $0x440] sm:$0xff]  ;;  %v1932_v51 = vld [vmem:[%s13450_s9 + $0x448] sm:$0xff]  ;;  %1929 = vst [vmem:[%s13455_s11 + $0x108] sm:$0xff] %v1928_v49 }
 0x1b2   : > { %1931 = vst [vmem:[%s13455_s11 + $0x110] sm:$0xff] %v1930_v50  ;;  %1933 = vst [vmem:[%s13455_s11 + $0x118] sm:$0xff] %v1932_v51  ;;  %v1934_v52 = vld [vmem:[%s13450_s9 + $0x480] sm:$0xff]  ;;  %v1936_v53 = vld [vmem:[%s13450_s9 + $0x488] sm:$0xff] }
 0x1b3   : > { %v1938_v54 = vld [vmem:[%s13450_s9 + $0x4c0] sm:$0xff]  ;;  %1935 = vst [vmem:[%s13455_s11 + $0x120] sm:$0xff] %v1934_v52  ;;  %1937 = vst [vmem:[%s13455_s11 + $0x128] sm:$0xff] %v1936_v53  ;;  %v1940_v55 = vld [vmem:[%s13450_s9 + $0x4c8] sm:$0xff] }
 0x1b4   : > { %1939 = vst [vmem:[%s13455_s11 + $0x130] sm:$0xff] %v1938_v54  ;;  %v1942_v56 = vld [vmem:[%s13450_s9 + $0x500] sm:$0xff]  ;;  %v1944_v57 = vld [vmem:[%s13450_s9 + $0x508] sm:$0xff]  ;;  %1941 = vst [vmem:[%s13455_s11 + $0x138] sm:$0xff] %v1940_v55 }
 0x1b5   : > { %1943 = vst [vmem:[%s13455_s11 + $0x140] sm:$0xff] %v1942_v56  ;;  %1945 = vst [vmem:[%s13455_s11 + $0x148] sm:$0xff] %v1944_v57  ;;  %v1946_v58 = vld [vmem:[%s13450_s9 + $0x540] sm:$0xff]  ;;  %v1948_v59 = vld [vmem:[%s13450_s9 + $0x548] sm:$0xff] }
 0x1b6   : > { %v1950_v60 = vld [vmem:[%s13450_s9 + $0x580] sm:$0xff]  ;;  %1947 = vst [vmem:[%s13455_s11 + $0x150] sm:$0xff] %v1946_v58  ;;  %1949 = vst [vmem:[%s13455_s11 + $0x158] sm:$0xff] %v1948_v59  ;;  %v1952_v61 = vld [vmem:[%s13450_s9 + $0x588] sm:$0xff] }
 0x1b7   : > { %1951 = vst [vmem:[%s13455_s11 + $0x160] sm:$0xff] %v1950_v60  ;;  %v1954_v62 = vld [vmem:[%s13450_s9 + $0x5c0] sm:$0xff]  ;;  %v1956_v63 = vld [vmem:[%s13450_s9 + $0x5c8] sm:$0xff]  ;;  %1953 = vst [vmem:[%s13455_s11 + $0x168] sm:$0xff] %v1952_v61 }
 0x1b8   : > { %1955 = vst [vmem:[%s13455_s11 + $0x170] sm:$0xff] %v1954_v62  ;;  %1957 = vst [vmem:[%s13455_s11 + $0x178] sm:$0xff] %v1956_v63  ;;  %v1958_v0 = vld [vmem:[%s13450_s9 + $0x600] sm:$0xff]  ;;  %v1960_v1 = vld [vmem:[%s13450_s9 + $0x608] sm:$0xff] }
 0x1b9   : > { %v1962_v2 = vld [vmem:[%s13450_s9 + $0x640] sm:$0xff]  ;;  %1959 = vst [vmem:[%s13455_s11 + $0x180] sm:$0xff] %v1958_v0  ;;  %1961 = vst [vmem:[%s13455_s11 + $0x188] sm:$0xff] %v1960_v1  ;;  %v1964_v3 = vld [vmem:[%s13450_s9 + $0x648] sm:$0xff] }
 0x1ba   : > { %1963 = vst [vmem:[%s13455_s11 + $0x190] sm:$0xff] %v1962_v2  ;;  %v1966_v4 = vld [vmem:[%s13450_s9 + $0x680] sm:$0xff]  ;;  %v1968_v5 = vld [vmem:[%s13450_s9 + $0x688] sm:$0xff]  ;;  %1965 = vst [vmem:[%s13455_s11 + $0x198] sm:$0xff] %v1964_v3 }
 0x1bb   : > { %1967 = vst [vmem:[%s13455_s11 + $0x1a0] sm:$0xff] %v1966_v4  ;;  %1969 = vst [vmem:[%s13455_s11 + $0x1a8] sm:$0xff] %v1968_v5  ;;  %v1970_v6 = vld [vmem:[%s13450_s9 + $0x6c0] sm:$0xff]  ;;  %v1972_v7 = vld [vmem:[%s13450_s9 + $0x6c8] sm:$0xff] }
 0x1bc   : > { %v1974_v8 = vld [vmem:[%s13450_s9 + $0x700] sm:$0xff]  ;;  %1971 = vst [vmem:[%s13455_s11 + $0x1b0] sm:$0xff] %v1970_v6  ;;  %1973 = vst [vmem:[%s13455_s11 + $0x1b8] sm:$0xff] %v1972_v7  ;;  %v1976_v9 = vld [vmem:[%s13450_s9 + $0x708] sm:$0xff] }
 0x1bd   : > { %1975 = vst [vmem:[%s13455_s11 + $0x1c0] sm:$0xff] %v1974_v8  ;;  %v1978_v10 = vld [vmem:[%s13450_s9 + $0x740] sm:$0xff]  ;;  %v1980_v11 = vld [vmem:[%s13450_s9 + $0x748] sm:$0xff]  ;;  %1977 = vst [vmem:[%s13455_s11 + $0x1c8] sm:$0xff] %v1976_v9 }
 0x1be   : > { %1979 = vst [vmem:[%s13455_s11 + $0x1d0] sm:$0xff] %v1978_v10  ;;  %1981 = vst [vmem:[%s13455_s11 + $0x1d8] sm:$0xff] %v1980_v11  ;;  %v1982_v12 = vld [vmem:[%s13450_s9 + $0x780] sm:$0xff]  ;;  %v1984_v13 = vld [vmem:[%s13450_s9 + $0x788] sm:$0xff] }
 0x1bf   : > { %v1986_v14 = vld [vmem:[%s13450_s9 + $0x7c0] sm:$0xff]  ;;  %1983 = vst [vmem:[%s13455_s11 + $0x1e0] sm:$0xff] %v1982_v12  ;;  %1985 = vst [vmem:[%s13455_s11 + $0x1e8] sm:$0xff] %v1984_v13  ;;  %v1988_v15 = vld [vmem:[%s13450_s9 + $0x7c8] sm:$0xff] }
 0x1c0   : > { %1987 = vst [vmem:[%s13455_s11 + $0x1f0] sm:$0xff] %v1986_v14  ;;  %v1990_v16 = vld [vmem:[%s13450_s9 + $0x800] sm:$0xff]  ;;  %v1992_v17 = vld [vmem:[%s13450_s9 + $0x808] sm:$0xff]  ;;  %1989 = vst [vmem:[%s13455_s11 + $0x1f8] sm:$0xff] %v1988_v15 }
 0x1c1   : > { %1991 = vst [vmem:[%s13455_s11 + $0x200] sm:$0xff] %v1990_v16  ;;  %1993 = vst [vmem:[%s13455_s11 + $0x208] sm:$0xff] %v1992_v17  ;;  %v1994_v18 = vld [vmem:[%s13450_s9 + $0x840] sm:$0xff]  ;;  %v1996_v19 = vld [vmem:[%s13450_s9 + $0x848] sm:$0xff] }
 0x1c2   : > { %v1998_v20 = vld [vmem:[%s13450_s9 + $0x880] sm:$0xff]  ;;  %1995 = vst [vmem:[%s13455_s11 + $0x210] sm:$0xff] %v1994_v18  ;;  %1997 = vst [vmem:[%s13455_s11 + $0x218] sm:$0xff] %v1996_v19  ;;  %v2000_v21 = vld [vmem:[%s13450_s9 + $0x888] sm:$0xff] }
 0x1c3   : > { %1999 = vst [vmem:[%s13455_s11 + $0x220] sm:$0xff] %v1998_v20  ;;  %v2002_v22 = vld [vmem:[%s13450_s9 + $0x8c0] sm:$0xff]  ;;  %v2004_v23 = vld [vmem:[%s13450_s9 + $0x8c8] sm:$0xff]  ;;  %2001 = vst [vmem:[%s13455_s11 + $0x228] sm:$0xff] %v2000_v21 }
 0x1c4   : > { %2003 = vst [vmem:[%s13455_s11 + $0x230] sm:$0xff] %v2002_v22  ;;  %2005 = vst [vmem:[%s13455_s11 + $0x238] sm:$0xff] %v2004_v23  ;;  %v2006_v24 = vld [vmem:[%s13450_s9 + $0x900] sm:$0xff]  ;;  %v2008_v25 = vld [vmem:[%s13450_s9 + $0x908] sm:$0xff] }
 0x1c5   : > { %v2010_v26 = vld [vmem:[%s13450_s9 + $0x940] sm:$0xff]  ;;  %2007 = vst [vmem:[%s13455_s11 + $0x240] sm:$0xff] %v2006_v24  ;;  %2009 = vst [vmem:[%s13455_s11 + $0x248] sm:$0xff] %v2008_v25  ;;  %v2012_v27 = vld [vmem:[%s13450_s9 + $0x948] sm:$0xff] }
 0x1c6   : > { %2011 = vst [vmem:[%s13455_s11 + $0x250] sm:$0xff] %v2010_v26  ;;  %v2014_v28 = vld [vmem:[%s13450_s9 + $0x980] sm:$0xff]  ;;  %v2016_v29 = vld [vmem:[%s13450_s9 + $0x988] sm:$0xff]  ;;  %2013 = vst [vmem:[%s13455_s11 + $0x258] sm:$0xff] %v2012_v27 }
 0x1c7   : > { %2015 = vst [vmem:[%s13455_s11 + $0x260] sm:$0xff] %v2014_v28  ;;  %2017 = vst [vmem:[%s13455_s11 + $0x268] sm:$0xff] %v2016_v29  ;;  %v2018_v30 = vld [vmem:[%s13450_s9 + $0x9c0] sm:$0xff]  ;;  %v2020_v31 = vld [vmem:[%s13450_s9 + $0x9c8] sm:$0xff] }
 0x1c8   : > { %v2022_v32 = vld [vmem:[%s13450_s9 + $0xa00] sm:$0xff]  ;;  %2019 = vst [vmem:[%s13455_s11 + $0x270] sm:$0xff] %v2018_v30  ;;  %2021 = vst [vmem:[%s13455_s11 + $0x278] sm:$0xff] %v2020_v31  ;;  %v2024_v33 = vld [vmem:[%s13450_s9 + $0xa08] sm:$0xff] }
 0x1c9   : > { %2023 = vst [vmem:[%s13455_s11 + $0x280] sm:$0xff] %v2022_v32  ;;  %v2026_v34 = vld [vmem:[%s13450_s9 + $0xa40] sm:$0xff]  ;;  %v2028_v35 = vld [vmem:[%s13450_s9 + $0xa48] sm:$0xff]  ;;  %2025 = vst [vmem:[%s13455_s11 + $0x288] sm:$0xff] %v2024_v33 }
 0x1ca   : > { %2027 = vst [vmem:[%s13455_s11 + $0x290] sm:$0xff] %v2026_v34  ;;  %2029 = vst [vmem:[%s13455_s11 + $0x298] sm:$0xff] %v2028_v35  ;;  %v2030_v36 = vld [vmem:[%s13450_s9 + $0xa80] sm:$0xff]  ;;  %v2032_v37 = vld [vmem:[%s13450_s9 + $0xa88] sm:$0xff] }
 0x1cb   : > { %v2034_v38 = vld [vmem:[%s13450_s9 + $0xac0] sm:$0xff]  ;;  %2031 = vst [vmem:[%s13455_s11 + $0x2a0] sm:$0xff] %v2030_v36  ;;  %2033 = vst [vmem:[%s13455_s11 + $0x2a8] sm:$0xff] %v2032_v37  ;;  %v2036_v39 = vld [vmem:[%s13450_s9 + $0xac8] sm:$0xff] }
 0x1cc   : > { %2035 = vst [vmem:[%s13455_s11 + $0x2b0] sm:$0xff] %v2034_v38  ;;  %v2038_v40 = vld [vmem:[%s13450_s9 + $0xb00] sm:$0xff]  ;;  %v2040_v41 = vld [vmem:[%s13450_s9 + $0xb08] sm:$0xff]  ;;  %2037 = vst [vmem:[%s13455_s11 + $0x2b8] sm:$0xff] %v2036_v39 }
 0x1cd   : > { %2039 = vst [vmem:[%s13455_s11 + $0x2c0] sm:$0xff] %v2038_v40  ;;  %2041 = vst [vmem:[%s13455_s11 + $0x2c8] sm:$0xff] %v2040_v41  ;;  %v2042_v42 = vld [vmem:[%s13450_s9 + $0xb40] sm:$0xff]  ;;  %v2044_v43 = vld [vmem:[%s13450_s9 + $0xb48] sm:$0xff] }
 0x1ce   : > { %v2046_v44 = vld [vmem:[%s13450_s9 + $0xb80] sm:$0xff]  ;;  %2043 = vst [vmem:[%s13455_s11 + $0x2d0] sm:$0xff] %v2042_v42  ;;  %2045 = vst [vmem:[%s13455_s11 + $0x2d8] sm:$0xff] %v2044_v43  ;;  %v2048_v45 = vld [vmem:[%s13450_s9 + $0xb88] sm:$0xff] }
 0x1cf   : > { %2047 = vst [vmem:[%s13455_s11 + $0x2e0] sm:$0xff] %v2046_v44  ;;  %v2050_v46 = vld [vmem:[%s13450_s9 + $0xbc0] sm:$0xff]  ;;  %v2052_v47 = vld [vmem:[%s13450_s9 + $0xbc8] sm:$0xff]  ;;  %2049 = vst [vmem:[%s13455_s11 + $0x2e8] sm:$0xff] %v2048_v45 }
 0x1d0   : > { %2051 = vst [vmem:[%s13455_s11 + $0x2f0] sm:$0xff] %v2050_v46  ;;  %2053 = vst [vmem:[%s13455_s11 + $0x2f8] sm:$0xff] %v2052_v47  ;;  %v2054_v48 = vld [vmem:[%s13450_s9 + $0xc00] sm:$0xff]  ;;  %v2056_v49 = vld [vmem:[%s13450_s9 + $0xc08] sm:$0xff] }
 0x1d1   : > { %v2058_v50 = vld [vmem:[%s13450_s9 + $0xc40] sm:$0xff]  ;;  %2055 = vst [vmem:[%s13455_s11 + $0x300] sm:$0xff] %v2054_v48  ;;  %2057 = vst [vmem:[%s13455_s11 + $0x308] sm:$0xff] %v2056_v49  ;;  %v2060_v51 = vld [vmem:[%s13450_s9 + $0xc48] sm:$0xff] }
 0x1d2   : > { %2059 = vst [vmem:[%s13455_s11 + $0x310] sm:$0xff] %v2058_v50  ;;  %v2062_v52 = vld [vmem:[%s13450_s9 + $0xc80] sm:$0xff]  ;;  %v2064_v53 = vld [vmem:[%s13450_s9 + $0xc88] sm:$0xff]  ;;  %2061 = vst [vmem:[%s13455_s11 + $0x318] sm:$0xff] %v2060_v51 }
 0x1d3   : > { %2063 = vst [vmem:[%s13455_s11 + $0x320] sm:$0xff] %v2062_v52  ;;  %2065 = vst [vmem:[%s13455_s11 + $0x328] sm:$0xff] %v2064_v53  ;;  %v2066_v54 = vld [vmem:[%s13450_s9 + $0xcc0] sm:$0xff]  ;;  %v2068_v55 = vld [vmem:[%s13450_s9 + $0xcc8] sm:$0xff] }
 0x1d4   : > { %v2070_v56 = vld [vmem:[%s13450_s9 + $0xd00] sm:$0xff]  ;;  %2067 = vst [vmem:[%s13455_s11 + $0x330] sm:$0xff] %v2066_v54  ;;  %2069 = vst [vmem:[%s13455_s11 + $0x338] sm:$0xff] %v2068_v55  ;;  %v2072_v57 = vld [vmem:[%s13450_s9 + $0xd08] sm:$0xff] }
 0x1d5   : > { %2071 = vst [vmem:[%s13455_s11 + $0x340] sm:$0xff] %v2070_v56  ;;  %v2074_v58 = vld [vmem:[%s13450_s9 + $0xd40] sm:$0xff]  ;;  %v2076_v59 = vld [vmem:[%s13450_s9 + $0xd48] sm:$0xff]  ;;  %2073 = vst [vmem:[%s13455_s11 + $0x348] sm:$0xff] %v2072_v57 }
 0x1d6   : > { %2075 = vst [vmem:[%s13455_s11 + $0x350] sm:$0xff] %v2074_v58  ;;  %2077 = vst [vmem:[%s13455_s11 + $0x358] sm:$0xff] %v2076_v59  ;;  %v2078_v60 = vld [vmem:[%s13450_s9 + $0xd80] sm:$0xff]  ;;  %v2080_v61 = vld [vmem:[%s13450_s9 + $0xd88] sm:$0xff] }
 0x1d7   : > { %v2082_v62 = vld [vmem:[%s13450_s9 + $0xdc0] sm:$0xff]  ;;  %2079 = vst [vmem:[%s13455_s11 + $0x360] sm:$0xff] %v2078_v60  ;;  %2081 = vst [vmem:[%s13455_s11 + $0x368] sm:$0xff] %v2080_v61  ;;  %v2084_v63 = vld [vmem:[%s13450_s9 + $0xdc8] sm:$0xff] }
 0x1d8   : > { %2083 = vst [vmem:[%s13455_s11 + $0x370] sm:$0xff] %v2082_v62  ;;  %v2086_v0 = vld [vmem:[%s13450_s9 + $0xe00] sm:$0xff]  ;;  %v2088_v1 = vld [vmem:[%s13450_s9 + $0xe08] sm:$0xff]  ;;  %2085 = vst [vmem:[%s13455_s11 + $0x378] sm:$0xff] %v2084_v63 }
 0x1d9   : > { %2087 = vst [vmem:[%s13455_s11 + $0x380] sm:$0xff] %v2086_v0  ;;  %2089 = vst [vmem:[%s13455_s11 + $0x388] sm:$0xff] %v2088_v1  ;;  %v2090_v2 = vld [vmem:[%s13450_s9 + $0xe40] sm:$0xff]  ;;  %v2092_v3 = vld [vmem:[%s13450_s9 + $0xe48] sm:$0xff] }
 0x1da   : > { %v2094_v4 = vld [vmem:[%s13450_s9 + $0xe80] sm:$0xff]  ;;  %2091 = vst [vmem:[%s13455_s11 + $0x390] sm:$0xff] %v2090_v2  ;;  %2093 = vst [vmem:[%s13455_s11 + $0x398] sm:$0xff] %v2092_v3  ;;  %v2096_v5 = vld [vmem:[%s13450_s9 + $0xe88] sm:$0xff] }
 0x1db   : > { %2095 = vst [vmem:[%s13455_s11 + $0x3a0] sm:$0xff] %v2094_v4  ;;  %v2098_v6 = vld [vmem:[%s13450_s9 + $0xec0] sm:$0xff]  ;;  %v2100_v7 = vld [vmem:[%s13450_s9 + $0xec8] sm:$0xff]  ;;  %2097 = vst [vmem:[%s13455_s11 + $0x3a8] sm:$0xff] %v2096_v5 }
 0x1dc   : > { %2099 = vst [vmem:[%s13455_s11 + $0x3b0] sm:$0xff] %v2098_v6  ;;  %2101 = vst [vmem:[%s13455_s11 + $0x3b8] sm:$0xff] %v2100_v7  ;;  %v2102_v8 = vld [vmem:[%s13450_s9 + $0xf00] sm:$0xff]  ;;  %v2104_v9 = vld [vmem:[%s13450_s9 + $0xf08] sm:$0xff] }
 0x1dd   : > { %v2106_v10 = vld [vmem:[%s13450_s9 + $0xf40] sm:$0xff]  ;;  %2103 = vst [vmem:[%s13455_s11 + $0x3c0] sm:$0xff] %v2102_v8  ;;  %2105 = vst [vmem:[%s13455_s11 + $0x3c8] sm:$0xff] %v2104_v9  ;;  %v2108_v11 = vld [vmem:[%s13450_s9 + $0xf48] sm:$0xff] }
 0x1de   : > { %2107 = vst [vmem:[%s13455_s11 + $0x3d0] sm:$0xff] %v2106_v10  ;;  %v2110_v12 = vld [vmem:[%s13450_s9 + $0xf80] sm:$0xff]  ;;  %v2112_v13 = vld [vmem:[%s13450_s9 + $0xf88] sm:$0xff]  ;;  %2109 = vst [vmem:[%s13455_s11 + $0x3d8] sm:$0xff] %v2108_v11 }
 0x1df   : > { %2111 = vst [vmem:[%s13455_s11 + $0x3e0] sm:$0xff] %v2110_v12  ;;  %2113 = vst [vmem:[%s13455_s11 + $0x3e8] sm:$0xff] %v2112_v13  ;;  %v2114_v14 = vld [vmem:[%s13450_s9 + $0xfc0] sm:$0xff]  ;;  %v2116_v15 = vld [vmem:[%s13450_s9 + $0xfc8] sm:$0xff] }
 0x1e0   : > { %2115 = vst [vmem:[%s13455_s11 + $0x3f0] sm:$0xff] %v2114_v14  ;;  %2117 = vst [vmem:[%s13455_s11 + $0x3f8] sm:$0xff] %v2116_v15 }
 0x1e1 PF: > { %p9346_p10 = scmp.ge.s32.totalorder %s11767_s27, 1  ;;  %p2130_p11 = scmp.lt.s32.totalorder %s11767_s27, 5 }
 0x1e3   : > { %p2131_p12 = pnand %p9346_p10, %p2130_p11 }
 0x1e4   : > { %s13713_s14 = sand.u32 (!%p2131_p12), 1, %s11759_s25   ;;  %s9350_s16 = sshll.u32 (!%p2131_p12), %s11833_s28, 2 }
 0x1e5   : > { %2134 = sbr.rel (%p2131_p12) target bundleno = 1650 (0x672), region = 82  ;;  %s9347_s17 = sshll.u32 (!%p2131_p12), %s13713_s14, 10 }
 0x1e6   : > { %s13723_s18 = scalar_lea.vmem (!%p2131_p12), [#allocation3], %s9347_s17  ;;  %s10278_s19 = smul.u32 (!%p2131_p12), 6272, %s13713_s14 }
 0x1e7   : > { %p2198_p13 = scmp.lt.s32.totalorder (!%p2131_p12), %s9350_s16, 15  ;;  %p2191_p0 = scmp.lt.s32.totalorder (!%p2131_p12), %s11833_s28, 3 }
 0x1e8   : > { %s13842_s20 = scalar_lea.vmem (!%p2131_p12), [#allocation2], %s10278_s19  ;;  %s9348_s8 = sshll.u32 (!%p2131_p12), %s13713_s14, 1 }
 0x1e9   : > { %s10272_s9 = sshll.u32 (!%p2131_p12), %s11833_s28, 5  ;;  %s2190_s11 = scalar_lea.vmem (!%p2131_p12), [#allocation4], %s9348_s8 }
 0x1ea   : > { %v13718_v16 = vld.sshfl [vmem:[%s15003_s1] sm:$0x33 pattern:$0x75316420]  ;;  %v3136_v17 = vlaneseq  ;;  %v11769_v18 = vmov 1966171168  }
 0x1eb   : > { %v3134_v19 = vunpack.c.l.s4 %v11769_v18  ;;  %v10320_v21 = vld [vmem:[%s13723_s18 + $0xe4] ss:$16 sps:$4 sm:$0xff]   ;;  %v3132_v23 = vcombine.high %v13718_v16, %v13718_v16  ;;  %v10324_v25 = vld [vmem:[%s13723_s18 + $0xe0] ss:$16 sps:$4 sm:$0xff]   ;;  %vm8066_vm0 = vcmask 523264   ;;  %s15018_s16 = smov (!%p2198_p13, %s9350_s16), 15 }
 0x1ec   : > { %v13721_v20 = vshrl.u32 %v3136_v17, 7  ;;  %v10322_v22 = vld [vmem:[%s13723_s18 + $0x2e4] ss:$16 sps:$4 sm:$0xff]   ;;  %3793 = vmatprep.subr.bf16.mxu0 %v10320_v21  ;;  %v10325_v26 = vld [vmem:[%s13723_s18 + $0x2e0] ss:$16 sps:$4 sm:$0xff]   ;;  %s2200_s19 = scalar_lea.vmem %s15007_s5, %s15018_s16  ;;  %s9210_s15 = sshll.u32 %s2190_s11, 4  ;;  %s14957_s15 = int_to_ptr.vmem [resolvable:$true] %s9210_s15 }
 0x1ed   : > { %v3135_v24 = vunpack.c.0.s8 %v3134_v19  ;;  %3834 = vmatprep.subr.bf16.mxu1 %v10322_v22  ;;  %v10326_v27 = vld [vmem:[%s13723_s18 + $0xc4] ss:$16 sps:$4 sm:$0xff]   ;;  %3794 = vmatpush1.bf16.msra.mxu0 %v10324_v25  ;;  %v10330_v30 = vld [vmem:[%s13723_s18 + $0xc0] ss:$16 sps:$4 sm:$0xff]   ;;  %s11771_s22 = smov [#allocation4]  }
 0x1ee   : > { %3835 = vmatpush1.bf16.msra.mxu1 %v10325_v26  ;;  %v10328_v29 = vld [vmem:[%s13723_s18 + $0x2c4] ss:$16 sps:$4 sm:$0xff]   ;;  %3795 = vmatprep.subr.bf16.mxu0 %v10326_v27  ;;  %v10331_v31 = vld [vmem:[%s13723_s18 + $0x2c0] ss:$16 sps:$4 sm:$0xff]   ;;  %s11711_s23 = sshll.u32 %s11771_s22, 4  ;;  %s11712_s23 = int_to_ptr.vmem [resolvable:$false] %s11711_s23 }
 0x1ef   : > { %v13733_v28 = vsub.s32 %v3135_v24, %v13721_v20  ;;  %3836 = vmatprep.subr.bf16.mxu1 %v10328_v29  ;;  %v10332_v33 = vld [vmem:[%s13723_s18 + $0xa4] ss:$16 sps:$4 sm:$0xff]   ;;  %v10336_v35 = vld [vmem:[%s13723_s18 + $0xa0] ss:$16 sps:$4 sm:$0xff]   ;;  %p11714_p4 = scmp.lt.s32.totalorder %s14957_s15, %s11712_s23 }
 0x1f0   : > { %v10334_v34 = vld [vmem:[%s13723_s18 + $0x2a4] ss:$16 sps:$4 sm:$0xff]   ;;  %v10337_v36 = vld [vmem:[%s13723_s18 + $0x2a0] ss:$16 sps:$4 sm:$0xff]  }
 0x1f1   : > { %v13739_v32 = vrot.slane %v3132_v23, %v13733_v28  ;;  %3796 = vmatpush1.bf16.msra.mxu0 %v10330_v30  ;;  %v10338_v38 = vld [vmem:[%s13723_s18 + $0x84] ss:$16 sps:$4 sm:$0xff]   ;;  %v10342_v40 = vld [vmem:[%s13723_s18 + $0x80] ss:$16 sps:$4 sm:$0xff]   ;;  %v13805_v29 = vrot.slane %v13718_v16, %v13733_v28  ;;  %v10418_v30 = vld [vmem:[%s13723_s18 + $0xec] ss:$16 sps:$4 sm:$0xff]  }
 0x1f2   : > { %3837 = vmatpush1.bf16.msra.mxu1 %v10331_v31  ;;  %3797 = vmatprep.subr.bf16.mxu0 %v10332_v33  ;;  %v10340_v39 = vld [vmem:[%s13723_s18 + $0x284] ss:$16 sps:$4 sm:$0xff]   ;;  %v10343_v41 = vld [vmem:[%s13723_s18 + $0x280] ss:$16 sps:$4 sm:$0xff]   ;;  %v10421_v31 = vld [vmem:[%s13723_s18 + $0x2ec] ss:$16 sps:$4 sm:$0xff]  }
 0x1f3   : > { %3825 = vmatprep.mubr.bf16.mxu0 %v13739_v32  ;;  %v13748_v37 = vcombine.high %v13739_v32, %v13739_v32  ;;  %3838 = vmatprep.subr.bf16.mxu1 %v10334_v34  ;;  %v10344_v42 = vld [vmem:[%s13723_s18 + $0x64] ss:$16 sps:$4 sm:$0xff]   ;;  %v10348_v44 = vld [vmem:[%s13723_s18 + $0x60] ss:$16 sps:$4 sm:$0xff]   ;;  %v13811_v33 = vcombine.high %v13805_v29, %v13805_v29  ;;  %v10416_v34 = vld [vmem:[%s13723_s18 + $0xe8] ss:$16 sps:$4 sm:$0xff]  }
 0x1f4   : > { %v10346_v43 = vld [vmem:[%s13723_s18 + $0x264] ss:$16 sps:$4 sm:$0xff]   ;;  %v10349_v45 = vld [vmem:[%s13723_s18 + $0x260] ss:$16 sps:$4 sm:$0xff]   ;;  %v10424_v16 = vld [vmem:[%s13723_s18 + $0xcc] ss:$16 sps:$4 sm:$0xff]  }
 0x1f5   : > { %3866 = vmatprep.mubr.bf16.mxu1 %v13748_v37  ;;  %3798 = vmatpush1.bf16.msra.mxu0 %v10336_v35  ;;  %v10350_v46 = vld [vmem:[%s13723_s18 + $0x44] ss:$16 sps:$4 sm:$0xff]   ;;  %v10354_v48 = vld [vmem:[%s13723_s18 + $0x40] ss:$16 sps:$4 sm:$0xff]   ;;  %v10419_v35 = vld [vmem:[%s13723_s18 + $0x2e8] ss:$16 sps:$4 sm:$0xff]  }
 0x1f6   : > { %3839 = vmatpush1.bf16.msra.mxu1 %v10337_v36  ;;  %3799 = vmatprep.subr.bf16.mxu0 %v10338_v38  ;;  %v10352_v47 = vld [vmem:[%s13723_s18 + $0x244] ss:$16 sps:$4 sm:$0xff]   ;;  %v10355_v49 = vld [vmem:[%s13723_s18 + $0x240] ss:$16 sps:$4 sm:$0xff]   ;;  %v10427_v36 = vld [vmem:[%s13723_s18 + $0x2cc] ss:$16 sps:$4 sm:$0xff]  }
 0x1f7   : > { %3840 = vmatprep.subr.bf16.mxu1 %v10340_v39  ;;  %v10356_v50 = vld [vmem:[%s13723_s18 + $0x24] ss:$16 sps:$4 sm:$0xff]   ;;  %v10360_v52 = vld [vmem:[%s13723_s18 + $0x20] ss:$16 sps:$4 sm:$0xff]   ;;  %v10422_v38 = vld [vmem:[%s13723_s18 + $0xc8] ss:$16 sps:$4 sm:$0xff]  }
 0x1f8   : > { %v10358_v51 = vld [vmem:[%s13723_s18 + $0x224] ss:$16 sps:$4 sm:$0xff]   ;;  %v10361_v53 = vld [vmem:[%s13723_s18 + $0x220] ss:$16 sps:$4 sm:$0xff]   ;;  %v10425_v39 = vld [vmem:[%s13723_s18 + $0x2c8] ss:$16 sps:$4 sm:$0xff]  }
 0x1f9   : > { %3800 = vmatpush1.bf16.msra.mxu0 %v10342_v40  ;;  %v10362_v54 = vld [vmem:[%s13723_s18 + $0x4] ss:$16 sps:$4 sm:$0xff]   ;;  %v10366_v56 = vld [vmem:[%s13723_s18] ss:$16 sps:$4 sm:$0xff]   ;;  %v10430_v40 = vld [vmem:[%s13723_s18 + $0xac] ss:$16 sps:$4 sm:$0xff]  }
 0x1fa   : > { %3841 = vmatpush1.bf16.msra.mxu1 %v10343_v41  ;;  %3801 = vmatprep.subr.bf16.mxu0 %v10344_v42  ;;  %v10364_v55 = vld [vmem:[%s13723_s18 + $0x204] ss:$16 sps:$4 sm:$0xff]   ;;  %v10367_v57 = vld [vmem:[%s13723_s18 + $0x200] ss:$16 sps:$4 sm:$0xff]   ;;  %v10433_v41 = vld [vmem:[%s13723_s18 + $0x2ac] ss:$16 sps:$4 sm:$0xff]  }
 0x1fb   : > { %3842 = vmatprep.subr.bf16.mxu1 %v10346_v43  ;;  %v10368_v58 = vld [vmem:[%s13723_s18 + $0x1e4] ss:$16 sps:$4 sm:$0xff]   ;;  %v10372_v60 = vld [vmem:[%s13723_s18 + $0x1e0] ss:$16 sps:$4 sm:$0xff]   ;;  %v10428_v42 = vld [vmem:[%s13723_s18 + $0xa8] ss:$16 sps:$4 sm:$0xff]  }
 0x1fc   : > { %v10370_v59 = vld [vmem:[%s13723_s18 + $0x3e4] ss:$16 sps:$4 sm:$0xff]   ;;  %v10373_v61 = vld [vmem:[%s13723_s18 + $0x3e0] ss:$16 sps:$4 sm:$0xff]   ;;  %v10431_v43 = vld [vmem:[%s13723_s18 + $0x2a8] ss:$16 sps:$4 sm:$0xff]  }
 0x1fd   : > { %3802 = vmatpush1.bf16.msra.mxu0 %v10348_v44  ;;  %v10374_v62 = vld [vmem:[%s13723_s18 + $0x1c4] ss:$16 sps:$4 sm:$0xff]   ;;  %v10378_v0 = vld [vmem:[%s13723_s18 + $0x1c0] ss:$16 sps:$4 sm:$0xff]   ;;  %v10436_v44 = vld [vmem:[%s13723_s18 + $0x8c] ss:$16 sps:$4 sm:$0xff]  }
 0x1fe   : > { %3843 = vmatpush1.bf16.msra.mxu1 %v10349_v45  ;;  %3803 = vmatprep.subr.bf16.mxu0 %v10350_v46  ;;  %v10376_v63 = vld [vmem:[%s13723_s18 + $0x3c4] ss:$16 sps:$4 sm:$0xff]   ;;  %v10379_v1 = vld [vmem:[%s13723_s18 + $0x3c0] ss:$16 sps:$4 sm:$0xff]   ;;  %v10439_v45 = vld [vmem:[%s13723_s18 + $0x28c] ss:$16 sps:$4 sm:$0xff]  }
 0x1ff   : > { %3844 = vmatprep.subr.bf16.mxu1 %v10352_v47  ;;  %v10380_v2 = vld [vmem:[%s13723_s18 + $0x1a4] ss:$16 sps:$4 sm:$0xff]   ;;  %v10384_v4 = vld [vmem:[%s13723_s18 + $0x1a0] ss:$16 sps:$4 sm:$0xff]   ;;  %v10434_v46 = vld [vmem:[%s13723_s18 + $0x88] ss:$16 sps:$4 sm:$0xff]  }
 0x200   : > { %v10382_v3 = vld [vmem:[%s13723_s18 + $0x3a4] ss:$16 sps:$4 sm:$0xff]   ;;  %v10385_v5 = vld [vmem:[%s13723_s18 + $0x3a0] ss:$16 sps:$4 sm:$0xff]   ;;  %v10437_v47 = vld [vmem:[%s13723_s18 + $0x288] ss:$16 sps:$4 sm:$0xff]  }
 0x201   : > { %3804 = vmatpush1.bf16.msra.mxu0 %v10354_v48  ;;  %v10386_v6 = vld [vmem:[%s13723_s18 + $0x184] ss:$16 sps:$4 sm:$0xff]   ;;  %v10390_v8 = vld [vmem:[%s13723_s18 + $0x180] ss:$16 sps:$4 sm:$0xff]   ;;  %v10440_v48 = vld [vmem:[%s13723_s18 + $0x68] ss:$16 sps:$4 sm:$0xff]  }
 0x202   : > { %3845 = vmatpush1.bf16.msra.mxu1 %v10355_v49  ;;  %3805 = vmatprep.subr.bf16.mxu0 %v10356_v50  ;;  %v10388_v7 = vld [vmem:[%s13723_s18 + $0x384] ss:$16 sps:$4 sm:$0xff]   ;;  %v10391_v9 = vld [vmem:[%s13723_s18 + $0x380] ss:$16 sps:$4 sm:$0xff]   ;;  %v10443_v49 = vld [vmem:[%s13723_s18 + $0x268] ss:$16 sps:$4 sm:$0xff]  }
 0x203   : > { %3846 = vmatprep.subr.bf16.mxu1 %v10358_v51  ;;  %v10392_v10 = vld [vmem:[%s13723_s18 + $0x164] ss:$16 sps:$4 sm:$0xff]   ;;  %v10396_v12 = vld [vmem:[%s13723_s18 + $0x160] ss:$16 sps:$4 sm:$0xff]   ;;  %v10448_v50 = vld [vmem:[%s13723_s18 + $0x4c] ss:$16 sps:$4 sm:$0xff]  }
 0x204   : > { %v10394_v11 = vld [vmem:[%s13723_s18 + $0x364] ss:$16 sps:$4 sm:$0xff]   ;;  %v10397_v13 = vld [vmem:[%s13723_s18 + $0x360] ss:$16 sps:$4 sm:$0xff]   ;;  %v10451_v51 = vld [vmem:[%s13723_s18 + $0x24c] ss:$16 sps:$4 sm:$0xff]  }
 0x205   : > { %3806 = vmatpush1.bf16.msra.mxu0 %v10360_v52  ;;  %v10398_v14 = vld [vmem:[%s13723_s18 + $0x144] ss:$16 sps:$4 sm:$0xff]   ;;  %v10402_v17 = vld [vmem:[%s13723_s18 + $0x140] ss:$16 sps:$4 sm:$0xff]   ;;  %v10446_v52 = vld [vmem:[%s13723_s18 + $0x48] ss:$16 sps:$4 sm:$0xff]  }
 0x206   : > { %3847 = vmatpush1.bf16.msra.mxu1 %v10361_v53  ;;  %3807 = vmatprep.subr.bf16.mxu0 %v10362_v54  ;;  %v10400_v15 = vld [vmem:[%s13723_s18 + $0x344] ss:$16 sps:$4 sm:$0xff]   ;;  %v10403_v18 = vld [vmem:[%s13723_s18 + $0x340] ss:$16 sps:$4 sm:$0xff]   ;;  %v10449_v53 = vld [vmem:[%s13723_s18 + $0x248] ss:$16 sps:$4 sm:$0xff]  }
 0x207   : > { %3848 = vmatprep.subr.bf16.mxu1 %v10364_v55  ;;  %v10404_v19 = vld [vmem:[%s13723_s18 + $0x124] ss:$16 sps:$4 sm:$0xff]   ;;  %v10408_v22 = vld [vmem:[%s13723_s18 + $0x120] ss:$16 sps:$4 sm:$0xff]   ;;  %v10454_v54 = vld [vmem:[%s13723_s18 + $0x2c] ss:$16 sps:$4 sm:$0xff]  }
 0x208   : > { %v10406_v21 = vld [vmem:[%s13723_s18 + $0x324] ss:$16 sps:$4 sm:$0xff]   ;;  %v10409_v23 = vld [vmem:[%s13723_s18 + $0x320] ss:$16 sps:$4 sm:$0xff]   ;;  %v10457_v55 = vld [vmem:[%s13723_s18 + $0x22c] ss:$16 sps:$4 sm:$0xff]  }
 0x209   : > { %3808 = vmatpush1.bf16.msra.mxu0 %v10366_v56  ;;  %v10410_v24 = vld [vmem:[%s13723_s18 + $0x104] ss:$16 sps:$4 sm:$0xff]   ;;  %v10414_v26 = vld [vmem:[%s13723_s18 + $0x100] ss:$16 sps:$4 sm:$0xff]   ;;  %v10452_v56 = vld [vmem:[%s13723_s18 + $0x28] ss:$16 sps:$4 sm:$0xff]  }
 0x20a   : > { %3849 = vmatpush1.bf16.msra.mxu1 %v10367_v57  ;;  %3809 = vmatprep.subr.bf16.mxu0 %v10368_v58  ;;  %v10412_v25 = vld [vmem:[%s13723_s18 + $0x304] ss:$16 sps:$4 sm:$0xff]   ;;  %v10415_v27 = vld [vmem:[%s13723_s18 + $0x300] ss:$16 sps:$4 sm:$0xff]   ;;  %v10455_v57 = vld [vmem:[%s13723_s18 + $0x228] ss:$16 sps:$4 sm:$0xff]  }
 0x20b   : > { %3850 = vmatprep.subr.bf16.mxu1 %v10370_v59  ;;  %v10460_v58 = vld [vmem:[%s13723_s18 + $0xc] ss:$16 sps:$4 sm:$0xff]  }
 0x20c   : > { %v10463_v59 = vld [vmem:[%s13723_s18 + $0x20c] ss:$16 sps:$4 sm:$0xff]  }
 0x20d   : > { %3810 = vmatpush2.bf16.msra.mxu0 %v10372_v60  ;;  %v10458_v60 = vld [vmem:[%s13723_s18 + $0x8] ss:$16 sps:$4 sm:$0xff]  }
 0x20e   : > { %3851 = vmatpush2.bf16.msra.mxu1 %v10373_v61  ;;  %3811 = vmatprep.subr.bf16.mxu0 %v10374_v62  ;;  %v10461_v61 = vld [vmem:[%s13723_s18 + $0x208] ss:$16 sps:$4 sm:$0xff]   ;;  %v10466_v62 = vld [vmem:[%s13723_s18 + $0x1ec] ss:$16 sps:$4 sm:$0xff]  }
 0x20f   : > { %3852 = vmatprep.subr.bf16.mxu1 %v10376_v63  ;;  %v10469_v63 = vld [vmem:[%s13723_s18 + $0x3ec] ss:$16 sps:$4 sm:$0xff]  }
 0x211   : > { %3812 = vmatpush2.bf16.msra.mxu0 %v10378_v0  ;;  %v10464_v0 = vld [vmem:[%s13723_s18 + $0x1e8] ss:$16 sps:$4 sm:$0xff]  }
 0x212   : > { %3853 = vmatpush2.bf16.msra.mxu1 %v10379_v1  ;;  %3813 = vmatprep.subr.bf16.mxu0 %v10380_v2  ;;  %v10467_v1 = vld [vmem:[%s13723_s18 + $0x3e8] ss:$16 sps:$4 sm:$0xff]   ;;  %v10472_v2 = vld [vmem:[%s13723_s18 + $0x1cc] ss:$16 sps:$4 sm:$0xff]  }
 0x213   : > { %3854 = vmatprep.subr.bf16.mxu1 %v10382_v3  ;;  %v10475_v3 = vld [vmem:[%s13723_s18 + $0x3cc] ss:$16 sps:$4 sm:$0xff]  }
 0x215   : > { %3814 = vmatpush2.bf16.msra.mxu0 %v10384_v4  ;;  %v10470_v4 = vld [vmem:[%s13723_s18 + $0x1c8] ss:$16 sps:$4 sm:$0xff]  }
 0x216   : > { %3855 = vmatpush2.bf16.msra.mxu1 %v10385_v5  ;;  %3815 = vmatprep.subr.bf16.mxu0 %v10386_v6  ;;  %v10473_v5 = vld [vmem:[%s13723_s18 + $0x3c8] ss:$16 sps:$4 sm:$0xff]   ;;  %v10478_v6 = vld [vmem:[%s13723_s18 + $0x1ac] ss:$16 sps:$4 sm:$0xff]  }
 0x217   : > { %3856 = vmatprep.subr.bf16.mxu1 %v10388_v7  ;;  %v10481_v7 = vld [vmem:[%s13723_s18 + $0x3ac] ss:$16 sps:$4 sm:$0xff]  }
 0x219   : > { %3816 = vmatpush2.bf16.msra.mxu0 %v10390_v8  ;;  %v10476_v8 = vld [vmem:[%s13723_s18 + $0x1a8] ss:$16 sps:$4 sm:$0xff]  }
 0x21a   : > { %3857 = vmatpush2.bf16.msra.mxu1 %v10391_v9  ;;  %3817 = vmatprep.subr.bf16.mxu0 %v10392_v10  ;;  %v10479_v9 = vld [vmem:[%s13723_s18 + $0x3a8] ss:$16 sps:$4 sm:$0xff]   ;;  %v10484_v10 = vld [vmem:[%s13723_s18 + $0x18c] ss:$16 sps:$4 sm:$0xff]  }
 0x21b   : > { %3858 = vmatprep.subr.bf16.mxu1 %v10394_v11  ;;  %v10487_v11 = vld [vmem:[%s13723_s18 + $0x38c] ss:$16 sps:$4 sm:$0xff]  }
 0x21d   : > { %3818 = vmatpush2.bf16.msra.mxu0 %v10396_v12  ;;  %v10482_v12 = vld [vmem:[%s13723_s18 + $0x188] ss:$16 sps:$4 sm:$0xff]  }
 0x21e   : > { %3859 = vmatpush2.bf16.msra.mxu1 %v10397_v13  ;;  %3819 = vmatprep.subr.bf16.mxu0 %v10398_v14  ;;  %v10485_v13 = vld [vmem:[%s13723_s18 + $0x388] ss:$16 sps:$4 sm:$0xff]   ;;  %v10490_v14 = vld [vmem:[%s13723_s18 + $0x16c] ss:$16 sps:$4 sm:$0xff]  }
 0x21f   : > { %3860 = vmatprep.subr.bf16.mxu1 %v10400_v15  ;;  %v10493_v15 = vld [vmem:[%s13723_s18 + $0x36c] ss:$16 sps:$4 sm:$0xff]  }
 0x221   : > { %3820 = vmatpush2.bf16.msra.mxu0 %v10402_v17  ;;  %v10488_v17 = vld [vmem:[%s13723_s18 + $0x168] ss:$16 sps:$4 sm:$0xff]  }
 0x222   : > { %3861 = vmatpush2.bf16.msra.mxu1 %v10403_v18  ;;  %3821 = vmatprep.subr.bf16.mxu0 %v10404_v19  ;;  %v10491_v18 = vld [vmem:[%s13723_s18 + $0x368] ss:$16 sps:$4 sm:$0xff]   ;;  %v10496_v19 = vld [vmem:[%s13723_s18 + $0x14c] ss:$16 sps:$4 sm:$0xff]  }
 0x223   : > { %3862 = vmatprep.subr.bf16.mxu1 %v10406_v21  ;;  %v10499_v21 = vld [vmem:[%s13723_s18 + $0x34c] ss:$16 sps:$4 sm:$0xff]  }
 0x225   : > { %3822 = vmatpush2.bf16.msra.mxu0 %v10408_v22  ;;  %v10494_v22 = vld [vmem:[%s13723_s18 + $0x148] ss:$16 sps:$4 sm:$0xff]  }
 0x226   : > { %3863 = vmatpush2.bf16.msra.mxu1 %v10409_v23  ;;  %3823 = vmatprep.subr.bf16.mxu0 %v10410_v24  ;;  %v10497_v23 = vld [vmem:[%s13723_s18 + $0x348] ss:$16 sps:$4 sm:$0xff]   ;;  %v10502_v24 = vld [vmem:[%s13723_s18 + $0x12c] ss:$16 sps:$4 sm:$0xff]  }
 0x227   : > { %3864 = vmatprep.subr.bf16.mxu1 %v10412_v25  ;;  %v10505_v25 = vld [vmem:[%s13723_s18 + $0x32c] ss:$16 sps:$4 sm:$0xff]  }
 0x229   : > { %3824 = vmatpush2.bf16.msra.mxu0 %v10414_v26  ;;  %v10500_v26 = vld [vmem:[%s13723_s18 + $0x128] ss:$16 sps:$4 sm:$0xff]  }
 0x22a   : > { %3865 = vmatpush2.bf16.msra.mxu1 %v10415_v27  ;;  %3875 = vmatprep.subr.bf16.mxu0 %v10418_v30  ;;  %v10503_v27 = vld [vmem:[%s13723_s18 + $0x328] ss:$16 sps:$4 sm:$0xff]   ;;  %v10508_v30 = vld [vmem:[%s13723_s18 + $0x10c] ss:$16 sps:$4 sm:$0xff]  }
 0x22b   : > { %3916 = vmatprep.subr.bf16.mxu1 %v10421_v31  ;;  %v10511_v31 = vld [vmem:[%s13723_s18 + $0x30c] ss:$16 sps:$4 sm:$0xff]  }
 0x22c   : > { %3826 = vmatmul.mubr.bf16.vlgmr.msra.gmra.mxu0 %v13805_v29 }
 0x22d   : > { %3867 = vmatmul.mubr.bf16.vlgmr.msra.gmra.mxu1 %v13811_v33  ;;  %3876 = vmatpush1.bf16.msra.mxu0 %v10416_v34  ;;  %v10506_v34 = vld [vmem:[%s13723_s18 + $0x108] ss:$16 sps:$4 sm:$0xff]  }
 0x22e   : > { %3917 = vmatpush1.bf16.msra.mxu1 %v10419_v35  ;;  %3877 = vmatprep.subr.bf16.mxu0 %v10424_v16  ;;  %v10509_v35 = vld [vmem:[%s13723_s18 + $0x308] ss:$16 sps:$4 sm:$0xff]   ;;  %v10514_v16 = vld [vmem:[%s13842_s20 + $0xe4] ss:$16 sps:$4 sm:$0xff]  }
 0x22f   : > { %3918 = vmatprep.subr.bf16.mxu1 %v10427_v36  ;;  %3907 = vmatprep.mubr.bf16.mxu0 %v13739_v32  ;;  %v10442_v32 = vld [vmem:[%s13723_s18 + $0x6c] ss:$16 sps:$4 sm:$0xff]   ;;  %v10517_v36 = vld [vmem:[%s13842_s20 + $0x2e4] ss:$16 sps:$4 sm:$0xff]  }
 0x230   : > { %3948 = vmatprep.mubr.bf16.mxu1 %v13748_v37  ;;  %v10445_v37 = vld [vmem:[%s13723_s18 + $0x26c] ss:$16 sps:$4 sm:$0xff]   ;;  %s14955_s18 = scalar_lea.hbm %s15009_s7, %s10272_s9 }
 0x231   : > { %3878 = vmatpush1.bf16.msra.mxu0 %v10422_v38  ;;  %v10512_v38 = vld [vmem:[%s13842_s20 + $0xe0] ss:$16 sps:$4 sm:$0xff]  }
 0x232   : > { %3919 = vmatpush1.bf16.msra.mxu1 %v10425_v39  ;;  %3879 = vmatprep.subr.bf16.mxu0 %v10430_v40  ;;  %v10515_v39 = vld [vmem:[%s13842_s20 + $0x2e0] ss:$16 sps:$4 sm:$0xff]  }
 0x233   : > { %3920 = vmatprep.subr.bf16.mxu1 %v10433_v41  ;;  %v13889_v40 = vld [vmem:[%s15002_s0] sm:$0xff] }
 0x234   : > { %v10520_v41 = vld [vmem:[%s13842_s20 + $0xc4] ss:$16 sps:$4 sm:$0xff]  }
 0x235   : > { %3880 = vmatpush1.bf16.msra.mxu0 %v10428_v42  ;;  %v10523_v42 = vld [vmem:[%s13842_s20 + $0x2c4] ss:$16 sps:$4 sm:$0xff]  }
 0x236   : > { %3921 = vmatpush1.bf16.msra.mxu1 %v10431_v43  ;;  %3881 = vmatprep.subr.bf16.mxu0 %v10436_v44  ;;  %v13895_v43 = vrot.slane %v13889_v40, %v13733_v28  ;;  %v10518_v44 = vld [vmem:[%s13842_s20 + $0xc0] ss:$16 sps:$4 sm:$0xff]  }
 0x237   : > { %3922 = vmatprep.subr.bf16.mxu1 %v10439_v45 }
 0x238   : > { %v3976_v45 = vcombine.high %v13895_v43, %v13895_v43 }
 0x239   : > { %3882 = vmatpush1.bf16.msra.mxu0 %v10434_v46  ;;  %v10521_v46 = vld [vmem:[%s13842_s20 + $0x2c0] ss:$16 sps:$4 sm:$0xff]  }
 0x23a   : > { %3923 = vmatpush1.bf16.msra.mxu1 %v10437_v47  ;;  %3883 = vmatprep.subr.bf16.mxu0 %v10442_v32  ;;  %v10526_v47 = vld [vmem:[%s13842_s20 + $0xa4] ss:$16 sps:$4 sm:$0xff]  }
 0x23b   : > { %3924 = vmatprep.subr.bf16.mxu1 %v10445_v37  ;;  %v10529_v32 = vld [vmem:[%s13842_s20 + $0x2a4] ss:$16 sps:$4 sm:$0xff]  }
 0x23d   : > { %3884 = vmatpush1.bf16.msra.mxu0 %v10440_v48  ;;  %v10527_v48 = vld [vmem:[%s13842_s20 + $0x2a0] ss:$16 sps:$4 sm:$0xff]  }
 0x23e   : > { %3925 = vmatpush1.bf16.msra.mxu1 %v10443_v49  ;;  %3885 = vmatprep.subr.bf16.mxu0 %v10448_v50  ;;  %v10532_v49 = vld [vmem:[%s13842_s20 + $0x84] ss:$16 sps:$4 sm:$0xff]  }
 0x23f   : > { %3926 = vmatprep.subr.bf16.mxu1 %v10451_v51  ;;  %v10535_v50 = vld [vmem:[%s13842_s20 + $0x284] ss:$16 sps:$4 sm:$0xff]   ;;  %v10530_v51 = vld [vmem:[%s13842_s20 + $0x80] ss:$16 sps:$4 sm:$0xff]  }
 0x241   : > { %3886 = vmatpush1.bf16.msra.mxu0 %v10446_v52  ;;  %v10533_v52 = vld [vmem:[%s13842_s20 + $0x280] ss:$16 sps:$4 sm:$0xff]  }
 0x242   : > { %3927 = vmatpush1.bf16.msra.mxu1 %v10449_v53  ;;  %3887 = vmatprep.subr.bf16.mxu0 %v10454_v54  ;;  %v10538_v53 = vld [vmem:[%s13842_s20 + $0x64] ss:$16 sps:$4 sm:$0xff]  }
 0x243   : > { %3928 = vmatprep.subr.bf16.mxu1 %v10457_v55  ;;  %v10541_v54 = vld [vmem:[%s13842_s20 + $0x264] ss:$16 sps:$4 sm:$0xff]   ;;  %v10536_v55 = vld [vmem:[%s13842_s20 + $0x60] ss:$16 sps:$4 sm:$0xff]  }
 0x245   : > { %3888 = vmatpush1.bf16.msra.mxu0 %v10452_v56  ;;  %v10539_v56 = vld [vmem:[%s13842_s20 + $0x260] ss:$16 sps:$4 sm:$0xff]  }
 0x246   : > { %3929 = vmatpush1.bf16.msra.mxu1 %v10455_v57  ;;  %3889 = vmatprep.subr.bf16.mxu0 %v10460_v58  ;;  %v10544_v57 = vld [vmem:[%s13842_s20 + $0x44] ss:$16 sps:$4 sm:$0xff]  }
 0x247   : > { %3930 = vmatprep.subr.bf16.mxu1 %v10463_v59  ;;  %v10547_v58 = vld [vmem:[%s13842_s20 + $0x244] ss:$16 sps:$4 sm:$0xff]   ;;  %v10542_v59 = vld [vmem:[%s13842_s20 + $0x40] ss:$16 sps:$4 sm:$0xff]  }
 0x249   : > { %3890 = vmatpush1.bf16.msra.mxu0 %v10458_v60  ;;  %v10545_v60 = vld [vmem:[%s13842_s20 + $0x240] ss:$16 sps:$4 sm:$0xff]  }
 0x24a   : > { %3931 = vmatpush1.bf16.msra.mxu1 %v10461_v61  ;;  %3891 = vmatprep.subr.bf16.mxu0 %v10466_v62  ;;  %v10550_v61 = vld [vmem:[%s13842_s20 + $0x24] ss:$16 sps:$4 sm:$0xff]  }
 0x24b   : > { %3932 = vmatprep.subr.bf16.mxu1 %v10469_v63  ;;  %v10553_v62 = vld [vmem:[%s13842_s20 + $0x224] ss:$16 sps:$4 sm:$0xff]   ;;  %v10548_v63 = vld [vmem:[%s13842_s20 + $0x20] ss:$16 sps:$4 sm:$0xff]  }
 0x24d   : > { %3892 = vmatpush2.bf16.msra.mxu0 %v10464_v0  ;;  %v10551_v0 = vld [vmem:[%s13842_s20 + $0x220] ss:$16 sps:$4 sm:$0xff]  }
 0x24e   : > { %3933 = vmatpush2.bf16.msra.mxu1 %v10467_v1  ;;  %3893 = vmatprep.subr.bf16.mxu0 %v10472_v2  ;;  %v10556_v1 = vld [vmem:[%s13842_s20 + $0x4] ss:$16 sps:$4 sm:$0xff]  }
 0x24f   : > { %3934 = vmatprep.subr.bf16.mxu1 %v10475_v3  ;;  %v10559_v2 = vld [vmem:[%s13842_s20 + $0x204] ss:$16 sps:$4 sm:$0xff]   ;;  %v10554_v3 = vld [vmem:[%s13842_s20] ss:$16 sps:$4 sm:$0xff]  }
 0x251   : > { %3894 = vmatpush2.bf16.msra.mxu0 %v10470_v4  ;;  %v10557_v4 = vld [vmem:[%s13842_s20 + $0x200] ss:$16 sps:$4 sm:$0xff]  }
 0x252   : > { %3935 = vmatpush2.bf16.msra.mxu1 %v10473_v5  ;;  %3895 = vmatprep.subr.bf16.mxu0 %v10478_v6  ;;  %v10562_v5 = vld [vmem:[%s13842_s20 + $0x1e4] ss:$16 sps:$4 sm:$0xff]  }
 0x253   : > { %3936 = vmatprep.subr.bf16.mxu1 %v10481_v7  ;;  %v10565_v6 = vld [vmem:[%s13842_s20 + $0x3e4] ss:$16 sps:$4 sm:$0xff]   ;;  %v10560_v7 = vld [vmem:[%s13842_s20 + $0x1e0] ss:$16 sps:$4 sm:$0xff]  }
 0x255   : > { %3896 = vmatpush2.bf16.msra.mxu0 %v10476_v8  ;;  %v10563_v8 = vld [vmem:[%s13842_s20 + $0x3e0] ss:$16 sps:$4 sm:$0xff]  }
 0x256   : > { %3937 = vmatpush2.bf16.msra.mxu1 %v10479_v9  ;;  %3897 = vmatprep.subr.bf16.mxu0 %v10484_v10  ;;  %v10568_v9 = vld [vmem:[%s13842_s20 + $0x1c4] ss:$16 sps:$4 sm:$0xff]  }
 0x257   : > { %3938 = vmatprep.subr.bf16.mxu1 %v10487_v11  ;;  %v10571_v10 = vld [vmem:[%s13842_s20 + $0x3c4] ss:$16 sps:$4 sm:$0xff]   ;;  %v10566_v11 = vld [vmem:[%s13842_s20 + $0x1c0] ss:$16 sps:$4 sm:$0xff]  }
 0x259   : > { %3898 = vmatpush2.bf16.msra.mxu0 %v10482_v12  ;;  %v10569_v12 = vld [vmem:[%s13842_s20 + $0x3c0] ss:$16 sps:$4 sm:$0xff]  }
 0x25a   : > { %3939 = vmatpush2.bf16.msra.mxu1 %v10485_v13  ;;  %3899 = vmatprep.subr.bf16.mxu0 %v10490_v14  ;;  %v10574_v13 = vld [vmem:[%s13842_s20 + $0x1a4] ss:$16 sps:$4 sm:$0xff]  }
 0x25b   : > { %3940 = vmatprep.subr.bf16.mxu1 %v10493_v15  ;;  %v10577_v14 = vld [vmem:[%s13842_s20 + $0x3a4] ss:$16 sps:$4 sm:$0xff]   ;;  %v10572_v15 = vld [vmem:[%s13842_s20 + $0x1a0] ss:$16 sps:$4 sm:$0xff]  }
 0x25d   : > { %3900 = vmatpush2.bf16.msra.mxu0 %v10488_v17  ;;  %v10575_v17 = vld [vmem:[%s13842_s20 + $0x3a0] ss:$16 sps:$4 sm:$0xff]  }
 0x25e   : > { %3941 = vmatpush2.bf16.msra.mxu1 %v10491_v18  ;;  %3901 = vmatprep.subr.bf16.mxu0 %v10496_v19  ;;  %v10580_v18 = vld [vmem:[%s13842_s20 + $0x184] ss:$16 sps:$4 sm:$0xff]  }
 0x25f   : > { %3942 = vmatprep.subr.bf16.mxu1 %v10499_v21  ;;  %v10583_v19 = vld [vmem:[%s13842_s20 + $0x384] ss:$16 sps:$4 sm:$0xff]   ;;  %v10578_v21 = vld [vmem:[%s13842_s20 + $0x180] ss:$16 sps:$4 sm:$0xff]  }
 0x261   : > { %3902 = vmatpush2.bf16.msra.mxu0 %v10494_v22  ;;  %v10581_v22 = vld [vmem:[%s13842_s20 + $0x380] ss:$16 sps:$4 sm:$0xff]  }
 0x262   : > { %3943 = vmatpush2.bf16.msra.mxu1 %v10497_v23  ;;  %3903 = vmatprep.subr.bf16.mxu0 %v10502_v24  ;;  %v10586_v23 = vld [vmem:[%s13842_s20 + $0x164] ss:$16 sps:$4 sm:$0xff]  }
 0x263   : > { %3944 = vmatprep.subr.bf16.mxu1 %v10505_v25  ;;  %v10589_v24 = vld [vmem:[%s13842_s20 + $0x364] ss:$16 sps:$4 sm:$0xff]   ;;  %v10584_v25 = vld [vmem:[%s13842_s20 + $0x160] ss:$16 sps:$4 sm:$0xff]  }
 0x265   : > { %3904 = vmatpush2.bf16.msra.mxu0 %v10500_v26  ;;  %v10587_v26 = vld [vmem:[%s13842_s20 + $0x360] ss:$16 sps:$4 sm:$0xff]  }
 0x266   : > { %3945 = vmatpush2.bf16.msra.mxu1 %v10503_v27  ;;  %3905 = vmatprep.subr.bf16.mxu0 %v10508_v30  ;;  %v10592_v27 = vld [vmem:[%s13842_s20 + $0x144] ss:$16 sps:$4 sm:$0xff]  }
 0x267   : > { %3946 = vmatprep.subr.bf16.mxu1 %v10511_v31  ;;  %v10595_v30 = vld [vmem:[%s13842_s20 + $0x344] ss:$16 sps:$4 sm:$0xff]   ;;  %v3961_v31 = vcombine.high %v13889_v40, %v13889_v40  ;;  %v10599_v40 = vld [vmem:[%s13842_s20 + $0x320] ss:$16 sps:$4 sm:$0xff]  }
 0x269   : > { %3906 = vmatpush2.bf16.msra.mxu0 %v10506_v34  ;;  %v10590_v34 = vld [vmem:[%s13842_s20 + $0x140] ss:$16 sps:$4 sm:$0xff]  }
 0x26a   : > { %3947 = vmatpush2.bf16.msra.mxu1 %v10509_v35  ;;  %8070 = vmatprep.subr.bf16.mxu0 %v10514_v16  ;;  %v10593_v35 = vld [vmem:[%s13842_s20 + $0x340] ss:$16 sps:$4 sm:$0xff]   ;;  %v10598_v16 = vld [vmem:[%s13842_s20 + $0x124] ss:$16 sps:$4 sm:$0xff]  }
 0x26b   : > { %8111 = vmatprep.subr.bf16.mxu1 %v10517_v36  ;;  %v10601_v36 = vld [vmem:[%s13842_s20 + $0x324] ss:$16 sps:$4 sm:$0xff]  }
 0x26c   : > { %3908 = vmatmul.mubr.bf16.vlgmr.msra.gmra.mxu0 %v13805_v29  ;;  %v13906_v29 = vrot.slane %v3976_v45, %v13733_v28  ;;  %v10602_v45 = vld [vmem:[%s13842_s20 + $0x100] ss:$16 sps:$4 sm:$0xff]  }
 0x26d   : > { %3949 = vmatmul.mubr.bf16.vlgmr.msra.gmra.mxu1 %v13811_v33  ;;  %8071 = vmatpush1.bf16.msra.mxu0 %v10512_v38  ;;  %v10524_v33 = vld [vmem:[%s13842_s20 + $0xa0] ss:$16 sps:$4 sm:$0xff]   ;;  %v13965_v38 = vrot.slane %v3961_v31, %v13733_v28 }
 0x26e   : > { %8112 = vmatpush1.bf16.msra.mxu1 %v10515_v39  ;;  %8072 = vmatprep.subr.bf16.mxu0 %v10520_v41  ;;  %v13912_v37 = vcombine.high %v13906_v29, %v13906_v29  ;;  %v10596_v39 = vld [vmem:[%s13842_s20 + $0x120] ss:$16 sps:$4 sm:$0xff]   ;;  %v10604_v41 = vld [vmem:[%s13842_s20 + $0x104] ss:$16 sps:$4 sm:$0xff]  }
 0x26f   : > { %8113 = vmatprep.subr.bf16.mxu1 %v10523_v42  ;;  %8102 = vmatprep.mubr.bf16.mxu0 %v13906_v29  ;;  %v10607_v42 = vld [vmem:[%s13842_s20 + $0x304] ss:$16 sps:$4 sm:$0xff]   ;;  %v10671_v31 = vld [vmem:[%s13842_s20 + $0x7a0] ss:$16 sps:$4 sm:$0xff]  }
 0x270   : > { %8143 = vmatprep.mubr.bf16.mxu1 %v13912_v37 }
 0x271   : > { %8073 = vmatpush1.bf16.msra.mxu0 %v10518_v44  ;;  %v3977_v44 = vcombine.high %v13965_v38, %v13965_v38 }
 0x272   : > { %8114 = vmatpush1.bf16.msra.mxu1 %v10521_v46  ;;  %8074 = vmatprep.subr.bf16.mxu0 %v10526_v47  ;;  %v13976_v46 = vrot.slane %v13895_v43, %v13733_v28  ;;  %v10605_v47 = vld [vmem:[%s13842_s20 + $0x300] ss:$16 sps:$4 sm:$0xff]  }
 0x273   : > { %8115 = vmatprep.subr.bf16.mxu1 %v10529_v32  ;;  %v10610_v32 = vld [vmem:[%s13842_s20 + $0x4e4] ss:$16 sps:$4 sm:$0xff]   ;;  %v10608_v43 = vld [vmem:[%s13842_s20 + $0x4e0] ss:$16 sps:$4 sm:$0xff]  }
 0x275   : > { %8075 = vmatpush1.bf16.msra.mxu0 %v10524_v33  ;;  %v10613_v33 = vld [vmem:[%s13842_s20 + $0x6e4] ss:$16 sps:$4 sm:$0xff]  }
 0x276   : > { %8116 = vmatpush1.bf16.msra.mxu1 %v10527_v48  ;;  %8076 = vmatprep.subr.bf16.mxu0 %v10532_v49  ;;  %v13982_v48 = vrot.slane %v3977_v44, %v13733_v28  ;;  %v13986_v49 = vcombine.high %v13976_v46, %v13976_v46  ;;  %v10688_v44 = vld [vmem:[%s13842_s20 + $0x544] ss:$16 sps:$4 sm:$0xff]  }
 0x277   : > { %8117 = vmatprep.subr.bf16.mxu1 %v10535_v50  ;;  %v10611_v50 = vld [vmem:[%s13842_s20 + $0x6e0] ss:$16 sps:$4 sm:$0xff]  }
 0x279   : > { %8077 = vmatpush1.bf16.msra.mxu0 %v10530_v51  ;;  %v10616_v51 = vld [vmem:[%s13842_s20 + $0x4c4] ss:$16 sps:$4 sm:$0xff]  }
 0x27a   : > { %8118 = vmatpush1.bf16.msra.mxu1 %v10533_v52  ;;  %8078 = vmatprep.subr.bf16.mxu0 %v10538_v53  ;;  %v10619_v52 = vld [vmem:[%s13842_s20 + $0x6c4] ss:$16 sps:$4 sm:$0xff]   ;;  %v13994_v53 = vcombine.high %v13982_v48, %v13982_v48 }
 0x27b   : > { %8119 = vmatprep.subr.bf16.mxu1 %v10541_v54  ;;  %v10614_v54 = vld [vmem:[%s13842_s20 + $0x4c0] ss:$16 sps:$4 sm:$0xff]  }
 0x27d   : > { %8079 = vmatpush1.bf16.msra.mxu0 %v10536_v55  ;;  %v10617_v55 = vld [vmem:[%s13842_s20 + $0x6c0] ss:$16 sps:$4 sm:$0xff]  }
 0x27e   : > { %8120 = vmatpush1.bf16.msra.mxu1 %v10539_v56  ;;  %8080 = vmatprep.subr.bf16.mxu0 %v10544_v57  ;;  %v10622_v56 = vld [vmem:[%s13842_s20 + $0x4a4] ss:$16 sps:$4 sm:$0xff]  }
 0x27f   : > { %8121 = vmatprep.subr.bf16.mxu1 %v10547_v58  ;;  %v10625_v57 = vld [vmem:[%s13842_s20 + $0x6a4] ss:$16 sps:$4 sm:$0xff]   ;;  %v10620_v58 = vld [vmem:[%s13842_s20 + $0x4a0] ss:$16 sps:$4 sm:$0xff]  }
 0x281   : > { %8081 = vmatpush1.bf16.msra.mxu0 %v10542_v59  ;;  %v10623_v59 = vld [vmem:[%s13842_s20 + $0x6a0] ss:$16 sps:$4 sm:$0xff]  }
 0x282   : > { %8122 = vmatpush1.bf16.msra.mxu1 %v10545_v60  ;;  %8082 = vmatprep.subr.bf16.mxu0 %v10550_v61  ;;  %v10628_v60 = vld [vmem:[%s13842_s20 + $0x484] ss:$16 sps:$4 sm:$0xff]  }
 0x283   : > { %8123 = vmatprep.subr.bf16.mxu1 %v10553_v62  ;;  %v10631_v61 = vld [vmem:[%s13842_s20 + $0x684] ss:$16 sps:$4 sm:$0xff]   ;;  %v10626_v62 = vld [vmem:[%s13842_s20 + $0x480] ss:$16 sps:$4 sm:$0xff]  }
 0x285   : > { %8083 = vmatpush1.bf16.msra.mxu0 %v10548_v63  ;;  %v10629_v63 = vld [vmem:[%s13842_s20 + $0x680] ss:$16 sps:$4 sm:$0xff]  }
 0x286   : > { %8124 = vmatpush1.bf16.msra.mxu1 %v10551_v0  ;;  %8084 = vmatprep.subr.bf16.mxu0 %v10556_v1  ;;  %v10634_v0 = vld [vmem:[%s13842_s20 + $0x464] ss:$16 sps:$4 sm:$0xff]  }
 0x287   : > { %8125 = vmatprep.subr.bf16.mxu1 %v10559_v2  ;;  %v10637_v1 = vld [vmem:[%s13842_s20 + $0x664] ss:$16 sps:$4 sm:$0xff]   ;;  %v10632_v2 = vld [vmem:[%s13842_s20 + $0x460] ss:$16 sps:$4 sm:$0xff]  }
 0x289   : > { %8085 = vmatpush1.bf16.msra.mxu0 %v10554_v3  ;;  %v10635_v3 = vld [vmem:[%s13842_s20 + $0x660] ss:$16 sps:$4 sm:$0xff]  }
 0x28a   : > { %8126 = vmatpush1.bf16.msra.mxu1 %v10557_v4  ;;  %8086 = vmatprep.subr.bf16.mxu0 %v10562_v5  ;;  %v10640_v4 = vld [vmem:[%s13842_s20 + $0x444] ss:$16 sps:$4 sm:$0xff]  }
 0x28b   : > { %8127 = vmatprep.subr.bf16.mxu1 %v10565_v6  ;;  %v10643_v5 = vld [vmem:[%s13842_s20 + $0x644] ss:$16 sps:$4 sm:$0xff]   ;;  %v10638_v6 = vld [vmem:[%s13842_s20 + $0x440] ss:$16 sps:$4 sm:$0xff]  }
 0x28d   : > { %8087 = vmatpush2.bf16.msra.mxu0 %v10560_v7  ;;  %v10641_v7 = vld [vmem:[%s13842_s20 + $0x640] ss:$16 sps:$4 sm:$0xff]  }
 0x28e   : > { %8128 = vmatpush2.bf16.msra.mxu1 %v10563_v8  ;;  %8088 = vmatprep.subr.bf16.mxu0 %v10568_v9  ;;  %v10646_v8 = vld [vmem:[%s13842_s20 + $0x424] ss:$16 sps:$4 sm:$0xff]  }
 0x28f   : > { %8129 = vmatprep.subr.bf16.mxu1 %v10571_v10  ;;  %v10649_v9 = vld [vmem:[%s13842_s20 + $0x624] ss:$16 sps:$4 sm:$0xff]   ;;  %v10644_v10 = vld [vmem:[%s13842_s20 + $0x420] ss:$16 sps:$4 sm:$0xff]  }
 0x291   : > { %8089 = vmatpush2.bf16.msra.mxu0 %v10566_v11  ;;  %v10647_v11 = vld [vmem:[%s13842_s20 + $0x620] ss:$16 sps:$4 sm:$0xff]  }
 0x292   : > { %8130 = vmatpush2.bf16.msra.mxu1 %v10569_v12  ;;  %8090 = vmatprep.subr.bf16.mxu0 %v10574_v13  ;;  %v10652_v12 = vld [vmem:[%s13842_s20 + $0x404] ss:$16 sps:$4 sm:$0xff]  }
 0x293   : > { %8131 = vmatprep.subr.bf16.mxu1 %v10577_v14  ;;  %v10655_v13 = vld [vmem:[%s13842_s20 + $0x604] ss:$16 sps:$4 sm:$0xff]   ;;  %v10650_v14 = vld [vmem:[%s13842_s20 + $0x400] ss:$16 sps:$4 sm:$0xff]  }
 0x295   : > { %8091 = vmatpush2.bf16.msra.mxu0 %v10572_v15  ;;  %v10653_v15 = vld [vmem:[%s13842_s20 + $0x600] ss:$16 sps:$4 sm:$0xff]  }
 0x296   : > { %8132 = vmatpush2.bf16.msra.mxu1 %v10575_v17  ;;  %8092 = vmatprep.subr.bf16.mxu0 %v10580_v18  ;;  %v10658_v17 = vld [vmem:[%s13842_s20 + $0x5e4] ss:$16 sps:$4 sm:$0xff]  }
 0x297   : > { %8133 = vmatprep.subr.bf16.mxu1 %v10583_v19  ;;  %v10661_v18 = vld [vmem:[%s13842_s20 + $0x7e4] ss:$16 sps:$4 sm:$0xff]   ;;  %v10656_v19 = vld [vmem:[%s13842_s20 + $0x5e0] ss:$16 sps:$4 sm:$0xff]  }
 0x299   : > { %8093 = vmatpush2.bf16.msra.mxu0 %v10578_v21  ;;  %v10659_v21 = vld [vmem:[%s13842_s20 + $0x7e0] ss:$16 sps:$4 sm:$0xff]  }
 0x29a   : > { %8134 = vmatpush2.bf16.msra.mxu1 %v10581_v22  ;;  %8094 = vmatprep.subr.bf16.mxu0 %v10586_v23  ;;  %v10664_v22 = vld [vmem:[%s13842_s20 + $0x5c4] ss:$16 sps:$4 sm:$0xff]  }
 0x29b   : > { %8135 = vmatprep.subr.bf16.mxu1 %v10589_v24  ;;  %v10667_v23 = vld [vmem:[%s13842_s20 + $0x7c4] ss:$16 sps:$4 sm:$0xff]   ;;  %v10662_v24 = vld [vmem:[%s13842_s20 + $0x5c0] ss:$16 sps:$4 sm:$0xff]  }
 0x29d   : > { %8095 = vmatpush2.bf16.msra.mxu0 %v10584_v25  ;;  %v10665_v25 = vld [vmem:[%s13842_s20 + $0x7c0] ss:$16 sps:$4 sm:$0xff]  }
 0x29e   : > { %8136 = vmatpush2.bf16.msra.mxu1 %v10587_v26  ;;  %8096 = vmatprep.subr.bf16.mxu0 %v10592_v27  ;;  %v10670_v26 = vld [vmem:[%s13842_s20 + $0x5a4] ss:$16 sps:$4 sm:$0xff]  }
 0x29f   : > { %8137 = vmatprep.subr.bf16.mxu1 %v10595_v30  ;;  %v10673_v27 = vld [vmem:[%s13842_s20 + $0x7a4] ss:$16 sps:$4 sm:$0xff]   ;;  %v10668_v30 = vld [vmem:[%s13842_s20 + $0x5a0] ss:$16 sps:$4 sm:$0xff]  }
 0x2a1   : > { %8097 = vmatpush2.bf16.msra.mxu0 %v10590_v34  ;;  %v10676_v34 = vld [vmem:[%s13842_s20 + $0x584] ss:$16 sps:$4 sm:$0xff]  }
 0x2a2   : > { %8138 = vmatpush2.bf16.msra.mxu1 %v10593_v35  ;;  %8098 = vmatprep.subr.bf16.mxu0 %v10598_v16  ;;  %v10679_v35 = vld [vmem:[%s13842_s20 + $0x784] ss:$16 sps:$4 sm:$0xff]   ;;  %v10674_v16 = vld [vmem:[%s13842_s20 + $0x580] ss:$16 sps:$4 sm:$0xff]  }
 0x2a3   : > { %8139 = vmatprep.subr.bf16.mxu1 %v10601_v36  ;;  %v10677_v36 = vld [vmem:[%s13842_s20 + $0x780] ss:$16 sps:$4 sm:$0xff]  }
 0x2a5   : > { %8099 = vmatpush2.bf16.msra.mxu0 %v10596_v39  ;;  %v10682_v39 = vld [vmem:[%s13842_s20 + $0x564] ss:$16 sps:$4 sm:$0xff]  }
 0x2a6   : > { %8140 = vmatpush2.bf16.msra.mxu1 %v10599_v40  ;;  %8100 = vmatprep.subr.bf16.mxu0 %v10604_v41  ;;  %v10685_v40 = vld [vmem:[%s13842_s20 + $0x764] ss:$16 sps:$4 sm:$0xff]   ;;  %v10680_v41 = vld [vmem:[%s13842_s20 + $0x560] ss:$16 sps:$4 sm:$0xff]  }
 0x2a7   : > { %8141 = vmatprep.subr.bf16.mxu1 %v10607_v42  ;;  %v10683_v42 = vld [vmem:[%s13842_s20 + $0x760] ss:$16 sps:$4 sm:$0xff]  }
 0x2a9   : > { %8101 = vmatpush2.bf16.msra.mxu0 %v10602_v45  ;;  %v10691_v45 = vld [vmem:[%s13842_s20 + $0x744] ss:$16 sps:$4 sm:$0xff]  }
 0x2aa   : > { %8142 = vmatpush2.bf16.msra.mxu1 %v10605_v47  ;;  %8152 = vmatprep.subr.bf16.mxu0 %v10610_v32  ;;  %v14051_v47 = vld [vmem:[%s15002_s0 + $0x8] sm:$0xff]  ;;  %v10686_v32 = vld [vmem:[%s13842_s20 + $0x540] ss:$16 sps:$4 sm:$0xff]  }
 0x2ab   : > { %8193 = vmatprep.subr.bf16.mxu1 %v10613_v33  ;;  %v10689_v33 = vld [vmem:[%s13842_s20 + $0x740] ss:$16 sps:$4 sm:$0xff]  }
 0x2ac   : > { %8103 = vmatmul.mubr.bf16.vlgmr.msra.gmra.mxu0 %v13976_v46 }
 0x2ad   : > { %8144 = vmatmul.mubr.bf16.vlgmr.msra.gmra.mxu1 %v13986_v49  ;;  %8153 = vmatpush1.bf16.msra.mxu0 %v10608_v43  ;;  %v10694_v43 = vld [vmem:[%s13842_s20 + $0x524] ss:$16 sps:$4 sm:$0xff]  }
 0x2ae   : > { %8194 = vmatpush1.bf16.msra.mxu1 %v10611_v50  ;;  %8154 = vmatprep.subr.bf16.mxu0 %v10616_v51  ;;  %v10697_v50 = vld [vmem:[%s13842_s20 + $0x724] ss:$16 sps:$4 sm:$0xff]   ;;  %v14059_v51 = vrot.slane %v14051_v47, %v13733_v28 }
 0x2af   : > { %8195 = vmatprep.subr.bf16.mxu1 %v10619_v52  ;;  %8184 = vmatprep.mubr.bf16.mxu0 %v13982_v48  ;;  %v10692_v52 = vld [vmem:[%s13842_s20 + $0x520] ss:$16 sps:$4 sm:$0xff]  }
 0x2b0   : > { %8225 = vmatprep.mubr.bf16.mxu1 %v13994_v53 }
 0x2b1   : > { %8155 = vmatpush1.bf16.msra.mxu0 %v10614_v54  ;;  %v10695_v54 = vld [vmem:[%s13842_s20 + $0x720] ss:$16 sps:$4 sm:$0xff]  }
 0x2b2   : > { %8196 = vmatpush1.bf16.msra.mxu1 %v10617_v55  ;;  %8156 = vmatprep.subr.bf16.mxu0 %v10622_v56  ;;  %v10700_v55 = vld [vmem:[%s13842_s20 + $0x504] ss:$16 sps:$4 sm:$0xff]  }
 0x2b3   : > { %8197 = vmatprep.subr.bf16.mxu1 %v10625_v57  ;;  %v10703_v56 = vld [vmem:[%s13842_s20 + $0x704] ss:$16 sps:$4 sm:$0xff]   ;;  %v4025_v57 = vcombine.high %v14059_v51, %v14059_v51 }
 0x2b5   : > { %8157 = vmatpush1.bf16.msra.mxu0 %v10620_v58  ;;  %v14069_v58 = vrot.slane %v13965_v38, %v13733_v28  ;;  %v10705_v38 = vld [vmem:[%s13842_s20 + $0x8e0] ss:$16 sps:$4 sm:$0xff]  }
 0x2b6   : > { %8198 = vmatpush1.bf16.msra.mxu1 %v10623_v59  ;;  %8158 = vmatprep.subr.bf16.mxu0 %v10628_v60  ;;  %v10698_v59 = vld [vmem:[%s13842_s20 + $0x500] ss:$16 sps:$4 sm:$0xff]  }
 0x2b7   : > { %8199 = vmatprep.subr.bf16.mxu1 %v10631_v61  ;;  %v10701_v60 = vld [vmem:[%s13842_s20 + $0x700] ss:$16 sps:$4 sm:$0xff]   ;;  %v10707_v61 = vld [vmem:[%s13842_s20 + $0x8e4] ss:$16 sps:$4 sm:$0xff]  }
 0x2b9   : > { %8159 = vmatpush1.bf16.msra.mxu0 %v10626_v62  ;;  %v10710_v62 = vld [vmem:[%s13842_s20 + $0xae4] ss:$16 sps:$4 sm:$0xff]  }
 0x2ba   : > { %8200 = vmatpush1.bf16.msra.mxu1 %v10629_v63  ;;  %8160 = vmatprep.subr.bf16.mxu0 %v10634_v0  ;;  %v14076_v63 = vrot.slane %v4025_v57, %v13733_v28  ;;  %v14080_v0 = vcombine.high %v14069_v58, %v14069_v58  ;;  %v10764_v57 = vld [vmem:[%s13842_s20 + $0xbc4] ss:$16 sps:$4 sm:$0xff]  }
 0x2bb   : > { %8201 = vmatprep.subr.bf16.mxu1 %v10637_v1  ;;  %v10708_v1 = vld [vmem:[%s13842_s20 + $0xae0] ss:$16 sps:$4 sm:$0xff]  }
 0x2bd   : > { %8161 = vmatpush1.bf16.msra.mxu0 %v10632_v2  ;;  %v10713_v2 = vld [vmem:[%s13842_s20 + $0x8c4] ss:$16 sps:$4 sm:$0xff]  }
 0x2be   : > { %8202 = vmatpush1.bf16.msra.mxu1 %v10635_v3  ;;  %8162 = vmatprep.subr.bf16.mxu0 %v10640_v4  ;;  %v10716_v3 = vld [vmem:[%s13842_s20 + $0xac4] ss:$16 sps:$4 sm:$0xff]   ;;  %v10711_v4 = vld [vmem:[%s13842_s20 + $0x8c0] ss:$16 sps:$4 sm:$0xff]  }
 0x2bf   : > { %8203 = vmatprep.subr.bf16.mxu1 %v10643_v5  ;;  %v14089_v5 = vcombine.high %v14076_v63, %v14076_v63 }
 0x2c1   : > { %8163 = vmatpush1.bf16.msra.mxu0 %v10638_v6 }
 0x2c2   : > { %8204 = vmatpush1.bf16.msra.mxu1 %v10641_v7  ;;  %8164 = vmatprep.subr.bf16.mxu0 %v10646_v8  ;;  %v10714_v8 = vld [vmem:[%s13842_s20 + $0xac0] ss:$16 sps:$4 sm:$0xff]  }
 0x2c3   : > { %8205 = vmatprep.subr.bf16.mxu1 %v10649_v9 }
 0x2c5   : > { %8165 = vmatpush1.bf16.msra.mxu0 %v10644_v10 }
 0x2c6   : > { %8206 = vmatpush1.bf16.msra.mxu1 %v10647_v11  ;;  %8166 = vmatprep.subr.bf16.mxu0 %v10652_v12  ;;  %v10719_v12 = vld [vmem:[%s13842_s20 + $0x8a4] ss:$16 sps:$4 sm:$0xff]  }
 0x2c7   : > { %8207 = vmatprep.subr.bf16.mxu1 %v10655_v13  ;;  %v10722_v13 = vld [vmem:[%s13842_s20 + $0xaa4] ss:$16 sps:$4 sm:$0xff]  }
 0x2c9   : > { %8167 = vmatpush1.bf16.msra.mxu0 %v10650_v14 }
 0x2ca   : > { %8208 = vmatpush1.bf16.msra.mxu1 %v10653_v15  ;;  %8168 = vmatprep.subr.bf16.mxu0 %v10658_v17  ;;  %v10717_v15 = vld [vmem:[%s13842_s20 + $0x8a0] ss:$16 sps:$4 sm:$0xff]  }
 0x2cb   : > { %8209 = vmatprep.subr.bf16.mxu1 %v10661_v18  ;;  %v10720_v17 = vld [vmem:[%s13842_s20 + $0xaa0] ss:$16 sps:$4 sm:$0xff]  }
 0x2cd   : > { %8169 = vmatpush2.bf16.msra.mxu0 %v10656_v19 }
 0x2ce   : > { %8210 = vmatpush2.bf16.msra.mxu1 %v10659_v21  ;;  %8170 = vmatprep.subr.bf16.mxu0 %v10664_v22 }
 0x2cf   : > { %8211 = vmatprep.subr.bf16.mxu1 %v10667_v23  ;;  %v10725_v23 = vld [vmem:[%s13842_s20 + $0x884] ss:$16 sps:$4 sm:$0xff]  }
 0x2d1   : > { %8171 = vmatpush2.bf16.msra.mxu0 %v10662_v24  ;;  %v10728_v24 = vld [vmem:[%s13842_s20 + $0xa84] ss:$16 sps:$4 sm:$0xff]  }
 0x2d2   : > { %8212 = vmatpush2.bf16.msra.mxu1 %v10665_v25  ;;  %8172 = vmatprep.subr.bf16.mxu0 %v10670_v26  ;;  %v10723_v25 = vld [vmem:[%s13842_s20 + $0x880] ss:$16 sps:$4 sm:$0xff]  }
 0x2d3   : > { %8213 = vmatprep.subr.bf16.mxu1 %v10673_v27  ;;  %v10726_v26 = vld [vmem:[%s13842_s20 + $0xa80] ss:$16 sps:$4 sm:$0xff]   ;;  %v10731_v27 = vld [vmem:[%s13842_s20 + $0x864] ss:$16 sps:$4 sm:$0xff]  }
 0x2d5   : > { %8173 = vmatpush2.bf16.msra.mxu0 %v10668_v30  ;;  %v10734_v30 = vld [vmem:[%s13842_s20 + $0xa64] ss:$16 sps:$4 sm:$0xff]  }
 0x2d6   : > { %8214 = vmatpush2.bf16.msra.mxu1 %v10671_v31  ;;  %8174 = vmatprep.subr.bf16.mxu0 %v10676_v34  ;;  %v10729_v31 = vld [vmem:[%s13842_s20 + $0x860] ss:$16 sps:$4 sm:$0xff]  }
 0x2d7   : > { %8215 = vmatprep.subr.bf16.mxu1 %v10679_v35  ;;  %v10732_v34 = vld [vmem:[%s13842_s20 + $0xa60] ss:$16 sps:$4 sm:$0xff]   ;;  %v10737_v35 = vld [vmem:[%s13842_s20 + $0x844] ss:$16 sps:$4 sm:$0xff]  }
 0x2d9   : > { %8175 = vmatpush2.bf16.msra.mxu0 %v10674_v16  ;;  %v10740_v16 = vld [vmem:[%s13842_s20 + $0xa44] ss:$16 sps:$4 sm:$0xff]  }
 0x2da   : > { %8216 = vmatpush2.bf16.msra.mxu1 %v10677_v36  ;;  %8176 = vmatprep.subr.bf16.mxu0 %v10682_v39  ;;  %v10735_v36 = vld [vmem:[%s13842_s20 + $0x840] ss:$16 sps:$4 sm:$0xff]  }
 0x2db   : > { %8217 = vmatprep.subr.bf16.mxu1 %v10685_v40  ;;  %v10738_v39 = vld [vmem:[%s13842_s20 + $0xa40] ss:$16 sps:$4 sm:$0xff]   ;;  %v10743_v40 = vld [vmem:[%s13842_s20 + $0x824] ss:$16 sps:$4 sm:$0xff]  }
 0x2dd   : > { %8177 = vmatpush2.bf16.msra.mxu0 %v10680_v41  ;;  %v10746_v41 = vld [vmem:[%s13842_s20 + $0xa24] ss:$16 sps:$4 sm:$0xff]  }
 0x2de   : > { %8218 = vmatpush2.bf16.msra.mxu1 %v10683_v42  ;;  %8178 = vmatprep.subr.bf16.mxu0 %v10688_v44  ;;  %v10741_v42 = vld [vmem:[%s13842_s20 + $0x820] ss:$16 sps:$4 sm:$0xff]  }
 0x2df   : > { %8219 = vmatprep.subr.bf16.mxu1 %v10691_v45  ;;  %v10744_v44 = vld [vmem:[%s13842_s20 + $0xa20] ss:$16 sps:$4 sm:$0xff]   ;;  %v10749_v45 = vld [vmem:[%s13842_s20 + $0x804] ss:$16 sps:$4 sm:$0xff]  }
 0x2e1   : > { %8179 = vmatpush2.bf16.msra.mxu0 %v10686_v32  ;;  %v10752_v32 = vld [vmem:[%s13842_s20 + $0xa04] ss:$16 sps:$4 sm:$0xff]  }
 0x2e2   : > { %8220 = vmatpush2.bf16.msra.mxu1 %v10689_v33  ;;  %8180 = vmatprep.subr.bf16.mxu0 %v10694_v43  ;;  %v10747_v33 = vld [vmem:[%s13842_s20 + $0x800] ss:$16 sps:$4 sm:$0xff]  }
 0x2e3   : > { %8221 = vmatprep.subr.bf16.mxu1 %v10697_v50  ;;  %v10750_v43 = vld [vmem:[%s13842_s20 + $0xa00] ss:$16 sps:$4 sm:$0xff]   ;;  %v10755_v50 = vld [vmem:[%s13842_s20 + $0x9e4] ss:$16 sps:$4 sm:$0xff]  }
 0x2e5   : > { %8181 = vmatpush2.bf16.msra.mxu0 %v10692_v52  ;;  %v10758_v52 = vld [vmem:[%s13842_s20 + $0xbe4] ss:$16 sps:$4 sm:$0xff]  }
 0x2e6   : > { %8222 = vmatpush2.bf16.msra.mxu1 %v10695_v54  ;;  %8182 = vmatprep.subr.bf16.mxu0 %v10700_v55  ;;  %v10753_v54 = vld [vmem:[%s13842_s20 + $0x9e0] ss:$16 sps:$4 sm:$0xff]  }
 0x2e7   : > { %8223 = vmatprep.subr.bf16.mxu1 %v10703_v56  ;;  %v10756_v55 = vld [vmem:[%s13842_s20 + $0xbe0] ss:$16 sps:$4 sm:$0xff]   ;;  %v10761_v56 = vld [vmem:[%s13842_s20 + $0x9c4] ss:$16 sps:$4 sm:$0xff]  }
 0x2e9   : > { %8183 = vmatpush2.bf16.msra.mxu0 %v10698_v59  ;;  %v10759_v59 = vld [vmem:[%s13842_s20 + $0x9c0] ss:$16 sps:$4 sm:$0xff]  }
 0x2ea   : > { %8224 = vmatpush2.bf16.msra.mxu1 %v10701_v60  ;;  %8234 = vmatprep.subr.bf16.mxu0 %v10707_v61  ;;  %v10762_v60 = vld [vmem:[%s13842_s20 + $0xbc0] ss:$16 sps:$4 sm:$0xff]   ;;  %v10767_v61 = vld [vmem:[%s13842_s20 + $0x9a4] ss:$16 sps:$4 sm:$0xff]  }
 0x2eb   : > { %8275 = vmatprep.subr.bf16.mxu1 %v10710_v62  ;;  %v10770_v62 = vld [vmem:[%s13842_s20 + $0xba4] ss:$16 sps:$4 sm:$0xff]  }
 0x2ec   : > { %v3827_v6 = vpop.f32.mrf.mxu0  ;;  %8185 = vmatmul.mubr.bf16.vlgmr.msra.gmra.mxu0 %v14069_v58 }
 0x2ed   : > { %v3868_v7 = vpop.f32.mrf.mxu1  ;;  %8226 = vmatmul.mubr.bf16.vlgmr.msra.gmra.mxu1 %v14080_v0  ;;  %8235 = vmatpush1.bf16.msra.mxu0 %v10705_v38  ;;  %v10765_v38 = vld [vmem:[%s13842_s20 + $0x9a0] ss:$16 sps:$4 sm:$0xff]  }
 0x2ee   : > { %v14094_v9 = vadd.f32 %v3868_v7, %v3827_v6  ;;  %8276 = vmatpush1.bf16.msra.mxu1 %v10708_v1  ;;  %v3829_v10 = vpop.f32.mrf.mxu0  ;;  %8236 = vmatprep.subr.bf16.mxu0 %v10713_v2  ;;  %v10768_v1 = vld [vmem:[%s13842_s20 + $0xba0] ss:$16 sps:$4 sm:$0xff]   ;;  %v10773_v2 = vld [vmem:[%s13842_s20 + $0x984] ss:$16 sps:$4 sm:$0xff]  }
 0x2ef   : > { %v3870_v11 = vpop.f32.mrf.mxu1  ;;  %8277 = vmatprep.subr.bf16.mxu1 %v10716_v3  ;;  %8266 = vmatprep.mubr.bf16.mxu0 %v14076_v63  ;;  %v10776_v3 = vld [vmem:[%s13842_s20 + $0xb84] ss:$16 sps:$4 sm:$0xff]   ;;  %v10774_v6 = vld [vmem:[%s13842_s20 + $0xb80] ss:$16 sps:$4 sm:$0xff]  }
 0x2f0   : > { %v14098_v14 = vadd.f32 %v3870_v11, %v3829_v10  ;;  %8307 = vmatprep.mubr.bf16.mxu1 %v14089_v5  ;;  %v3831_v18 = vpop.f32.mrf.mxu0  ;;  %v10779_v7 = vld [vmem:[%s13842_s20 + $0x964] ss:$16 sps:$4 sm:$0xff]   ;;  %v10777_v10 = vld [vmem:[%s13842_s20 + $0x960] ss:$16 sps:$4 sm:$0xff]  }
 0x2f1   : > { %v3872_v19 = vpop.f32.mrf.mxu1  ;;  %8237 = vmatpush1.bf16.msra.mxu0 %v10711_v4  ;;  %v10771_v4 = vld [vmem:[%s13842_s20 + $0x980] ss:$16 sps:$4 sm:$0xff]  }
 0x2f2   : > { %8278 = vmatpush1.bf16.msra.mxu1 %v10714_v8  ;;  %v3832_v21 = vpop.f32.mrf.mxu0  ;;  %8238 = vmatprep.subr.bf16.mxu0 %v10719_v12  ;;  %v10782_v8 = vld [vmem:[%s13842_s20 + $0xb64] ss:$16 sps:$4 sm:$0xff]   ;;  %v10780_v11 = vld [vmem:[%s13842_s20 + $0xb60] ss:$16 sps:$4 sm:$0xff]  }
 0x2f3   : > { %v3873_v22 = vpop.f32.mrf.mxu1  ;;  %8279 = vmatprep.subr.bf16.mxu1 %v10722_v13  ;;  %v10785_v12 = vld [vmem:[%s13842_s20 + $0x944] ss:$16 sps:$4 sm:$0xff]   ;;  %v10786_v18 = vld [vmem:[%s13842_s20 + $0xb40] ss:$16 sps:$4 sm:$0xff]  }
 0x2f4   : > { %v10788_v13 = vld [vmem:[%s13842_s20 + $0xb44] ss:$16 sps:$4 sm:$0xff]  }
 0x2f5   : > { %8239 = vmatpush1.bf16.msra.mxu0 %v10717_v15  ;;  %v4010_v15 = vcombine.high %v14051_v47, %v14051_v47  ;;  %v10791_v19 = vld [vmem:[%s13842_s20 + $0x924] ss:$16 sps:$4 sm:$0xff]   ;;  %v10789_v47 = vld [vmem:[%s13842_s20 + $0x920] ss:$16 sps:$4 sm:$0xff]  }
 0x2f6   : > { %8280 = vmatpush1.bf16.msra.mxu1 %v10720_v17  ;;  %8240 = vmatprep.subr.bf16.mxu0 %v10725_v23  ;;  %v10783_v17 = vld [vmem:[%s13842_s20 + $0x940] ss:$16 sps:$4 sm:$0xff]   ;;  %v10794_v21 = vld [vmem:[%s13842_s20 + $0xb24] ss:$16 sps:$4 sm:$0xff]  }
 0x2f7   : > { %8281 = vmatprep.subr.bf16.mxu1 %v10728_v24  ;;  %v14153_v22 = vrot.slane %v4010_v15, %v13733_v28  ;;  %v10792_v23 = vld [vmem:[%s13842_s20 + $0xb20] ss:$16 sps:$4 sm:$0xff]   ;;  %v10797_v24 = vld [vmem:[%s13842_s20 + $0x904] ss:$16 sps:$4 sm:$0xff]  }
 0x2f8   : > { %v10834_v15 = vld [vmem:[%s13842_s20 + $0xe40] ss:$16 sps:$4 sm:$0xff]  }
 0x2f9   : > { %8241 = vmatpush1.bf16.msra.mxu0 %v10723_v25  ;;  %v10800_v25 = vld [vmem:[%s13842_s20 + $0xb04] ss:$16 sps:$4 sm:$0xff]  }
 0x2fa   : > { %8282 = vmatpush1.bf16.msra.mxu1 %v10726_v26  ;;  %8242 = vmatprep.subr.bf16.mxu0 %v10731_v27  ;;  %v4026_v26 = vcombine.high %v14153_v22, %v14153_v22  ;;  %v14163_v27 = vrot.slane %v14059_v51, %v13733_v28 }
 0x2fb   : > { %8283 = vmatprep.subr.bf16.mxu1 %v10734_v30  ;;  %v10795_v30 = vld [vmem:[%s13842_s20 + $0x900] ss:$16 sps:$4 sm:$0xff]  }
 0x2fc   : > { %v14176_v51 = vcombine.high %v14163_v27, %v14163_v27 }
 0x2fd   : > { %8243 = vmatpush1.bf16.msra.mxu0 %v10729_v31  ;;  %v10798_v31 = vld [vmem:[%s13842_s20 + $0xb00] ss:$16 sps:$4 sm:$0xff]  }
 0x2fe   : > { %8284 = vmatpush1.bf16.msra.mxu1 %v10732_v34  ;;  %8244 = vmatprep.subr.bf16.mxu0 %v10737_v35  ;;  %v10803_v34 = vld [vmem:[%s13842_s20 + $0xce4] ss:$16 sps:$4 sm:$0xff]  }
 0x2ff   : > { %8285 = vmatprep.subr.bf16.mxu1 %v10740_v16  ;;  %v10806_v35 = vld [vmem:[%s13842_s20 + $0xee4] ss:$16 sps:$4 sm:$0xff]   ;;  %v10801_v16 = vld [vmem:[%s13842_s20 + $0xce0] ss:$16 sps:$4 sm:$0xff]  }
 0x301   : > { %8245 = vmatpush1.bf16.msra.mxu0 %v10735_v36  ;;  %v10804_v36 = vld [vmem:[%s13842_s20 + $0xee0] ss:$16 sps:$4 sm:$0xff]  }
 0x302   : > { %8286 = vmatpush1.bf16.msra.mxu1 %v10738_v39  ;;  %8246 = vmatprep.subr.bf16.mxu0 %v10743_v40  ;;  %v14172_v39 = vrot.slane %v4026_v26, %v13733_v28  ;;  %v10809_v40 = vld [vmem:[%s13842_s20 + $0xcc4] ss:$16 sps:$4 sm:$0xff]  }
 0x303   : > { %8287 = vmatprep.subr.bf16.mxu1 %v10746_v41  ;;  %v10812_v41 = vld [vmem:[%s13842_s20 + $0xec4] ss:$16 sps:$4 sm:$0xff]  }
 0x304   : > { %v10851_v26 = vld [vmem:[%s13842_s20 + $0xde4] ss:$16 sps:$4 sm:$0xff]  }
 0x305   : > { %8247 = vmatpush1.bf16.msra.mxu0 %v10741_v42  ;;  %v10807_v42 = vld [vmem:[%s13842_s20 + $0xcc0] ss:$16 sps:$4 sm:$0xff]  }
 0x306   : > { %8288 = vmatpush1.bf16.msra.mxu1 %v10744_v44  ;;  %8248 = vmatprep.subr.bf16.mxu0 %v10749_v45  ;;  %v10810_v44 = vld [vmem:[%s13842_s20 + $0xec0] ss:$16 sps:$4 sm:$0xff]   ;;  %v14184_v45 = vcombine.high %v14172_v39, %v14172_v39 }
 0x307   : > { %8289 = vmatprep.subr.bf16.mxu1 %v10752_v32 }
 0x309   : > { %8249 = vmatpush1.bf16.msra.mxu0 %v10747_v33 }
 0x30a   : > { %8290 = vmatpush1.bf16.msra.mxu1 %v10750_v43  ;;  %8250 = vmatprep.subr.bf16.mxu0 %v10755_v50 }
 0x30b   : > { %8291 = vmatprep.subr.bf16.mxu1 %v10758_v52 }
 0x30d   : > { %8251 = vmatpush2.bf16.msra.mxu0 %v10753_v54  ;;  %v10815_v54 = vld [vmem:[%s13842_s20 + $0xca4] ss:$16 sps:$4 sm:$0xff]  }
 0x30e   : > { %8292 = vmatpush2.bf16.msra.mxu1 %v10756_v55  ;;  %8252 = vmatprep.subr.bf16.mxu0 %v10761_v56  ;;  %v10818_v55 = vld [vmem:[%s13842_s20 + $0xea4] ss:$16 sps:$4 sm:$0xff]  }
 0x30f   : > { %8293 = vmatprep.subr.bf16.mxu1 %v10764_v57  ;;  %v10813_v57 = vld [vmem:[%s13842_s20 + $0xca0] ss:$16 sps:$4 sm:$0xff]  }
 0x311   : > { %8253 = vmatpush2.bf16.msra.mxu0 %v10759_v59  ;;  %v10816_v59 = vld [vmem:[%s13842_s20 + $0xea0] ss:$16 sps:$4 sm:$0xff]  }
 0x312   : > { %8294 = vmatpush2.bf16.msra.mxu1 %v10762_v60  ;;  %8254 = vmatprep.subr.bf16.mxu0 %v10767_v61 }
 0x313   : > { %8295 = vmatprep.subr.bf16.mxu1 %v10770_v62 }
 0x315   : > { %8255 = vmatpush2.bf16.msra.mxu0 %v10765_v38 }
 0x316   : > { %8296 = vmatpush2.bf16.msra.mxu1 %v10768_v1  ;;  %8256 = vmatprep.subr.bf16.mxu0 %v10773_v2  ;;  %v10821_v1 = vld [vmem:[%s13842_s20 + $0xc84] ss:$16 sps:$4 sm:$0xff]  }
 0x317   : > { %8297 = vmatprep.subr.bf16.mxu1 %v10776_v3  ;;  %v10824_v2 = vld [vmem:[%s13842_s20 + $0xe84] ss:$16 sps:$4 sm:$0xff]   ;;  %v10819_v3 = vld [vmem:[%s13842_s20 + $0xc80] ss:$16 sps:$4 sm:$0xff]  }
 0x319   : > { %8257 = vmatpush2.bf16.msra.mxu0 %v10771_v4  ;;  %v10822_v4 = vld [vmem:[%s13842_s20 + $0xe80] ss:$16 sps:$4 sm:$0xff]  }
 0x31a   : > { %8298 = vmatpush2.bf16.msra.mxu1 %v10774_v6  ;;  %8258 = vmatprep.subr.bf16.mxu0 %v10779_v7  ;;  %v10827_v6 = vld [vmem:[%s13842_s20 + $0xc64] ss:$16 sps:$4 sm:$0xff]  }
 0x31b   : > { %8299 = vmatprep.subr.bf16.mxu1 %v10782_v8  ;;  %v10830_v7 = vld [vmem:[%s13842_s20 + $0xe64] ss:$16 sps:$4 sm:$0xff]   ;;  %v10825_v8 = vld [vmem:[%s13842_s20 + $0xc60] ss:$16 sps:$4 sm:$0xff]  }
 0x31d   : > { %8259 = vmatpush2.bf16.msra.mxu0 %v10777_v10  ;;  %v10828_v10 = vld [vmem:[%s13842_s20 + $0xe60] ss:$16 sps:$4 sm:$0xff]  }
 0x31e   : > { %8300 = vmatpush2.bf16.msra.mxu1 %v10780_v11  ;;  %8260 = vmatprep.subr.bf16.mxu0 %v10785_v12  ;;  %v10833_v11 = vld [vmem:[%s13842_s20 + $0xc44] ss:$16 sps:$4 sm:$0xff]  }
 0x31f   : > { %8301 = vmatprep.subr.bf16.mxu1 %v10788_v13  ;;  %v10836_v12 = vld [vmem:[%s13842_s20 + $0xe44] ss:$16 sps:$4 sm:$0xff]   ;;  %v10831_v13 = vld [vmem:[%s13842_s20 + $0xc40] ss:$16 sps:$4 sm:$0xff]  }
 0x321   : > { %8261 = vmatpush2.bf16.msra.mxu0 %v10783_v17  ;;  %v10839_v17 = vld [vmem:[%s13842_s20 + $0xc24] ss:$16 sps:$4 sm:$0xff]  }
 0x322   : > { %8302 = vmatpush2.bf16.msra.mxu1 %v10786_v18  ;;  %8262 = vmatprep.subr.bf16.mxu0 %v10791_v19  ;;  %v10842_v18 = vld [vmem:[%s13842_s20 + $0xe24] ss:$16 sps:$4 sm:$0xff]   ;;  %v10837_v19 = vld [vmem:[%s13842_s20 + $0xc20] ss:$16 sps:$4 sm:$0xff]  }
 0x323   : > { %8303 = vmatprep.subr.bf16.mxu1 %v10794_v21  ;;  %v10840_v21 = vld [vmem:[%s13842_s20 + $0xe20] ss:$16 sps:$4 sm:$0xff]  }
 0x325   : > { %8263 = vmatpush2.bf16.msra.mxu0 %v10789_v47  ;;  %v10845_v47 = vld [vmem:[%s13842_s20 + $0xc04] ss:$16 sps:$4 sm:$0xff]  }
 0x326   : > { %8304 = vmatpush2.bf16.msra.mxu1 %v10792_v23  ;;  %8264 = vmatprep.subr.bf16.mxu0 %v10797_v24  ;;  %v10848_v23 = vld [vmem:[%s13842_s20 + $0xe04] ss:$16 sps:$4 sm:$0xff]   ;;  %v10843_v24 = vld [vmem:[%s13842_s20 + $0xc00] ss:$16 sps:$4 sm:$0xff]  }
 0x327   : > { %8305 = vmatprep.subr.bf16.mxu1 %v10800_v25  ;;  %v10846_v25 = vld [vmem:[%s13842_s20 + $0xe00] ss:$16 sps:$4 sm:$0xff]  }
 0x329   : > { %8265 = vmatpush2.bf16.msra.mxu0 %v10795_v30  ;;  %v10854_v30 = vld [vmem:[%s13842_s20 + $0xfe4] ss:$16 sps:$4 sm:$0xff]  }
 0x32a   : > { %8306 = vmatpush2.bf16.msra.mxu1 %v10798_v31  ;;  %8316 = vmatprep.subr.bf16.mxu0 %v10803_v34  ;;  %v10849_v31 = vld [vmem:[%s13842_s20 + $0xde0] ss:$16 sps:$4 sm:$0xff]  }
 0x32b   : > { %8357 = vmatprep.subr.bf16.mxu1 %v10806_v35  ;;  %v10852_v34 = vld [vmem:[%s13842_s20 + $0xfe0] ss:$16 sps:$4 sm:$0xff]   ;;  %v10857_v35 = vld [vmem:[%s13842_s20 + $0xdc4] ss:$16 sps:$4 sm:$0xff]  }
 0x32c   : > { %v3909_v32 = vpop.f32.mrf.mxu0  ;;  %8267 = vmatmul.mubr.bf16.vlgmr.msra.gmra.mxu0 %v14163_v27 }
 0x32d   : > { %v3950_v33 = vpop.f32.mrf.mxu1  ;;  %8308 = vmatmul.mubr.bf16.vlgmr.msra.gmra.mxu1 %v14176_v51  ;;  %8317 = vmatpush1.bf16.msra.mxu0 %v10801_v16  ;;  %v10860_v16 = vld [vmem:[%s13842_s20 + $0xfc4] ss:$16 sps:$4 sm:$0xff]  }
 0x32e   : > { %v14188_v43 = vadd.f32 %v3950_v33, %v3909_v32  ;;  %8358 = vmatpush1.bf16.msra.mxu1 %v10804_v36  ;;  %v3911_v50 = vpop.f32.mrf.mxu0  ;;  %8318 = vmatprep.subr.bf16.mxu0 %v10809_v40  ;;  %v10855_v36 = vld [vmem:[%s13842_s20 + $0xdc0] ss:$16 sps:$4 sm:$0xff]   ;;  %v10869_v33 = vld [vmem:[%s13842_s20 + $0xd84] ss:$16 sps:$4 sm:$0xff]  }
 0x32f   : > { %v3952_v52 = vpop.f32.mrf.mxu1  ;;  %8359 = vmatprep.subr.bf16.mxu1 %v10812_v41  ;;  %8348 = vmatprep.mubr.bf16.mxu0 %v14172_v39  ;;  %v10858_v40 = vld [vmem:[%s13842_s20 + $0xfc0] ss:$16 sps:$4 sm:$0xff]   ;;  %v10863_v41 = vld [vmem:[%s13842_s20 + $0xda4] ss:$16 sps:$4 sm:$0xff]  }
 0x330   : > { %v14192_v56 = vadd.f32 %v3952_v52, %v3911_v50  ;;  %8389 = vmatprep.mubr.bf16.mxu1 %v14184_v45  ;;  %v3913_v60 = vpop.f32.mrf.mxu0  ;;  %v10864_v32 = vld [vmem:[%s13842_s20 + $0xfa0] ss:$16 sps:$4 sm:$0xff]   ;;  %v10872_v50 = vld [vmem:[%s13842_s20 + $0xf84] ss:$16 sps:$4 sm:$0xff]  }
 0x331   : > { %v3954_v61 = vpop.f32.mrf.mxu1  ;;  %8319 = vmatpush1.bf16.msra.mxu0 %v10807_v42  ;;  %v10866_v42 = vld [vmem:[%s13842_s20 + $0xfa4] ss:$16 sps:$4 sm:$0xff]   ;;  %v10867_v52 = vld [vmem:[%s13842_s20 + $0xd80] ss:$16 sps:$4 sm:$0xff]  }
 0x332   : > { %8360 = vmatpush1.bf16.msra.mxu1 %v10810_v44  ;;  %v3914_v62 = vpop.f32.mrf.mxu0  ;;  %8320 = vmatprep.subr.bf16.mxu0 %v10815_v54  ;;  %v10861_v44 = vld [vmem:[%s13842_s20 + $0xda0] ss:$16 sps:$4 sm:$0xff]   ;;  %v10881_v61 = vld [vmem:[%s13842_s20 + $0xd44] ss:$16 sps:$4 sm:$0xff]  }
 0x333   : > { %v3955_v38 = vpop.f32.mrf.mxu1  ;;  %8361 = vmatprep.subr.bf16.mxu1 %v10818_v55  ;;  %v10870_v54 = vld [vmem:[%s13842_s20 + $0xf80] ss:$16 sps:$4 sm:$0xff]   ;;  %v10875_v55 = vld [vmem:[%s13842_s20 + $0xd64] ss:$16 sps:$4 sm:$0xff]  }
 0x334   : > { %v10876_v60 = vld [vmem:[%s13842_s20 + $0xf60] ss:$16 sps:$4 sm:$0xff]   ;;  %v10884_v62 = vld [vmem:[%s13842_s20 + $0xf44] ss:$16 sps:$4 sm:$0xff]  }
 0x335   : > { %8321 = vmatpush1.bf16.msra.mxu0 %v10813_v57  ;;  %v10878_v57 = vld [vmem:[%s13842_s20 + $0xf64] ss:$16 sps:$4 sm:$0xff]  }
 0x336   : > { %8362 = vmatpush1.bf16.msra.mxu1 %v10816_v59  ;;  %8322 = vmatprep.subr.bf16.mxu0 %v10821_v1  ;;  %v10873_v59 = vld [vmem:[%s13842_s20 + $0xd60] ss:$16 sps:$4 sm:$0xff]  }
 0x337   : > { %8363 = vmatprep.subr.bf16.mxu1 %v10824_v2  ;;  %v14243_v38 = vld [vmem:[%s15002_s0 + $0x10] sm:$0xff] }
 0x338   : > { %v10879_v1 = vld [vmem:[%s13842_s20 + $0xd40] ss:$16 sps:$4 sm:$0xff]  }
 0x339   : > { %8323 = vmatpush1.bf16.msra.mxu0 %v10819_v3  ;;  %v10882_v2 = vld [vmem:[%s13842_s20 + $0xf40] ss:$16 sps:$4 sm:$0xff]   ;;  %v10887_v3 = vld [vmem:[%s13842_s20 + $0xd24] ss:$16 sps:$4 sm:$0xff]  }
 0x33a   : > { %8364 = vmatpush1.bf16.msra.mxu1 %v10822_v4  ;;  %8324 = vmatprep.subr.bf16.mxu0 %v10827_v6  ;;  %v10890_v4 = vld [vmem:[%s13842_s20 + $0xf24] ss:$16 sps:$4 sm:$0xff]   ;;  %v14251_v6 = vrot.slane %v14243_v38, %v13733_v28 }
 0x33b   : > { %8365 = vmatprep.subr.bf16.mxu1 %v10830_v7  ;;  %v10885_v7 = vld [vmem:[%s13842_s20 + $0xd20] ss:$16 sps:$4 sm:$0xff]  }
 0x33d   : > { %8325 = vmatpush1.bf16.msra.mxu0 %v10825_v8  ;;  %v10888_v8 = vld [vmem:[%s13842_s20 + $0xf20] ss:$16 sps:$4 sm:$0xff]  }
 0x33e   : > { %8366 = vmatpush1.bf16.msra.mxu1 %v10828_v10  ;;  %8326 = vmatprep.subr.bf16.mxu0 %v10833_v11  ;;  %v10893_v10 = vld [vmem:[%s13842_s20 + $0xd04] ss:$16 sps:$4 sm:$0xff]  }
 0x33f   : > { %8367 = vmatprep.subr.bf16.mxu1 %v10836_v12  ;;  %v10896_v11 = vld [vmem:[%s13842_s20 + $0xf04] ss:$16 sps:$4 sm:$0xff]   ;;  %v4074_v12 = vcombine.high %v14251_v6, %v14251_v6 }
 0x341   : > { %8327 = vmatpush1.bf16.msra.mxu0 %v10831_v13  ;;  %v14261_v13 = vrot.slane %v14153_v22, %v13733_v28 }
 0x342   : > { %8368 = vmatpush1.bf16.msra.mxu1 %v10834_v15  ;;  %8328 = vmatprep.subr.bf16.mxu0 %v10839_v17  ;;  %v10891_v15 = vld [vmem:[%s13842_s20 + $0xd00] ss:$16 sps:$4 sm:$0xff]  }
 0x343   : > { %8369 = vmatprep.subr.bf16.mxu1 %v10842_v18  ;;  %v10894_v17 = vld [vmem:[%s13842_s20 + $0xf00] ss:$16 sps:$4 sm:$0xff]   ;;  %v10900_v18 = vld [vmem:[%s13842_s20 + $0x10e4] ss:$16 sps:$4 sm:$0xff]   ;;  %v14274_v22 = vcombine.high %v14261_v13, %v14261_v13 }
 0x345   : > { %8329 = vmatpush1.bf16.msra.mxu0 %v10837_v19  ;;  %v10903_v19 = vld [vmem:[%s13842_s20 + $0x12e4] ss:$16 sps:$4 sm:$0xff]  }
 0x346   : > { %8370 = vmatpush1.bf16.msra.mxu1 %v10840_v21  ;;  %8330 = vmatprep.subr.bf16.mxu0 %v10845_v47  ;;  %v10898_v21 = vld [vmem:[%s13842_s20 + $0x10e0] ss:$16 sps:$4 sm:$0xff]  }
 0x347   : > { %8371 = vmatprep.subr.bf16.mxu1 %v10848_v23  ;;  %v10901_v47 = vld [vmem:[%s13842_s20 + $0x12e0] ss:$16 sps:$4 sm:$0xff]   ;;  %v14270_v23 = vrot.slane %v4074_v12, %v13733_v28  ;;  %v10939_v12 = vld [vmem:[%s13842_s20 + $0x1224] ss:$16 sps:$4 sm:$0xff]  }
 0x349   : > { %8331 = vmatpush1.bf16.msra.mxu0 %v10843_v24  ;;  %v10906_v24 = vld [vmem:[%s13842_s20 + $0x10c4] ss:$16 sps:$4 sm:$0xff]  }
 0x34a   : > { %8372 = vmatpush1.bf16.msra.mxu1 %v10846_v25  ;;  %8332 = vmatprep.subr.bf16.mxu0 %v10851_v26  ;;  %v10909_v25 = vld [vmem:[%s13842_s20 + $0x12c4] ss:$16 sps:$4 sm:$0xff]   ;;  %v10904_v26 = vld [vmem:[%s13842_s20 + $0x10c0] ss:$16 sps:$4 sm:$0xff]  }
 0x34b   : > { %8373 = vmatprep.subr.bf16.mxu1 %v10854_v30  ;;  %v10907_v30 = vld [vmem:[%s13842_s20 + $0x12c0] ss:$16 sps:$4 sm:$0xff]  }
 0x34d   : > { %8333 = vmatpush2.bf16.msra.mxu0 %v10849_v31  ;;  %v14282_v31 = vcombine.high %v14270_v23, %v14270_v23 }
 0x34e   : > { %8374 = vmatpush2.bf16.msra.mxu1 %v10852_v34  ;;  %8334 = vmatprep.subr.bf16.mxu0 %v10857_v35 }
 0x34f   : > { %8375 = vmatprep.subr.bf16.mxu1 %v10860_v16 }
 0x351   : > { %8335 = vmatpush2.bf16.msra.mxu0 %v10855_v36 }
 0x352   : > { %8376 = vmatpush2.bf16.msra.mxu1 %v10858_v40  ;;  %8336 = vmatprep.subr.bf16.mxu0 %v10863_v41  ;;  %v10912_v41 = vld [vmem:[%s13842_s20 + $0x10a4] ss:$16 sps:$4 sm:$0xff]  }
 0x353   : > { %8377 = vmatprep.subr.bf16.mxu1 %v10866_v42  ;;  %v10915_v42 = vld [vmem:[%s13842_s20 + $0x12a4] ss:$16 sps:$4 sm:$0xff]  }
 0x355   : > { %8337 = vmatpush2.bf16.msra.mxu0 %v10861_v44 }
 0x356   : > { %8378 = vmatpush2.bf16.msra.mxu1 %v10864_v32  ;;  %8338 = vmatprep.subr.bf16.mxu0 %v10869_v33  ;;  %v10910_v33 = vld [vmem:[%s13842_s20 + $0x10a0] ss:$16 sps:$4 sm:$0xff]  }
 0x357   : > { %8379 = vmatprep.subr.bf16.mxu1 %v10872_v50  ;;  %v10913_v50 = vld [vmem:[%s13842_s20 + $0x12a0] ss:$16 sps:$4 sm:$0xff]  }
 0x359   : > { %8339 = vmatpush2.bf16.msra.mxu0 %v10867_v52 }
 0x35a   : > { %8380 = vmatpush2.bf16.msra.mxu1 %v10870_v54  ;;  %8340 = vmatprep.subr.bf16.mxu0 %v10875_v55 }
 0x35b   : > { %8381 = vmatprep.subr.bf16.mxu1 %v10878_v57 }
 0x35d   : > { %8341 = vmatpush2.bf16.msra.mxu0 %v10873_v59  ;;  %v10921_v59 = vld [vmem:[%s13842_s20 + $0x1284] ss:$16 sps:$4 sm:$0xff]  }
 0x35e   : > { %8382 = vmatpush2.bf16.msra.mxu1 %v10876_v60  ;;  %8342 = vmatprep.subr.bf16.mxu0 %v10881_v61  ;;  %v10916_v60 = vld [vmem:[%s13842_s20 + $0x1080] ss:$16 sps:$4 sm:$0xff]  }
 0x35f   : > { %8383 = vmatprep.subr.bf16.mxu1 %v10884_v62  ;;  %v10919_v61 = vld [vmem:[%s13842_s20 + $0x1280] ss:$16 sps:$4 sm:$0xff]   ;;  %v10924_v62 = vld [vmem:[%s13842_s20 + $0x1064] ss:$16 sps:$4 sm:$0xff]  }
 0x361   : > { %8343 = vmatpush2.bf16.msra.mxu0 %v10879_v1  ;;  %v10927_v1 = vld [vmem:[%s13842_s20 + $0x1264] ss:$16 sps:$4 sm:$0xff]  }
 0x362   : > { %8384 = vmatpush2.bf16.msra.mxu1 %v10882_v2  ;;  %8344 = vmatprep.subr.bf16.mxu0 %v10887_v3  ;;  %v10922_v2 = vld [vmem:[%s13842_s20 + $0x1060] ss:$16 sps:$4 sm:$0xff]  }
 0x363   : > { %8385 = vmatprep.subr.bf16.mxu1 %v10890_v4  ;;  %v10925_v3 = vld [vmem:[%s13842_s20 + $0x1260] ss:$16 sps:$4 sm:$0xff]   ;;  %v10930_v4 = vld [vmem:[%s13842_s20 + $0x1044] ss:$16 sps:$4 sm:$0xff]  }
 0x365   : > { %8345 = vmatpush2.bf16.msra.mxu0 %v10885_v7  ;;  %v10933_v7 = vld [vmem:[%s13842_s20 + $0x1244] ss:$16 sps:$4 sm:$0xff]  }
 0x366   : > { %8386 = vmatpush2.bf16.msra.mxu1 %v10888_v8  ;;  %8346 = vmatprep.subr.bf16.mxu0 %v10893_v10  ;;  %v10928_v8 = vld [vmem:[%s13842_s20 + $0x1040] ss:$16 sps:$4 sm:$0xff]  }
 0x367   : > { %8387 = vmatprep.subr.bf16.mxu1 %v10896_v11  ;;  %v10931_v10 = vld [vmem:[%s13842_s20 + $0x1240] ss:$16 sps:$4 sm:$0xff]   ;;  %v10936_v11 = vld [vmem:[%s13842_s20 + $0x1024] ss:$16 sps:$4 sm:$0xff]  }
 0x369   : > { %8347 = vmatpush2.bf16.msra.mxu0 %v10891_v15  ;;  %v10934_v15 = vld [vmem:[%s13842_s20 + $0x1020] ss:$16 sps:$4 sm:$0xff]  }
 0x36a   : > { %8388 = vmatpush2.bf16.msra.mxu1 %v10894_v17  ;;  %8398 = vmatprep.subr.bf16.mxu0 %v10900_v18  ;;  %v10937_v17 = vld [vmem:[%s13842_s20 + $0x1220] ss:$16 sps:$4 sm:$0xff]   ;;  %v10942_v18 = vld [vmem:[%s13842_s20 + $0x1004] ss:$16 sps:$4 sm:$0xff]  }
 0x36b   : > { %8439 = vmatprep.subr.bf16.mxu1 %v10903_v19  ;;  %v10945_v19 = vld [vmem:[%s13842_s20 + $0x1204] ss:$16 sps:$4 sm:$0xff]  }
 0x36c   : > { %v8104_v34 = vpop.f32.mrf.mxu0  ;;  %8349 = vmatmul.mubr.bf16.vlgmr.msra.gmra.mxu0 %v14261_v13 }
 0x36d   : > { %v8145_v35 = vpop.f32.mrf.mxu1  ;;  %8390 = vmatmul.mubr.bf16.vlgmr.msra.gmra.mxu1 %v14274_v22  ;;  %v8105_v16 = vadd.f32 %v8104_v34, %v14094_v9  ;;  %8399 = vmatpush1.bf16.msra.mxu0 %v10898_v21  ;;  %v10940_v21 = vld [vmem:[%s13842_s20 + $0x1000] ss:$16 sps:$4 sm:$0xff]   ;;  %v10954_v34 = vld [vmem:[%s13842_s20 + $0x11c4] ss:$16 sps:$4 sm:$0xff]  }
 0x36e   : > { %8440 = vmatpush1.bf16.msra.mxu1 %v10901_v47  ;;  %v8106_v36 = vpop.f32.mrf.mxu0  ;;  %8400 = vmatprep.subr.bf16.mxu0 %v10906_v24  ;;  %v10943_v47 = vld [vmem:[%s13842_s20 + $0x1200] ss:$16 sps:$4 sm:$0xff]   ;;  %v10948_v24 = vld [vmem:[%s13842_s20 + $0x11e4] ss:$16 sps:$4 sm:$0xff]  }
 0x36f   : > { %v8147_v40 = vpop.f32.mrf.mxu1  ;;  %8441 = vmatprep.subr.bf16.mxu1 %v10909_v25  ;;  %v14289_v44 = vadd.f32 %v8145_v35, %v8105_v16  ;;  %v8107_v32 = vadd.f32 %v8106_v36, %v14098_v14  ;;  %8430 = vmatprep.mubr.bf16.mxu0 %v14270_v23  ;;  %v10918_v14 = vld [vmem:[%s13842_s20 + $0x1084] ss:$16 sps:$4 sm:$0xff]   ;;  %v10952_v16 = vld [vmem:[%s13842_s20 + $0x11c0] ss:$16 sps:$4 sm:$0xff]  }
 0x370   : > { %8471 = vmatprep.mubr.bf16.mxu1 %v14282_v31  ;;  %v8108_v9 = vpop.f32.mrf.mxu0  ;;  %v10951_v25 = vld [vmem:[%s13842_s20 + $0x13e4] ss:$16 sps:$4 sm:$0xff]   ;;  %v10955_v36 = vld [vmem:[%s13842_s20 + $0x13c0] ss:$16 sps:$4 sm:$0xff]  }
 0x371   : > { %v8149_v52 = vpop.f32.mrf.mxu1  ;;  %v14296_v54 = vadd.f32 %v8147_v40, %v8107_v32  ;;  %8401 = vmatpush1.bf16.msra.mxu0 %v10904_v26  ;;  %v10946_v26 = vld [vmem:[%s13842_s20 + $0x11e0] ss:$16 sps:$4 sm:$0xff]   ;;  %v10957_v35 = vld [vmem:[%s13842_s20 + $0x13c4] ss:$16 sps:$4 sm:$0xff]  }
 0x372   : > { %8442 = vmatpush1.bf16.msra.mxu1 %v10907_v30  ;;  %v8109_v55 = vpop.f32.mrf.mxu0  ;;  %8402 = vmatprep.subr.bf16.mxu0 %v10912_v41  ;;  %v10949_v30 = vld [vmem:[%s13842_s20 + $0x13e0] ss:$16 sps:$4 sm:$0xff]   ;;  %v10960_v40 = vld [vmem:[%s13842_s20 + $0x11a4] ss:$16 sps:$4 sm:$0xff]  }
 0x373   : > { %v8150_v57 = vpop.f32.mrf.mxu1  ;;  %8443 = vmatprep.subr.bf16.mxu1 %v10915_v42  ;;  %v10963_v41 = vld [vmem:[%s13842_s20 + $0x13a4] ss:$16 sps:$4 sm:$0xff]   ;;  %v10958_v42 = vld [vmem:[%s13842_s20 + $0x11a0] ss:$16 sps:$4 sm:$0xff]  }
 0x374   : > { %v10961_v32 = vld [vmem:[%s13842_s20 + $0x13a0] ss:$16 sps:$4 sm:$0xff]   ;;  %v10972_v55 = vld [vmem:[%s13842_s20 + $0x1164] ss:$16 sps:$4 sm:$0xff]  }
 0x375   : > { %8403 = vmatpush1.bf16.msra.mxu0 %v10910_v33  ;;  %v10966_v33 = vld [vmem:[%s13842_s20 + $0x1184] ss:$16 sps:$4 sm:$0xff]   ;;  %v10964_v9 = vld [vmem:[%s13842_s20 + $0x1180] ss:$16 sps:$4 sm:$0xff]  }
 0x376   : > { %8444 = vmatpush1.bf16.msra.mxu1 %v10913_v50  ;;  %8404 = vmatprep.subr.bf16.mxu0 %v10918_v14  ;;  %v10969_v50 = vld [vmem:[%s13842_s20 + $0x1384] ss:$16 sps:$4 sm:$0xff]   ;;  %v10967_v52 = vld [vmem:[%s13842_s20 + $0x1380] ss:$16 sps:$4 sm:$0xff]  }
 0x377   : > { %8445 = vmatprep.subr.bf16.mxu1 %v10921_v59  ;;  %v10975_v57 = vld [vmem:[%s13842_s20 + $0x1364] ss:$16 sps:$4 sm:$0xff]   ;;  %v10970_v14 = vld [vmem:[%s13842_s20 + $0x1160] ss:$16 sps:$4 sm:$0xff]  }
 0x378   : > { %v10973_v59 = vld [vmem:[%s13842_s20 + $0x1360] ss:$16 sps:$4 sm:$0xff]  }
 0x379   : > { %8405 = vmatpush1.bf16.msra.mxu0 %v10916_v60  ;;  %v10978_v60 = vld [vmem:[%s13842_s20 + $0x1144] ss:$16 sps:$4 sm:$0xff]  }
 0x37a   : > { %8446 = vmatpush1.bf16.msra.mxu1 %v10919_v61  ;;  %8406 = vmatprep.subr.bf16.mxu0 %v10924_v62  ;;  %v10981_v61 = vld [vmem:[%s13842_s20 + $0x1344] ss:$16 sps:$4 sm:$0xff]   ;;  %v4059_v62 = vcombine.high %v14243_v38, %v14243_v38  ;;  %v10982_v38 = vld [vmem:[%s13842_s20 + $0x1120] ss:$16 sps:$4 sm:$0xff]  }
 0x37b   : > { %8447 = vmatprep.subr.bf16.mxu1 %v10927_v1  ;;  %v10976_v1 = vld [vmem:[%s13842_s20 + $0x1140] ss:$16 sps:$4 sm:$0xff]  }
 0x37d   : > { %8407 = vmatpush1.bf16.msra.mxu0 %v10922_v2  ;;  %v10979_v2 = vld [vmem:[%s13842_s20 + $0x1340] ss:$16 sps:$4 sm:$0xff]  }
 0x37e   : > { %8448 = vmatpush1.bf16.msra.mxu1 %v10925_v3  ;;  %8408 = vmatprep.subr.bf16.mxu0 %v10930_v4  ;;  %v10984_v3 = vld [vmem:[%s13842_s20 + $0x1124] ss:$16 sps:$4 sm:$0xff]  }
 0x37f   : > { %8449 = vmatprep.subr.bf16.mxu1 %v10933_v7  ;;  %v10987_v4 = vld [vmem:[%s13842_s20 + $0x1324] ss:$16 sps:$4 sm:$0xff]   ;;  %v14347_v7 = vrot.slane %v4059_v62, %v13733_v28 }
 0x380   : > { %v11017_v62 = vld [vmem:[%s13842_s20 + $0x1684] ss:$16 sps:$4 sm:$0xff]  }
 0x381   : > { %8409 = vmatpush1.bf16.msra.mxu0 %v10928_v8  ;;  %v10985_v8 = vld [vmem:[%s13842_s20 + $0x1320] ss:$16 sps:$4 sm:$0xff]  }
 0x382   : > { %8450 = vmatpush1.bf16.msra.mxu1 %v10931_v10  ;;  %8410 = vmatprep.subr.bf16.mxu0 %v10936_v11  ;;  %v10990_v10 = vld [vmem:[%s13842_s20 + $0x1104] ss:$16 sps:$4 sm:$0xff]  }
 0x383   : > { %8451 = vmatprep.subr.bf16.mxu1 %v10939_v12  ;;  %v10993_v11 = vld [vmem:[%s13842_s20 + $0x1304] ss:$16 sps:$4 sm:$0xff]   ;;  %v4075_v12 = vcombine.high %v14347_v7, %v14347_v7 }
 0x385   : > { %8411 = vmatpush1.bf16.msra.mxu0 %v10934_v15  ;;  %v14357_v15 = vrot.slane %v14251_v6, %v13733_v28 }
 0x386   : > { %8452 = vmatpush1.bf16.msra.mxu1 %v10937_v17  ;;  %8412 = vmatprep.subr.bf16.mxu0 %v10942_v18  ;;  %v10988_v17 = vld [vmem:[%s13842_s20 + $0x1100] ss:$16 sps:$4 sm:$0xff]  }
 0x387   : > { %8453 = vmatprep.subr.bf16.mxu1 %v10945_v19  ;;  %v10991_v18 = vld [vmem:[%s13842_s20 + $0x1300] ss:$16 sps:$4 sm:$0xff]   ;;  %v10996_v19 = vld [vmem:[%s13842_s20 + $0x14e4] ss:$16 sps:$4 sm:$0xff]   ;;  %v14370_v6 = vcombine.high %v14357_v15, %v14357_v15 }
 0x389   : > { %8413 = vmatpush1.bf16.msra.mxu0 %v10940_v21  ;;  %v10999_v21 = vld [vmem:[%s13842_s20 + $0x16e4] ss:$16 sps:$4 sm:$0xff]  }
 0x38a   : > { %8454 = vmatpush1.bf16.msra.mxu1 %v10943_v47  ;;  %8414 = vmatprep.subr.bf16.mxu0 %v10948_v24  ;;  %v10994_v47 = vld [vmem:[%s13842_s20 + $0x14e0] ss:$16 sps:$4 sm:$0xff]  }
 0x38b   : > { %8455 = vmatprep.subr.bf16.mxu1 %v10951_v25  ;;  %v10997_v24 = vld [vmem:[%s13842_s20 + $0x16e0] ss:$16 sps:$4 sm:$0xff]   ;;  %v14366_v25 = vrot.slane %v4075_v12, %v13733_v28 }
 0x38c   : > { %v11024_v12 = vld [vmem:[%s13842_s20 + $0x1440] ss:$16 sps:$4 sm:$0xff]  }
 0x38d   : > { %8415 = vmatpush2.bf16.msra.mxu0 %v10946_v26  ;;  %v11002_v26 = vld [vmem:[%s13842_s20 + $0x14c4] ss:$16 sps:$4 sm:$0xff]  }
 0x38e   : > { %8456 = vmatpush2.bf16.msra.mxu1 %v10949_v30  ;;  %8416 = vmatprep.subr.bf16.mxu0 %v10954_v34  ;;  %v11005_v30 = vld [vmem:[%s13842_s20 + $0x16c4] ss:$16 sps:$4 sm:$0xff]   ;;  %v11000_v34 = vld [vmem:[%s13842_s20 + $0x14c0] ss:$16 sps:$4 sm:$0xff]  }
 0x38f   : > { %8457 = vmatprep.subr.bf16.mxu1 %v10957_v35  ;;  %v11003_v35 = vld [vmem:[%s13842_s20 + $0x16c0] ss:$16 sps:$4 sm:$0xff]  }
 0x391   : > { %8417 = vmatpush2.bf16.msra.mxu0 %v10952_v16  ;;  %v14378_v16 = vcombine.high %v14366_v25, %v14366_v25 }
 0x392   : > { %8458 = vmatpush2.bf16.msra.mxu1 %v10955_v36  ;;  %8418 = vmatprep.subr.bf16.mxu0 %v10960_v40 }
 0x393   : > { %8459 = vmatprep.subr.bf16.mxu1 %v10963_v41 }
 0x395   : > { %8419 = vmatpush2.bf16.msra.mxu0 %v10958_v42 }
 0x396   : > { %8460 = vmatpush2.bf16.msra.mxu1 %v10961_v32  ;;  %8420 = vmatprep.subr.bf16.mxu0 %v10966_v33  ;;  %v11008_v33 = vld [vmem:[%s13842_s20 + $0x14a4] ss:$16 sps:$4 sm:$0xff]  }
 0x397   : > { %8461 = vmatprep.subr.bf16.mxu1 %v10969_v50  ;;  %v11011_v50 = vld [vmem:[%s13842_s20 + $0x16a4] ss:$16 sps:$4 sm:$0xff]  }
 0x399   : > { %8421 = vmatpush2.bf16.msra.mxu0 %v10964_v9 }
 0x39a   : > { %8462 = vmatpush2.bf16.msra.mxu1 %v10967_v52  ;;  %8422 = vmatprep.subr.bf16.mxu0 %v10972_v55  ;;  %v11006_v55 = vld [vmem:[%s13842_s20 + $0x14a0] ss:$16 sps:$4 sm:$0xff]  }
 0x39b   : > { %8463 = vmatprep.subr.bf16.mxu1 %v10975_v57  ;;  %v11009_v57 = vld [vmem:[%s13842_s20 + $0x16a0] ss:$16 sps:$4 sm:$0xff]  }
 0x39d   : > { %8423 = vmatpush2.bf16.msra.mxu0 %v10970_v14 }
 0x39e   : > { %8464 = vmatpush2.bf16.msra.mxu1 %v10973_v59  ;;  %8424 = vmatprep.subr.bf16.mxu0 %v10978_v60 }
 0x39f   : > { %8465 = vmatprep.subr.bf16.mxu1 %v10981_v61  ;;  %v11014_v61 = vld [vmem:[%s13842_s20 + $0x1484] ss:$16 sps:$4 sm:$0xff]  }
 0x3a1   : > { %8425 = vmatpush2.bf16.msra.mxu0 %v10976_v1  ;;  %v11012_v1 = vld [vmem:[%s13842_s20 + $0x1480] ss:$16 sps:$4 sm:$0xff]  }
 0x3a2   : > { %8466 = vmatpush2.bf16.msra.mxu1 %v10979_v2  ;;  %8426 = vmatprep.subr.bf16.mxu0 %v10984_v3  ;;  %v11015_v2 = vld [vmem:[%s13842_s20 + $0x1680] ss:$16 sps:$4 sm:$0xff]   ;;  %v11020_v3 = vld [vmem:[%s13842_s20 + $0x1464] ss:$16 sps:$4 sm:$0xff]  }
 0x3a3   : > { %8467 = vmatprep.subr.bf16.mxu1 %v10987_v4  ;;  %v11023_v4 = vld [vmem:[%s13842_s20 + $0x1664] ss:$16 sps:$4 sm:$0xff]  }
 0x3a5   : > { %8427 = vmatpush2.bf16.msra.mxu0 %v10982_v38  ;;  %v11018_v38 = vld [vmem:[%s13842_s20 + $0x1460] ss:$16 sps:$4 sm:$0xff]  }
 0x3a6   : > { %8468 = vmatpush2.bf16.msra.mxu1 %v10985_v8  ;;  %8428 = vmatprep.subr.bf16.mxu0 %v10990_v10  ;;  %v11021_v8 = vld [vmem:[%s13842_s20 + $0x1660] ss:$16 sps:$4 sm:$0xff]   ;;  %v11026_v10 = vld [vmem:[%s13842_s20 + $0x1444] ss:$16 sps:$4 sm:$0xff]  }
 0x3a7   : > { %8469 = vmatprep.subr.bf16.mxu1 %v10993_v11  ;;  %v11029_v11 = vld [vmem:[%s13842_s20 + $0x1644] ss:$16 sps:$4 sm:$0xff]  }
 0x3a9   : > { %8429 = vmatpush2.bf16.msra.mxu0 %v10988_v17  ;;  %v11027_v17 = vld [vmem:[%s13842_s20 + $0x1640] ss:$16 sps:$4 sm:$0xff]  }
 0x3aa   : > { %8470 = vmatpush2.bf16.msra.mxu1 %v10991_v18  ;;  %8480 = vmatprep.subr.bf16.mxu0 %v10996_v19  ;;  %v11032_v18 = vld [vmem:[%s13842_s20 + $0x1424] ss:$16 sps:$4 sm:$0xff]  }
 0x3ab   : > { %8521 = vmatprep.subr.bf16.mxu1 %v10999_v21  ;;  %v11035_v19 = vld [vmem:[%s13842_s20 + $0x1624] ss:$16 sps:$4 sm:$0xff]   ;;  %v11030_v21 = vld [vmem:[%s13842_s20 + $0x1420] ss:$16 sps:$4 sm:$0xff]  }
 0x3ac   : > { %v8186_v36 = vpop.f32.mrf.mxu0  ;;  %8431 = vmatmul.mubr.bf16.vlgmr.msra.gmra.mxu0 %v14357_v15 }
 0x3ad   : > { %v8227_v40 = vpop.f32.mrf.mxu1  ;;  %8472 = vmatmul.mubr.bf16.vlgmr.msra.gmra.mxu1 %v14370_v6  ;;  %v8187_v41 = vadd.f32 %v8186_v36, %v14289_v44  ;;  %8481 = vmatpush1.bf16.msra.mxu0 %v10994_v47  ;;  %v11033_v47 = vld [vmem:[%s13842_s20 + $0x1620] ss:$16 sps:$4 sm:$0xff]   ;;  %v11047_v36 = vld [vmem:[%s13842_s20 + $0x17e4] ss:$16 sps:$4 sm:$0xff]  }
 0x3ae   : > { %8522 = vmatpush1.bf16.msra.mxu1 %v10997_v24  ;;  %v8188_v42 = vpop.f32.mrf.mxu0  ;;  %8482 = vmatprep.subr.bf16.mxu0 %v11002_v26  ;;  %v11038_v24 = vld [vmem:[%s13842_s20 + $0x1404] ss:$16 sps:$4 sm:$0xff]  }
 0x3af   : > { %v8229_v32 = vpop.f32.mrf.mxu1  ;;  %8523 = vmatprep.subr.bf16.mxu1 %v11005_v30  ;;  %v14385_v9 = vadd.f32 %v8227_v40, %v8187_v41  ;;  %v8189_v52 = vadd.f32 %v8188_v42, %v14296_v54  ;;  %8512 = vmatprep.mubr.bf16.mxu0 %v14366_v25  ;;  %v11041_v26 = vld [vmem:[%s13842_s20 + $0x1604] ss:$16 sps:$4 sm:$0xff]   ;;  %v11036_v30 = vld [vmem:[%s13842_s20 + $0x1400] ss:$16 sps:$4 sm:$0xff]  }
 0x3b0   : > { %8553 = vmatprep.mubr.bf16.mxu1 %v14378_v16  ;;  %v8190_v44 = vpop.f32.mrf.mxu0  ;;  %v11042_v40 = vld [vmem:[%s13842_s20 + $0x15e0] ss:$16 sps:$4 sm:$0xff]   ;;  %v11050_v42 = vld [vmem:[%s13842_s20 + $0x15c4] ss:$16 sps:$4 sm:$0xff]  }
 0x3b1   : > { %v8231_v14 = vpop.f32.mrf.mxu1  ;;  %v14392_v59 = vadd.f32 %v8229_v32, %v8189_v52  ;;  %8483 = vmatpush1.bf16.msra.mxu0 %v11000_v34  ;;  %v11039_v34 = vld [vmem:[%s13842_s20 + $0x1600] ss:$16 sps:$4 sm:$0xff]   ;;  %v11053_v32 = vld [vmem:[%s13842_s20 + $0x17c4] ss:$16 sps:$4 sm:$0xff]  }
 0x3b2   : > { %8524 = vmatpush1.bf16.msra.mxu1 %v11003_v35  ;;  %v8191_v60 = vpop.f32.mrf.mxu0  ;;  %8484 = vmatprep.subr.bf16.mxu0 %v11008_v33  ;;  %v11044_v35 = vld [vmem:[%s13842_s20 + $0x15e4] ss:$16 sps:$4 sm:$0xff]   ;;  %v11045_v41 = vld [vmem:[%s13842_s20 + $0x17e0] ss:$16 sps:$4 sm:$0xff]  }
 0x3b3   : > { %v8232_v54 = vpop.f32.mrf.mxu1  ;;  %8525 = vmatprep.subr.bf16.mxu1 %v11011_v50  ;;  %v11048_v33 = vld [vmem:[%s13842_s20 + $0x15c0] ss:$16 sps:$4 sm:$0xff]   ;;  %v11056_v52 = vld [vmem:[%s13842_s20 + $0x15a4] ss:$16 sps:$4 sm:$0xff]  }
 0x3b4   : > { %v11051_v50 = vld [vmem:[%s13842_s20 + $0x17c0] ss:$16 sps:$4 sm:$0xff]   ;;  %v11062_v14 = vld [vmem:[%s13842_s20 + $0x1584] ss:$16 sps:$4 sm:$0xff]  }
 0x3b5   : > { %8485 = vmatpush1.bf16.msra.mxu0 %v11006_v55  ;;  %v11059_v55 = vld [vmem:[%s13842_s20 + $0x17a4] ss:$16 sps:$4 sm:$0xff]   ;;  %v11057_v44 = vld [vmem:[%s13842_s20 + $0x17a0] ss:$16 sps:$4 sm:$0xff]  }
 0x3b6   : > { %8526 = vmatpush1.bf16.msra.mxu1 %v11009_v57  ;;  %8486 = vmatprep.subr.bf16.mxu0 %v11014_v61  ;;  %v11054_v57 = vld [vmem:[%s13842_s20 + $0x15a0] ss:$16 sps:$4 sm:$0xff]   ;;  %v11065_v60 = vld [vmem:[%s13842_s20 + $0x1784] ss:$16 sps:$4 sm:$0xff]  }
 0x3b7   : > { %8527 = vmatprep.subr.bf16.mxu1 %v11017_v62  ;;  %v11060_v54 = vld [vmem:[%s13842_s20 + $0x1580] ss:$16 sps:$4 sm:$0xff]   ;;  %v11068_v62 = vld [vmem:[%s13842_s20 + $0x1564] ss:$16 sps:$4 sm:$0xff]  }
 0x3b8   : > { %v11063_v61 = vld [vmem:[%s13842_s20 + $0x1780] ss:$16 sps:$4 sm:$0xff]  }
 0x3b9   : > { %8487 = vmatpush1.bf16.msra.mxu0 %v11012_v1  ;;  %v11071_v1 = vld [vmem:[%s13842_s20 + $0x1764] ss:$16 sps:$4 sm:$0xff]  }
 0x3ba   : > { %8528 = vmatpush1.bf16.msra.mxu1 %v11015_v2  ;;  %8488 = vmatprep.subr.bf16.mxu0 %v11020_v3  ;;  %v11066_v2 = vld [vmem:[%s13842_s20 + $0x1560] ss:$16 sps:$4 sm:$0xff]  }
 0x3bb   : > { %8529 = vmatprep.subr.bf16.mxu1 %v11023_v4  ;;  %v11069_v3 = vld [vmem:[%s13842_s20 + $0x1760] ss:$16 sps:$4 sm:$0xff]   ;;  %v11074_v4 = vld [vmem:[%s13842_s20 + $0x1544] ss:$16 sps:$4 sm:$0xff]  }
 0x3bd   : > { %8489 = vmatpush1.bf16.msra.mxu0 %v11018_v38  ;;  %v11077_v38 = vld [vmem:[%s13842_s20 + $0x1744] ss:$16 sps:$4 sm:$0xff]  }
 0x3be   : > { %8530 = vmatpush1.bf16.msra.mxu1 %v11021_v8  ;;  %8490 = vmatprep.subr.bf16.mxu0 %v11026_v10  ;;  %v11072_v8 = vld [vmem:[%s13842_s20 + $0x1540] ss:$16 sps:$4 sm:$0xff]  }
 0x3bf   : > { %8531 = vmatprep.subr.bf16.mxu1 %v11029_v11  ;;  %v11075_v10 = vld [vmem:[%s13842_s20 + $0x1740] ss:$16 sps:$4 sm:$0xff]   ;;  %v11080_v11 = vld [vmem:[%s13842_s20 + $0x1524] ss:$16 sps:$4 sm:$0xff]  }
 0x3c1   : > { %8491 = vmatpush1.bf16.msra.mxu0 %v11024_v12  ;;  %v11083_v12 = vld [vmem:[%s13842_s20 + $0x1724] ss:$16 sps:$4 sm:$0xff]  }
 0x3c2   : > { %8532 = vmatpush1.bf16.msra.mxu1 %v11027_v17  ;;  %8492 = vmatprep.subr.bf16.mxu0 %v11032_v18  ;;  %v11078_v17 = vld [vmem:[%s13842_s20 + $0x1520] ss:$16 sps:$4 sm:$0xff]  }
 0x3c3   : > { %8533 = vmatprep.subr.bf16.mxu1 %v11035_v19  ;;  %v11081_v18 = vld [vmem:[%s13842_s20 + $0x1720] ss:$16 sps:$4 sm:$0xff]   ;;  %v11086_v19 = vld [vmem:[%s13842_s20 + $0x1504] ss:$16 sps:$4 sm:$0xff]  }
 0x3c5   : > { %8493 = vmatpush1.bf16.msra.mxu0 %v11030_v21  ;;  %v11089_v21 = vld [vmem:[%s13842_s20 + $0x1704] ss:$16 sps:$4 sm:$0xff]  }
 0x3c6   : > { %8534 = vmatpush1.bf16.msra.mxu1 %v11033_v47  ;;  %8494 = vmatprep.subr.bf16.mxu0 %v11038_v24  ;;  %v14446_v47 = vrot.slane %v14347_v7, %v13733_v28  ;;  %v11084_v24 = vld [vmem:[%s13842_s20 + $0x1500] ss:$16 sps:$4 sm:$0xff]   ;;  %v11099_v7 = vld [vmem:[%s13842_s20 + $0x1844] ss:$16 sps:$4 sm:$0xff]  }
 0x3c7   : > { %8535 = vmatprep.subr.bf16.mxu1 %v11041_v26  ;;  %v11087_v26 = vld [vmem:[%s13842_s20 + $0x1700] ss:$16 sps:$4 sm:$0xff]  }
 0x3c9   : > { %8495 = vmatpush1.bf16.msra.mxu0 %v11036_v30  ;;  %v11093_v30 = vld [vmem:[%s13842_s20 + $0x1864] ss:$16 sps:$4 sm:$0xff]  }
 0x3ca   : > { %8536 = vmatpush1.bf16.msra.mxu1 %v11039_v34  ;;  %8496 = vmatprep.subr.bf16.mxu0 %v11044_v35  ;;  %v11096_v34 = vld [vmem:[%s13842_s20 + $0xec] ss:$16 sps:$4 sm:$0xff]   ;;  %v11091_v35 = vld [vmem:[%s13842_s20 + $0x1860] ss:$16 sps:$4 sm:$0xff]  }
 0x3cb   : > { %8537 = vmatprep.subr.bf16.mxu1 %v11047_v36  ;;  %v11094_v36 = vld [vmem:[%s13842_s20 + $0xe8] ss:$16 sps:$4 sm:$0xff]  }
 0x3cd   : > { %8497 = vmatpush2.bf16.msra.mxu0 %v11042_v40  ;;  %v14456_v40 = vcombine.high %v14446_v47, %v14446_v47 }
 0x3ce   : > { %8538 = vmatpush2.bf16.msra.mxu1 %v11045_v41  ;;  %8498 = vmatprep.subr.bf16.mxu0 %v11050_v42  ;;  %v11102_v41 = vld [vmem:[%s13842_s20 + $0xcc] ss:$16 sps:$4 sm:$0xff]   ;;  %v11097_v42 = vld [vmem:[%s13842_s20 + $0x1840] ss:$16 sps:$4 sm:$0xff]  }
 0x3cf   : > { %8539 = vmatprep.subr.bf16.mxu1 %v11053_v32  ;;  %v11100_v32 = vld [vmem:[%s13842_s20 + $0xc8] ss:$16 sps:$4 sm:$0xff]  }
 0x3d1   : > { %8499 = vmatpush2.bf16.msra.mxu0 %v11048_v33 }
 0x3d2   : > { %8540 = vmatpush2.bf16.msra.mxu1 %v11051_v50  ;;  %8500 = vmatprep.subr.bf16.mxu0 %v11056_v52 }
 0x3d3   : > { %8541 = vmatprep.subr.bf16.mxu1 %v11059_v55 }
 0x3d5   : > { %8501 = vmatpush2.bf16.msra.mxu0 %v11054_v57 }
 0x3d6   : > { %8542 = vmatpush2.bf16.msra.mxu1 %v11057_v44  ;;  %8502 = vmatprep.subr.bf16.mxu0 %v11062_v14  ;;  %v11105_v44 = vld [vmem:[%s13842_s20 + $0x1824] ss:$16 sps:$4 sm:$0xff]   ;;  %v11108_v14 = vld [vmem:[%s13842_s20 + $0xac] ss:$16 sps:$4 sm:$0xff]  }
 0x3d7   : > { %8543 = vmatprep.subr.bf16.mxu1 %v11065_v60 }
 0x3d9   : > { %8503 = vmatpush2.bf16.msra.mxu0 %v11060_v54 }
 0x3da   : > { %8544 = vmatpush2.bf16.msra.mxu1 %v11063_v61  ;;  %8504 = vmatprep.subr.bf16.mxu0 %v11068_v62  ;;  %v11103_v61 = vld [vmem:[%s13842_s20 + $0x1820] ss:$16 sps:$4 sm:$0xff]   ;;  %v11106_v62 = vld [vmem:[%s13842_s20 + $0xa8] ss:$16 sps:$4 sm:$0xff]  }
 0x3db   : > { %8545 = vmatprep.subr.bf16.mxu1 %v11071_v1  ;;  %v11770_v1 = vmov 0  }
 0x3dd   : > { %8505 = vmatpush2.bf16.msra.mxu0 %v11066_v2 }
 0x3de   : > { %8546 = vmatpush2.bf16.msra.mxu1 %v11069_v3  ;;  %8506 = vmatprep.subr.bf16.mxu0 %v11074_v4 }
 0x3df   : > { %8547 = vmatprep.subr.bf16.mxu1 %v11077_v38  ;;  %v11111_v38 = vld [vmem:[%s13842_s20 + $0x1804] ss:$16 sps:$4 sm:$0xff]  }
 0x3e1   : > { %8507 = vmatpush2.bf16.msra.mxu0 %v11072_v8  ;;  %v11114_v8 = vld [vmem:[%s13842_s20 + $0x8c] ss:$16 sps:$4 sm:$0xff]  }
 0x3e2   : > { %8548 = vmatpush2.bf16.msra.mxu1 %v11075_v10  ;;  %8508 = vmatprep.subr.bf16.mxu0 %v11080_v11  ;;  %v11109_v10 = vld [vmem:[%s13842_s20 + $0x1800] ss:$16 sps:$4 sm:$0xff]   ;;  %v9481_v11 = vld.sshfl [vmem:[%s15002_s0 + $0x18] sm:$0x1 pattern:$0x75316420] }
 0x3e3   : > { %8549 = vmatprep.subr.bf16.mxu1 %v11083_v12  ;;  %v11117_v12 = vld [vmem:[%s13842_s20 + $0x6c] ss:$16 sps:$4 sm:$0xff]  }
 0x3e5   : > { %8509 = vmatpush2.bf16.msra.mxu0 %v11078_v17  ;;  %v11120_v17 = vld [vmem:[%s13842_s20 + $0x2ec] ss:$16 sps:$4 sm:$0xff]  }
 0x3e6   : > { %8550 = vmatpush2.bf16.msra.mxu1 %v11081_v18  ;;  %8510 = vmatprep.subr.bf16.mxu0 %v11086_v19  ;;  %v14486_v18 = vrot.slane %v9481_v11, %v13733_v28  ;;  %v11115_v19 = vld [vmem:[%s13842_s20 + $0x68] ss:$16 sps:$4 sm:$0xff]  }
 0x3e7   : > { %8551 = vmatprep.subr.bf16.mxu1 %v11089_v21  ;;  %v11118_v21 = vld [vmem:[%s13842_s20 + $0x2e8] ss:$16 sps:$4 sm:$0xff]  }
 0x3e8   : > { %v11121_v28 = vld [vmem:[%s13842_s20 + $0x48] ss:$16 sps:$4 sm:$0xff]  }
 0x3e9   : > { %8511 = vmatpush2.bf16.msra.mxu0 %v11084_v24  ;;  %v11123_v24 = vld [vmem:[%s13842_s20 + $0x4c] ss:$16 sps:$4 sm:$0xff]   ;;  %v11163_v11 = vld [vmem:[%s13842_s20 + $0x168] ss:$16 sps:$4 sm:$0xff]  }
 0x3ea   : > { %8552 = vmatpush2.bf16.msra.mxu1 %v11087_v26  ;;  %8570 = vmatprep.subr.bf16.mxu0 %v11093_v30  ;;  %v11126_v26 = vld [vmem:[%s13842_s20 + $0x2cc] ss:$16 sps:$4 sm:$0xff]   ;;  %v11124_v30 = vld [vmem:[%s13842_s20 + $0x2c8] ss:$16 sps:$4 sm:$0xff]  }
 0x3eb   : > { %8603 = vmatprep.subr.bf16.mxu1 %v11096_v34  ;;  %v11129_v34 = vld [vmem:[%s13842_s20 + $0x2c] ss:$16 sps:$4 sm:$0xff]  }
 0x3ec   : > { %v8268_v33 = vpop.f32.mrf.mxu0  ;;  %8513 = vmatmul.mubr.bf16.vlgmr.msra.gmra.mxu0 %v14446_v47 }
 0x3ed   : > { %v8309_v50 = vpop.f32.mrf.mxu1  ;;  %8554 = vmatmul.mubr.bf16.vlgmr.msra.gmra.mxu1 %v14456_v40  ;;  %v8269_v52 = vadd.f32 %v8268_v33, %v14385_v9  ;;  %8571 = vmatpush1.bf16.msra.mxu0 %v11091_v35  ;;  %v11132_v35 = vld [vmem:[%s13842_s20 + $0x2ac] ss:$16 sps:$4 sm:$0xff]   ;;  %v11136_v33 = vld [vmem:[%s13842_s20 + $0x288] ss:$16 sps:$4 sm:$0xff]  }
 0x3ee   : > { %8604 = vmatpush1.bf16.msra.mxu1 %v11094_v36  ;;  %v8270_v55 = vpop.f32.mrf.mxu0  ;;  %8572 = vmatprep.subr.bf16.mxu0 %v11099_v7  ;;  %v11127_v36 = vld [vmem:[%s13842_s20 + $0x28] ss:$16 sps:$4 sm:$0xff]  }
 0x3ef   : > { %v8311_v57 = vpop.f32.mrf.mxu1  ;;  %8605 = vmatprep.subr.bf16.mxu1 %v11102_v41  ;;  %v14467_v60 = vadd.f32 %v8309_v50, %v8269_v52  ;;  %v8271_v54 = vadd.f32 %v8270_v55, %v14392_v59  ;;  %8594 = vmatprep.mubr.bf16.mxu0 %v11770_v1  ;;  %v11130_v7 = vld [vmem:[%s13842_s20 + $0x2a8] ss:$16 sps:$4 sm:$0xff]   ;;  %v11135_v41 = vld [vmem:[%s13842_s20 + $0xc] ss:$16 sps:$4 sm:$0xff]  }
 0x3f0   : > { %8635 = vmatprep.mubr.bf16.mxu1 %v13906_v29  ;;  %v8272_v9 = vpop.f32.mrf.mxu0  ;;  %v11112_v29 = vld [vmem:[%s13842_s20 + $0x88] ss:$16 sps:$4 sm:$0xff]   ;;  %v11144_v50 = vld [vmem:[%s13842_s20 + $0x26c] ss:$16 sps:$4 sm:$0xff]  }
 0x3f1   : > { %v8313_v2 = vpop.f32.mrf.mxu1  ;;  %v14474_v3 = vadd.f32 %v8311_v57, %v8271_v54  ;;  %8573 = vmatpush1.bf16.msra.mxu0 %v11097_v42  ;;  %v11138_v42 = vld [vmem:[%s13842_s20 + $0x28c] ss:$16 sps:$4 sm:$0xff]   ;;  %v11139_v52 = vld [vmem:[%s13842_s20 + $0x1e8] ss:$16 sps:$4 sm:$0xff]  }
 0x3f2   : > { %8606 = vmatpush1.bf16.msra.mxu1 %v11100_v32  ;;  %v8273_v4 = vpop.f32.mrf.mxu0  ;;  %8574 = vmatprep.subr.bf16.mxu0 %v11105_v44  ;;  %v11133_v32 = vld [vmem:[%s13842_s20 + $0x8] ss:$16 sps:$4 sm:$0xff]   ;;  %v11147_v57 = vld [vmem:[%s13842_s20 + $0x1cc] ss:$16 sps:$4 sm:$0xff]  }
 0x3f3   : > { %v8314_v59 = vpop.f32.mrf.mxu1  ;;  %8607 = vmatprep.subr.bf16.mxu1 %v11108_v14  ;;  %v11142_v55 = vld [vmem:[%s13842_s20 + $0x268] ss:$16 sps:$4 sm:$0xff]   ;;  %v11150_v44 = vld [vmem:[%s13842_s20 + $0x24c] ss:$16 sps:$4 sm:$0xff]  }
 0x3f4   : > { %v11145_v14 = vld [vmem:[%s13842_s20 + $0x1c8] ss:$16 sps:$4 sm:$0xff]   ;;  %v11159_v4 = vld [vmem:[%s13842_s20 + $0x18c] ss:$16 sps:$4 sm:$0xff]  }
 0x3f5   : > { %8575 = vmatpush1.bf16.msra.mxu0 %v11103_v61  ;;  %v11148_v54 = vld [vmem:[%s13842_s20 + $0x248] ss:$16 sps:$4 sm:$0xff]   ;;  %v11153_v61 = vld [vmem:[%s13842_s20 + $0x1ac] ss:$16 sps:$4 sm:$0xff]  }
 0x3f6   : > { %8608 = vmatpush1.bf16.msra.mxu1 %v11106_v62  ;;  %8576 = vmatprep.subr.bf16.mxu0 %v11111_v38  ;;  %v11156_v62 = vld [vmem:[%s13842_s20 + $0x22c] ss:$16 sps:$4 sm:$0xff]   ;;  %v11151_v9 = vld [vmem:[%s13842_s20 + $0x1a8] ss:$16 sps:$4 sm:$0xff]  }
 0x3f7   : > { %8609 = vmatprep.subr.bf16.mxu1 %v11114_v8  ;;  %v11154_v2 = vld [vmem:[%s13842_s20 + $0x228] ss:$16 sps:$4 sm:$0xff]   ;;  %v11162_v59 = vld [vmem:[%s13842_s20 + $0x20c] ss:$16 sps:$4 sm:$0xff]  }
 0x3f8   : > { %v11157_v38 = vld [vmem:[%s13842_s20 + $0x188] ss:$16 sps:$4 sm:$0xff]  }
 0x3f9   : > { %8577 = vmatpush1.bf16.msra.mxu0 %v11109_v10  ;;  %v11160_v8 = vld [vmem:[%s13842_s20 + $0x208] ss:$16 sps:$4 sm:$0xff]   ;;  %v11165_v10 = vld [vmem:[%s13842_s20 + $0x16c] ss:$16 sps:$4 sm:$0xff]  }
 0x3fa   : > { %8610 = vmatpush1.bf16.msra.mxu1 %v11112_v29  ;;  %8644 = vmatprep.subr.bf16.mxu0 %v11120_v17  ;;  %v11168_v29 = vld [vmem:[%s13842_s20 + $0x3ec] ss:$16 sps:$4 sm:$0xff]  }
 0x3fb   : > { %8611 = vmatprep.subr.bf16.mxu1 %v11117_v12  ;;  %v11166_v12 = vld [vmem:[%s13842_s20 + $0x3e8] ss:$16 sps:$4 sm:$0xff]   ;;  %v11171_v17 = vld [vmem:[%s13842_s20 + $0x14c] ss:$16 sps:$4 sm:$0xff]  }
 0x3fc   : > { %10266 = vmatmul.mubr.msk.bf16.vlgmr.msra.gmra.mxu0 %vm8066_vm0, %v14486_v18 }
 0x3fd   : > { %8645 = vmatpush1.bf16.msra.mxu0 %v11118_v21  ;;  %8676 = vmatprep.mubr.bf16.mxu0 %v13912_v37  ;;  %v11141_v37 = vld [vmem:[%s13842_s20 + $0x1ec] ss:$16 sps:$4 sm:$0xff]   ;;  %v11169_v21 = vld [vmem:[%s13842_s20 + $0x148] ss:$16 sps:$4 sm:$0xff]  }
 0x3fe   : > { %8612 = vmatpush1.bf16.msra.mxu1 %v11115_v19  ;;  %8646 = vmatprep.subr.bf16.mxu0 %v11126_v26  ;;  %v11174_v19 = vld [vmem:[%s13842_s20 + $0x3cc] ss:$16 sps:$4 sm:$0xff]  }
 0x3ff   : > { %8613 = vmatprep.subr.bf16.mxu1 %v11123_v24  ;;  %v11172_v24 = vld [vmem:[%s13842_s20 + $0x3c8] ss:$16 sps:$4 sm:$0xff]   ;;  %v11177_v26 = vld [vmem:[%s13842_s20 + $0x12c] ss:$16 sps:$4 sm:$0xff]  }
 0x401   : > { %8647 = vmatpush1.bf16.msra.mxu0 %v11124_v30  ;;  %v11175_v30 = vld [vmem:[%s13842_s20 + $0x128] ss:$16 sps:$4 sm:$0xff]  }
 0x402   : > { %8614 = vmatpush1.bf16.msra.mxu1 %v11121_v28  ;;  %8648 = vmatprep.subr.bf16.mxu0 %v11132_v35  ;;  %v11180_v28 = vld [vmem:[%s13842_s20 + $0x3ac] ss:$16 sps:$4 sm:$0xff]  }
 0x403   : > { %8615 = vmatprep.subr.bf16.mxu1 %v11129_v34  ;;  %v11178_v34 = vld [vmem:[%s13842_s20 + $0x3a8] ss:$16 sps:$4 sm:$0xff]   ;;  %v11183_v35 = vld [vmem:[%s13842_s20 + $0x10c] ss:$16 sps:$4 sm:$0xff]  }
 0x405   : > { %8649 = vmatpush1.bf16.msra.mxu0 %v11130_v7  ;;  %v11181_v7 = vld [vmem:[%s13842_s20 + $0x108] ss:$16 sps:$4 sm:$0xff]  }
 0x406   : > { %8616 = vmatpush1.bf16.msra.mxu1 %v11127_v36  ;;  %8650 = vmatprep.subr.bf16.mxu0 %v11138_v42  ;;  %v11186_v36 = vld [vmem:[%s13842_s20 + $0x38c] ss:$16 sps:$4 sm:$0xff]  }
 0x407   : > { %8617 = vmatprep.subr.bf16.mxu1 %v11135_v41  ;;  %v11184_v41 = vld [vmem:[%s13842_s20 + $0x388] ss:$16 sps:$4 sm:$0xff]   ;;  %v11189_v42 = vld [vmem:[%s13842_s20 + $0x36c] ss:$16 sps:$4 sm:$0xff]  }
 0x409   : > { %8651 = vmatpush1.bf16.msra.mxu0 %v11136_v33  ;;  %v11187_v33 = vld [vmem:[%s13842_s20 + $0x368] ss:$16 sps:$4 sm:$0xff]  }
 0x40a   : > { %8618 = vmatpush1.bf16.msra.mxu1 %v11133_v32  ;;  %8652 = vmatprep.subr.bf16.mxu0 %v11144_v50  ;;  %v11192_v32 = vld [vmem:[%s13842_s20 + $0x4ec] ss:$16 sps:$4 sm:$0xff]  }
 0x40b   : > { %8619 = vmatprep.subr.bf16.mxu1 %v11141_v37  ;;  %v11190_v37 = vld [vmem:[%s13842_s20 + $0x4e8] ss:$16 sps:$4 sm:$0xff]   ;;  %v11195_v50 = vld [vmem:[%s13842_s20 + $0x34c] ss:$16 sps:$4 sm:$0xff]  }
 0x40d   : > { %8653 = vmatpush1.bf16.msra.mxu0 %v11142_v55 }
 0x40e   : > { %8620 = vmatpush2.bf16.msra.mxu1 %v11139_v52  ;;  %8654 = vmatprep.subr.bf16.mxu0 %v11150_v44  ;;  %v11198_v52 = vld [vmem:[%s13842_s20 + $0x4cc] ss:$16 sps:$4 sm:$0xff]  }
 0x40f   : > { %8621 = vmatprep.subr.bf16.mxu1 %v11147_v57 }
 0x411   : > { %8655 = vmatpush1.bf16.msra.mxu0 %v11148_v54  ;;  %v11196_v54 = vld [vmem:[%s13842_s20 + $0x4c8] ss:$16 sps:$4 sm:$0xff]  }
 0x412   : > { %8622 = vmatpush2.bf16.msra.mxu1 %v11145_v14  ;;  %8656 = vmatprep.subr.bf16.mxu0 %v11156_v62  ;;  %v11193_v14 = vld [vmem:[%s13842_s20 + $0x348] ss:$16 sps:$4 sm:$0xff]  }
 0x413   : > { %8623 = vmatprep.subr.bf16.mxu1 %v11153_v61 }
 0x415   : > { %8657 = vmatpush1.bf16.msra.mxu0 %v11154_v2  ;;  %v11204_v2 = vld [vmem:[%s13842_s20 + $0x4ac] ss:$16 sps:$4 sm:$0xff]  }
 0x416   : > { %8624 = vmatpush2.bf16.msra.mxu1 %v11151_v9  ;;  %8658 = vmatprep.subr.bf16.mxu0 %v11162_v59  ;;  %v11201_v9 = vld [vmem:[%s13842_s20 + $0x32c] ss:$16 sps:$4 sm:$0xff]  }
 0x417   : > { %8625 = vmatprep.subr.bf16.mxu1 %v11159_v4 }
 0x419   : > { %8659 = vmatpush1.bf16.msra.mxu0 %v11160_v8  ;;  %v11199_v8 = vld [vmem:[%s13842_s20 + $0x328] ss:$16 sps:$4 sm:$0xff]  }
 0x41a   : > { %8626 = vmatpush2.bf16.msra.mxu1 %v11157_v38  ;;  %8660 = vmatprep.subr.bf16.mxu0 %v11168_v29 }
 0x41b   : > { %8627 = vmatprep.subr.bf16.mxu1 %v11165_v10  ;;  %v11202_v10 = vld [vmem:[%s13842_s20 + $0x4a8] ss:$16 sps:$4 sm:$0xff]  }
 0x41d   : > { %8661 = vmatpush2.bf16.msra.mxu0 %v11166_v12  ;;  %v11205_v12 = vld [vmem:[%s13842_s20 + $0x308] ss:$16 sps:$4 sm:$0xff]  }
 0x41e   : > { %8628 = vmatpush2.bf16.msra.mxu1 %v11163_v11  ;;  %8662 = vmatprep.subr.bf16.mxu0 %v11174_v19  ;;  %v11213_v19 = vld [vmem:[%s13842_s20 + $0x46c] ss:$16 sps:$4 sm:$0xff]  }
 0x41f   : > { %8629 = vmatprep.subr.bf16.mxu1 %v11171_v17  ;;  %v11208_v17 = vld [vmem:[%s13842_s20 + $0x488] ss:$16 sps:$4 sm:$0xff]  }
 0x421   : > { %8663 = vmatpush2.bf16.msra.mxu0 %v11172_v24  ;;  %v11211_v24 = vld [vmem:[%s13842_s20 + $0x468] ss:$16 sps:$4 sm:$0xff]  }
 0x422   : > { %8630 = vmatpush2.bf16.msra.mxu1 %v11169_v21  ;;  %8664 = vmatprep.subr.bf16.mxu0 %v11180_v28  ;;  %v11216_v21 = vld [vmem:[%s13842_s20 + $0x6ec] ss:$16 sps:$4 sm:$0xff]  }
 0x423   : > { %8631 = vmatprep.subr.bf16.mxu1 %v11177_v26  ;;  %v11214_v26 = vld [vmem:[%s13842_s20 + $0x6e8] ss:$16 sps:$4 sm:$0xff]   ;;  %v11219_v28 = vld [vmem:[%s13842_s20 + $0x44c] ss:$16 sps:$4 sm:$0xff]  }
 0x425   : > { %8665 = vmatpush2.bf16.msra.mxu0 %v11178_v34  ;;  %v11217_v34 = vld [vmem:[%s13842_s20 + $0x448] ss:$16 sps:$4 sm:$0xff]  }
 0x426   : > { %8632 = vmatpush2.bf16.msra.mxu1 %v11175_v30  ;;  %8666 = vmatprep.subr.bf16.mxu0 %v11186_v36  ;;  %v11222_v30 = vld [vmem:[%s13842_s20 + $0x6cc] ss:$16 sps:$4 sm:$0xff]  }
 0x427   : > { %8633 = vmatprep.subr.bf16.mxu1 %v11183_v35  ;;  %v11220_v35 = vld [vmem:[%s13842_s20 + $0x6c8] ss:$16 sps:$4 sm:$0xff]   ;;  %v11225_v36 = vld [vmem:[%s13842_s20 + $0x42c] ss:$16 sps:$4 sm:$0xff]  }
 0x429   : > { %8667 = vmatpush2.bf16.msra.mxu0 %v11184_v41  ;;  %v11223_v41 = vld [vmem:[%s13842_s20 + $0x428] ss:$16 sps:$4 sm:$0xff]  }
 0x42a   : > { %8634 = vmatpush2.bf16.msra.mxu1 %v11181_v7  ;;  %8668 = vmatprep.subr.bf16.mxu0 %v11189_v42  ;;  %v11228_v7 = vld [vmem:[%s13842_s20 + $0x6ac] ss:$16 sps:$4 sm:$0xff]  }
 0x42b   : > { %8685 = vmatprep.subr.bf16.mxu1 %v11192_v32  ;;  %v11231_v42 = vld [vmem:[%s13842_s20 + $0x40c] ss:$16 sps:$4 sm:$0xff]  }
 0x42c   : > { %v8350_v55 = vpop.f32.mrf.mxu0  ;;  %v11234_v32 = vld [vmem:[%s13842_s20 + $0x68c] ss:$16 sps:$4 sm:$0xff]  }
 0x42d   : > { %v8391_v57 = vpop.f32.mrf.mxu1  ;;  %8636 = vmatmul.mubr.bf16.vlgmr.msra.gmra.mxu1 %v13976_v46  ;;  %v8351_v44 = vadd.f32 %v8350_v55, %v14467_v60  ;;  %8669 = vmatpush2.bf16.msra.mxu0 %v11187_v33  ;;  %v11229_v33 = vld [vmem:[%s13842_s20 + $0x408] ss:$16 sps:$4 sm:$0xff]  }
 0x42e   : > { %8686 = vmatpush1.bf16.msra.mxu1 %v11190_v37  ;;  %v8352_v61 = vpop.f32.mrf.mxu0  ;;  %8670 = vmatprep.subr.bf16.mxu0 %v11195_v50  ;;  %v11232_v37 = vld [vmem:[%s13842_s20 + $0x688] ss:$16 sps:$4 sm:$0xff]   ;;  %v11240_v50 = vld [vmem:[%s13842_s20 + $0x66c] ss:$16 sps:$4 sm:$0xff]  }
 0x42f   : > { %v8393_v62 = vpop.f32.mrf.mxu1  ;;  %8687 = vmatprep.subr.bf16.mxu1 %v11198_v52  ;;  %v14549_v4 = vadd.f32 %v8391_v57, %v8351_v44  ;;  %v8353_v46 = vadd.f32 %v8352_v61, %v14474_v3  ;;  %8717 = vmatprep.mubr.bf16.mxu1 %v13982_v48  ;;  %v11207_v3 = vld [vmem:[%s13842_s20 + $0x30c] ss:$16 sps:$4 sm:$0xff]   ;;  %v11235_v52 = vld [vmem:[%s13842_s20 + $0x5e8] ss:$16 sps:$4 sm:$0xff]  }
 0x430   : > { %v8354_v60 = vpop.f32.mrf.mxu0  ;;  %v11210_v48 = vld [vmem:[%s13842_s20 + $0x48c] ss:$16 sps:$4 sm:$0xff]   ;;  %v11238_v55 = vld [vmem:[%s13842_s20 + $0x668] ss:$16 sps:$4 sm:$0xff]  }
 0x431   : > { %v8395_v59 = vpop.f32.mrf.mxu1  ;;  %v14553_v38 = vadd.f32 %v8393_v62, %v8353_v46  ;;  %8671 = vmatpush2.bf16.msra.mxu0 %v11193_v14  ;;  %v11243_v57 = vld [vmem:[%s13842_s20 + $0x5cc] ss:$16 sps:$4 sm:$0xff]   ;;  %v11241_v14 = vld [vmem:[%s13842_s20 + $0x5c8] ss:$16 sps:$4 sm:$0xff]  }
 0x432   : > { %8688 = vmatpush1.bf16.msra.mxu1 %v11196_v54  ;;  %v8355_v29 = vpop.f32.mrf.mxu0  ;;  %8672 = vmatprep.subr.bf16.mxu0 %v11201_v9  ;;  %v11246_v44 = vld [vmem:[%s13842_s20 + $0x64c] ss:$16 sps:$4 sm:$0xff]   ;;  %v11244_v54 = vld [vmem:[%s13842_s20 + $0x648] ss:$16 sps:$4 sm:$0xff]  }
 0x433   : > { %v8396_v11 = vpop.f32.mrf.mxu1  ;;  %8689 = vmatprep.subr.bf16.mxu1 %v11204_v2  ;;  %v11249_v61 = vld [vmem:[%s13842_s20 + $0x5ac] ss:$16 sps:$4 sm:$0xff]   ;;  %v11247_v9 = vld [vmem:[%s13842_s20 + $0x5a8] ss:$16 sps:$4 sm:$0xff]  }
 0x434   : > { %v11252_v62 = vld [vmem:[%s13842_s20 + $0x62c] ss:$16 sps:$4 sm:$0xff]   ;;  %v11250_v2 = vld [vmem:[%s13842_s20 + $0x628] ss:$16 sps:$4 sm:$0xff]  }
 0x435   : > { %8673 = vmatpush2.bf16.msra.mxu0 %v11199_v8  ;;  %v11255_v46 = vld [vmem:[%s13842_s20 + $0x58c] ss:$16 sps:$4 sm:$0xff]   ;;  %v11253_v59 = vld [vmem:[%s13842_s20 + $0x588] ss:$16 sps:$4 sm:$0xff]  }
 0x436   : > { %8690 = vmatpush1.bf16.msra.mxu1 %v11202_v10  ;;  %8674 = vmatprep.subr.bf16.mxu0 %v11207_v3  ;;  %v11258_v60 = vld [vmem:[%s13842_s20 + $0x60c] ss:$16 sps:$4 sm:$0xff]   ;;  %v11256_v8 = vld [vmem:[%s13842_s20 + $0x608] ss:$16 sps:$4 sm:$0xff]  }
 0x437   : > { %8691 = vmatprep.subr.bf16.mxu1 %v11210_v48  ;;  %v11261_v10 = vld [vmem:[%s13842_s20 + $0x56c] ss:$16 sps:$4 sm:$0xff]   ;;  %v11259_v11 = vld [vmem:[%s13842_s20 + $0x568] ss:$16 sps:$4 sm:$0xff]  }
 0x438   : > { %v11264_v29 = vld [vmem:[%s13842_s20 + $0x7ec] ss:$16 sps:$4 sm:$0xff]   ;;  %v11262_v3 = vld [vmem:[%s13842_s20 + $0x7e8] ss:$16 sps:$4 sm:$0xff]  }
 0x439   : > { %8675 = vmatpush2.bf16.msra.mxu0 %v11205_v12  ;;  %v11267_v48 = vld [vmem:[%s13842_s20 + $0x54c] ss:$16 sps:$4 sm:$0xff]  }
 0x43a   : > { %8692 = vmatpush1.bf16.msra.mxu1 %v11208_v17  ;;  %8726 = vmatprep.subr.bf16.mxu0 %v11216_v21  ;;  %v11270_v12 = vld [vmem:[%s13842_s20 + $0x7cc] ss:$16 sps:$4 sm:$0xff]   ;;  %v11265_v17 = vld [vmem:[%s13842_s20 + $0x548] ss:$16 sps:$4 sm:$0xff]  }
 0x43b   : > { %8693 = vmatprep.subr.bf16.mxu1 %v11213_v19  ;;  %v11268_v19 = vld [vmem:[%s13842_s20 + $0x7c8] ss:$16 sps:$4 sm:$0xff]   ;;  %v11273_v21 = vld [vmem:[%s13842_s20 + $0x52c] ss:$16 sps:$4 sm:$0xff]  }
 0x43c   : > { %8677 = vmatmul.mubr.bf16.vlgmr.msra.gmra.mxu0 %v13986_v49  ;;  %v11226_v49 = vld [vmem:[%s13842_s20 + $0x6a8] ss:$16 sps:$4 sm:$0xff]  }
 0x43d   : > { %8727 = vmatpush1.bf16.msra.mxu0 %v11214_v26  ;;  %8758 = vmatprep.mubr.bf16.mxu0 %v13994_v53  ;;  %v11237_v53 = vld [vmem:[%s13842_s20 + $0x5ec] ss:$16 sps:$4 sm:$0xff]   ;;  %v11271_v26 = vld [vmem:[%s13842_s20 + $0x528] ss:$16 sps:$4 sm:$0xff]  }
 0x43e   : > { %8694 = vmatpush1.bf16.msra.mxu1 %v11211_v24  ;;  %8728 = vmatprep.subr.bf16.mxu0 %v11222_v30  ;;  %v11276_v24 = vld [vmem:[%s13842_s20 + $0x7ac] ss:$16 sps:$4 sm:$0xff]  }
 0x43f   : > { %8695 = vmatprep.subr.bf16.mxu1 %v11219_v28  ;;  %v11274_v28 = vld [vmem:[%s13842_s20 + $0x7a8] ss:$16 sps:$4 sm:$0xff]   ;;  %v11279_v30 = vld [vmem:[%s13842_s20 + $0x50c] ss:$16 sps:$4 sm:$0xff]  }
 0x441   : > { %8729 = vmatpush1.bf16.msra.mxu0 %v11220_v35  ;;  %v11277_v35 = vld [vmem:[%s13842_s20 + $0x508] ss:$16 sps:$4 sm:$0xff]  }
 0x442   : > { %8696 = vmatpush1.bf16.msra.mxu1 %v11217_v34  ;;  %8730 = vmatprep.subr.bf16.mxu0 %v11228_v7  ;;  %v11282_v34 = vld [vmem:[%s13842_s20 + $0x78c] ss:$16 sps:$4 sm:$0xff]  }
 0x443   : > { %8697 = vmatprep.subr.bf16.mxu1 %v11225_v36  ;;  %v11280_v36 = vld [vmem:[%s13842_s20 + $0x788] ss:$16 sps:$4 sm:$0xff]   ;;  %v11285_v7 = vld [vmem:[%s13842_s20 + $0x76c] ss:$16 sps:$4 sm:$0xff]  }
 0x445   : > { %8731 = vmatpush1.bf16.msra.mxu0 %v11226_v49  ;;  %v11283_v49 = vld [vmem:[%s13842_s20 + $0x768] ss:$16 sps:$4 sm:$0xff]  }
 0x446   : > { %8698 = vmatpush1.bf16.msra.mxu1 %v11223_v41  ;;  %8732 = vmatprep.subr.bf16.mxu0 %v11234_v32  ;;  %v11288_v41 = vld [vmem:[%s13842_s20 + $0x8ec] ss:$16 sps:$4 sm:$0xff]  }
 0x447   : > { %8699 = vmatprep.subr.bf16.mxu1 %v11231_v42  ;;  %v11286_v42 = vld [vmem:[%s13842_s20 + $0x8e8] ss:$16 sps:$4 sm:$0xff]   ;;  %v11291_v32 = vld [vmem:[%s13842_s20 + $0x74c] ss:$16 sps:$4 sm:$0xff]  }
 0x449   : > { %8733 = vmatpush1.bf16.msra.mxu0 %v11232_v37 }
 0x44a   : > { %8700 = vmatpush1.bf16.msra.mxu1 %v11229_v33  ;;  %8734 = vmatprep.subr.bf16.mxu0 %v11240_v50  ;;  %v11294_v33 = vld [vmem:[%s13842_s20 + $0x8cc] ss:$16 sps:$4 sm:$0xff]  }
 0x44b   : > { %8701 = vmatprep.subr.bf16.mxu1 %v11237_v53 }
 0x44d   : > { %8735 = vmatpush1.bf16.msra.mxu0 %v11238_v55  ;;  %v11292_v55 = vld [vmem:[%s13842_s20 + $0x8c8] ss:$16 sps:$4 sm:$0xff]  }
 0x44e   : > { %8702 = vmatpush2.bf16.msra.mxu1 %v11235_v52  ;;  %8736 = vmatprep.subr.bf16.mxu0 %v11246_v44  ;;  %v11289_v52 = vld [vmem:[%s13842_s20 + $0x748] ss:$16 sps:$4 sm:$0xff]  }
 0x44f   : > { %8703 = vmatprep.subr.bf16.mxu1 %v11243_v57 }
 0x451   : > { %8737 = vmatpush1.bf16.msra.mxu0 %v11244_v54  ;;  %v11300_v54 = vld [vmem:[%s13842_s20 + $0x8ac] ss:$16 sps:$4 sm:$0xff]  }
 0x452   : > { %8704 = vmatpush2.bf16.msra.mxu1 %v11241_v14  ;;  %8738 = vmatprep.subr.bf16.mxu0 %v11252_v62  ;;  %v11297_v14 = vld [vmem:[%s13842_s20 + $0x72c] ss:$16 sps:$4 sm:$0xff]  }
 0x453   : > { %8705 = vmatprep.subr.bf16.mxu1 %v11249_v61 }
 0x455   : > { %8739 = vmatpush1.bf16.msra.mxu0 %v11250_v2  ;;  %v11295_v2 = vld [vmem:[%s13842_s20 + $0x728] ss:$16 sps:$4 sm:$0xff]  }
 0x456   : > { %8706 = vmatpush2.bf16.msra.mxu1 %v11247_v9  ;;  %8740 = vmatprep.subr.bf16.mxu0 %v11258_v60 }
 0x457   : > { %8707 = vmatprep.subr.bf16.mxu1 %v11255_v46  ;;  %v11298_v46 = vld [vmem:[%s13842_s20 + $0x8a8] ss:$16 sps:$4 sm:$0xff]  }
 0x459   : > { %8741 = vmatpush1.bf16.msra.mxu0 %v11256_v8  ;;  %v11301_v8 = vld [vmem:[%s13842_s20 + $0x708] ss:$16 sps:$4 sm:$0xff]  }
 0x45a   : > { %8708 = vmatpush2.bf16.msra.mxu1 %v11253_v59  ;;  %8742 = vmatprep.subr.bf16.mxu0 %v11264_v29  ;;  %v11309_v29 = vld [vmem:[%s13842_s20 + $0x86c] ss:$16 sps:$4 sm:$0xff]  }
 0x45b   : > { %8709 = vmatprep.subr.bf16.mxu1 %v11261_v10  ;;  %v11304_v10 = vld [vmem:[%s13842_s20 + $0x888] ss:$16 sps:$4 sm:$0xff]  }
 0x45d   : > { %8743 = vmatpush2.bf16.msra.mxu0 %v11262_v3  ;;  %v11307_v3 = vld [vmem:[%s13842_s20 + $0x868] ss:$16 sps:$4 sm:$0xff]  }
 0x45e   : > { %8710 = vmatpush2.bf16.msra.mxu1 %v11259_v11  ;;  %8744 = vmatprep.subr.bf16.mxu0 %v11270_v12  ;;  %v11312_v11 = vld [vmem:[%s13842_s20 + $0xaec] ss:$16 sps:$4 sm:$0xff]  }
 0x45f   : > { %8711 = vmatprep.subr.bf16.mxu1 %v11267_v48  ;;  %v11310_v48 = vld [vmem:[%s13842_s20 + $0xae8] ss:$16 sps:$4 sm:$0xff]   ;;  %v11315_v12 = vld [vmem:[%s13842_s20 + $0x84c] ss:$16 sps:$4 sm:$0xff]  }
 0x461   : > { %8745 = vmatpush2.bf16.msra.mxu0 %v11268_v19  ;;  %v11313_v19 = vld [vmem:[%s13842_s20 + $0x848] ss:$16 sps:$4 sm:$0xff]  }
 0x462   : > { %8712 = vmatpush2.bf16.msra.mxu1 %v11265_v17  ;;  %8746 = vmatprep.subr.bf16.mxu0 %v11276_v24  ;;  %v11318_v17 = vld [vmem:[%s13842_s20 + $0xacc] ss:$16 sps:$4 sm:$0xff]  }
 0x463   : > { %8713 = vmatprep.subr.bf16.mxu1 %v11273_v21  ;;  %v11316_v21 = vld [vmem:[%s13842_s20 + $0xac8] ss:$16 sps:$4 sm:$0xff]   ;;  %v11321_v24 = vld [vmem:[%s13842_s20 + $0x82c] ss:$16 sps:$4 sm:$0xff]  }
 0x465   : > { %8747 = vmatpush2.bf16.msra.mxu0 %v11274_v28  ;;  %v11319_v28 = vld [vmem:[%s13842_s20 + $0x828] ss:$16 sps:$4 sm:$0xff]  }
 0x466   : > { %8714 = vmatpush2.bf16.msra.mxu1 %v11271_v26  ;;  %8748 = vmatprep.subr.bf16.mxu0 %v11282_v34  ;;  %v11324_v26 = vld [vmem:[%s13842_s20 + $0xaac] ss:$16 sps:$4 sm:$0xff]  }
 0x467   : > { %8715 = vmatprep.subr.bf16.mxu1 %v11279_v30  ;;  %v11327_v30 = vld [vmem:[%s13842_s20 + $0x80c] ss:$16 sps:$4 sm:$0xff]  }
 0x468   : > { %v11330_v34 = vld [vmem:[%s13842_s20 + $0xa8c] ss:$16 sps:$4 sm:$0xff]  }
 0x469   : > { %8749 = vmatpush2.bf16.msra.mxu0 %v11280_v36  ;;  %v11328_v36 = vld [vmem:[%s13842_s20 + $0xa88] ss:$16 sps:$4 sm:$0xff]  }
 0x46a   : > { %8716 = vmatpush2.bf16.msra.mxu1 %v11277_v35  ;;  %8750 = vmatprep.subr.bf16.mxu0 %v11285_v7  ;;  %v11325_v35 = vld [vmem:[%s13842_s20 + $0x808] ss:$16 sps:$4 sm:$0xff]   ;;  %v11336_v7 = vld [vmem:[%s13842_s20 + $0xa6c] ss:$16 sps:$4 sm:$0xff]  }
 0x46b   : > { %8767 = vmatprep.subr.bf16.mxu1 %v11288_v41  ;;  %v11331_v41 = vld [vmem:[%s13842_s20 + $0x9e8] ss:$16 sps:$4 sm:$0xff]  }
 0x46c   : > { %v8432_v37 = vpop.f32.mrf.mxu0 }
 0x46d   : > { %v8473_v53 = vpop.f32.mrf.mxu1  ;;  %8718 = vmatmul.mubr.bf16.vlgmr.msra.gmra.mxu1 %v14069_v58  ;;  %v8433_v50 = vadd.f32 %v8432_v37, %v14549_v4  ;;  %8751 = vmatpush2.bf16.msra.mxu0 %v11283_v49  ;;  %v11334_v49 = vld [vmem:[%s13842_s20 + $0xa68] ss:$16 sps:$4 sm:$0xff]  }
 0x46e   : > { %8768 = vmatpush1.bf16.msra.mxu1 %v11286_v42  ;;  %v8434_v57 = vpop.f32.mrf.mxu0  ;;  %8752 = vmatprep.subr.bf16.mxu0 %v11291_v32  ;;  %v11339_v42 = vld [vmem:[%s13842_s20 + $0x9cc] ss:$16 sps:$4 sm:$0xff]   ;;  %v11340_v37 = vld [vmem:[%s13842_s20 + $0xa48] ss:$16 sps:$4 sm:$0xff]  }
 0x46f   : > { %v8475_v44 = vpop.f32.mrf.mxu1  ;;  %8769 = vmatprep.subr.bf16.mxu1 %v11294_v33  ;;  %v14623_v61 = vadd.f32 %v8473_v53, %v8433_v50  ;;  %v8435_v58 = vadd.f32 %v8434_v57, %v14553_v38  ;;  %8799 = vmatprep.mubr.bf16.mxu1 %v14076_v63  ;;  %v11303_v38 = vld [vmem:[%s13842_s20 + $0x70c] ss:$16 sps:$4 sm:$0xff]   ;;  %v11337_v33 = vld [vmem:[%s13842_s20 + $0x9c8] ss:$16 sps:$4 sm:$0xff]  }
 0x470   : > { %v8436_v4 = vpop.f32.mrf.mxu0  ;;  %v11306_v63 = vld [vmem:[%s13842_s20 + $0x88c] ss:$16 sps:$4 sm:$0xff]  }
 0x471   : > { %v8477_v62 = vpop.f32.mrf.mxu1  ;;  %v14627_v9 = vadd.f32 %v8475_v44, %v8435_v58  ;;  %8753 = vmatpush2.bf16.msra.mxu0 %v11289_v52  ;;  %v11342_v32 = vld [vmem:[%s13842_s20 + $0xa4c] ss:$16 sps:$4 sm:$0xff]   ;;  %v11343_v52 = vld [vmem:[%s13842_s20 + $0x9a8] ss:$16 sps:$4 sm:$0xff]  }
 0x472   : > { %8770 = vmatpush1.bf16.msra.mxu1 %v11292_v55  ;;  %v8437_v60 = vpop.f32.mrf.mxu0  ;;  %8754 = vmatprep.subr.bf16.mxu0 %v11297_v14  ;;  %v11345_v53 = vld [vmem:[%s13842_s20 + $0x9ac] ss:$16 sps:$4 sm:$0xff]   ;;  %v11346_v55 = vld [vmem:[%s13842_s20 + $0xa28] ss:$16 sps:$4 sm:$0xff]  }
 0x473   : > { %v8478_v59 = vpop.f32.mrf.mxu1  ;;  %8771 = vmatprep.subr.bf16.mxu1 %v11300_v54  ;;  %v11348_v50 = vld [vmem:[%s13842_s20 + $0xa2c] ss:$16 sps:$4 sm:$0xff]   ;;  %v11349_v14 = vld [vmem:[%s13842_s20 + $0x988] ss:$16 sps:$4 sm:$0xff]  }
 0x474   : > { %v11351_v57 = vld [vmem:[%s13842_s20 + $0x98c] ss:$16 sps:$4 sm:$0xff]   ;;  %v11352_v54 = vld [vmem:[%s13842_s20 + $0xa08] ss:$16 sps:$4 sm:$0xff]  }
 0x475   : > { %8755 = vmatpush2.bf16.msra.mxu0 %v11295_v2  ;;  %v11354_v44 = vld [vmem:[%s13842_s20 + $0xa0c] ss:$16 sps:$4 sm:$0xff]   ;;  %v11355_v62 = vld [vmem:[%s13842_s20 + $0x968] ss:$16 sps:$4 sm:$0xff]  }
 0x476   : > { %8772 = vmatpush1.bf16.msra.mxu1 %v11298_v46  ;;  %8756 = vmatprep.subr.bf16.mxu0 %v11303_v38  ;;  %v11357_v58 = vld [vmem:[%s13842_s20 + $0x96c] ss:$16 sps:$4 sm:$0xff]   ;;  %v11358_v2 = vld [vmem:[%s13842_s20 + $0xbe8] ss:$16 sps:$4 sm:$0xff]  }
 0x477   : > { %8773 = vmatprep.subr.bf16.mxu1 %v11306_v63  ;;  %v11360_v4 = vld [vmem:[%s13842_s20 + $0xbec] ss:$16 sps:$4 sm:$0xff]   ;;  %v11361_v59 = vld [vmem:[%s13842_s20 + $0x948] ss:$16 sps:$4 sm:$0xff]  }
 0x478   : > { %v11363_v46 = vld [vmem:[%s13842_s20 + $0x94c] ss:$16 sps:$4 sm:$0xff]   ;;  %v11364_v38 = vld [vmem:[%s13842_s20 + $0xbc8] ss:$16 sps:$4 sm:$0xff]  }
 0x479   : > { %8757 = vmatpush2.bf16.msra.mxu0 %v11301_v8  ;;  %v11366_v60 = vld [vmem:[%s13842_s20 + $0xbcc] ss:$16 sps:$4 sm:$0xff]  }
 0x47a   : > { %8774 = vmatpush1.bf16.msra.mxu1 %v11304_v10  ;;  %8808 = vmatprep.subr.bf16.mxu0 %v11312_v11  ;;  %v11369_v63 = vld [vmem:[%s13842_s20 + $0x92c] ss:$16 sps:$4 sm:$0xff]   ;;  %v11367_v10 = vld [vmem:[%s13842_s20 + $0x928] ss:$16 sps:$4 sm:$0xff]  }
 0x47b   : > { %8775 = vmatprep.subr.bf16.mxu1 %v11309_v29  ;;  %v11372_v8 = vld [vmem:[%s13842_s20 + $0xbac] ss:$16 sps:$4 sm:$0xff]   ;;  %v11370_v29 = vld [vmem:[%s13842_s20 + $0xba8] ss:$16 sps:$4 sm:$0xff]  }
 0x47c   : > { %8759 = vmatmul.mubr.bf16.vlgmr.msra.gmra.mxu0 %v14080_v0  ;;  %v11322_v0 = vld [vmem:[%s13842_s20 + $0xaa8] ss:$16 sps:$4 sm:$0xff]   ;;  %v11375_v11 = vld [vmem:[%s13842_s20 + $0x90c] ss:$16 sps:$4 sm:$0xff]  }
 0x47d   : > { %8809 = vmatpush1.bf16.msra.mxu0 %v11310_v48  ;;  %8840 = vmatprep.mubr.bf16.mxu0 %v14089_v5  ;;  %v11333_v5 = vld [vmem:[%s13842_s20 + $0x9ec] ss:$16 sps:$4 sm:$0xff]   ;;  %v11373_v48 = vld [vmem:[%s13842_s20 + $0x908] ss:$16 sps:$4 sm:$0xff]  }
 0x47e   : > { %8776 = vmatpush1.bf16.msra.mxu1 %v11307_v3  ;;  %8810 = vmatprep.subr.bf16.mxu0 %v11318_v17  ;;  %v11378_v3 = vld [vmem:[%s13842_s20 + $0xb8c] ss:$16 sps:$4 sm:$0xff]  }
 0x47f   : > { %8777 = vmatprep.subr.bf16.mxu1 %v11315_v12  ;;  %v11376_v12 = vld [vmem:[%s13842_s20 + $0xb88] ss:$16 sps:$4 sm:$0xff]   ;;  %v11381_v17 = vld [vmem:[%s13842_s20 + $0xb6c] ss:$16 sps:$4 sm:$0xff]  }
 0x481   : > { %8811 = vmatpush1.bf16.msra.mxu0 %v11316_v21  ;;  %v11379_v21 = vld [vmem:[%s13842_s20 + $0xb68] ss:$16 sps:$4 sm:$0xff]  }
 0x482   : > { %8778 = vmatpush1.bf16.msra.mxu1 %v11313_v19  ;;  %8812 = vmatprep.subr.bf16.mxu0 %v11324_v26  ;;  %v11384_v19 = vld [vmem:[%s13842_s20 + $0xcec] ss:$16 sps:$4 sm:$0xff]  }
 0x483   : > { %8779 = vmatprep.subr.bf16.mxu1 %v11321_v24  ;;  %v11382_v24 = vld [vmem:[%s13842_s20 + $0xce8] ss:$16 sps:$4 sm:$0xff]   ;;  %v11387_v26 = vld [vmem:[%s13842_s20 + $0xb4c] ss:$16 sps:$4 sm:$0xff]  }
 0x485   : > { %8813 = vmatpush1.bf16.msra.mxu0 %v11322_v0 }
 0x486   : > { %8780 = vmatpush1.bf16.msra.mxu1 %v11319_v28  ;;  %8814 = vmatprep.subr.bf16.mxu0 %v11330_v34  ;;  %v11390_v28 = vld [vmem:[%s13842_s20 + $0xccc] ss:$16 sps:$4 sm:$0xff]  }
 0x487   : > { %8781 = vmatprep.subr.bf16.mxu1 %v11327_v30 }
 0x489   : > { %8815 = vmatpush1.bf16.msra.mxu0 %v11328_v36  ;;  %v11388_v36 = vld [vmem:[%s13842_s20 + $0xcc8] ss:$16 sps:$4 sm:$0xff]  }
 0x48a   : > { %8782 = vmatpush1.bf16.msra.mxu1 %v11325_v35  ;;  %8816 = vmatprep.subr.bf16.mxu0 %v11336_v7  ;;  %v11385_v35 = vld [vmem:[%s13842_s20 + $0xb48] ss:$16 sps:$4 sm:$0xff]  }
 0x48b   : > { %8783 = vmatprep.subr.bf16.mxu1 %v11333_v5 }
 0x48d   : > { %8817 = vmatpush1.bf16.msra.mxu0 %v11334_v49  ;;  %v11396_v49 = vld [vmem:[%s13842_s20 + $0xcac] ss:$16 sps:$4 sm:$0xff]  }
 0x48e   : > { %8784 = vmatpush2.bf16.msra.mxu1 %v11331_v41  ;;  %8818 = vmatprep.subr.bf16.mxu0 %v11342_v32  ;;  %v11393_v41 = vld [vmem:[%s13842_s20 + $0xb2c] ss:$16 sps:$4 sm:$0xff]  }
 0x48f   : > { %8785 = vmatprep.subr.bf16.mxu1 %v11339_v42 }
 0x491   : > { %8819 = vmatpush1.bf16.msra.mxu0 %v11340_v37  ;;  %v11391_v37 = vld [vmem:[%s13842_s20 + $0xb28] ss:$16 sps:$4 sm:$0xff]  }
 0x492   : > { %8786 = vmatpush2.bf16.msra.mxu1 %v11337_v33  ;;  %8820 = vmatprep.subr.bf16.mxu0 %v11348_v50 }
 0x493   : > { %8787 = vmatprep.subr.bf16.mxu1 %v11345_v53  ;;  %v11394_v53 = vld [vmem:[%s13842_s20 + $0xca8] ss:$16 sps:$4 sm:$0xff]  }
 0x495   : > { %8821 = vmatpush1.bf16.msra.mxu0 %v11346_v55  ;;  %v11397_v55 = vld [vmem:[%s13842_s20 + $0xb08] ss:$16 sps:$4 sm:$0xff]  }
 0x496   : > { %8788 = vmatpush2.bf16.msra.mxu1 %v11343_v52  ;;  %8822 = vmatprep.subr.bf16.mxu0 %v11354_v44  ;;  %v11405_v44 = vld [vmem:[%s13842_s20 + $0xc6c] ss:$16 sps:$4 sm:$0xff]  }
 0x497   : > { %8789 = vmatprep.subr.bf16.mxu1 %v11351_v57  ;;  %v11400_v57 = vld [vmem:[%s13842_s20 + $0xc88] ss:$16 sps:$4 sm:$0xff]  }
 0x499   : > { %8823 = vmatpush1.bf16.msra.mxu0 %v11352_v54  ;;  %v11403_v54 = vld [vmem:[%s13842_s20 + $0xc68] ss:$16 sps:$4 sm:$0xff]  }
 0x49a   : > { %8790 = vmatpush2.bf16.msra.mxu1 %v11349_v14  ;;  %8824 = vmatprep.subr.bf16.mxu0 %v11360_v4  ;;  %v11408_v14 = vld [vmem:[%s13842_s20 + $0xeec] ss:$16 sps:$4 sm:$0xff]  }
 0x49b   : > { %8791 = vmatprep.subr.bf16.mxu1 %v11357_v58  ;;  %v11406_v58 = vld [vmem:[%s13842_s20 + $0xee8] ss:$16 sps:$4 sm:$0xff]   ;;  %v11411_v4 = vld [vmem:[%s13842_s20 + $0xc4c] ss:$16 sps:$4 sm:$0xff]  }
 0x49d   : > { %8825 = vmatpush2.bf16.msra.mxu0 %v11358_v2 }
 0x49e   : > { %8792 = vmatpush2.bf16.msra.mxu1 %v11355_v62  ;;  %8826 = vmatprep.subr.bf16.mxu0 %v11366_v60  ;;  %v11414_v62 = vld [vmem:[%s13842_s20 + $0xecc] ss:$16 sps:$4 sm:$0xff]   ;;  %v11409_v60 = vld [vmem:[%s13842_s20 + $0xc48] ss:$16 sps:$4 sm:$0xff]  }
 0x49f   : > { %8793 = vmatprep.subr.bf16.mxu1 %v11363_v46 }
 0x4a1   : > { %8827 = vmatpush2.bf16.msra.mxu0 %v11364_v38 }
 0x4a2   : > { %8794 = vmatpush2.bf16.msra.mxu1 %v11361_v59  ;;  %8828 = vmatprep.subr.bf16.mxu0 %v11372_v8  ;;  %v11412_v59 = vld [vmem:[%s13842_s20 + $0xec8] ss:$16 sps:$4 sm:$0xff]   ;;  %v11420_v8 = vld [vmem:[%s13842_s20 + $0xeac] ss:$16 sps:$4 sm:$0xff]  }
 0x4a3   : > { %8795 = vmatprep.subr.bf16.mxu1 %v11369_v63  ;;  %v11417_v63 = vld [vmem:[%s13842_s20 + $0xc2c] ss:$16 sps:$4 sm:$0xff]  }
 0x4a5   : > { %8829 = vmatpush2.bf16.msra.mxu0 %v11370_v29  ;;  %v11415_v29 = vld [vmem:[%s13842_s20 + $0xc28] ss:$16 sps:$4 sm:$0xff]  }
 0x4a6   : > { %8796 = vmatpush2.bf16.msra.mxu1 %v11367_v10  ;;  %8830 = vmatprep.subr.bf16.mxu0 %v11378_v3 }
 0x4a7   : > { %8797 = vmatprep.subr.bf16.mxu1 %v11375_v11  ;;  %v11418_v11 = vld [vmem:[%s13842_s20 + $0xea8] ss:$16 sps:$4 sm:$0xff]  }
 0x4a9   : > { %8831 = vmatpush2.bf16.msra.mxu0 %v11376_v12  ;;  %v11426_v12 = vld [vmem:[%s13842_s20 + $0xe8c] ss:$16 sps:$4 sm:$0xff]  }
 0x4aa   : > { %8798 = vmatpush2.bf16.msra.mxu1 %v11373_v48  ;;  %8832 = vmatprep.subr.bf16.mxu0 %v11381_v17  ;;  %v11423_v48 = vld [vmem:[%s13842_s20 + $0xc0c] ss:$16 sps:$4 sm:$0xff]   ;;  %v11421_v17 = vld [vmem:[%s13842_s20 + $0xc08] ss:$16 sps:$4 sm:$0xff]  }
 0x4ab   : > { %8849 = vmatprep.subr.bf16.mxu1 %v11384_v19  ;;  %v11429_v19 = vld [vmem:[%s13842_s20 + $0xdec] ss:$16 sps:$4 sm:$0xff]  }
 0x4ac   : > { %v8514_v0 = vpop.f32.mrf.mxu0 }
 0x4ad   : > { %v8555_v30 = vpop.f32.mrf.mxu1  ;;  %8800 = vmatmul.mubr.bf16.vlgmr.msra.gmra.mxu1 %v14163_v27  ;;  %v8515_v34 = vadd.f32 %v8514_v0, %v14623_v61  ;;  %8833 = vmatpush2.bf16.msra.mxu0 %v11379_v21  ;;  %v11432_v21 = vld [vmem:[%s13842_s20 + $0xe6c] ss:$16 sps:$4 sm:$0xff]  }
 0x4ae   : > { %8850 = vmatpush1.bf16.msra.mxu1 %v11382_v24  ;;  %v8516_v5 = vpop.f32.mrf.mxu0  ;;  %8834 = vmatprep.subr.bf16.mxu0 %v11387_v26  ;;  %v11427_v24 = vld [vmem:[%s13842_s20 + $0xde8] ss:$16 sps:$4 sm:$0xff]   ;;  %v11438_v0 = vld [vmem:[%s13842_s20 + $0xe4c] ss:$16 sps:$4 sm:$0xff]  }
 0x4af   : > { %v8557_v7 = vpop.f32.mrf.mxu1  ;;  %8851 = vmatprep.subr.bf16.mxu1 %v11390_v28  ;;  %v8556_v42 = vadd.f32 %v8555_v30, %v8515_v34  ;;  %v8517_v32 = vadd.f32 %v8516_v5, %v14627_v9  ;;  %8881 = vmatprep.mubr.bf16.mxu1 %v14172_v39  ;;  %v11399_v9 = vld [vmem:[%s13842_s20 + $0xb0c] ss:$16 sps:$4 sm:$0xff]   ;;  %v11430_v26 = vld [vmem:[%s13842_s20 + $0xe68] ss:$16 sps:$4 sm:$0xff]  }
 0x4b0   : > { %v8518_v27 = vpop.f32.mrf.mxu0  ;;  %v11402_v39 = vld [vmem:[%s13842_s20 + $0xc8c] ss:$16 sps:$4 sm:$0xff]   ;;  %v11433_v30 = vld [vmem:[%s13842_s20 + $0xdc8] ss:$16 sps:$4 sm:$0xff]  }
 0x4b1   : > { %v8559_v61 = vpop.f32.mrf.mxu1  ;;  %v8558_v33 = vadd.f32 %v8557_v7, %v8517_v32  ;;  %8835 = vmatpush2.bf16.msra.mxu0 %v11385_v35  ;;  %v11435_v28 = vld [vmem:[%s13842_s20 + $0xdcc] ss:$16 sps:$4 sm:$0xff]   ;;  %v11436_v34 = vld [vmem:[%s13842_s20 + $0xe48] ss:$16 sps:$4 sm:$0xff]  }
 0x4b2   : > { %8852 = vmatpush1.bf16.msra.mxu1 %v11388_v36  ;;  %v8519_v50 = vpop.f32.mrf.mxu0  ;;  %8836 = vmatprep.subr.bf16.mxu0 %v11393_v41  ;;  %v11441_v35 = vld [vmem:[%s13842_s20 + $0xdac] ss:$16 sps:$4 sm:$0xff]   ;;  %v11439_v5 = vld [vmem:[%s13842_s20 + $0xda8] ss:$16 sps:$4 sm:$0xff]  }
 0x4b3   : > { %v8560_v52 = vpop.f32.mrf.mxu1  ;;  %8853 = vmatprep.subr.bf16.mxu1 %v11396_v49  ;;  %v11444_v36 = vld [vmem:[%s13842_s20 + $0xe2c] ss:$16 sps:$4 sm:$0xff]   ;;  %v11442_v7 = vld [vmem:[%s13842_s20 + $0xe28] ss:$16 sps:$4 sm:$0xff]  }
 0x4b4   : > { %v11447_v41 = vld [vmem:[%s13842_s20 + $0xd8c] ss:$16 sps:$4 sm:$0xff]   ;;  %v11448_v32 = vld [vmem:[%s13842_s20 + $0xe08] ss:$16 sps:$4 sm:$0xff]  }
 0x4b5   : > { %8837 = vmatpush2.bf16.msra.mxu0 %v11391_v37  ;;  %v11450_v49 = vld [vmem:[%s13842_s20 + $0xe0c] ss:$16 sps:$4 sm:$0xff]   ;;  %v11454_v37 = vld [vmem:[%s13842_s20 + $0xfe8] ss:$16 sps:$4 sm:$0xff]  }
 0x4b6   : > { %8854 = vmatpush1.bf16.msra.mxu1 %v11394_v53  ;;  %8838 = vmatprep.subr.bf16.mxu0 %v11399_v9  ;;  %v11453_v27 = vld [vmem:[%s13842_s20 + $0xd6c] ss:$16 sps:$4 sm:$0xff]   ;;  %v11457_v52 = vld [vmem:[%s13842_s20 + $0xd48] ss:$16 sps:$4 sm:$0xff]  }
 0x4b7   : > { %8855 = vmatprep.subr.bf16.mxu1 %v11402_v39  ;;  %v11456_v61 = vld [vmem:[%s13842_s20 + $0xfec] ss:$16 sps:$4 sm:$0xff]   ;;  %v11460_v9 = vld [vmem:[%s13842_s20 + $0xfc8] ss:$16 sps:$4 sm:$0xff]  }
 0x4b8   : > { %v11459_v53 = vld [vmem:[%s13842_s20 + $0xd4c] ss:$16 sps:$4 sm:$0xff]  }
 0x4b9   : > { %8839 = vmatpush2.bf16.msra.mxu0 %v11397_v55  ;;  %v11462_v50 = vld [vmem:[%s13842_s20 + $0xfcc] ss:$16 sps:$4 sm:$0xff]  }
 0x4ba   : > { %8856 = vmatpush1.bf16.msra.mxu1 %v11400_v57  ;;  %8890 = vmatprep.subr.bf16.mxu0 %v11408_v14  ;;  %v11465_v39 = vld [vmem:[%s13842_s20 + $0xd2c] ss:$16 sps:$4 sm:$0xff]   ;;  %v11463_v57 = vld [vmem:[%s13842_s20 + $0xd28] ss:$16 sps:$4 sm:$0xff]  }
 0x4bb   : > { %8857 = vmatprep.subr.bf16.mxu1 %v11405_v44  ;;  %v11468_v55 = vld [vmem:[%s13842_s20 + $0xfac] ss:$16 sps:$4 sm:$0xff]   ;;  %v11466_v44 = vld [vmem:[%s13842_s20 + $0xfa8] ss:$16 sps:$4 sm:$0xff]  }
 0x4bc   : > { %v8596_v2 = vpop.f32.mrf.mxu0  ;;  %8841 = vmatmul.mubr.bf16.vlgmr.msra.gmra.mxu0 %v14176_v51  ;;  %v11471_v14 = vld [vmem:[%s13842_s20 + $0xd0c] ss:$16 sps:$4 sm:$0xff]  }
 0x4bd   : > { %v14712_v46 = vadd.f32 %v8596_v2, %v8556_v42  ;;  %8891 = vmatpush1.bf16.msra.mxu0 %v11406_v58  ;;  %8922 = vmatprep.mubr.bf16.mxu0 %v14184_v45  ;;  %v11424_v45 = vld [vmem:[%s13842_s20 + $0xe88] ss:$16 sps:$4 sm:$0xff]   ;;  %v11480_v2 = vld [vmem:[%s13842_s20 + $0x10ec] ss:$16 sps:$4 sm:$0xff]  }
 0x4be   : > { %8858 = vmatpush1.bf16.msra.mxu1 %v11403_v54  ;;  %v8598_v38 = vpop.f32.mrf.mxu0  ;;  %8892 = vmatprep.subr.bf16.mxu0 %v11414_v62  ;;  %v11445_v42 = vld [vmem:[%s13842_s20 + $0xd88] ss:$16 sps:$4 sm:$0xff]   ;;  %v11474_v54 = vld [vmem:[%s13842_s20 + $0xf8c] ss:$16 sps:$4 sm:$0xff]  }
 0x4bf   : > { %8859 = vmatprep.subr.bf16.mxu1 %v11411_v4  ;;  %v14718_v10 = vadd.f32 %v8598_v38, %v8558_v33  ;;  %v11451_v33 = vld [vmem:[%s13842_s20 + $0xd68] ss:$16 sps:$4 sm:$0xff]   ;;  %v11477_v62 = vld [vmem:[%s13842_s20 + $0xf6c] ss:$16 sps:$4 sm:$0xff]  }
 0x4c0   : > { %v8600_v51 = vpop.f32.mrf.mxu0  ;;  %v11469_v58 = vld [vmem:[%s13842_s20 + $0xd08] ss:$16 sps:$4 sm:$0xff]   ;;  %v11483_v38 = vld [vmem:[%s13842_s20 + $0xf4c] ss:$16 sps:$4 sm:$0xff]  }
 0x4c1   : > { %8893 = vmatpush1.bf16.msra.mxu0 %v11412_v59  ;;  %v11472_v4 = vld [vmem:[%s13842_s20 + $0xf88] ss:$16 sps:$4 sm:$0xff]  }
 0x4c2   : > { %8860 = vmatpush1.bf16.msra.mxu1 %v11409_v60  ;;  %v8601_v3 = vpop.f32.mrf.mxu0  ;;  %8894 = vmatprep.subr.bf16.mxu0 %v11420_v8  ;;  %v11475_v60 = vld [vmem:[%s13842_s20 + $0xf68] ss:$16 sps:$4 sm:$0xff]  }
 0x4c3   : > { %8861 = vmatprep.subr.bf16.mxu1 %v11417_v63  ;;  %v11478_v59 = vld [vmem:[%s13842_s20 + $0x10e8] ss:$16 sps:$4 sm:$0xff]   ;;  %v11486_v63 = vld [vmem:[%s13842_s20 + $0x10cc] ss:$16 sps:$4 sm:$0xff]  }
 0x4c5   : > { %8895 = vmatpush1.bf16.msra.mxu0 %v11418_v11  ;;  %v11484_v11 = vld [vmem:[%s13842_s20 + $0x10c8] ss:$16 sps:$4 sm:$0xff]  }
 0x4c6   : > { %8862 = vmatpush1.bf16.msra.mxu1 %v11415_v29  ;;  %8896 = vmatprep.subr.bf16.mxu0 %v11426_v12  ;;  %v11481_v29 = vld [vmem:[%s13842_s20 + $0xf48] ss:$16 sps:$4 sm:$0xff]   ;;  %v11492_v12 = vld [vmem:[%s13842_s20 + $0x10ac] ss:$16 sps:$4 sm:$0xff]  }
 0x4c7   : > { %8863 = vmatprep.subr.bf16.mxu1 %v11423_v48  ;;  %v11489_v48 = vld [vmem:[%s13842_s20 + $0xf2c] ss:$16 sps:$4 sm:$0xff]  }
 0x4c9   : > { %8897 = vmatpush1.bf16.msra.mxu0 %v11424_v45  ;;  %v11490_v45 = vld [vmem:[%s13842_s20 + $0x10a8] ss:$16 sps:$4 sm:$0xff]  }
 0x4ca   : > { %8864 = vmatpush1.bf16.msra.mxu1 %v11421_v17  ;;  %8898 = vmatprep.subr.bf16.mxu0 %v11432_v21  ;;  %v11495_v21 = vld [vmem:[%s13842_s20 + $0xf0c] ss:$16 sps:$4 sm:$0xff]  }
 0x4cb   : > { %8865 = vmatprep.subr.bf16.mxu1 %v11429_v19 }
 0x4cd   : > { %8899 = vmatpush1.bf16.msra.mxu0 %v11430_v26  ;;  %v11501_v26 = vld [vmem:[%s13842_s20 + $0x106c] ss:$16 sps:$4 sm:$0xff]  }
 0x4ce   : > { %8866 = vmatpush2.bf16.msra.mxu1 %v11427_v24  ;;  %8900 = vmatprep.subr.bf16.mxu0 %v11438_v0  ;;  %v11498_v24 = vld [vmem:[%s13842_s20 + $0x108c] ss:$16 sps:$4 sm:$0xff]   ;;  %v11499_v0 = vld [vmem:[%s13842_s20 + $0x1068] ss:$16 sps:$4 sm:$0xff]  }
 0x4cf   : > { %8867 = vmatprep.subr.bf16.mxu1 %v11435_v28  ;;  %v11504_v28 = vld [vmem:[%s13842_s20 + $0x12ec] ss:$16 sps:$4 sm:$0xff]  }
 0x4d1   : > { %8901 = vmatpush1.bf16.msra.mxu0 %v11436_v34  ;;  %v11507_v34 = vld [vmem:[%s13842_s20 + $0x104c] ss:$16 sps:$4 sm:$0xff]  }
 0x4d2   : > { %8868 = vmatpush2.bf16.msra.mxu1 %v11433_v30  ;;  %8902 = vmatprep.subr.bf16.mxu0 %v11444_v36  ;;  %v11502_v30 = vld [vmem:[%s13842_s20 + $0x12e8] ss:$16 sps:$4 sm:$0xff]  }
 0x4d3   : > { %8869 = vmatprep.subr.bf16.mxu1 %v11441_v35  ;;  %v11510_v35 = vld [vmem:[%s13842_s20 + $0x12cc] ss:$16 sps:$4 sm:$0xff]  }
 0x4d5   : > { %8903 = vmatpush1.bf16.msra.mxu0 %v11442_v7  ;;  %v11505_v7 = vld [vmem:[%s13842_s20 + $0x1048] ss:$16 sps:$4 sm:$0xff]  }
 0x4d6   : > { %8870 = vmatpush2.bf16.msra.mxu1 %v11439_v5  ;;  %8904 = vmatprep.subr.bf16.mxu0 %v11450_v49 }
 0x4d7   : > { %8871 = vmatprep.subr.bf16.mxu1 %v11447_v41  ;;  %v11508_v41 = vld [vmem:[%s13842_s20 + $0x12c8] ss:$16 sps:$4 sm:$0xff]  }
 0x4d9   : > { %8905 = vmatpush1.bf16.msra.mxu0 %v11448_v32  ;;  %v11516_v32 = vld [vmem:[%s13842_s20 + $0x12ac] ss:$16 sps:$4 sm:$0xff]  }
 0x4da   : > { %8872 = vmatpush2.bf16.msra.mxu1 %v11445_v42  ;;  %8906 = vmatprep.subr.bf16.mxu0 %v11456_v61  ;;  %v11513_v42 = vld [vmem:[%s13842_s20 + $0x102c] ss:$16 sps:$4 sm:$0xff]   ;;  %v11511_v61 = vld [vmem:[%s13842_s20 + $0x1028] ss:$16 sps:$4 sm:$0xff]  }
 0x4db   : > { %8873 = vmatprep.subr.bf16.mxu1 %v11453_v27 }
 0x4dd   : > { %8907 = vmatpush2.bf16.msra.mxu0 %v11454_v37 }
 0x4de   : > { %8874 = vmatpush2.bf16.msra.mxu1 %v11451_v33  ;;  %8908 = vmatprep.subr.bf16.mxu0 %v11462_v50  ;;  %v11514_v33 = vld [vmem:[%s13842_s20 + $0x12a8] ss:$16 sps:$4 sm:$0xff]   ;;  %v11522_v50 = vld [vmem:[%s13842_s20 + $0x128c] ss:$16 sps:$4 sm:$0xff]  }
 0x4df   : > { %8875 = vmatprep.subr.bf16.mxu1 %v11459_v53  ;;  %v11519_v53 = vld [vmem:[%s13842_s20 + $0x100c] ss:$16 sps:$4 sm:$0xff]  }
 0x4e1   : > { %8909 = vmatpush2.bf16.msra.mxu0 %v11460_v9  ;;  %v11525_v9 = vld [vmem:[%s13842_s20 + $0x11ec] ss:$16 sps:$4 sm:$0xff]  }
 0x4e2   : > { %8876 = vmatpush2.bf16.msra.mxu1 %v11457_v52  ;;  %8910 = vmatprep.subr.bf16.mxu0 %v11468_v55  ;;  %v11517_v52 = vld [vmem:[%s13842_s20 + $0x1008] ss:$16 sps:$4 sm:$0xff]  }
 0x4e3   : > { %8877 = vmatprep.subr.bf16.mxu1 %v11465_v39  ;;  %v11528_v39 = vld [vmem:[%s13842_s20 + $0x126c] ss:$16 sps:$4 sm:$0xff]   ;;  %v11523_v55 = vld [vmem:[%s13842_s20 + $0x11e8] ss:$16 sps:$4 sm:$0xff]  }
 0x4e5   : > { %8911 = vmatpush2.bf16.msra.mxu0 %v11466_v44  ;;  %v11531_v44 = vld [vmem:[%s13842_s20 + $0x11cc] ss:$16 sps:$4 sm:$0xff]  }
 0x4e6   : > { %8878 = vmatpush2.bf16.msra.mxu1 %v11463_v57  ;;  %8912 = vmatprep.subr.bf16.mxu0 %v11474_v54  ;;  %v11526_v57 = vld [vmem:[%s13842_s20 + $0x1268] ss:$16 sps:$4 sm:$0xff]  }
 0x4e7   : > { %8879 = vmatprep.subr.bf16.mxu1 %v11471_v14  ;;  %v11534_v14 = vld [vmem:[%s13842_s20 + $0x124c] ss:$16 sps:$4 sm:$0xff]   ;;  %v11529_v54 = vld [vmem:[%s13842_s20 + $0x11c8] ss:$16 sps:$4 sm:$0xff]  }
 0x4e9   : > { %8913 = vmatpush2.bf16.msra.mxu0 %v11472_v4  ;;  %v11537_v4 = vld [vmem:[%s13842_s20 + $0x11ac] ss:$16 sps:$4 sm:$0xff]  }
 0x4ea   : > { %8880 = vmatpush2.bf16.msra.mxu1 %v11469_v58  ;;  %8914 = vmatprep.subr.bf16.mxu0 %v11477_v62  ;;  %v11532_v58 = vld [vmem:[%s13842_s20 + $0x1248] ss:$16 sps:$4 sm:$0xff]   ;;  %v11540_v62 = vld [vmem:[%s13842_s20 + $0x122c] ss:$16 sps:$4 sm:$0xff]  }
 0x4eb   : > { %8931 = vmatprep.subr.bf16.mxu1 %v11480_v2  ;;  %v11535_v2 = vld [vmem:[%s13842_s20 + $0x11a8] ss:$16 sps:$4 sm:$0xff]  }
 0x4ed   : > { %v8637_v8 = vpop.f32.mrf.mxu1  ;;  %8882 = vmatmul.mubr.bf16.vlgmr.msra.gmra.mxu1 %v14261_v13  ;;  %8915 = vmatpush2.bf16.msra.mxu0 %v11475_v60  ;;  %v11538_v60 = vld [vmem:[%s13842_s20 + $0x1228] ss:$16 sps:$4 sm:$0xff]  }
 0x4ee   : > { %v8638_v51 = vadd.f32 %v8637_v8, %v14188_v43  ;;  %8932 = vmatpush1.bf16.msra.mxu1 %v11478_v59  ;;  %8916 = vmatprep.subr.bf16.mxu0 %v11483_v38  ;;  %v11487_v43 = vld [vmem:[%s13842_s20 + $0xf28] ss:$16 sps:$4 sm:$0xff]   ;;  %v11543_v59 = vld [vmem:[%s13842_s20 + $0x118c] ss:$16 sps:$4 sm:$0xff]  }
 0x4ef   : > { %v8639_v3 = vpop.f32.mrf.mxu1  ;;  %8933 = vmatprep.subr.bf16.mxu1 %v11486_v63  ;;  %8963 = vmatprep.mubr.bf16.mxu1 %v14270_v23  ;;  %v11496_v23 = vld [vmem:[%s13842_s20 + $0x1088] ss:$16 sps:$4 sm:$0xff]   ;;  %v11546_v38 = vld [vmem:[%s13842_s20 + $0x120c] ss:$16 sps:$4 sm:$0xff]  }
 0x4f0   : > { %v8640_v17 = vadd.f32 %v8639_v3, %v14192_v56  ;;  %v11493_v56 = vld [vmem:[%s13842_s20 + $0xf08] ss:$16 sps:$4 sm:$0xff]  }
 0x4f1   : > { %v8641_v13 = vpop.f32.mrf.mxu1  ;;  %8917 = vmatpush2.bf16.msra.mxu0 %v11481_v29  ;;  %v11541_v63 = vld [vmem:[%s13842_s20 + $0x1188] ss:$16 sps:$4 sm:$0xff]   ;;  %v11552_v29 = vld [vmem:[%s13842_s20 + $0x13ec] ss:$16 sps:$4 sm:$0xff]  }
 0x4f2   : > { %8934 = vmatpush1.bf16.msra.mxu1 %v11484_v11  ;;  %8918 = vmatprep.subr.bf16.mxu0 %v11489_v48  ;;  %v11544_v8 = vld [vmem:[%s13842_s20 + $0x1208] ss:$16 sps:$4 sm:$0xff]   ;;  %v11555_v48 = vld [vmem:[%s13842_s20 + $0x114c] ss:$16 sps:$4 sm:$0xff]  }
 0x4f3   : > { %v8642_v19 = vpop.f32.mrf.mxu1  ;;  %8935 = vmatprep.subr.bf16.mxu1 %v11492_v12  ;;  %v11547_v11 = vld [vmem:[%s13842_s20 + $0x1168] ss:$16 sps:$4 sm:$0xff]   ;;  %v11558_v12 = vld [vmem:[%s13842_s20 + $0x13cc] ss:$16 sps:$4 sm:$0xff]  }
 0x4f4   : > { %v11550_v3 = vld [vmem:[%s13842_s20 + $0x13e8] ss:$16 sps:$4 sm:$0xff]  }
 0x4f5   : > { %8919 = vmatpush2.bf16.msra.mxu0 %v11487_v43  ;;  %v11556_v13 = vld [vmem:[%s13842_s20 + $0x13c8] ss:$16 sps:$4 sm:$0xff]   ;;  %v11561_v43 = vld [vmem:[%s13842_s20 + $0x112c] ss:$16 sps:$4 sm:$0xff]  }
 0x4f6   : > { %8936 = vmatpush1.bf16.msra.mxu1 %v11490_v45  ;;  %8920 = vmatprep.subr.bf16.mxu0 %v11495_v21  ;;  %v11564_v45 = vld [vmem:[%s13842_s20 + $0x13ac] ss:$16 sps:$4 sm:$0xff]   ;;  %v11559_v19 = vld [vmem:[%s13842_s20 + $0x1128] ss:$16 sps:$4 sm:$0xff]  }
 0x4f7   : > { %8937 = vmatprep.subr.bf16.mxu1 %v11498_v24  ;;  %v11562_v21 = vld [vmem:[%s13842_s20 + $0x13a8] ss:$16 sps:$4 sm:$0xff]   ;;  %v11567_v24 = vld [vmem:[%s13842_s20 + $0x110c] ss:$16 sps:$4 sm:$0xff]  }
 0x4f9   : > { %8921 = vmatpush2.bf16.msra.mxu0 %v11493_v56  ;;  %v11570_v56 = vld [vmem:[%s13842_s20 + $0x138c] ss:$16 sps:$4 sm:$0xff]  }
 0x4fa   : > { %8938 = vmatpush1.bf16.msra.mxu1 %v11496_v23  ;;  %8972 = vmatprep.subr.bf16.mxu0 %v11504_v28  ;;  %v11565_v23 = vld [vmem:[%s13842_s20 + $0x1108] ss:$16 sps:$4 sm:$0xff]   ;;  %v11573_v28 = vld [vmem:[%s13842_s20 + $0x136c] ss:$16 sps:$4 sm:$0xff]  }
 0x4fb   : > { %8939 = vmatprep.subr.bf16.mxu1 %v11501_v26  ;;  %v11568_v26 = vld [vmem:[%s13842_s20 + $0x1388] ss:$16 sps:$4 sm:$0xff]  }
 0x4fc   : > { %v8678_v36 = vpop.f32.mrf.mxu0  ;;  %8923 = vmatmul.mubr.bf16.vlgmr.msra.gmra.mxu0 %v14274_v22 }
 0x4fd   : > { %v14786_v5 = vadd.f32 %v8678_v36, %v8638_v51  ;;  %8973 = vmatpush1.bf16.msra.mxu0 %v11502_v30  ;;  %9004 = vmatprep.mubr.bf16.mxu0 %v14282_v31  ;;  %v11520_v31 = vld [vmem:[%s13842_s20 + $0x1288] ss:$16 sps:$4 sm:$0xff]   ;;  %v11549_v51 = vld [vmem:[%s13842_s20 + $0x116c] ss:$16 sps:$4 sm:$0xff]  }
 0x4fe   : > { %8940 = vmatpush1.bf16.msra.mxu1 %v11499_v0  ;;  %v8680_v49 = vpop.f32.mrf.mxu0  ;;  %8974 = vmatprep.subr.bf16.mxu0 %v11510_v35  ;;  %v11576_v0 = vld [vmem:[%s13842_s20 + $0x14ec] ss:$16 sps:$4 sm:$0xff]   ;;  %v11571_v30 = vld [vmem:[%s13842_s20 + $0x1368] ss:$16 sps:$4 sm:$0xff]  }
 0x4ff   : > { %8941 = vmatprep.subr.bf16.mxu1 %v11507_v34  ;;  %v14792_v27 = vadd.f32 %v8680_v49, %v8640_v17  ;;  %v11553_v17 = vld [vmem:[%s13842_s20 + $0x1148] ss:$16 sps:$4 sm:$0xff]   ;;  %v11579_v35 = vld [vmem:[%s13842_s20 + $0x134c] ss:$16 sps:$4 sm:$0xff]  }
 0x500   : > { %v8682_v22 = vpop.f32.mrf.mxu0  ;;  %v11574_v34 = vld [vmem:[%s13842_s20 + $0x14e8] ss:$16 sps:$4 sm:$0xff]   ;;  %v11582_v36 = vld [vmem:[%s13842_s20 + $0x14cc] ss:$16 sps:$4 sm:$0xff]  }
 0x501   : > { %8975 = vmatpush1.bf16.msra.mxu0 %v11508_v41  ;;  %v11577_v49 = vld [vmem:[%s13842_s20 + $0x1348] ss:$16 sps:$4 sm:$0xff]   ;;  %v11585_v22 = vld [vmem:[%s13842_s20 + $0x132c] ss:$16 sps:$4 sm:$0xff]  }
 0x502   : > { %8942 = vmatpush1.bf16.msra.mxu1 %v11505_v7  ;;  %v8683_v37 = vpop.f32.mrf.mxu0  ;;  %8976 = vmatprep.subr.bf16.mxu0 %v11516_v32 }
 0x503   : > { %8943 = vmatprep.subr.bf16.mxu1 %v11513_v42  ;;  %v11580_v42 = vld [vmem:[%s13842_s20 + $0x14c8] ss:$16 sps:$4 sm:$0xff]  }
 0x504   : > { %v11586_v37 = vld [vmem:[%s13842_s20 + $0x14a8] ss:$16 sps:$4 sm:$0xff]  }
 0x505   : > { %8977 = vmatpush1.bf16.msra.mxu0 %v11514_v33 }
 0x506   : > { %8944 = vmatpush1.bf16.msra.mxu1 %v11511_v61  ;;  %8978 = vmatprep.subr.bf16.mxu0 %v11522_v50  ;;  %v11588_v61 = vld [vmem:[%s13842_s20 + $0x14ac] ss:$16 sps:$4 sm:$0xff]  }
 0x507   : > { %8945 = vmatprep.subr.bf16.mxu1 %v11519_v53  ;;  %v11591_v50 = vld [vmem:[%s13842_s20 + $0x130c] ss:$16 sps:$4 sm:$0xff]  }
 0x509   : > { %8979 = vmatpush1.bf16.msra.mxu0 %v11520_v31  ;;  %v11597_v31 = vld [vmem:[%s13842_s20 + $0x146c] ss:$16 sps:$4 sm:$0xff]  }
 0x50a   : > { %8946 = vmatpush1.bf16.msra.mxu1 %v11517_v52  ;;  %8980 = vmatprep.subr.bf16.mxu0 %v11528_v39  ;;  %v11594_v52 = vld [vmem:[%s13842_s20 + $0x148c] ss:$16 sps:$4 sm:$0xff]   ;;  %v11595_v39 = vld [vmem:[%s13842_s20 + $0x1468] ss:$16 sps:$4 sm:$0xff]  }
 0x50b   : > { %8947 = vmatprep.subr.bf16.mxu1 %v11525_v9  ;;  %v11600_v9 = vld [vmem:[%s13842_s20 + $0x16ec] ss:$16 sps:$4 sm:$0xff]  }
 0x50d   : > { %8981 = vmatpush1.bf16.msra.mxu0 %v11526_v57  ;;  %v11603_v57 = vld [vmem:[%s13842_s20 + $0x144c] ss:$16 sps:$4 sm:$0xff]  }
 0x50e   : > { %8948 = vmatpush2.bf16.msra.mxu1 %v11523_v55  ;;  %8982 = vmatprep.subr.bf16.mxu0 %v11534_v14  ;;  %v11598_v55 = vld [vmem:[%s13842_s20 + $0x16e8] ss:$16 sps:$4 sm:$0xff]  }
 0x50f   : > { %8949 = vmatprep.subr.bf16.mxu1 %v11531_v44  ;;  %v11606_v44 = vld [vmem:[%s13842_s20 + $0x16cc] ss:$16 sps:$4 sm:$0xff]  }
 0x511   : > { %8983 = vmatpush1.bf16.msra.mxu0 %v11532_v58  ;;  %v11601_v58 = vld [vmem:[%s13842_s20 + $0x1448] ss:$16 sps:$4 sm:$0xff]  }
 0x512   : > { %8950 = vmatpush2.bf16.msra.mxu1 %v11529_v54  ;;  %8984 = vmatprep.subr.bf16.mxu0 %v11540_v62 }
 0x513   : > { %8951 = vmatprep.subr.bf16.mxu1 %v11537_v4  ;;  %v11604_v4 = vld [vmem:[%s13842_s20 + $0x16c8] ss:$16 sps:$4 sm:$0xff]  }
 0x515   : > { %8985 = vmatpush1.bf16.msra.mxu0 %v11538_v60  ;;  %v11612_v60 = vld [vmem:[%s13842_s20 + $0x16ac] ss:$16 sps:$4 sm:$0xff]  }
 0x516   : > { %8952 = vmatpush2.bf16.msra.mxu1 %v11535_v2  ;;  %8986 = vmatprep.subr.bf16.mxu0 %v11546_v38  ;;  %v11609_v2 = vld [vmem:[%s13842_s20 + $0x142c] ss:$16 sps:$4 sm:$0xff]   ;;  %v11607_v38 = vld [vmem:[%s13842_s20 + $0x1428] ss:$16 sps:$4 sm:$0xff]  }
 0x517   : > { %8953 = vmatprep.subr.bf16.mxu1 %v11543_v59 }
 0x519   : > { %8987 = vmatpush1.bf16.msra.mxu0 %v11544_v8 }
 0x51a   : > { %8954 = vmatpush2.bf16.msra.mxu1 %v11541_v63  ;;  %8988 = vmatprep.subr.bf16.mxu0 %v11552_v29  ;;  %v11610_v63 = vld [vmem:[%s13842_s20 + $0x16a8] ss:$16 sps:$4 sm:$0xff]   ;;  %v11618_v29 = vld [vmem:[%s13842_s20 + $0x168c] ss:$16 sps:$4 sm:$0xff]  }
 0x51b   : > { %8955 = vmatprep.subr.bf16.mxu1 %v11549_v51  ;;  %v11615_v51 = vld [vmem:[%s13842_s20 + $0x140c] ss:$16 sps:$4 sm:$0xff]  }
 0x51d   : > { %8989 = vmatpush2.bf16.msra.mxu0 %v11550_v3  ;;  %v11621_v3 = vld [vmem:[%s13842_s20 + $0x15ec] ss:$16 sps:$4 sm:$0xff]  }
 0x51e   : > { %8956 = vmatpush2.bf16.msra.mxu1 %v11547_v11  ;;  %8990 = vmatprep.subr.bf16.mxu0 %v11558_v12  ;;  %v11613_v11 = vld [vmem:[%s13842_s20 + $0x1408] ss:$16 sps:$4 sm:$0xff]  }
 0x51f   : > { %8957 = vmatprep.subr.bf16.mxu1 %v11555_v48  ;;  %v11624_v48 = vld [vmem:[%s13842_s20 + $0x166c] ss:$16 sps:$4 sm:$0xff]   ;;  %v11619_v12 = vld [vmem:[%s13842_s20 + $0x15e8] ss:$16 sps:$4 sm:$0xff]  }
 0x521   : > { %8991 = vmatpush2.bf16.msra.mxu0 %v11556_v13  ;;  %v11627_v13 = vld [vmem:[%s13842_s20 + $0x15cc] ss:$16 sps:$4 sm:$0xff]  }
 0x522   : > { %8958 = vmatpush2.bf16.msra.mxu1 %v11553_v17  ;;  %8992 = vmatprep.subr.bf16.mxu0 %v11564_v45  ;;  %v11622_v17 = vld [vmem:[%s13842_s20 + $0x1668] ss:$16 sps:$4 sm:$0xff]  }
 0x523   : > { %8959 = vmatprep.subr.bf16.mxu1 %v11561_v43  ;;  %v11630_v43 = vld [vmem:[%s13842_s20 + $0x164c] ss:$16 sps:$4 sm:$0xff]   ;;  %v11625_v45 = vld [vmem:[%s13842_s20 + $0x15c8] ss:$16 sps:$4 sm:$0xff]  }
 0x525   : > { %8993 = vmatpush2.bf16.msra.mxu0 %v11562_v21  ;;  %v11633_v21 = vld [vmem:[%s13842_s20 + $0x15ac] ss:$16 sps:$4 sm:$0xff]  }
 0x526   : > { %8960 = vmatpush2.bf16.msra.mxu1 %v11559_v19  ;;  %8994 = vmatprep.subr.bf16.mxu0 %v11570_v56  ;;  %v11628_v19 = vld [vmem:[%s13842_s20 + $0x1648] ss:$16 sps:$4 sm:$0xff]  }
 0x527   : > { %8961 = vmatprep.subr.bf16.mxu1 %v11567_v24  ;;  %v11636_v24 = vld [vmem:[%s13842_s20 + $0x162c] ss:$16 sps:$4 sm:$0xff]   ;;  %v11631_v56 = vld [vmem:[%s13842_s20 + $0x15a8] ss:$16 sps:$4 sm:$0xff]  }
 0x529   : > { %8995 = vmatpush2.bf16.msra.mxu0 %v11568_v26  ;;  %v11639_v26 = vld [vmem:[%s13842_s20 + $0x158c] ss:$16 sps:$4 sm:$0xff]  }
 0x52a   : > { %8962 = vmatpush2.bf16.msra.mxu1 %v11565_v23  ;;  %8996 = vmatprep.subr.bf16.mxu0 %v11573_v28  ;;  %v11634_v23 = vld [vmem:[%s13842_s20 + $0x1628] ss:$16 sps:$4 sm:$0xff]   ;;  %v11642_v28 = vld [vmem:[%s13842_s20 + $0x160c] ss:$16 sps:$4 sm:$0xff]  }
 0x52b   : > { %9013 = vmatprep.subr.bf16.mxu1 %v11576_v0  ;;  %v11637_v0 = vld [vmem:[%s13842_s20 + $0x1588] ss:$16 sps:$4 sm:$0xff]  }
 0x52d   : > { %v8719_v7 = vpop.f32.mrf.mxu1  ;;  %8964 = vmatmul.mubr.bf16.vlgmr.msra.gmra.mxu1 %v14357_v15  ;;  %8997 = vmatpush2.bf16.msra.mxu0 %v11571_v30  ;;  %v11640_v30 = vld [vmem:[%s13842_s20 + $0x1608] ss:$16 sps:$4 sm:$0xff]  }
 0x52e   : > { %v8720_v41 = vadd.f32 %v8719_v7, %v14786_v5  ;;  %9014 = vmatpush1.bf16.msra.mxu1 %v11574_v34  ;;  %8998 = vmatprep.subr.bf16.mxu0 %v11579_v35  ;;  %v11583_v5 = vld [vmem:[%s13842_s20 + $0x1328] ss:$16 sps:$4 sm:$0xff]   ;;  %v11645_v34 = vld [vmem:[%s13842_s20 + $0x156c] ss:$16 sps:$4 sm:$0xff]  }
 0x52f   : > { %v8721_v32 = vpop.f32.mrf.mxu1  ;;  %9015 = vmatprep.subr.bf16.mxu1 %v11582_v36  ;;  %9045 = vmatprep.mubr.bf16.mxu1 %v14366_v25  ;;  %v11592_v25 = vld [vmem:[%s13842_s20 + $0x1488] ss:$16 sps:$4 sm:$0xff]   ;;  %v11648_v35 = vld [vmem:[%s13842_s20 + $0x17ec] ss:$16 sps:$4 sm:$0xff]  }
 0x530   : > { %v8722_v33 = vadd.f32 %v8721_v32, %v14792_v27  ;;  %v11589_v27 = vld [vmem:[%s13842_s20 + $0x1308] ss:$16 sps:$4 sm:$0xff]  }
 0x531   : > { %v8723_v15 = vpop.f32.mrf.mxu1  ;;  %8999 = vmatpush2.bf16.msra.mxu0 %v11577_v49  ;;  %v11643_v36 = vld [vmem:[%s13842_s20 + $0x1568] ss:$16 sps:$4 sm:$0xff]   ;;  %v11654_v49 = vld [vmem:[%s13842_s20 + $0x17cc] ss:$16 sps:$4 sm:$0xff]  }
 0x532   : > { %9016 = vmatpush1.bf16.msra.mxu1 %v11580_v42  ;;  %9000 = vmatprep.subr.bf16.mxu0 %v11585_v22  ;;  %v11646_v7 = vld [vmem:[%s13842_s20 + $0x17e8] ss:$16 sps:$4 sm:$0xff]   ;;  %v11657_v22 = vld [vmem:[%s13842_s20 + $0x152c] ss:$16 sps:$4 sm:$0xff]  }
 0x533   : > { %v8724_v53 = vpop.f32.mrf.mxu1  ;;  %9017 = vmatprep.subr.bf16.mxu1 %v11588_v61  ;;  %v11649_v42 = vld [vmem:[%s13842_s20 + $0x1548] ss:$16 sps:$4 sm:$0xff]   ;;  %v11660_v61 = vld [vmem:[%s13842_s20 + $0x17ac] ss:$16 sps:$4 sm:$0xff]  }
 0x534   : > { %v11652_v32 = vld [vmem:[%s13842_s20 + $0x17c8] ss:$16 sps:$4 sm:$0xff]  }
 0x535   : > { %9001 = vmatpush2.bf16.msra.mxu0 %v11583_v5  ;;  %v11658_v15 = vld [vmem:[%s13842_s20 + $0x17a8] ss:$16 sps:$4 sm:$0xff]   ;;  %v11663_v5 = vld [vmem:[%s13842_s20 + $0x150c] ss:$16 sps:$4 sm:$0xff]  }
 0x536   : > { %9018 = vmatpush1.bf16.msra.mxu1 %v11586_v37  ;;  %9002 = vmatprep.subr.bf16.mxu0 %v11591_v50  ;;  %v11666_v37 = vld [vmem:[%s13842_s20 + $0x178c] ss:$16 sps:$4 sm:$0xff]   ;;  %v11661_v53 = vld [vmem:[%s13842_s20 + $0x1508] ss:$16 sps:$4 sm:$0xff]  }
 0x537   : > { %9019 = vmatprep.subr.bf16.mxu1 %v11594_v52  ;;  %v11664_v50 = vld [vmem:[%s13842_s20 + $0x1788] ss:$16 sps:$4 sm:$0xff]   ;;  %v11669_v52 = vld [vmem:[%s13842_s20 + $0x176c] ss:$16 sps:$4 sm:$0xff]  }
 0x539   : > { %9003 = vmatpush2.bf16.msra.mxu0 %v11589_v27  ;;  %v11672_v27 = vld [vmem:[%s13842_s20 + $0x186c] ss:$16 sps:$4 sm:$0xff]  }
 0x53a   : > { %9020 = vmatpush1.bf16.msra.mxu1 %v11592_v25  ;;  %9054 = vmatprep.subr.bf16.mxu0 %v11600_v9  ;;  %v11667_v25 = vld [vmem:[%s13842_s20 + $0x1768] ss:$16 sps:$4 sm:$0xff]   ;;  %v11675_v9 = vld [vmem:[%s13842_s20 + $0x174c] ss:$16 sps:$4 sm:$0xff]  }
 0x53b   : > { %9021 = vmatprep.subr.bf16.mxu1 %v11597_v31  ;;  %v11670_v31 = vld [vmem:[%s13842_s20 + $0x1868] ss:$16 sps:$4 sm:$0xff]  }
 0x53c   : > { %v8760_v14 = vpop.f32.mrf.mxu0  ;;  %9005 = vmatmul.mubr.bf16.vlgmr.msra.gmra.mxu0 %v14370_v6 }
 0x53d   : > { %v14860_v54 = vadd.f32 %v8760_v14, %v8720_v41  ;;  %9055 = vmatpush1.bf16.msra.mxu0 %v11598_v55  ;;  %9086 = vmatprep.mubr.bf16.mxu0 %v14378_v16  ;;  %v11616_v16 = vld [vmem:[%s13842_s20 + $0x1688] ss:$16 sps:$4 sm:$0xff]   ;;  %v11651_v41 = vld [vmem:[%s13842_s20 + $0x154c] ss:$16 sps:$4 sm:$0xff]  }
 0x53e   : > { %9022 = vmatpush1.bf16.msra.mxu1 %v11595_v39  ;;  %v8762_v62 = vpop.f32.mrf.mxu0  ;;  %9056 = vmatprep.subr.bf16.mxu0 %v11606_v44  ;;  %v11678_v39 = vld [vmem:[%s13842_s20 + $0x184c] ss:$16 sps:$4 sm:$0xff]   ;;  %v11673_v44 = vld [vmem:[%s13842_s20 + $0x1748] ss:$16 sps:$4 sm:$0xff]  }
 0x53f   : > { %9023 = vmatprep.subr.bf16.mxu1 %v11603_v57  ;;  %v14866_v59 = vadd.f32 %v8762_v62, %v8722_v33  ;;  %v11655_v33 = vld [vmem:[%s13842_s20 + $0x1528] ss:$16 sps:$4 sm:$0xff]   ;;  %v11684_v62 = vld [vmem:[%s13842_s20 + $0x182c] ss:$16 sps:$4 sm:$0xff]  }
 0x540   : > { %v8764_v6 = vpop.f32.mrf.mxu0  ;;  %v11676_v14 = vld [vmem:[%s13842_s20 + $0x1848] ss:$16 sps:$4 sm:$0xff]  }
 0x541   : > { %9057 = vmatpush1.bf16.msra.mxu0 %v11604_v4  ;;  %v11681_v4 = vld [vmem:[%s13842_s20 + $0x172c] ss:$16 sps:$4 sm:$0xff]  }
 0x542   : > { %9024 = vmatpush1.bf16.msra.mxu1 %v11601_v58  ;;  %v8765_v8 = vpop.f32.mrf.mxu0  ;;  %9058 = vmatprep.subr.bf16.mxu0 %v11612_v60  ;;  %v11682_v60 = vld [vmem:[%s13842_s20 + $0x1828] ss:$16 sps:$4 sm:$0xff]  }
 0x543   : > { %9025 = vmatprep.subr.bf16.mxu1 %v11609_v2  ;;  %v11685_v8 = vld [vmem:[%s13842_s20 + $0x1708] ss:$16 sps:$4 sm:$0xff]  }
 0x545   : > { %9059 = vmatpush1.bf16.msra.mxu0 %v11610_v63  ;;  %v11690_v63 = vld [vmem:[%s13842_s20 + $0x180c] ss:$16 sps:$4 sm:$0xff]  }
 0x546   : > { %9026 = vmatpush1.bf16.msra.mxu1 %v11607_v38  ;;  %9060 = vmatprep.subr.bf16.mxu0 %v11618_v29  ;;  %v11687_v38 = vld [vmem:[%s13842_s20 + $0x170c] ss:$16 sps:$4 sm:$0xff]  }
 0x547   : > { %9027 = vmatprep.subr.bf16.mxu1 %v11615_v51  ;;  %v11688_v51 = vld [vmem:[%s13842_s20 + $0x1808] ss:$16 sps:$4 sm:$0xff]  }
 0x549   : > { %9061 = vmatpush1.bf16.msra.mxu0 %v11616_v16 }
 0x54a   : > { %9028 = vmatpush1.bf16.msra.mxu1 %v11613_v11  ;;  %9062 = vmatprep.subr.bf16.mxu0 %v11624_v48 }
 0x54b   : > { %9029 = vmatprep.subr.bf16.mxu1 %v11621_v3 }
 0x54d   : > { %9063 = vmatpush1.bf16.msra.mxu0 %v11622_v17 }
 0x54e   : > { %9030 = vmatpush2.bf16.msra.mxu1 %v11619_v12  ;;  %9064 = vmatprep.subr.bf16.mxu0 %v11630_v43 }
 0x54f   : > { %9031 = vmatprep.subr.bf16.mxu1 %v11627_v13 }
 0x551   : > { %9065 = vmatpush1.bf16.msra.mxu0 %v11628_v19 }
 0x552   : > { %9032 = vmatpush2.bf16.msra.mxu1 %v11625_v45  ;;  %9066 = vmatprep.subr.bf16.mxu0 %v11636_v24 }
 0x553   : > { %9033 = vmatprep.subr.bf16.mxu1 %v11633_v21 }
 0x555   : > { %9067 = vmatpush1.bf16.msra.mxu0 %v11634_v23 }
 0x556   : > { %9034 = vmatpush2.bf16.msra.mxu1 %v11631_v56  ;;  %9068 = vmatprep.subr.bf16.mxu0 %v11642_v28 }
 0x557   : > { %9035 = vmatprep.subr.bf16.mxu1 %v11639_v26 }
 0x559   : > { %9069 = vmatpush1.bf16.msra.mxu0 %v11640_v30 }
 0x55a   : > { %9036 = vmatpush2.bf16.msra.mxu1 %v11637_v0  ;;  %9070 = vmatprep.subr.bf16.mxu0 %v11648_v35 }
 0x55b   : > { %9037 = vmatprep.subr.bf16.mxu1 %v11645_v34 }
 0x55d   : > { %9071 = vmatpush2.bf16.msra.mxu0 %v11646_v7 }
 0x55e   : > { %9038 = vmatpush2.bf16.msra.mxu1 %v11643_v36  ;;  %9072 = vmatprep.subr.bf16.mxu0 %v11654_v49  ;;  %v9144_v49 = vsub.s32 1, %v13721_v20 }
 0x55f   : > { %9039 = vmatprep.subr.bf16.mxu1 %v11651_v41 }
 0x561   : > { %9073 = vmatpush2.bf16.msra.mxu0 %v11652_v32  ;;  %v9136_v32 = vld [vmem:[%s2200_s19] sm:$0xf]  ;;  %s11707_s19 = scalar_lea.vmem %s14957_s15, 32 }
 0x562   : > { %9040 = vmatpush2.bf16.msra.mxu1 %v11649_v42  ;;  %9074 = vmatprep.subr.bf16.mxu0 %v11660_v61  ;;  %v9140_v42 = vsub.s32 0, %v13721_v20  ;;  %p11708_p1 = scmp.ne.s32.totalorder %s14957_s15, %s11707_s19 }
 0x563   : > { %9041 = vmatprep.subr.bf16.mxu1 %v11657_v22  ;;  %v9145_v22 = vrot.slane %v9136_v32, %v9144_v49 }
 0x564   : > { %v9141_v61 = vrot.slane %v9136_v32, %v9140_v42  ;;  %p11709_p2 = pnand %p11708_p1, %p11855_p6 }
 0x565   : > { %9075 = vmatpush2.bf16.msra.mxu0 %v11658_v15 }
 0x566   : > { %9042 = vmatpush2.bf16.msra.mxu1 %v11655_v33  ;;  %9076 = vmatprep.subr.bf16.mxu0 %v11666_v37  ;;  %v9159_v33 = vadd.f32 %v9145_v22, %v14718_v10  ;;  %v9158_v15 = vadd.f32 %v9141_v61, %v14712_v46  ;;  %v9152_v10 = vsub.s32 3, %v13721_v20  ;;  %p11710_p3 = pneg %p11709_p2 }
 0x567   : > { %9043 = vmatprep.subr.bf16.mxu1 %v11663_v5 }
 0x568   : > { %v10269_v5 = vmul.f32 -1.442695, %v9159_v33  ;;  %v10268_v37 = vmul.f32 -1.442695, %v9158_v15 }
 0x569   : > { %9077 = vmatpush2.bf16.msra.mxu0 %v11664_v50 }
 0x56a   : > { %9044 = vmatpush2.bf16.msra.mxu1 %v11661_v53  ;;  %9078 = vmatprep.subr.bf16.mxu0 %v11669_v52  ;;  %11691 = vpow2.f32 %v10269_v5 }
 0x56b   : > { %9103 = vmatprep.subr.bf16.mxu1 %v11672_v27  ;;  %11693 = vpow2.f32 %v10268_v37 }
 0x56d   : > { %v8801_v55 = vpop.f32.mrf.mxu1  ;;  %9046 = vmatmul.mubr.bf16.vlgmr.msra.gmra.mxu1 %v14446_v47  ;;  %9079 = vmatpush2.bf16.msra.mxu0 %v11667_v25 }
 0x56e   : > { %v8802_v57 = vadd.f32 %v8801_v55, %v14860_v54  ;;  %9104 = vmatpush1.bf16.msra.mxu1 %v11670_v31  ;;  %9080 = vmatprep.subr.bf16.mxu0 %v11675_v9  ;;  %v11679_v54 = vld [vmem:[%s13842_s20 + $0x1728] ss:$16 sps:$4 sm:$0xff]   ;;  %v9148_v31 = vsub.s32 2, %v13721_v20  ;;  %s14942_s20 = scalar_select %p2191_p0, %s11833_s28, 3 }
 0x56f   : > { %v8803_v58 = vpop.f32.mrf.mxu1  ;;  %9105 = vmatprep.subr.bf16.mxu1 %v11678_v39  ;;  %9127 = vmatprep.mubr.bf16.mxu1 %v11770_v1  ;;  %s9194_s28 = scalar_lea.sflag [#allocation5], %s13713_s14 }
 0x570   : > { %v8804_v2 = vadd.f32 %v8803_v58, %v14866_v59  ;;  %s9349_s21 = sshll.u32 %s14942_s20, 1 }
 0x571   : > { %v8805_v47 = vpop.f32.mrf.mxu1  ;;  %9081 = vmatpush2.bf16.msra.mxu0 %v11673_v44  ;;  %s2194_s29 = scalar_lea.vmem %s15004_s2, %s9349_s21 }
 0x572   : > { %9106 = vmatpush1.bf16.msra.mxu1 %v11676_v14  ;;  %9082 = vmatprep.subr.bf16.mxu0 %v11681_v4 }
 0x573   : > { %v8806_v6 = vpop.f32.mrf.mxu1  ;;  %9107 = vmatprep.subr.bf16.mxu1 %v11684_v62  ;;  %v9149_v62 = vrot.slane %v9136_v32, %v9148_v31 }
 0x575   : > { %9083 = vmatpush2.bf16.msra.mxu0 %v11679_v54 }
 0x576   : > { %9108 = vmatpush1.bf16.msra.mxu1 %v11682_v60  ;;  %9084 = vmatprep.subr.bf16.mxu0 %v11687_v38  ;;  %v9153_v38 = vrot.slane %v9136_v32, %v9152_v10 }
 0x577   : > { %9109 = vmatprep.subr.bf16.mxu1 %v11690_v63  ;;  %v11692_v9 = vpop.eup %11691 }
 0x578   : > { %v11694_v39 = vpop.eup %11693  ;;  %v9171_v14 = vadd.f32 1.0, %v11692_v9 }
 0x579   : > { %9085 = vmatpush2.bf16.msra.mxu0 %v11685_v8 }
 0x57a   : > { %9110 = vmatpush1.bf16.msra.mxu1 %v11688_v51  ;;  %11695 = vrcp.f32 %v9171_v14 }
 0x57c   : > { %v8842_v59 = vpop.f32.mrf.mxu0  ;;  %9087 = vmatmul.mubr.bf16.vlgmr.msra.gmra.mxu0 %v14456_v40 }
 0x57d   : > { %10267 = vmatmul.mubr.msk.bf16.vlgmr.msra.gmra.mxu1 %vm8066_vm0, %v14486_v18  ;;  %v8843_v1 = vadd.f32 %v8842_v59, %v8802_v57 }
 0x57e   : > { %v8844_v29 = vpop.f32.mrf.mxu0 }
 0x57f   : > { %v8845_v11 = vadd.f32 %v8844_v29, %v8804_v2  ;;  %v9165_v2 = vadd.f32 1.0, %v11694_v39 }
 0x580   : > { %v8846_v16 = vpop.f32.mrf.mxu0 }
 0x581   : > { %11697 = vrcp.f32 %v9165_v2 }
 0x582   : > { %v8847_v3 = vpop.f32.mrf.mxu0 }
 0x583   : > { %v9181_v3 = vld [vmem:[%s2194_s29] sm:$0x3]  ;;  %s11713_s29 = scalar_lea.vmem %s11712_s23, 64 }
 0x584   : > { %p11715_p5 = scmp.lt.s32.totalorder %s11713_s29, %s11707_s19 }
 0x586   : > { %p11716_p7 = por %p11715_p5, %p11714_p4 }
 0x587   : > { %v11696_v16 = vpop.eup %11695 }
 0x588   : > { %p11717_p9 = pnand %p11716_p7, %p11710_p3 }
 0x5ad   : > { %v8883_v48 = vpop.f32.mrf.mxu1 }
 0x5ae   : > { %v8884_v12 = vadd.f32 %v8883_v48, %v8843_v1  ;;  %v11698_v48 = vpop.eup %11697 }
 0x5af   : > { %v8885_v17 = vpop.f32.mrf.mxu1 }
 0x5b0   : > { %v8886_v13 = vadd.f32 %v8885_v17, %v8845_v11  ;;  %v9182_v17 = vmul.f32 %v11696_v16, %v9181_v3 }
 0x5b1   : > { %v8887_v43 = vpop.f32.mrf.mxu1 }
 0x5b3   : > { %v8888_v45 = vpop.f32.mrf.mxu1 }
 0x5bc   : > { %v8924_v19 = vpop.f32.mrf.mxu0 }
 0x5bd   : > { %v8925_v21 = vadd.f32 %v8924_v19, %v8884_v12 }
 0x5be   : > { %v8926_v24 = vpop.f32.mrf.mxu0 }
 0x5bf   : > { %v8927_v56 = vadd.f32 %v8926_v24, %v8886_v13 }
 0x5c0   : > { %v8928_v40 = vpop.f32.mrf.mxu0 }
 0x5c2   : > { %v8929_v23 = vpop.f32.mrf.mxu0 }
 0x5ed   : > { %v8965_v26 = vpop.f32.mrf.mxu1 }
 0x5ee   : > { %v8966_v18 = vadd.f32 %v8965_v26, %v8925_v21 }
 0x5ef   : > { %v8967_v28 = vpop.f32.mrf.mxu1 }
 0x5f0   : > { %v8968_v0 = vadd.f32 %v8967_v28, %v8927_v56 }
 0x5f1   : > { %v8969_v30 = vpop.f32.mrf.mxu1 }
 0x5f3   : > { %v8970_v34 = vpop.f32.mrf.mxu1 }
 0x5fc   : > { %v9006_v35 = vpop.f32.mrf.mxu0 }
 0x5fd   : > { %v9007_v25 = vadd.f32 %v9006_v35, %v8966_v18 }
 0x5fe   : > { %v9008_v36 = vpop.f32.mrf.mxu0 }
 0x5ff   : > { %v9009_v55 = vadd.f32 %v9008_v36, %v8968_v0 }
 0x600   : > { %v9010_v7 = vpop.f32.mrf.mxu0 }
 0x602   : > { %v9011_v41 = vpop.f32.mrf.mxu0 }
 0x62d   : > { %v9047_v53 = vpop.f32.mrf.mxu1 }
 0x62e   : > { %v9048_v57 = vadd.f32 %v9047_v53, %v9007_v25 }
 0x62f   : > { %v9049_v50 = vpop.f32.mrf.mxu1 }
 0x630   : > { %v9050_v58 = vadd.f32 %v9049_v50, %v9009_v55 }
 0x631   : > { %v9051_v52 = vpop.f32.mrf.mxu1 }
 0x633   : > { %v9052_v27 = vpop.f32.mrf.mxu1 }
 0x63c   : > { %v9088_v44 = vpop.f32.mrf.mxu0 }
 0x63d   : > { %v9129_v46 = vpop.f32.mrf.mxu1  ;;  %v9089_v4 = vadd.f32 %v9088_v44, %v9048_v57 }
 0x63e   : > { %v9090_v47 = vpop.f32.mrf.mxu0 }
 0x63f   : > { %v9131_v54 = vpop.f32.mrf.mxu1  ;;  %v9130_v60 = vadd.f32 %v9129_v46, %v9089_v4  ;;  %v9091_v6 = vadd.f32 %v9090_v47, %v9050_v58 }
 0x640   : > { %v9092_v63 = vpop.f32.mrf.mxu0 }
 0x641   : > { %v9133_v8 = vpop.f32.mrf.mxu1  ;;  %v9160_v51 = vadd.f32 %v9149_v62, %v9130_v60  ;;  %v9132_v20 = vadd.f32 %v9131_v54, %v9091_v6 }
 0x642   : > { %v9093_v59 = vpop.f32.mrf.mxu0 }
 0x643   : > { %v9134_v1 = vpop.f32.mrf.mxu1  ;;  %11699 = vtanh.f32 %v9160_v51  ;;  %v9161_v29 = vadd.f32 %v9153_v38, %v9132_v20 }
 0x645   : > { %v10270_v11 = vmul.f32 -1.442695, %v9161_v29 }
 0x647   : > { %11701 = vpow2.f32 %v10270_v11 }
 0x650   : > { %v11700_v12 = vpop.eup %11699 }
 0x651   : > { %v9183_v13 = vmul.f32 %v11700_v12, %v11698_v48 }
 0x653   : > { %v9184_v43 = vadd.f32 %v9183_v13, %v9182_v17 }
 0x654   : > { %v11702_v45 = vpop.eup %11701 }
 0x655   : > { %v9178_v19 = vadd.f32 1.0, %v11702_v45  ;;  %9187 = vst [vmem:[%s2190_s11] sm:$0x3] %v9184_v43  ;;  %11703 = vtanh.f32 %v9184_v43 }
 0x656   : > { %11720 = shalt.err (!%p11717_p9)
}
 0x657   : > { %s11721_s8 = scalar_lea.hbm %s14955_s18, 32  ;;  %s11725_s11 = scalar_lea.hbm %s15009_s7, 128 }
 0x658   : > { %p11722_p10 = scmp.ne.s32.totalorder %s14955_s18, %s11721_s8  ;;  %p11726_p13 = scmp.lt.s32.totalorder %s14955_s18, %s15009_s7 }
 0x659   : > { %p11727_p0 = scmp.lt.s32.totalorder %s11725_s11, %s11721_s8 }
 0x65a   : > { %p11723_p11 = pnand %p11722_p10, %p11855_p6 }
 0x65b   : > { %p11728_p1 = por %p11727_p0, %p11726_p13 }
 0x65c   : > { %p11724_p12 = pneg %p11723_p11 }
 0x65e   : > { %p11729_p2 = pnand %p11728_p1, %p11724_p12 }
 0x660   : > { %11732 = shalt.err (!%p11729_p2)
}
 0x661   : > { %10279 = dma.vmem_to_hbm [thread:$0]  (%p11855_p6), %s14957_s15, 32, %s14955_s18, %s9194_s28   ;;  %11705 = vrcp.f32 %v9178_v19 }
 0x662   : > { %v11704_v21 = vpop.eup %11703  ;;  %s2205_s23 = scalar_lea.vmem %s15008_s6, %s9349_s21 }
 0x66e   : > { %v11706_v24 = vpop.eup %11705 }
 0x66f   : > { %v9186_v56 = vmul.f32 %v11706_v24, %v11704_v21 }
 0x671   : > { %9188 = vst [vmem:[%s2205_s23] sm:$0x3] %v9186_v56 }
 0x672 PF: > { %p10285_p3 = scmp.ge.s32.totalorder %s11767_s27, 2  ;;  %s9229_s12 = sand.u32 1, %s11755_s24  }
 0x673   : > { %s9230_s15 = scalar_lea.sflag [#allocation5], %s9229_s12 }
 0x674   : > { %p10282_p4 = pnand %p10285_p3, %p11859_p8 }
 0x676   : > { %p10283_p5 = pneg %p10282_p4 }
 0x678   : > { %11750 = dma.done.wait (%p10283_p5), %s9230_s15, 32  }
 0x679   : > { %11752 = vsyncadd (%p10283_p5), %s9230_s15, 4294967264  ;;  %p18_p6 = scmp.ge.s32.totalorder %s11837_s30, 6   ;;  %s15013_s24 = smov %s11759_s25 }
 0x67a   : > { %s15014_s25 = smov %s11763_s26  ;;  %s15015_s26 = smov %s11849_s10 }
 0x67b   : > { %s15016_s27 = smov %s11837_s30  ;;  %20 = sbr.rel (!%p18_p6) target bundleno = 3 (0x3), region = 156 }
 0x680   :  { %9235 = vsyncpa [#allocation5], 1 }
 0x681   :  { %9237 = vsyncpa [#allocation5 + $0x1], 1 }

</bundles_post_ra>
